<compile_context>
chip_gen: v6e
topology: v6e:2x2x1
jax: 0.10.0
libtpu: 0.0.40
codegen_flags: <defaults>
</compile_context>

<pallas_src>
import functools

import jax
import jax.numpy as jnp
from jax.experimental import pallas as pl
from jax.experimental.pallas import tpu as pltpu

IN_DIM = 12288
H1 = 1000
H2 = 100
OUT = 1

# lane-padded sizes
H1_PAD = 1024
H2_PAD = 128
OUT_PAD = 128

LRELU_SLOPE = 0.05
LN_EPS = 1e-5  # PyTorch LayerNorm default


# -----------------------------------------------------------------------------
# Fused kernel: K-tiled Linear(12288,1000) accumulation + full tail of the net
# executed in the finalize step of the reduction axis.
# -----------------------------------------------------------------------------
def _d_kernel(x_ref, w1_ref, b1_ref, g1_ref, be1_ref,
              w2_ref, b2_ref, g2_ref, be2_ref,
              w3_ref, b3_ref, o_ref, acc_ref):
    k = pl.program_id(1)

    @pl.when(k == 0)
    def _():
        acc_ref[...] = jnp.zeros_like(acc_ref)

    # bf16 x bf16 -> f32 accumulate on the MXU (W1 streamed as bf16).
    acc_ref[...] += jnp.dot(
        x_ref[...].astype(jnp.bfloat16), w1_ref[...],
        preferred_element_type=jnp.float32,
    )

    @pl.when(k == pl.num_programs(1) - 1)
    def _():
        # ---- Layer 1 epilogue: bias + LeakyReLU + LayerNorm(1000) ----------
        h = acc_ref[...] + b1_ref[...]
        h = jnp.where(h > 0, h, LRELU_SLOPE * h)
        # Padded lanes 1000..1023 are exactly 0 (zero W1 cols, zero bias), so
        # sums over all 1024 lanes equal sums over the real 1000 lanes.
        lane1 = jax.lax.broadcasted_iota(jnp.int32, h.shape, 1)
        mask1 = lane1 < H1
        mu1 = jnp.sum(h, axis=-1, keepdims=True) * (1.0 / H1)
        d1 = jnp.where(mask1, h - mu1, 0.0)
        var1 = jnp.sum(d1 * d1, axis=-1, keepdims=True) * (1.0 / H1)
        # padded gamma/beta are 0 -> padded lanes of h1 are exactly 0 again.
        h1 = d1 * jax.lax.rsqrt(var1 + LN_EPS) * g1_ref[...] + be1_ref[...]

        # ---- Layer 2: Linear(1000,100) + LeakyReLU + LayerNorm(100) --------
        h2 = jnp.dot(h1, w2_ref[...], preferred_element_type=jnp.float32)
        h2 = h2 + b2_ref[...]
        h2 = jnp.where(h2 > 0, h2, LRELU_SLOPE * h2)
        lane2 = jax.lax.broadcasted_iota(jnp.int32, h2.shape, 1)
        mask2 = lane2 < H2
        mu2 = jnp.sum(h2, axis=-1, keepdims=True) * (1.0 / H2)
        d2 = jnp.where(mask2, h2 - mu2, 0.0)
        var2 = jnp.sum(d2 * d2, axis=-1, keepdims=True) * (1.0 / H2)
        h2n = d2 * jax.lax.rsqrt(var2 + LN_EPS) * g2_ref[...] + be2_ref[...]

        # ---- Layer 3: Linear(100,1) + Sigmoid (lane-dense padded output) ---
        z = jnp.dot(h2n, w3_ref[...], preferred_element_type=jnp.float32)
        z = z + b3_ref[...]
        o_ref[...] = (1.0 / (1.0 + jnp.exp(-z))).astype(o_ref.dtype)


# -----------------------------------------------------------------------------
# Wrapper
# -----------------------------------------------------------------------------
@functools.partial(jax.jit, static_argnames=("tk", "tb"))
def d_forward(x, prepared_params, tk=3072, tb=None):
    B, K = x.shape
    assert K == IN_DIM and K % tk == 0

    if tb is None:
        tb = B if B <= 256 else 256
    assert B % tb == 0

    (w1, b1, g1, be1, w2, b2, g2, be2, w3, b3) = prepared_params

    out_pad = pl.pallas_call(
        _d_kernel,
        out_shape=jax.ShapeDtypeStruct((B, OUT_PAD), jnp.float32),
        grid_spec=pltpu.PrefetchScalarGridSpec(
            num_scalar_prefetch=0,
            grid=(B // tb, K // tk),                               # (batch, K-reduction)
            in_specs=[
                pl.BlockSpec((tb, tk), lambda b, k: (b, k)),       # x (f32)
                pl.BlockSpec((tk, H1_PAD), lambda b, k: (k, 0)),   # W1 (bf16, K-tiled)
                pl.BlockSpec((1, H1_PAD), lambda b, k: (0, 0)),    # b1
                pl.BlockSpec((1, H1_PAD), lambda b, k: (0, 0)),    # gamma1
                pl.BlockSpec((1, H1_PAD), lambda b, k: (0, 0)),    # beta1
                pl.BlockSpec((H1_PAD, H2_PAD), lambda b, k: (0, 0)),  # W2
                pl.BlockSpec((1, H2_PAD), lambda b, k: (0, 0)),    # b2
                pl.BlockSpec((1, H2_PAD), lambda b, k: (0, 0)),    # gamma2
                pl.BlockSpec((1, H2_PAD), lambda b, k: (0, 0)),    # beta2
                pl.BlockSpec((H2_PAD, OUT_PAD), lambda b, k: (0, 0)),  # W3
                pl.BlockSpec((1, OUT_PAD), lambda b, k: (0, 0)),   # b3
            ],
            out_specs=pl.BlockSpec((tb, OUT_PAD), lambda b, k: (b, 0)),
            scratch_shapes=[pltpu.VMEM((tb, H1_PAD), jnp.float32)],
        ),
        compiler_params=pltpu.CompilerParams(
            dimension_semantics=("parallel", "arbitrary"),
            vmem_limit_bytes=32 << 20,
        ),
    )(x, w1, b1, g1, be1, w2, b2, g2, be2, w3, b3)

    return out_pad[:, :OUT]


def prepare_params(params):
    """One-time prep: lane-pad all params with zeros and cast W1 to bf16."""
    w1, b1, g1, be1, w2, b2, g2, be2, w3, b3 = params

    def pad2(a, rows, cols):
        return jnp.pad(a, ((0, rows - a.shape[0]), (0, cols - a.shape[1])))

    w1p = pad2(w1, IN_DIM, H1_PAD).astype(jnp.bfloat16)
    b1p, g1p, be1p = (pad2(a, 1, H1_PAD) for a in (b1, g1, be1))
    w2p = pad2(w2, H1_PAD, H2_PAD)
    b2p, g2p, be2p = (pad2(a, 1, H2_PAD) for a in (b2, g2, be2))
    w3p = pad2(w3, H2_PAD, OUT_PAD)
    b3p = pad2(b3, 1, OUT_PAD)
    return (w1p, b1p, g1p, be1p, w2p, b2p, g2p, be2p, w3p, b3p)


def init_params(key):
    """Deterministic init mimicking PyTorch defaults:
    Linear: U(-1/sqrt(fan_in), 1/sqrt(fan_in)) for W and b.
    LayerNorm: weight=1, bias=0."""
    ks = jax.random.split(key, 6)

    def lin(kw, kb, fan_in, fan_out):
        bound = 1.0 / jnp.sqrt(fan_in)
        w = jax.random.uniform(kw, (fan_in, fan_out), jnp.float32, -bound, bound)
        b = jax.random.uniform(kb, (1, fan_out), jnp.float32, -bound, bound)
        return w, b

    w1, b1 = lin(ks[0], ks[1], IN_DIM, H1)
    w2, b2 = lin(ks[2], ks[3], H1, H2)
    w3, b3 = lin(ks[4], ks[5], H2, OUT)
    g1 = jnp.ones((1, H1), jnp.float32)
    be1 = jnp.zeros((1, H1), jnp.float32)
    g2 = jnp.ones((1, H2), jnp.float32)
    be2 = jnp.zeros((1, H2), jnp.float32)
    return (w1, b1, g1, be1, w2, b2, g2, be2, w3, b3)


def _reference_forward(x, params):
    """Pure-JAX reference (mirrors the kernel's bf16 streaming of x / W1)."""
    w1, b1, g1, be1, w2, b2, g2, be2, w3, b3 = params

    def lrelu(v):
        return jnp.where(v > 0, v, LRELU_SLOPE * v)

    def ln(v, g, b):
        mu = jnp.mean(v, axis=-1, keepdims=True)
        var = jnp.mean((v - mu) ** 2, axis=-1, keepdims=True)
        return (v - mu) * jax.lax.rsqrt(var + LN_EPS) * g + b

    h = jnp.dot(x.astype(jnp.bfloat16), w1.astype(jnp.bfloat16),
                preferred_element_type=jnp.float32) + b1
    h = ln(lrelu(h), g1, be1)
    h = ln(lrelu(h @ w2 + b2), g2, be2)
    return jax.nn.sigmoid(h @ w3 + b3)


if __name__ == "__main__":
    key = jax.random.PRNGKey(0)
    k_x, k_p = jax.random.split(key)

    B = 2
    x = jax.random.normal(k_x, (B, IN_DIM), jnp.float32)
    params = init_params(k_p)
    prepared = prepare_params(params)

    out = d_forward(x, prepared)
    out = jax.block_until_ready(out)

    ref = _reference_forward(x, params)
    assert out.shape == (B, OUT)
    assert jnp.allclose(out, ref, atol=2e-3, rtol=2e-3), (out, ref)

    print("KERNEL_OK")
</pallas_src>

<mosaic_0001>
module attributes {stable_mosaic.version = 11 : i64} {
  func.func @_d_kernel(%arg0: i32, %arg1: i32, %arg2: memref<2x3072xf32, #tpu.memory_space<vmem>>, %arg3: memref<3072x1024xbf16, #tpu.memory_space<vmem>>, %arg4: memref<1x1024xf32, #tpu.memory_space<vmem>>, %arg5: memref<1x1024xf32, #tpu.memory_space<vmem>>, %arg6: memref<1x1024xf32, #tpu.memory_space<vmem>>, %arg7: memref<1024x128xf32, #tpu.memory_space<vmem>>, %arg8: memref<1x128xf32, #tpu.memory_space<vmem>>, %arg9: memref<1x128xf32, #tpu.memory_space<vmem>>, %arg10: memref<1x128xf32, #tpu.memory_space<vmem>>, %arg11: memref<128x128xf32, #tpu.memory_space<vmem>>, %arg12: memref<1x128xf32, #tpu.memory_space<vmem>>, %arg13: memref<2x128xf32, #tpu.memory_space<vmem>>, %arg14: memref<2x1024xf32, #tpu.memory_space<vmem>>) attributes {dimension_semantics = [#tpu.dimension_semantics<parallel>, #tpu.dimension_semantics<arbitrary>], iteration_bounds = array<i64: 1, 4>, scalar_prefetch = 0 : i64, scratch_operands = 1 : i64, tpu.core_type = #tpu.core_type<tc>, window_params = [{transform_indices = @transform_0, window_bounds = array<i64: 2, 3072>}, {transform_indices = @transform_1, window_bounds = array<i64: 3072, 1024>}, {pipeline_mode = #tpu.pipeline_mode<synchronous>, transform_indices = @transform_2, window_bounds = array<i64: 1, 1024>}, {pipeline_mode = #tpu.pipeline_mode<synchronous>, transform_indices = @transform_3, window_bounds = array<i64: 1, 1024>}, {pipeline_mode = #tpu.pipeline_mode<synchronous>, transform_indices = @transform_4, window_bounds = array<i64: 1, 1024>}, {pipeline_mode = #tpu.pipeline_mode<synchronous>, transform_indices = @transform_5, window_bounds = array<i64: 1024, 128>}, {pipeline_mode = #tpu.pipeline_mode<synchronous>, transform_indices = @transform_6, window_bounds = array<i64: 1, 128>}, {pipeline_mode = #tpu.pipeline_mode<synchronous>, transform_indices = @transform_7, window_bounds = array<i64: 1, 128>}, {pipeline_mode = #tpu.pipeline_mode<synchronous>, transform_indices = @transform_8, window_bounds = array<i64: 1, 128>}, {pipeline_mode = #tpu.pipeline_mode<synchronous>, transform_indices = @transform_9, window_bounds = array<i64: 128, 128>}, {pipeline_mode = #tpu.pipeline_mode<synchronous>, transform_indices = @transform_10, window_bounds = array<i64: 1, 128>}, {transform_indices = @transform_11, window_bounds = array<i64: 2, 128>}]} {
    %c0_i32 = arith.constant 0 : i32
    %0 = arith.cmpi eq, %arg1, %c0_i32 : i32
    %1 = arith.extui %0 : i1 to i32
    %c0_i32_0 = arith.constant 0 : i32
    %2 = arith.cmpi ne, %1, %c0_i32_0 : i32
    scf.if %2 {
      %cst_9 = arith.constant 0.000000e+00 : f32
      %13 = vector.broadcast %cst_9 : f32 to vector<2x1024xf32>
      %c0_10 = arith.constant 0 : index
      %c0_11 = arith.constant 0 : index
      %14 = vector.load %arg14[%c0_10, %c0_11] : memref<2x1024xf32, #tpu.memory_space<vmem>>, vector<2x1024xf32>
      tpu.vector_store %arg14[%c0_10, %c0_11], %13 {strides = array<i32>} : memref<2x1024xf32, #tpu.memory_space<vmem>>, vector<2x1024xf32>,
    } else {
    }
    %c0 = arith.constant 0 : index
    %c0_1 = arith.constant 0 : index
    %3 = vector.load %arg14[%c0, %c0_1] : memref<2x1024xf32, #tpu.memory_space<vmem>>, vector<2x1024xf32>
    %c0_2 = arith.constant 0 : index
    %c0_3 = arith.constant 0 : index
    %4 = vector.load %arg2[%c0_2, %c0_3] : memref<2x3072xf32, #tpu.memory_space<vmem>>, vector<2x3072xf32>
    %5 = arith.truncf %4 : vector<2x3072xf32> to vector<2x3072xbf16>
    %c0_4 = arith.constant 0 : index
    %c0_5 = arith.constant 0 : index
    %6 = vector.load %arg3[%c0_4, %c0_5] : memref<3072x1024xbf16, #tpu.memory_space<vmem>>, vector<3072x1024xbf16>
    %cst = arith.constant dense<0.000000e+00> : vector<2x1024xf32>
    %7 = tpu.matmul %5, %6, %cst {dimension_numbers = #tpu.dot_dimension_numbers<[1], [0], [0], [1], [0, 0, 1, 1], [], []>} : vector<2x3072xbf16>, vector<3072x1024xbf16>, vector<2x1024xf32> -> vector<2x1024xf32>
    %8 = arith.addf %3, %7 : vector<2x1024xf32>
    %c0_6 = arith.constant 0 : index
    %c0_7 = arith.constant 0 : index
    %9 = vector.load %arg14[%c0_6, %c0_7] : memref<2x1024xf32, #tpu.memory_space<vmem>>, vector<2x1024xf32>
    tpu.vector_store %arg14[%c0_6, %c0_7], %8 {strides = array<i32>} : memref<2x1024xf32, #tpu.memory_space<vmem>>, vector<2x1024xf32>,
    %c3_i32 = arith.constant 3 : i32
    %10 = arith.cmpi eq, %arg1, %c3_i32 : i32
    %11 = arith.extui %10 : i1 to i32
    %c0_i32_8 = arith.constant 0 : i32
    %12 = arith.cmpi ne, %11, %c0_i32_8 : i32
    scf.if %12 {
      %c0_9 = arith.constant 0 : index
      %c0_10 = arith.constant 0 : index
      %13 = vector.load %arg14[%c0_9, %c0_10] : memref<2x1024xf32, #tpu.memory_space<vmem>>, vector<2x1024xf32>
      %c0_11 = arith.constant 0 : index
      %c0_12 = arith.constant 0 : index
      %14 = vector.load %arg4[%c0_11, %c0_12] : memref<1x1024xf32, #tpu.memory_space<vmem>>, vector<1x1024xf32>
      %15 = vector.broadcast %14 : vector<1x1024xf32> to vector<2x1024xf32>
      %16 = arith.addf %13, %15 : vector<2x1024xf32>
      %cst_13 = arith.constant 0.000000e+00 : f32
      %17 = vector.broadcast %cst_13 : f32 to vector<2x1024xf32>
      %18 = arith.cmpf ogt, %16, %17 : vector<2x1024xf32>
      %cst_14 = arith.constant 5.000000e-02 : f32
      %19 = vector.broadcast %cst_14 : f32 to vector<2x1024xf32>
      %20 = arith.mulf %19, %16 : vector<2x1024xf32>
      %21 = arith.select %18, %16, %20 : vector<2x1024xi1>, vector<2x1024xf32>
      %22 = tpu.iota {dimensions = array<i32: 1>} : vector<2x1024xi32>
      %c1000_i32 = arith.constant 1000 : i32
      %23 = vector.broadcast %c1000_i32 : i32 to vector<2x1024xi32>
      %24 = arith.cmpi slt, %22, %23 : vector<2x1024xi32>
      %cst_15 = arith.constant dense<0.000000e+00> : vector<2xf32>
      %25 = vector.multi_reduction <add>, %21, %cst_15 [1] : vector<2x1024xf32> to vector<2xf32>
      %26 = vector.shape_cast %25 : vector<2xf32> to vector<2x1xf32>
      %cst_16 = arith.constant 1.000000e-03 : f32
      %27 = vector.broadcast %cst_16 : f32 to vector<2x1xf32>
      %28 = arith.mulf %26, %27 : vector<2x1xf32>
      %29 = vector.broadcast %28 : vector<2x1xf32> to vector<2x1024xf32>
      %30 = arith.subf %21, %29 : vector<2x1024xf32>
      %cst_17 = arith.constant 0.000000e+00 : f32
      %31 = vector.broadcast %cst_17 : f32 to vector<2x1024xf32>
      %32 = arith.select %24, %30, %31 : vector<2x1024xi1>, vector<2x1024xf32>
      %33 = arith.mulf %32, %32 : vector<2x1024xf32>
      %cst_18 = arith.constant dense<0.000000e+00> : vector<2xf32>
      %34 = vector.multi_reduction <add>, %33, %cst_18 [1] : vector<2x1024xf32> to vector<2xf32>
      %35 = vector.shape_cast %34 : vector<2xf32> to vector<2x1xf32>
      %cst_19 = arith.constant 1.000000e-03 : f32
      %36 = vector.broadcast %cst_19 : f32 to vector<2x1xf32>
      %37 = arith.mulf %35, %36 : vector<2x1xf32>
      %cst_20 = arith.constant 9.99999974E-6 : f32
      %38 = vector.broadcast %cst_20 : f32 to vector<2x1xf32>
      %39 = arith.addf %37, %38 : vector<2x1xf32>
      %40 = math.rsqrt %39 : vector<2x1xf32>
      %41 = vector.broadcast %40 : vector<2x1xf32> to vector<2x1024xf32>
      %42 = arith.mulf %32, %41 : vector<2x1024xf32>
      %c0_21 = arith.constant 0 : index
      %c0_22 = arith.constant 0 : index
      %43 = vector.load %arg5[%c0_21, %c0_22] : memref<1x1024xf32, #tpu.memory_space<vmem>>, vector<1x1024xf32>
      %44 = vector.broadcast %43 : vector<1x1024xf32> to vector<2x1024xf32>
      %45 = arith.mulf %42, %44 : vector<2x1024xf32>
      %c0_23 = arith.constant 0 : index
      %c0_24 = arith.constant 0 : index
      %46 = vector.load %arg6[%c0_23, %c0_24] : memref<1x1024xf32, #tpu.memory_space<vmem>>, vector<1x1024xf32>
      %47 = vector.broadcast %46 : vector<1x1024xf32> to vector<2x1024xf32>
      %48 = arith.addf %45, %47 : vector<2x1024xf32>
      %c0_25 = arith.constant 0 : index
      %c0_26 = arith.constant 0 : index
      %49 = vector.load %arg7[%c0_25, %c0_26] : memref<1024x128xf32, #tpu.memory_space<vmem>>, vector<1024x128xf32>
      %cst_27 = arith.constant dense<0.000000e+00> : vector<2x128xf32>
      %50 = tpu.matmul %48, %49, %cst_27 {dimension_numbers = #tpu.dot_dimension_numbers<[1], [0], [0], [1], [0, 0, 1, 1], [], []>} : vector<2x1024xf32>, vector<1024x128xf32>, vector<2x128xf32> -> vector<2x128xf32>
      %c0_28 = arith.constant 0 : index
      %c0_29 = arith.constant 0 : index
      %51 = vector.load %arg8[%c0_28, %c0_29] : memref<1x128xf32, #tpu.memory_space<vmem>>, vector<1x128xf32>
      %52 = vector.broadcast %51 : vector<1x128xf32> to vector<2x128xf32>
      %53 = arith.addf %50, %52 : vector<2x128xf32>
      %cst_30 = arith.constant 0.000000e+00 : f32
      %54 = vector.broadcast %cst_30 : f32 to vector<2x128xf32>
      %55 = arith.cmpf ogt, %53, %54 : vector<2x128xf32>
      %cst_31 = arith.constant 5.000000e-02 : f32
      %56 = vector.broadcast %cst_31 : f32 to vector<2x128xf32>
      %57 = arith.mulf %56, %53 : vector<2x128xf32>
      %58 = arith.select %55, %53, %57 : vector<2x128xi1>, vector<2x128xf32>
      %59 = tpu.iota {dimensions = array<i32: 1>} : vector<2x128xi32>
      %c100_i32 = arith.constant 100 : i32
      %60 = vector.broadcast %c100_i32 : i32 to vector<2x128xi32>
      %61 = arith.cmpi slt, %59, %60 : vector<2x128xi32>
      %cst_32 = arith.constant dense<0.000000e+00> : vector<2xf32>
      %62 = vector.multi_reduction <add>, %58, %cst_32 [1] : vector<2x128xf32> to vector<2xf32>
      %63 = vector.shape_cast %62 : vector<2xf32> to vector<2x1xf32>
      %cst_33 = arith.constant 0.00999999977 : f32
      %64 = vector.broadcast %cst_33 : f32 to vector<2x1xf32>
      %65 = arith.mulf %63, %64 : vector<2x1xf32>
      %66 = vector.broadcast %65 : vector<2x1xf32> to vector<2x128xf32>
      %67 = arith.subf %58, %66 : vector<2x128xf32>
      %cst_34 = arith.constant 0.000000e+00 : f32
      %68 = vector.broadcast %cst_34 : f32 to vector<2x128xf32>
      %69 = arith.select %61, %67, %68 : vector<2x128xi1>, vector<2x128xf32>
      %70 = arith.mulf %69, %69 : vector<2x128xf32>
      %cst_35 = arith.constant dense<0.000000e+00> : vector<2xf32>
      %71 = vector.multi_reduction <add>, %70, %cst_35 [1] : vector<2x128xf32> to vector<2xf32>
      %72 = vector.shape_cast %71 : vector<2xf32> to vector<2x1xf32>
      %cst_36 = arith.constant 0.00999999977 : f32
      %73 = vector.broadcast %cst_36 : f32 to vector<2x1xf32>
      %74 = arith.mulf %72, %73 : vector<2x1xf32>
      %cst_37 = arith.constant 9.99999974E-6 : f32
      %75 = vector.broadcast %cst_37 : f32 to vector<2x1xf32>
      %76 = arith.addf %74, %75 : vector<2x1xf32>
      %77 = math.rsqrt %76 : vector<2x1xf32>
      %78 = vector.broadcast %77 : vector<2x1xf32> to vector<2x128xf32>
      %79 = arith.mulf %69, %78 : vector<2x128xf32>
      %c0_38 = arith.constant 0 : index
      %c0_39 = arith.constant 0 : index
      %80 = vector.load %arg9[%c0_38, %c0_39] : memref<1x128xf32, #tpu.memory_space<vmem>>, vector<1x128xf32>
      %81 = vector.broadcast %80 : vector<1x128xf32> to vector<2x128xf32>
      %82 = arith.mulf %79, %81 : vector<2x128xf32>
      %c0_40 = arith.constant 0 : index
      %c0_41 = arith.constant 0 : index
      %83 = vector.load %arg10[%c0_40, %c0_41] : memref<1x128xf32, #tpu.memory_space<vmem>>, vector<1x128xf32>
      %84 = vector.broadcast %83 : vector<1x128xf32> to vector<2x128xf32>
      %85 = arith.addf %82, %84 : vector<2x128xf32>
      %c0_42 = arith.constant 0 : index
      %c0_43 = arith.constant 0 : index
      %86 = vector.load %arg11[%c0_42, %c0_43] : memref<128x128xf32, #tpu.memory_space<vmem>>, vector<128x128xf32>
      %cst_44 = arith.constant dense<0.000000e+00> : vector<2x128xf32>
      %87 = tpu.matmul %85, %86, %cst_44 {dimension_numbers = #tpu.dot_dimension_numbers<[1], [0], [0], [1], [0, 0, 1, 1], [], []>} : vector<2x128xf32>, vector<128x128xf32>, vector<2x128xf32> -> vector<2x128xf32>
      %c0_45 = arith.constant 0 : index
      %c0_46 = arith.constant 0 : index
      %88 = vector.load %arg12[%c0_45, %c0_46] : memref<1x128xf32, #tpu.memory_space<vmem>>, vector<1x128xf32>
      %89 = vector.broadcast %88 : vector<1x128xf32> to vector<2x128xf32>
      %90 = arith.addf %87, %89 : vector<2x128xf32>
      %cst_47 = arith.constant 0.000000e+00 : f32
      %91 = vector.broadcast %cst_47 : f32 to vector<2x128xf32>
      %92 = arith.subf %91, %90 : vector<2x128xf32>
      %93 = math.exp %92 : vector<2x128xf32>
      %cst_48 = arith.constant 1.000000e+00 : f32
      %94 = vector.broadcast %cst_48 : f32 to vector<2x128xf32>
      %95 = arith.addf %94, %93 : vector<2x128xf32>
      %cst_49 = arith.constant 1.000000e+00 : f32
      %96 = vector.broadcast %cst_49 : f32 to vector<2x128xf32>
      %97 = arith.divf %96, %95 : vector<2x128xf32>
      %c0_50 = arith.constant 0 : index
      %c0_51 = arith.constant 0 : index
      %98 = vector.load %arg13[%c0_50, %c0_51] : memref<2x128xf32, #tpu.memory_space<vmem>>, vector<2x128xf32>
      tpu.vector_store %arg13[%c0_50, %c0_51], %97 {strides = array<i32>} : memref<2x128xf32, #tpu.memory_space<vmem>>, vector<2x128xf32>,
    } else {
    }
    return
  }
  func.func @transform_0(%arg0: i32, %arg1: i32) -> (i32, i32) {
    %c0_i32 = arith.constant 0 : i32
    return %arg0, %arg1 : i32, i32
  }
  func.func @transform_1(%arg0: i32, %arg1: i32) -> (i32, i32) {
    %c0_i32 = arith.constant 0 : i32
    %c0_i32_0 = arith.constant 0 : i32
    return %arg1, %c0_i32 : i32, i32
  }
  func.func @transform_2(%arg0: i32, %arg1: i32) -> (i32, i32) {
    %c0_i32 = arith.constant 0 : i32
    %c0_i32_0 = arith.constant 0 : i32
    %c0_i32_1 = arith.constant 0 : i32
    return %c0_i32, %c0_i32_0 : i32, i32
  }
  func.func @transform_3(%arg0: i32, %arg1: i32) -> (i32, i32) {
    %c0_i32 = arith.constant 0 : i32
    %c0_i32_0 = arith.constant 0 : i32
    %c0_i32_1 = arith.constant 0 : i32
    return %c0_i32, %c0_i32_0 : i32, i32
  }
  func.func @transform_4(%arg0: i32, %arg1: i32) -> (i32, i32) {
    %c0_i32 = arith.constant 0 : i32
    %c0_i32_0 = arith.constant 0 : i32
    %c0_i32_1 = arith.constant 0 : i32
    return %c0_i32, %c0_i32_0 : i32, i32
  }
  func.func @transform_5(%arg0: i32, %arg1: i32) -> (i32, i32) {
    %c0_i32 = arith.constant 0 : i32
    %c0_i32_0 = arith.constant 0 : i32
    %c0_i32_1 = arith.constant 0 : i32
    return %c0_i32, %c0_i32_0 : i32, i32
  }
  func.func @transform_6(%arg0: i32, %arg1: i32) -> (i32, i32) {
    %c0_i32 = arith.constant 0 : i32
    %c0_i32_0 = arith.constant 0 : i32
    %c0_i32_1 = arith.constant 0 : i32
    return %c0_i32, %c0_i32_0 : i32, i32
  }
  func.func @transform_7(%arg0: i32, %arg1: i32) -> (i32, i32) {
    %c0_i32 = arith.constant 0 : i32
    %c0_i32_0 = arith.constant 0 : i32
    %c0_i32_1 = arith.constant 0 : i32
    return %c0_i32, %c0_i32_0 : i32, i32
  }
  func.func @transform_8(%arg0: i32, %arg1: i32) -> (i32, i32) {
    %c0_i32 = arith.constant 0 : i32
    %c0_i32_0 = arith.constant 0 : i32
    %c0_i32_1 = arith.constant 0 : i32
    return %c0_i32, %c0_i32_0 : i32, i32
  }
  func.func @transform_9(%arg0: i32, %arg1: i32) -> (i32, i32) {
    %c0_i32 = arith.constant 0 : i32
    %c0_i32_0 = arith.constant 0 : i32
    %c0_i32_1 = arith.constant 0 : i32
    return %c0_i32, %c0_i32_0 : i32, i32
  }
  func.func @transform_10(%arg0: i32, %arg1: i32) -> (i32, i32) {
    %c0_i32 = arith.constant 0 : i32
    %c0_i32_0 = arith.constant 0 : i32
    %c0_i32_1 = arith.constant 0 : i32
    return %c0_i32, %c0_i32_0 : i32, i32
  }
  func.func @transform_11(%arg0: i32, %arg1: i32) -> (i32, i32) {
    %c0_i32 = arith.constant 0 : i32
    %c0_i32_0 = arith.constant 0 : i32
    return %arg0, %c0_i32 : i32, i32
  }
}

</mosaic_0001>

<bundles_post_ra>
// kernel: d_forward.1
= control target key start
LH: loop header
LB: loop body
LE: loop exit
PB: predicated region body
PF: predicated region fallthrough
CT: control target
= control target key end

     0   :  { %s17783_s0 = inlined_call_operand.hbm [shape: f32[2,12288], index: 0, kind: input, shape index: {}]   ;;  %s17784_s1 = inlined_call_operand.hbm [shape: bf16[12288,1024], index: 1, kind: input, shape index: {}]   ;;  %s17785_s2 = inlined_call_operand.hbm [shape: f32[1,1024], index: 2, kind: input, shape index: {}]   ;;  %s17786_s3 = inlined_call_operand.hbm [shape: f32[1,1024], index: 3, kind: input, shape index: {}]   ;;  %s17787_s4 = inlined_call_operand.hbm [shape: f32[1,1024], index: 4, kind: input, shape index: {}]   ;;  %s17788_s5 = inlined_call_operand.hbm [shape: f32[1024,128], index: 5, kind: input, shape index: {}]   ;;  %s17789_s6 = inlined_call_operand.hbm [shape: f32[1,128], index: 6, kind: input, shape index: {}]   ;;  %s17790_s7 = inlined_call_operand.hbm [shape: f32[1,128], index: 7, kind: input, shape index: {}]   ;;  %s17791_s8 = inlined_call_operand.hbm [shape: f32[1,128], index: 8, kind: input, shape index: {}]   ;;  %s17792_s9 = inlined_call_operand.hbm [shape: f32[128,128], index: 9, kind: input, shape index: {}]   ;;  %s17793_s10 = inlined_call_operand.hbm [shape: f32[1,128], index: 10, kind: input, shape index: {}]   ;;  %s17794_s11 = inlined_call_operand.vmem [shape: f32[2,128], index: 11, kind: output, shape index: {}]  }
   0x1   :  { %17799 = sst [smem:[#allocation27_spill]] %s17783_s0 }
   0x2   :  { %17800 = sst [smem:[#allocation28_spill]] %s17785_s2 }
   0x3   :  { %17801 = sst [smem:[#allocation29_spill]] %s17786_s3 }
   0x4   :  { %17802 = sst [smem:[#allocation30_spill]] %s17787_s4 }
   0x5   :  { %17803 = sst [smem:[#allocation31_spill]] %s17788_s5 }
   0x6   :  { %17804 = sst [smem:[#allocation32_spill]] %s17789_s6 }
   0x7   :  { %17805 = sst [smem:[#allocation33_spill]] %s17790_s7 }
   0x8   :  { %16 = vsyncpa [#allocation4], 0 }
   0x9   :  { %18 = vsyncpa [#allocation4 + $0x1], 0 }
   0xa   :  { %19 = vsyncpa [#allocation6], 0 }
   0xb   :  { %21 = vsyncpa [#allocation6 + $0x1], 0 }
   0xc   :  { %22 = vsyncpa [#allocation9], 0 }
   0xd   :  { %23 = vsyncpa [#allocation12], 0 }
   0xe   :  { %24 = vsyncpa [#allocation15], 0 }
   0xf   :  { %25 = vsyncpa [#allocation18], 0  ;;  %s15463_s17 = smov 0   ;;  %s15465_s18 = smov 0  }
  0x10   :  { %s15467_s19 = smov 0   ;;  %s15469_s20 = smov 0  }
  0x11   :  { %s15471_s21 = smov 0   ;;  %s15473_s22 = smov 0  }
  0x12 LB: > { %s17798_s23 = sadd.s32 4294967295, %s15381_s22   ;;  %p13074_p0 = scmp.ge.s32.totalorder %s15381_s22, 1  ;;  %s15381_s22 = sphi %s15473_s22, %s31_s22   ;;  %s15377_s21 = sphi %s15471_s21, %s17827_s21   ;;  %s15373_s20 = sphi %s15469_s20, %s17826_s20   ;;  %s15369_s19 = sphi %s15467_s19, %s17825_s19   ;;  %s15365_s18 = sphi %s15465_s18, %s17824_s18   ;;  %s15361_s17 = sphi %s15463_s17, %s17823_s17  }
  0x13   : > { %p15497_p1 = scmp.eq.s32.totalorder %s17798_s23, 0  ;;  %p317_p2 = scmp.lt.s32.totalorder %s15381_s22, 5 }
  0x14   : > { %s15383_s26 = smov [#allocation7]   ;;  %s15384_s28 = smov [#allocation8]  }
  0x15   : > { %s17806_s24 = scalar_select %p15497_p1, 1, 0 }
  0x16   : > { %p15502_p3 = pnand %p13074_p0, %p317_p2  ;;  %s330_s27 = sshll.u32 %s15383_s26, 4  ;;  %s331_s27 = int_to_ptr.vmem [resolvable:$true] %s330_s27 }
  0x17   : > { %s341_s29 = sshll.u32 %s15384_s28, 4  ;;  %s15385_s12 = smov [#allocation11]   ;;  %s342_s29 = int_to_ptr.vmem [resolvable:$true] %s341_s29 }
  0x18   : > { %s17807_s25 = scalar_select %p15502_p3, 1, 0 }
  0x19   : > { %p14883_p4 = pneg %p15502_p3  ;;  %s362_s13 = sshll.u32 %s15385_s12, 4  ;;  %s15514_s13 = int_to_ptr.vmem [resolvable:$true] %s362_s13 }
  0x1a   : > { %s15028_s15 = scalar_lea.vmem %s331_s27, 128  ;;  %p15036_p10 = scmp.lt.s32.totalorder %s331_s27, %s331_s27 }
  0x1b   : > { %p15510_p5 = pnand %p14883_p4, %p15497_p1  ;;  %p15029_p7 = scmp.ne.s32.totalorder %s331_s27, %s15028_s15 }
  0x1c   : > { %p15037_p11 = scmp.lt.s32.totalorder %s15028_s15, %s15028_s15 }
  0x1d   : > { %p15518_p6 = pneg %p15510_p5 }
  0x1e   : > { %p15038_p12 = por %p15037_p11, %p15036_p10 }
  0x1f   : > { %p15031_p8 = pnand %p15029_p7, %p15518_p6 }
  0x21   : > { %p15032_p9 = pneg %p15031_p8 }
  0x23   : > { %p15039_p13 = pnand %p15038_p12, %p15032_p9 }
  0x25   : > { %15042 = shalt.err (!%p15039_p13)
}
  0x26   : > { %s17810_s2 = sld [smem:[#allocation28_spill]]  ;;  %s15054_s28 = scalar_lea.vmem %s342_s29, 128 }
  0x27   : > { %p15055_p0 = scmp.ne.s32.totalorder %s342_s29, %s15054_s28  ;;  %p15062_p3 = scmp.lt.s32.totalorder %s342_s29, %s342_s29 }
  0x28   : > { %p15063_p7 = scmp.lt.s32.totalorder %s15054_s28, %s15054_s28 }
  0x29   : > { %p15057_p2 = pnand %p15055_p0, %p15518_p6 }
  0x2a   : > { %p15064_p8 = por %p15063_p7, %p15062_p3 }
  0x2b   : > { %p15058_p4 = pneg %p15057_p2 }
  0x2c   : > { %14886 = dma.hbm_to_vmem [thread:$0]  (!%p15510_p5), %s17810_s2, 128, %s331_s27, [#allocation6]  }
  0x2d   : > { %p15065_p1 = pnand %p15064_p8, %p15058_p4 }
  0x2f   : > { %15068 = shalt.err (!%p15065_p1)
}
  0x30   : > { %s17811_s3 = sld [smem:[#allocation29_spill]]  ;;  %s15080_s27 = scalar_lea.vmem %s15514_s13, 16384 }
  0x31   : > { %p15081_p9 = scmp.ne.s32.totalorder %s15514_s13, %s15080_s27  ;;  %p15088_p12 = scmp.lt.s32.totalorder %s15514_s13, %s15514_s13 }
  0x32   : > { %p15089_p3 = scmp.lt.s32.totalorder %s15080_s27, %s15080_s27 }
  0x33   : > { %p15083_p10 = pnand %p15081_p9, %p15518_p6 }
  0x34   : > { %p15090_p13 = por %p15089_p3, %p15088_p12 }
  0x35   : > { %p15084_p11 = pneg %p15083_p10 }
  0x36   : > { %14889 = dma.hbm_to_vmem [thread:$0]  (!%p15510_p5), %s17811_s3, 128, %s342_s29, [#allocation9]  }
  0x37   : > { %p15091_p1 = pnand %p15090_p13, %p15084_p11 }
  0x39   : > { %15094 = shalt.err (!%p15091_p1)
}
  0x3a   : > { %s15386_s16 = smov 128   ;;  %s15387_s26 = smov 8  }
  0x3b   : > { %s17812_s5 = sld [smem:[#allocation31_spill]]  ;;  %s15388_s12 = smov [#allocation14]  }
  0x3c   : > { %s387_s15 = sshll.u32 %s15388_s12, 4  ;;  %s15389_s27 = smov [#allocation17]   ;;  %s388_s15 = int_to_ptr.vmem [resolvable:$true] %s387_s15 }
  0x3d   : > { %s408_s23 = sshll.u32 %s15389_s27, 4  ;;  %s15106_s2 = scalar_lea.vmem %s388_s15, 16  ;;  %s409_s23 = int_to_ptr.vmem [resolvable:$true] %s408_s23 }
  0x3e   : > { %p15107_p0 = scmp.ne.s32.totalorder %s388_s15, %s15106_s2  ;;  %s15113_s3 = scalar_lea.vmem %s388_s15, 32 }
  0x3f   : > { %p15114_p7 = scmp.lt.s32.totalorder %s388_s15, %s388_s15  ;;  %p15115_p8 = scmp.lt.s32.totalorder %s15113_s3, %s15106_s2 }
  0x40   : > { %p15109_p2 = pnand %p15107_p0, %p15518_p6 }
  0x41   : > { %14895 = dma.hbm_to_vmem [thread:$0]  (!%p15510_p5), %s17812_s5, 16384, %s15514_s13, [#allocation12], %s15386_s16, %s15386_s16, %s15387_s26  }
  0x42   : > { %p15110_p4 = pneg %p15109_p2  ;;  %p15116_p9 = por %p15115_p8, %p15114_p7 }
  0x44   : > { %p15117_p10 = pnand %p15116_p9, %p15110_p4 }
  0x46   : > { %15120 = shalt.err (!%p15117_p10)
}
  0x47   : > { %s17813_s7 = sld [smem:[#allocation33_spill]]  ;;  %s15132_s28 = scalar_lea.vmem %s409_s23, 2048 }
  0x48   : > { %p15133_p11 = scmp.ne.s32.totalorder %s409_s23, %s15132_s28  ;;  %p15140_p13 = scmp.lt.s32.totalorder %s409_s23, %s409_s23 }
  0x49   : > { %p15141_p1 = scmp.lt.s32.totalorder %s15132_s28, %s15132_s28 }
  0x4a   : > { %p15135_p12 = pnand %p15133_p11, %p15518_p6 }
  0x4b   : > { %p15142_p0 = por %p15141_p1, %p15140_p13 }
  0x4c   : > { %p15136_p3 = pneg %p15135_p12 }
  0x4d   : > { %14901 = dma.hbm_to_vmem [thread:$0]  (!%p15510_p5), %s17813_s7, 16, %s388_s15, [#allocation15]  }
  0x4e   : > { %p15143_p2 = pnand %p15142_p0, %p15136_p3 }
  0x50   : > { %15146 = shalt.err (!%p15143_p2)
}
  0x51   : > { %14907 = dma.hbm_to_vmem [thread:$0]  (!%p15510_p5), %s17792_s9, 2048, %s409_s23, [#allocation18], %s15386_s16, %s15386_s16, %s15387_s26  }
  0x52   : > { %s15390_s12 = smov [#allocation10]   ;;  %s15391_s27 = smov [#allocation13]  }
  0x53   : > { %s352_s15 = sshll.u32 %s15390_s12, 4  ;;  %s376_s29 = sshll.u32 %s15391_s27, 4  ;;  %s353_s15 = int_to_ptr.vmem [resolvable:$true] %s352_s15  ;;  %s377_s29 = int_to_ptr.vmem [resolvable:$true] %s376_s29 }
  0x54   : > { %s15158_s13 = scalar_lea.vmem %s353_s15, 128  ;;  %p15166_p9 = scmp.lt.s32.totalorder %s353_s15, %s353_s15 }
  0x55   : > { %p15159_p4 = scmp.ne.s32.totalorder %s353_s15, %s15158_s13  ;;  %p15167_p10 = scmp.lt.s32.totalorder %s15158_s13, %s15158_s13 }
  0x57   : > { %p15161_p7 = pnand %p15159_p4, %p15518_p6  ;;  %p15168_p11 = por %p15167_p10, %p15166_p9 }
  0x59   : > { %p15162_p8 = pneg %p15161_p7 }
  0x5b   : > { %p15169_p12 = pnand %p15168_p11, %p15162_p8 }
  0x5d   : > { %15172 = shalt.err (!%p15169_p12)
}
  0x5e   : > { %s17814_s4 = sld [smem:[#allocation30_spill]]  ;;  %s15184_s23 = scalar_lea.vmem %s377_s29, 16 }
  0x5f   : > { %p15185_p3 = scmp.ne.s32.totalorder %s377_s29, %s15184_s23  ;;  %s15191_s16 = scalar_lea.vmem %s377_s29, 32 }
  0x60   : > { %p15192_p0 = scmp.lt.s32.totalorder %s377_s29, %s377_s29  ;;  %p15193_p2 = scmp.lt.s32.totalorder %s15191_s16, %s15184_s23 }
  0x61   : > { %p15187_p13 = pnand %p15185_p3, %p15518_p6 }
  0x62   : > { %p15194_p4 = por %p15193_p2, %p15192_p0 }
  0x63   : > { %p15188_p1 = pneg %p15187_p13 }
  0x64   : > { %14892 = dma.hbm_to_vmem [thread:$0]  (!%p15510_p5), %s17814_s4, 128, %s353_s15, [#allocation9]  }
  0x65   : > { %p15195_p7 = pnand %p15194_p4, %p15188_p1 }
  0x67   : > { %15198 = shalt.err (!%p15195_p7)
}
  0x68   : > { %s17815_s6 = sld [smem:[#allocation32_spill]]  ;;  %s15392_s12 = smov [#allocation16]  }
  0x69   : > { %s398_s15 = sshll.u32 %s15392_s12, 4  ;;  %s15393_s27 = smov [#allocation19]   ;;  %s399_s15 = int_to_ptr.vmem [resolvable:$true] %s398_s15 }
  0x6a   : > { %s422_s13 = sshll.u32 %s15393_s27, 4  ;;  %s15210_s28 = scalar_lea.vmem %s399_s15, 16  ;;  %s423_s13 = int_to_ptr.vmem [resolvable:$true] %s422_s13 }
  0x6b   : > { %p15211_p8 = scmp.ne.s32.totalorder %s399_s15, %s15210_s28  ;;  %s15217_s2 = scalar_lea.vmem %s399_s15, 32 }
  0x6c   : > { %p15218_p11 = scmp.lt.s32.totalorder %s399_s15, %s399_s15  ;;  %p15219_p12 = scmp.lt.s32.totalorder %s15217_s2, %s15210_s28 }
  0x6d   : > { %p15213_p9 = pnand %p15211_p8, %p15518_p6 }
  0x6e   : > { %14898 = dma.hbm_to_vmem [thread:$0]  (!%p15510_p5), %s17815_s6, 16, %s377_s29, [#allocation12]  }
  0x6f   : > { %p15214_p10 = pneg %p15213_p9  ;;  %p15220_p3 = por %p15219_p12, %p15218_p11 }
  0x71   : > { %p15221_p13 = pnand %p15220_p3, %p15214_p10 }
  0x73   : > { %15224 = shalt.err (!%p15221_p13)
}
  0x74   : > { %14904 = dma.hbm_to_vmem [thread:$0]  (!%p15510_p5), %s17791_s8, 16, %s399_s15, [#allocation15]  }
  0x75   : > { %s15236_s16 = scalar_lea.vmem %s423_s13, 16  ;;  %s15243_s26 = scalar_lea.vmem %s423_s13, 32 }
  0x76   : > { %p15237_p1 = scmp.ne.s32.totalorder %s423_s13, %s15236_s16  ;;  %p15244_p4 = scmp.lt.s32.totalorder %s423_s13, %s423_s13 }
  0x77   : > { %p15245_p7 = scmp.lt.s32.totalorder %s15243_s26, %s15236_s16 }
  0x78   : > { %p15239_p0 = pnand %p15237_p1, %p15518_p6 }
  0x79   : > { %p15246_p8 = por %p15245_p7, %p15244_p4 }
  0x7a   : > { %p15240_p2 = pneg %p15239_p0 }
  0x7c   : > { %p15247_p9 = pnand %p15246_p8, %p15240_p2 }
  0x7e   : > { %15250 = shalt.err (!%p15247_p9)
}
  0x7f   : > { %14910 = dma.hbm_to_vmem [thread:$0]  (!%p15510_p5), %s17793_s10, 16, %s423_s13, [#allocation18]  }
  0x80   : > { %s40_s14 = sadd.s32 1, %s15377_s21  ;;  %s52_s30 = sadd.s32 1, %s15369_s19 }
  0x81   : > { %p41_p6 = scmp.ge.s32.totalorder %s40_s14, 4  ;;  %p59_p10 = scmp.ne.s32.totalorder %s15369_s19, %s15365_s18 }
  0x82   : > { %p60_p11 = scmp.eq.s32.totalorder %s15381_s22, 0  ;;  %p65_p3 = scmp.ne.s32.totalorder %s15365_s18, %s15361_s17 }
  0x83   : > { %s17829_s14 = smov (%p41_p6, %s40_s14), 0  ;;  %p14927_p13 = scmp.lt.s32.totalorder %s15381_s22, 4 }
  0x84   : > { %p61_p12 = por %p60_p11, %p59_p10  ;;  %s48_s15 = ssub.s32 %s15377_s21, %s17829_s14 }
  0x85   : > { %p50_p1 = scmp.eq.s32.totalorder %s48_s15, 0  ;;  %p17816_p0 = scmp.ne.s32.totalorder %s17806_s24, 0 }
  0x86   : > { %s433_s28 = sand.u32 1, %s15369_s19   ;;  %s14643_s13 = smul.u32 768, %s15377_s21 }
  0x87   : > { %p15610_p2 = por %p17816_p0, %p65_p3  ;;  %s14839_s23 = smul.u32 48, %s433_s28 }
  0x88   : > { %s15617_s2 = scalar_select %p50_p1, %s15369_s19, %s52_s30  }
  0x89   : > { %s17818_s0 = sld [smem:[#allocation27_spill]]  ;;  %p15622_p5 = pnand %p14927_p13, %p61_p12 }
  0x8a   : > { %s14840_s17 = smul.u32 12288, %s433_s28  ;;  %s437_s12 = scalar_lea.vmem [#allocation3], %s14839_s23 }
  0x8b   : > { %s447_s15 = sshll.u32 %s437_s12, 4  ;;  %s434_s4 = scalar_lea.sflag [#allocation4], %s433_s28  ;;  %s448_s15 = int_to_ptr.vmem [resolvable:$true] %s447_s15 }
  0x8c   : > { %p15253_p4 = pneg %p15622_p5  ;;  %s15264_s30 = scalar_lea.vmem %s448_s15, 768 }
  0x8d   : > { %p15265_p7 = scmp.ne.s32.totalorder %s448_s15, %s15264_s30 }
  0x8f   : > { %s445_s26 = scalar_lea.hbm %s17818_s0, %s14643_s13  ;;  %p15267_p8 = pnand %p15265_p7, %p15253_p4 }
  0x90   : > { %s15394_s13 = smov [#allocation3]  }
  0x91   : > { %p15268_p9 = pneg %p15267_p8  ;;  %s15269_s29 = sshll.u32 %s15394_s13, 4  ;;  %s15270_s29 = int_to_ptr.vmem [resolvable:$false] %s15269_s29 }
  0x92   : > { %s15271_s16 = scalar_lea.vmem %s15270_s29, 1536  ;;  %p15272_p6 = scmp.lt.s32.totalorder %s448_s15, %s15270_s29 }
  0x93   : > { %p15273_p10 = scmp.lt.s32.totalorder %s15271_s16, %s15264_s30 }
  0x95   : > { %p15274_p11 = por %p15273_p10, %p15272_p6 }
  0x97   : > { %p15275_p12 = pnand %p15274_p11, %p15268_p9 }
  0x99   : > { %15278 = shalt.err (!%p15275_p12)
}
  0x9a   : > { %14914 = dma.hbm_to_vmem [thread:$0]  (!%p15622_p5), %s445_s26, 768, %s448_s15, %s434_s4  }
  0x9b   : > { %s14646_s28 = smul.u32 196608, %s15377_s21  ;;  %s458_s23 = scalar_lea.vmem [#allocation5], %s14840_s17 }
  0x9c   : > { %s466_s12 = sshll.u32 %s458_s23, 4  ;;  %s454_s0 = sand.u32 1, %s15381_s22   ;;  %s467_s12 = int_to_ptr.vmem [resolvable:$true] %s466_s12 }
  0x9d   : > { %s465_s6 = scalar_lea.hbm %s17784_s1, %s14646_s28  ;;  %s455_s29 = scalar_lea.sflag [#allocation6], %s454_s0 }
  0x9e   : > { %s15292_s30 = scalar_lea.vmem %s467_s12, 196608  ;;  %s15395_s16 = smov [#allocation5]  }
  0x9f   : > { %p15293_p3 = scmp.ne.s32.totalorder %s467_s12, %s15292_s30  ;;  %s15297_s7 = sshll.u32 %s15395_s16, 4  ;;  %s15298_s7 = int_to_ptr.vmem [resolvable:$false] %s15297_s7 }
  0xa0   : > { %s15299_s4 = scalar_lea.vmem %s15298_s7, 393216  ;;  %p15300_p0 = scmp.lt.s32.totalorder %s467_s12, %s15298_s7 }
  0xa1   : > { %p15295_p13 = pnand %p15293_p3, %p15253_p4  ;;  %p15301_p7 = scmp.lt.s32.totalorder %s15299_s4, %s15292_s30 }
  0xa3   : > { %p15296_p1 = pneg %p15295_p13  ;;  %p15302_p8 = por %p15301_p7, %p15300_p0 }
  0xa5   : > { %p15303_p9 = pnand %p15302_p8, %p15296_p1 }
  0xa7   : > { %15306 = shalt.err (!%p15303_p9)
}
  0xa8   : > { %s15396_s26 = smov 512   ;;  %s15397_s5 = smov 32  }
  0xa9   : > { %14917 = dma.hbm_to_vmem [thread:$0]  (!%p15622_p5), %s465_s6, 196608, %s467_s12, %s455_s29, %s15396_s26, %s15396_s26, %s15397_s5  }
  0xaa   : > { %p17820_p6 = scmp.ne.s32.totalorder %s17807_s25, 0 }
  0xab   : > { %s480_s0 = sand.u32 (!%p17820_p6), 1, %s15365_s18  }
  0xac   : > { %478 = sbr.rel (%p17820_p6) target bundleno = 3091 (0xc13), region = 64  ;;  %s481_s15 = scalar_lea.sflag (!%p17820_p6), [#allocation4], %s480_s0 }
  0xad   : > { %s14841_s17 = smul.u32 (!%p17820_p6), 48, %s480_s0 }
  0xaf   : > { %s15646_s28 = scalar_lea.vmem (!%p17820_p6), [#allocation3], %s14841_s17 }
  0xb1   : > { %15332 = dma.done.wait (%p15610_p2), %s481_s15, 768  }
  0xb2   : > { %15334 = vsyncadd (%p15610_p2), %s481_s15, 4294966528  ;;  %s17821_s7 = sadd.s32 4294967295, %s15381_s22   ;;  %s14842_s6 = smul.u32 12288, %s480_s0 }
  0xb3   : > { %s489_s3 = sand.u32 1, %s17821_s7  }
  0xb4   : > { %s490_s23 = scalar_lea.sflag [#allocation6], %s489_s3  ;;  %s15654_s25 = scalar_lea.vmem [#allocation5], %s14842_s6 }
  0xb5   : > { %15336 = dma.done.wait (%p15610_p2), %s490_s23, 196608  }
  0xb6   : > { %15338 = vsyncadd (%p15610_p2), %s490_s23, 4294770688  ;;  %p17822_p5 = scmp.ne.s32.totalorder %s17806_s24, 0 }
  0xb8   : > { %15340 = dma.done.wait (%p17822_p5), [#allocation6], 128  }
  0xb9   : > { %15342 = vsyncadd (%p17822_p5), [#allocation6], 4294967168 }
  0xba   : > { %15344 = dma.done.wait (%p17822_p5), [#allocation9], 256  }
  0xbb   : > { %15346 = vsyncadd (%p17822_p5), [#allocation9], 4294967040 }
  0xbc   : > { %15348 = dma.done.wait (%p17822_p5), [#allocation12], 16400  }
  0xbd   : > { %15350 = vsyncadd (%p17822_p5), [#allocation12], 4294950896 }
  0xbe   : > { %15352 = dma.done.wait (%p17822_p5), [#allocation15], 32  }
  0xbf   : > { %15354 = vsyncadd (%p17822_p5), [#allocation15], 4294967264 }
  0xc0   : > { %15356 = dma.done.wait (%p17822_p5), [#allocation18], 2064  }
  0xc1   : > { %15358 = vsyncadd (%p17822_p5), [#allocation18], 4294965232  ;;  %p13098_p2 = scmp.ne.s32.totalorder %s15373_s20, 0 }
  0xc3   : > { %581 = sbr.rel (%p13098_p2) target bundleno = 202 (0xca), region = 112 }
  0xc8   : > { %v15398_v0 = vmov 0.0  }
  0xc9   : > { %582 = vst [vmem:[#allocation2] sm:$0xff] %v15398_v0  ;;  %583 = vst [vmem:[#allocation2 + $0x8] sm:$0xff] %v15398_v0 }
  0xca PF: > { %v804_v1 = vld [vmem:[%s15654_s25 + $0x1c0] sm:$0xff]  ;;  %v15399_v33 = vmov 1983009808   ;;  %v602_v35 = vlaneseq  ;;  %p14635_p4 = scmp.ne.s32.totalorder %s15373_s20, 3 }
  0xcb   : > { %v808_v2 = vld [vmem:[%s15654_s25 + $0x1e0] sm:$0xff]  ;;  %v600_v34 = vunpack.c.l.s4 %v15399_v33 }
  0xcc   : > { %v932_v3 = vld [vmem:[%s15654_s25 + $0x5c0] sm:$0xff]  ;;  %v13156_v4 = vcombine.high %v804_v1, %v808_v2  ;;  %v13155_v6 = vcombine.low %v804_v1, %v808_v2  ;;  %v15704_v45 = vshrl.u32 %v602_v35, 7 }
  0xcd   : > { %v936_v5 = vld [vmem:[%s15654_s25 + $0x5e0] sm:$0xff]  ;;  %v601_v44 = vunpack.c.0.s8 %v600_v34 }
  0xce   : > { %v796_v7 = vld [vmem:[%s15654_s25 + $0x180] sm:$0xff]  ;;  %v13284_v9 = vcombine.high %v932_v3, %v936_v5  ;;  %v13283_v10 = vcombine.low %v932_v3, %v936_v5  ;;  %9964 = vmatprep.subr.bf16.mxu0 %v13156_v4 }
  0xcf   : > { %v800_v8 = vld [vmem:[%s15654_s25 + $0x1a0] sm:$0xff]  ;;  %9965 = vmatpush1.bf16.msra.mxu0 %v13155_v6  ;;  %v15711_v54 = vsub.s32 %v601_v44, %v15704_v45 }
  0xd0   : > { %v13148_v11 = vcombine.high %v796_v7, %v800_v8  ;;  %v924_v12 = vld [vmem:[%s15654_s25 + $0x580] sm:$0xff]  ;;  %10005 = vmatprep.subr.bf16.mxu1 %v13284_v9  ;;  %v13147_v19 = vcombine.low %v796_v7, %v800_v8 }
  0xd1   : > { %v928_v13 = vld [vmem:[%s15654_s25 + $0x5a0] sm:$0xff]  ;;  %10006 = vmatpush1.bf16.msra.mxu1 %v13283_v10 }
  0xd2   : > { %v788_v14 = vld [vmem:[%s15654_s25 + $0x140] sm:$0xff]  ;;  %v13276_v15 = vcombine.high %v924_v12, %v928_v13  ;;  %9966 = vmatprep.subr.bf16.mxu0 %v13148_v11  ;;  %v13275_v20 = vcombine.low %v924_v12, %v928_v13 }
  0xd3   : > { %v792_v16 = vld [vmem:[%s15654_s25 + $0x160] sm:$0xff]  ;;  %9967 = vmatpush1.bf16.msra.mxu0 %v13147_v19 }
  0xd4   : > { %v916_v17 = vld [vmem:[%s15654_s25 + $0x540] sm:$0xff]  ;;  %v13140_v21 = vcombine.high %v788_v14, %v792_v16  ;;  %10007 = vmatprep.subr.bf16.mxu1 %v13276_v15  ;;  %v13139_v27 = vcombine.low %v788_v14, %v792_v16 }
  0xd5   : > { %v920_v18 = vld [vmem:[%s15654_s25 + $0x560] sm:$0xff]  ;;  %10008 = vmatpush1.bf16.msra.mxu1 %v13275_v20 }
  0xd6   : > { %v13268_v22 = vcombine.high %v916_v17, %v920_v18  ;;  %v780_v23 = vld [vmem:[%s15654_s25 + $0x100] sm:$0xff]  ;;  %9968 = vmatprep.subr.bf16.mxu0 %v13140_v21  ;;  %v13267_v28 = vcombine.low %v916_v17, %v920_v18 }
  0xd7   : > { %v784_v24 = vld [vmem:[%s15654_s25 + $0x120] sm:$0xff]  ;;  %9969 = vmatpush1.bf16.msra.mxu0 %v13139_v27 }
  0xd8   : > { %v908_v25 = vld [vmem:[%s15654_s25 + $0x500] sm:$0xff]  ;;  %v13132_v29 = vcombine.high %v780_v23, %v784_v24  ;;  %10009 = vmatprep.subr.bf16.mxu1 %v13268_v22  ;;  %v13131_v38 = vcombine.low %v780_v23, %v784_v24 }
  0xd9   : > { %v912_v26 = vld [vmem:[%s15654_s25 + $0x520] sm:$0xff]  ;;  %10010 = vmatpush1.bf16.msra.mxu1 %v13267_v28 }
  0xda   : > { %v13260_v30 = vcombine.high %v908_v25, %v912_v26  ;;  %v772_v31 = vld [vmem:[%s15654_s25 + $0xc0] sm:$0xff]  ;;  %9970 = vmatprep.subr.bf16.mxu0 %v13132_v29  ;;  %v13259_v39 = vcombine.low %v908_v25, %v912_v26 }
  0xdb   : > { %v776_v32 = vld [vmem:[%s15654_s25 + $0xe0] sm:$0xff]  ;;  %9971 = vmatpush1.bf16.msra.mxu0 %v13131_v38 }
  0xdc   : > { %v900_v36 = vld [vmem:[%s15654_s25 + $0x4c0] sm:$0xff]  ;;  %v13124_v40 = vcombine.high %v772_v31, %v776_v32  ;;  %10011 = vmatprep.subr.bf16.mxu1 %v13260_v30  ;;  %v13123_v48 = vcombine.low %v772_v31, %v776_v32 }
  0xdd   : > { %v904_v37 = vld [vmem:[%s15654_s25 + $0x4e0] sm:$0xff]  ;;  %10012 = vmatpush1.bf16.msra.mxu1 %v13259_v39 }
  0xde   : > { %v13252_v41 = vcombine.high %v900_v36, %v904_v37  ;;  %v764_v42 = vld [vmem:[%s15654_s25 + $0x80] sm:$0xff]  ;;  %9972 = vmatprep.subr.bf16.mxu0 %v13124_v40  ;;  %v13251_v49 = vcombine.low %v900_v36, %v904_v37 }
  0xdf   : > { %v768_v43 = vld [vmem:[%s15654_s25 + $0xa0] sm:$0xff]  ;;  %9973 = vmatpush1.bf16.msra.mxu0 %v13123_v48 }
  0xe0   : > { %v892_v46 = vld [vmem:[%s15654_s25 + $0x480] sm:$0xff]  ;;  %v13116_v50 = vcombine.high %v764_v42, %v768_v43  ;;  %10013 = vmatprep.subr.bf16.mxu1 %v13252_v41  ;;  %v13115_v57 = vcombine.low %v764_v42, %v768_v43 }
  0xe1   : > { %v896_v47 = vld [vmem:[%s15654_s25 + $0x4a0] sm:$0xff]  ;;  %10014 = vmatpush1.bf16.msra.mxu1 %v13251_v49 }
  0xe2   : > { %v13244_v51 = vcombine.high %v892_v46, %v896_v47  ;;  %v756_v52 = vld [vmem:[%s15654_s25 + $0x40] sm:$0xff]  ;;  %9974 = vmatprep.subr.bf16.mxu0 %v13116_v50  ;;  %v13243_v58 = vcombine.low %v892_v46, %v896_v47 }
  0xe3   : > { %v760_v53 = vld [vmem:[%s15654_s25 + $0x60] sm:$0xff]  ;;  %9975 = vmatpush1.bf16.msra.mxu0 %v13115_v57 }
  0xe4   : > { %v884_v55 = vld [vmem:[%s15654_s25 + $0x440] sm:$0xff]  ;;  %v13108_v59 = vcombine.high %v756_v52, %v760_v53  ;;  %10015 = vmatprep.subr.bf16.mxu1 %v13244_v51  ;;  %v13107_v4 = vcombine.low %v756_v52, %v760_v53 }
  0xe5   : > { %v888_v56 = vld [vmem:[%s15654_s25 + $0x460] sm:$0xff]  ;;  %10016 = vmatpush1.bf16.msra.mxu1 %v13243_v58 }
  0xe6   : > { %v586_v60 = vld [vmem:[%s15646_s28] sm:$0xff]  ;;  %v13236_v61 = vcombine.high %v884_v55, %v888_v56  ;;  %9976 = vmatprep.subr.bf16.mxu0 %v13108_v59  ;;  %v13235_v7 = vcombine.low %v884_v55, %v888_v56 }
  0xe7   : > { %v748_v62 = vld [vmem:[%s15654_s25] sm:$0xff]  ;;  %v15719_v0 = vrot.slane %v586_v60, %v15711_v54  ;;  %v598_v1 = vcombine.high %v586_v60, %v586_v60  ;;  %9977 = vmatpush1.bf16.msra.mxu0 %v13107_v4 }
  0xe8   : > { %v752_v63 = vld [vmem:[%s15654_s25 + $0x20] sm:$0xff]  ;;  %10017 = vmatprep.subr.bf16.mxu1 %v13236_v61 }
  0xe9   : > { %v876_v2 = vld [vmem:[%s15654_s25 + $0x400] sm:$0xff]  ;;  %v613_v5 = vcombine.high %v15719_v0, %v15719_v0  ;;  %v15726_v6 = vrot.slane %v598_v1, %v15711_v54  ;;  %v13100_v8 = vcombine.high %v748_v62, %v752_v63  ;;  %v13099_v16 = vcombine.low %v748_v62, %v752_v63  ;;  %10018 = vmatpush1.bf16.msra.mxu1 %v13235_v7  ;;  %v587_v7 = vld [vmem:[%s15646_s28 + $0x8] sm:$0xff] }
  0xea   : > { %v880_v3 = vld [vmem:[%s15654_s25 + $0x420] sm:$0xff] }
  0xeb   : > { %v13228_v9 = vcombine.high %v876_v2, %v880_v3  ;;  %v868_v10 = vld [vmem:[%s15654_s25 + $0x3c0] sm:$0xff]  ;;  %v15730_v12 = vpack.c.bf16 %v613_v5, %v613_v5  ;;  %v614_v13 = vcombine.high %v15726_v6, %v15726_v6  ;;  %9978 = vmatprep.subr.bf16.mxu0 %v13100_v8  ;;  %v13227_v18 = vcombine.low %v876_v2, %v880_v3 }
  0xec   : > { %v872_v11 = vld [vmem:[%s15654_s25 + $0x3e0] sm:$0xff]  ;;  %9979 = vmatpush1.bf16.msra.mxu0 %v13099_v16  ;;  %v615_v16 = vcombine.high %v587_v7, %v587_v7 }
  0xed   : > { %v996_v14 = vld [vmem:[%s15654_s25 + $0x7c0] sm:$0xff]  ;;  %9996 = vmatprep.mubr.bf16.mxu0 %v15730_v12  ;;  %v15737_v17 = vpack.c.bf16 %v614_v13, %v614_v13  ;;  %v13220_v19 = vcombine.high %v868_v10, %v872_v11  ;;  %10019 = vmatprep.subr.bf16.mxu1 %v13228_v9  ;;  %v13219_v25 = vcombine.low %v868_v10, %v872_v11 }
  0xee   : > { %v1000_v15 = vld [vmem:[%s15654_s25 + $0x7e0] sm:$0xff]  ;;  %10020 = vmatpush1.bf16.msra.mxu1 %v13227_v18 }
  0xef   : > { %v13348_v20 = vcombine.high %v996_v14, %v1000_v15  ;;  %v860_v21 = vld [vmem:[%s15654_s25 + $0x380] sm:$0xff]  ;;  %10037 = vmatprep.mubr.bf16.mxu1 %v15737_v17  ;;  %9980 = vmatprep.subr.bf16.mxu0 %v13220_v19  ;;  %v13347_v26 = vcombine.low %v996_v14, %v1000_v15 }
  0xf0   : > { %v864_v22 = vld [vmem:[%s15654_s25 + $0x3a0] sm:$0xff]  ;;  %9981 = vmatpush2.bf16.msra.mxu0 %v13219_v25 }
  0xf1   : > { %v988_v23 = vld [vmem:[%s15654_s25 + $0x780] sm:$0xff]  ;;  %v13212_v27 = vcombine.high %v860_v21, %v864_v22  ;;  %10021 = vmatprep.subr.bf16.mxu1 %v13348_v20  ;;  %v13211_v33 = vcombine.low %v860_v21, %v864_v22 }
  0xf2   : > { %v992_v24 = vld [vmem:[%s15654_s25 + $0x7a0] sm:$0xff]  ;;  %10022 = vmatpush2.bf16.msra.mxu1 %v13347_v26 }
  0xf3   : > { %v13340_v28 = vcombine.high %v988_v23, %v992_v24  ;;  %v852_v29 = vld [vmem:[%s15654_s25 + $0x340] sm:$0xff]  ;;  %9982 = vmatprep.subr.bf16.mxu0 %v13212_v27  ;;  %v13339_v34 = vcombine.low %v988_v23, %v992_v24  ;;  %v15772_v24 = vrot.slane %v587_v7, %v15711_v54  ;;  %v15777_v27 = vrot.slane %v615_v16, %v15711_v54 }
  0xf4   : > { %v856_v30 = vld [vmem:[%s15654_s25 + $0x360] sm:$0xff]  ;;  %9983 = vmatpush2.bf16.msra.mxu0 %v13211_v33 }
  0xf5   : > { %v980_v31 = vld [vmem:[%s15654_s25 + $0x740] sm:$0xff]  ;;  %v13204_v36 = vcombine.high %v852_v29, %v856_v30  ;;  %10023 = vmatprep.subr.bf16.mxu1 %v13340_v28  ;;  %v13203_v42 = vcombine.low %v852_v29, %v856_v30 }
  0xf6   : > { %v984_v32 = vld [vmem:[%s15654_s25 + $0x760] sm:$0xff]  ;;  %10024 = vmatpush2.bf16.msra.mxu1 %v13339_v34  ;;  %v630_v34 = vcombine.high %v15772_v24, %v15772_v24 }
  0xf7   : > { %v13332_v37 = vcombine.high %v980_v31, %v984_v32  ;;  %v844_v38 = vld [vmem:[%s15654_s25 + $0x300] sm:$0xff]  ;;  %9984 = vmatprep.subr.bf16.mxu0 %v13204_v36  ;;  %v13331_v43 = vcombine.low %v980_v31, %v984_v32  ;;  %v15785_v36 = vpack.c.bf16 %v15719_v0, %v15719_v0 }
  0xf8   : > { %v848_v39 = vld [vmem:[%s15654_s25 + $0x320] sm:$0xff]  ;;  %9985 = vmatpush2.bf16.msra.mxu0 %v13203_v42 }
  0xf9   : > { %v972_v40 = vld [vmem:[%s15654_s25 + $0x700] sm:$0xff]  ;;  %v13196_v44 = vcombine.high %v844_v38, %v848_v39  ;;  %10025 = vmatprep.subr.bf16.mxu1 %v13332_v37  ;;  %v13195_v51 = vcombine.low %v844_v38, %v848_v39  ;;  %v631_v39 = vcombine.high %v15777_v27, %v15777_v27 }
  0xfa   : > { %v976_v41 = vld [vmem:[%s15654_s25 + $0x720] sm:$0xff]  ;;  %10026 = vmatpush2.bf16.msra.mxu1 %v13331_v43 }
  0xfb   : > { %v13324_v46 = vcombine.high %v972_v40, %v976_v41  ;;  %v836_v47 = vld [vmem:[%s15654_s25 + $0x2c0] sm:$0xff]  ;;  %9986 = vmatprep.subr.bf16.mxu0 %v13196_v44  ;;  %v13323_v52 = vcombine.low %v972_v40, %v976_v41  ;;  %v15793_v40 = vpack.c.bf16 %v15726_v6, %v15726_v6 }
  0xfc   : > { %v840_v48 = vld [vmem:[%s15654_s25 + $0x2e0] sm:$0xff]  ;;  %9987 = vmatpush2.bf16.msra.mxu0 %v13195_v51 }
  0xfd   : > { %v964_v49 = vld [vmem:[%s15654_s25 + $0x6c0] sm:$0xff]  ;;  %v13188_v53 = vcombine.high %v836_v47, %v840_v48  ;;  %10027 = vmatprep.subr.bf16.mxu1 %v13324_v46  ;;  %v13187_v60 = vcombine.low %v836_v47, %v840_v48  ;;  %v15797_v47 = vpack.c.bf16 %v630_v34, %v630_v34 }
  0xfe   : > { %v968_v50 = vld [vmem:[%s15654_s25 + $0x6e0] sm:$0xff]  ;;  %10028 = vmatpush2.bf16.msra.mxu1 %v13323_v52 }
  0xff   : > { %v13316_v55 = vcombine.high %v964_v49, %v968_v50  ;;  %v828_v56 = vld [vmem:[%s15654_s25 + $0x280] sm:$0xff]  ;;  %9988 = vmatprep.subr.bf16.mxu0 %v13188_v53  ;;  %v13315_v61 = vcombine.low %v964_v49, %v968_v50  ;;  %v15802_v49 = vpack.c.bf16 %v631_v39, %v631_v39 }
 0x100   : > { %v832_v57 = vld [vmem:[%s15654_s25 + $0x2a0] sm:$0xff]  ;;  %9989 = vmatpush2.bf16.msra.mxu0 %v13187_v60 }
 0x101   : > { %v956_v58 = vld [vmem:[%s15654_s25 + $0x680] sm:$0xff]  ;;  %v13180_v62 = vcombine.high %v828_v56, %v832_v57  ;;  %10029 = vmatprep.subr.bf16.mxu1 %v13316_v55  ;;  %v13179_v5 = vcombine.low %v828_v56, %v832_v57 }
 0x102   : > { %v960_v59 = vld [vmem:[%s15654_s25 + $0x6a0] sm:$0xff]  ;;  %10030 = vmatpush2.bf16.msra.mxu1 %v13315_v61 }
 0x103   : > { %v13308_v63 = vcombine.high %v956_v58, %v960_v59  ;;  %v820_v1 = vld [vmem:[%s15654_s25 + $0x240] sm:$0xff]  ;;  %9990 = vmatprep.subr.bf16.mxu0 %v13180_v62  ;;  %v13307_v8 = vcombine.low %v956_v58, %v960_v59 }
 0x104   : > { %v824_v2 = vld [vmem:[%s15654_s25 + $0x260] sm:$0xff]  ;;  %9991 = vmatpush2.bf16.msra.mxu0 %v13179_v5 }
 0x105   : > { %v948_v3 = vld [vmem:[%s15654_s25 + $0x640] sm:$0xff]  ;;  %v13172_v9 = vcombine.high %v820_v1, %v824_v2  ;;  %10031 = vmatprep.subr.bf16.mxu1 %v13308_v63  ;;  %v13171_v18 = vcombine.low %v820_v1, %v824_v2 }
 0x106   : > { %v952_v4 = vld [vmem:[%s15654_s25 + $0x660] sm:$0xff]  ;;  %10032 = vmatpush2.bf16.msra.mxu1 %v13307_v8 }
 0x107   : > { %v13300_v10 = vcombine.high %v948_v3, %v952_v4  ;;  %v812_v11 = vld [vmem:[%s15654_s25 + $0x200] sm:$0xff]  ;;  %9992 = vmatprep.subr.bf16.mxu0 %v13172_v9  ;;  %v13299_v19 = vcombine.low %v948_v3, %v952_v4 }
 0x108   : > { %v816_v13 = vld [vmem:[%s15654_s25 + $0x220] sm:$0xff]  ;;  %9993 = vmatpush2.bf16.msra.mxu0 %v13171_v18 }
 0x109   : > { %v940_v14 = vld [vmem:[%s15654_s25 + $0x600] sm:$0xff]  ;;  %v13164_v20 = vcombine.high %v812_v11, %v816_v13  ;;  %10033 = vmatprep.subr.bf16.mxu1 %v13300_v10  ;;  %v13163_v28 = vcombine.low %v812_v11, %v816_v13 }
 0x10a   : > { %v944_v15 = vld [vmem:[%s15654_s25 + $0x620] sm:$0xff]  ;;  %10034 = vmatpush2.bf16.msra.mxu1 %v13299_v19 }
 0x10b   : > { %v13292_v21 = vcombine.high %v940_v14, %v944_v15  ;;  %v1060_v22 = vld [vmem:[%s15654_s25 + $0x9c0] sm:$0xff]  ;;  %9994 = vmatprep.subr.bf16.mxu0 %v13164_v20  ;;  %v13291_v29 = vcombine.low %v940_v14, %v944_v15 }
 0x10c   : > { %v1064_v23 = vld [vmem:[%s15654_s25 + $0x9e0] sm:$0xff]  ;;  %9995 = vmatpush2.bf16.msra.mxu0 %v13163_v28 }
 0x10d   : > { %v1188_v25 = vld [vmem:[%s15654_s25 + $0xdc0] sm:$0xff]  ;;  %v13412_v30 = vcombine.high %v1060_v22, %v1064_v23  ;;  %10035 = vmatprep.subr.bf16.mxu1 %v13292_v21  ;;  %v13411_v41 = vcombine.low %v1060_v22, %v1064_v23 }
 0x10e   : > { %v1192_v26 = vld [vmem:[%s15654_s25 + $0xde0] sm:$0xff]  ;;  %10036 = vmatpush2.bf16.msra.mxu1 %v13291_v29 }
 0x10f   : > { %v13540_v31 = vcombine.high %v1188_v25, %v1192_v26  ;;  %v1052_v32 = vld [vmem:[%s15654_s25 + $0x980] sm:$0xff]  ;;  %10046 = vmatprep.subr.bf16.mxu0 %v13412_v30  ;;  %v13539_v42 = vcombine.low %v1188_v25, %v1192_v26  ;;  %9997 = vmatmul.mubr.bf16.vlgmr.msra.gmra.mxu0 %v15785_v36 }
 0x110   : > { %v1056_v33 = vld [vmem:[%s15654_s25 + $0x9a0] sm:$0xff]  ;;  %10047 = vmatpush1.bf16.msra.mxu0 %v13411_v41  ;;  %10078 = vmatprep.mubr.bf16.mxu0 %v15797_v47 }
 0x111   : > { %v1180_v37 = vld [vmem:[%s15654_s25 + $0xd80] sm:$0xff]  ;;  %v13404_v43 = vcombine.high %v1052_v32, %v1056_v33  ;;  %10087 = vmatprep.subr.bf16.mxu1 %v13540_v31  ;;  %10038 = vmatmul.mubr.bf16.vlgmr.msra.gmra.mxu1 %v15793_v40  ;;  %v13403_v50 = vcombine.low %v1052_v32, %v1056_v33 }
 0x112   : > { %v1184_v38 = vld [vmem:[%s15654_s25 + $0xda0] sm:$0xff]  ;;  %10088 = vmatpush1.bf16.msra.mxu1 %v13539_v42  ;;  %10119 = vmatprep.mubr.bf16.mxu1 %v15802_v49 }
 0x113   : > { %v13532_v0 = vcombine.high %v1180_v37, %v1184_v38  ;;  %v1044_v44 = vld [vmem:[%s15654_s25 + $0x940] sm:$0xff]  ;;  %10048 = vmatprep.subr.bf16.mxu0 %v13404_v43  ;;  %v13531_v51 = vcombine.low %v1180_v37, %v1184_v38 }
 0x114   : > { %v1048_v46 = vld [vmem:[%s15654_s25 + $0x960] sm:$0xff]  ;;  %10049 = vmatpush1.bf16.msra.mxu0 %v13403_v50 }
 0x115   : > { %v1172_v48 = vld [vmem:[%s15654_s25 + $0xd40] sm:$0xff]  ;;  %v13396_v52 = vcombine.high %v1044_v44, %v1048_v46  ;;  %10089 = vmatprep.subr.bf16.mxu1 %v13532_v0  ;;  %v13395_v59 = vcombine.low %v1044_v44, %v1048_v46 }
 0x116   : > { %v1176_v6 = vld [vmem:[%s15654_s25 + $0xd60] sm:$0xff]  ;;  %10090 = vmatpush1.bf16.msra.mxu1 %v13531_v51 }
 0x117   : > { %v13524_v53 = vcombine.high %v1172_v48, %v1176_v6  ;;  %v1036_v55 = vld [vmem:[%s15654_s25 + $0x900] sm:$0xff]  ;;  %10050 = vmatprep.subr.bf16.mxu0 %v13396_v52  ;;  %v13523_v60 = vcombine.low %v1172_v48, %v1176_v6 }
 0x118   : > { %v1040_v56 = vld [vmem:[%s15654_s25 + $0x920] sm:$0xff]  ;;  %10051 = vmatpush1.bf16.msra.mxu0 %v13395_v59 }
 0x119   : > { %v1164_v57 = vld [vmem:[%s15654_s25 + $0xd00] sm:$0xff]  ;;  %v13388_v61 = vcombine.high %v1036_v55, %v1040_v56  ;;  %10091 = vmatprep.subr.bf16.mxu1 %v13524_v53  ;;  %v13387_v4 = vcombine.low %v1036_v55, %v1040_v56 }
 0x11a   : > { %v1168_v58 = vld [vmem:[%s15654_s25 + $0xd20] sm:$0xff]  ;;  %10092 = vmatpush1.bf16.msra.mxu1 %v13523_v60 }
 0x11b   : > { %v13516_v62 = vcombine.high %v1164_v57, %v1168_v58  ;;  %v1028_v63 = vld [vmem:[%s15654_s25 + $0x8c0] sm:$0xff]  ;;  %10052 = vmatprep.subr.bf16.mxu0 %v13388_v61  ;;  %v13515_v5 = vcombine.low %v1164_v57, %v1168_v58 }
 0x11c   : > { %v1032_v1 = vld [vmem:[%s15654_s25 + $0x8e0] sm:$0xff]  ;;  %10053 = vmatpush1.bf16.msra.mxu0 %v13387_v4 }
 0x11d   : > { %v1156_v2 = vld [vmem:[%s15654_s25 + $0xcc0] sm:$0xff]  ;;  %v13380_v7 = vcombine.high %v1028_v63, %v1032_v1  ;;  %10093 = vmatprep.subr.bf16.mxu1 %v13516_v62  ;;  %v13379_v14 = vcombine.low %v1028_v63, %v1032_v1 }
 0x11e   : > { %v1160_v3 = vld [vmem:[%s15654_s25 + $0xce0] sm:$0xff]  ;;  %10094 = vmatpush1.bf16.msra.mxu1 %v13515_v5 }
 0x11f   : > { %v13508_v8 = vcombine.high %v1156_v2, %v1160_v3  ;;  %v1020_v9 = vld [vmem:[%s15654_s25 + $0x880] sm:$0xff]  ;;  %10054 = vmatprep.subr.bf16.mxu0 %v13380_v7  ;;  %v13507_v15 = vcombine.low %v1156_v2, %v1160_v3 }
 0x120   : > { %v1024_v10 = vld [vmem:[%s15654_s25 + $0x8a0] sm:$0xff]  ;;  %10055 = vmatpush1.bf16.msra.mxu0 %v13379_v14 }
 0x121   : > { %v1148_v11 = vld [vmem:[%s15654_s25 + $0xc80] sm:$0xff]  ;;  %v13372_v16 = vcombine.high %v1020_v9, %v1024_v10  ;;  %10095 = vmatprep.subr.bf16.mxu1 %v13508_v8  ;;  %v13371_v23 = vcombine.low %v1020_v9, %v1024_v10 }
 0x122   : > { %v1152_v13 = vld [vmem:[%s15654_s25 + $0xca0] sm:$0xff]  ;;  %10096 = vmatpush1.bf16.msra.mxu1 %v13507_v15 }
 0x123   : > { %v13500_v18 = vcombine.high %v1148_v11, %v1152_v13  ;;  %v1012_v19 = vld [vmem:[%s15654_s25 + $0x840] sm:$0xff]  ;;  %10056 = vmatprep.subr.bf16.mxu0 %v13372_v16  ;;  %v13499_v25 = vcombine.low %v1148_v11, %v1152_v13 }
 0x124   : > { %v1016_v20 = vld [vmem:[%s15654_s25 + $0x860] sm:$0xff]  ;;  %10057 = vmatpush1.bf16.msra.mxu0 %v13371_v23 }
 0x125   : > { %v1140_v21 = vld [vmem:[%s15654_s25 + $0xc40] sm:$0xff]  ;;  %v13364_v26 = vcombine.high %v1012_v19, %v1016_v20  ;;  %10097 = vmatprep.subr.bf16.mxu1 %v13500_v18  ;;  %v13363_v33 = vcombine.low %v1012_v19, %v1016_v20 }
 0x126   : > { %v1144_v22 = vld [vmem:[%s15654_s25 + $0xc60] sm:$0xff]  ;;  %10098 = vmatpush1.bf16.msra.mxu1 %v13499_v25 }
 0x127   : > { %v13492_v28 = vcombine.high %v1140_v21, %v1144_v22  ;;  %v1004_v29 = vld [vmem:[%s15654_s25 + $0x800] sm:$0xff]  ;;  %10058 = vmatprep.subr.bf16.mxu0 %v13364_v26  ;;  %v13491_v34 = vcombine.low %v1140_v21, %v1144_v22 }
 0x128   : > { %v1008_v30 = vld [vmem:[%s15654_s25 + $0x820] sm:$0xff]  ;;  %10059 = vmatpush1.bf16.msra.mxu0 %v13363_v33 }
 0x129   : > { %v1132_v31 = vld [vmem:[%s15654_s25 + $0xc00] sm:$0xff]  ;;  %v13356_v37 = vcombine.high %v1004_v29, %v1008_v30  ;;  %10099 = vmatprep.subr.bf16.mxu1 %v13492_v28  ;;  %v13355_v0 = vcombine.low %v1004_v29, %v1008_v30 }
 0x12a   : > { %v1136_v32 = vld [vmem:[%s15654_s25 + $0xc20] sm:$0xff]  ;;  %10100 = vmatpush1.bf16.msra.mxu1 %v13491_v34 }
 0x12b   : > { %v13484_v38 = vcombine.high %v1132_v31, %v1136_v32  ;;  %v1124_v39 = vld [vmem:[%s15654_s25 + $0xbc0] sm:$0xff]  ;;  %10060 = vmatprep.subr.bf16.mxu0 %v13356_v37  ;;  %v13483_v44 = vcombine.low %v1132_v31, %v1136_v32 }
 0x12c   : > { %v1128_v41 = vld [vmem:[%s15654_s25 + $0xbe0] sm:$0xff]  ;;  %10061 = vmatpush1.bf16.msra.mxu0 %v13355_v0 }
 0x12d   : > { %v1252_v42 = vld [vmem:[%s15654_s25 + $0xfc0] sm:$0xff]  ;;  %v13476_v46 = vcombine.high %v1124_v39, %v1128_v41  ;;  %10101 = vmatprep.subr.bf16.mxu1 %v13484_v38  ;;  %v13475_v53 = vcombine.low %v1124_v39, %v1128_v41 }
 0x12e   : > { %v1256_v43 = vld [vmem:[%s15654_s25 + $0xfe0] sm:$0xff]  ;;  %10102 = vmatpush1.bf16.msra.mxu1 %v13483_v44 }
 0x12f   : > { %v13604_v48 = vcombine.high %v1252_v42, %v1256_v43  ;;  %v1116_v6 = vld [vmem:[%s15654_s25 + $0xb80] sm:$0xff]  ;;  %10062 = vmatprep.subr.bf16.mxu0 %v13476_v46  ;;  %v13603_v55 = vcombine.low %v1252_v42, %v1256_v43 }
 0x130   : > { %v1120_v50 = vld [vmem:[%s15654_s25 + $0xba0] sm:$0xff]  ;;  %10063 = vmatpush2.bf16.msra.mxu0 %v13475_v53 }
 0x131   : > { %v1244_v51 = vld [vmem:[%s15654_s25 + $0xf80] sm:$0xff]  ;;  %v13468_v56 = vcombine.high %v1116_v6, %v1120_v50  ;;  %10103 = vmatprep.subr.bf16.mxu1 %v13604_v48  ;;  %v13467_v62 = vcombine.low %v1116_v6, %v1120_v50 }
 0x132   : > { %v1248_v52 = vld [vmem:[%s15654_s25 + $0xfa0] sm:$0xff]  ;;  %10104 = vmatpush2.bf16.msra.mxu1 %v13603_v55 }
 0x133   : > { %v13596_v57 = vcombine.high %v1244_v51, %v1248_v52  ;;  %v1108_v58 = vld [vmem:[%s15654_s25 + $0xb40] sm:$0xff]  ;;  %10064 = vmatprep.subr.bf16.mxu0 %v13468_v56  ;;  %v13595_v63 = vcombine.low %v1244_v51, %v1248_v52 }
 0x134   : > { %v1112_v59 = vld [vmem:[%s15654_s25 + $0xb60] sm:$0xff]  ;;  %10065 = vmatpush2.bf16.msra.mxu0 %v13467_v62 }
 0x135   : > { %v1236_v60 = vld [vmem:[%s15654_s25 + $0xf40] sm:$0xff]  ;;  %v13460_v1 = vcombine.high %v1108_v58, %v1112_v59  ;;  %10105 = vmatprep.subr.bf16.mxu1 %v13596_v57  ;;  %v13459_v8 = vcombine.low %v1108_v58, %v1112_v59 }
 0x136   : > { %v1240_v61 = vld [vmem:[%s15654_s25 + $0xf60] sm:$0xff]  ;;  %10106 = vmatpush2.bf16.msra.mxu1 %v13595_v63 }
 0x137   : > { %v13588_v2 = vcombine.high %v1236_v60, %v1240_v61  ;;  %v1100_v3 = vld [vmem:[%s15654_s25 + $0xb00] sm:$0xff]  ;;  %10066 = vmatprep.subr.bf16.mxu0 %v13460_v1  ;;  %v13587_v9 = vcombine.low %v1236_v60, %v1240_v61 }
 0x138   : > { %v1104_v4 = vld [vmem:[%s15654_s25 + $0xb20] sm:$0xff]  ;;  %10067 = vmatpush2.bf16.msra.mxu0 %v13459_v8 }
 0x139   : > { %v1228_v5 = vld [vmem:[%s15654_s25 + $0xf00] sm:$0xff]  ;;  %v13452_v10 = vcombine.high %v1100_v3, %v1104_v4  ;;  %10107 = vmatprep.subr.bf16.mxu1 %v13588_v2  ;;  %v13451_v18 = vcombine.low %v1100_v3, %v1104_v4 }
 0x13a   : > { %v1232_v7 = vld [vmem:[%s15654_s25 + $0xf20] sm:$0xff]  ;;  %10108 = vmatpush2.bf16.msra.mxu1 %v13587_v9 }
 0x13b   : > { %v13580_v11 = vcombine.high %v1228_v5, %v1232_v7  ;;  %v1092_v13 = vld [vmem:[%s15654_s25 + $0xac0] sm:$0xff]  ;;  %10068 = vmatprep.subr.bf16.mxu0 %v13452_v10  ;;  %v13579_v19 = vcombine.low %v1228_v5, %v1232_v7  ;;  %v15876_v5 = vpack.c.bf16 %v15772_v24, %v15772_v24  ;;  %v15884_v10 = vpack.c.bf16 %v15777_v27, %v15777_v27 }
 0x13c   : > { %v1096_v14 = vld [vmem:[%s15654_s25 + $0xae0] sm:$0xff]  ;;  %10069 = vmatpush2.bf16.msra.mxu0 %v13451_v18 }
 0x13d   : > { %v1220_v15 = vld [vmem:[%s15654_s25 + $0xec0] sm:$0xff]  ;;  %v13444_v20 = vcombine.high %v1092_v13, %v1096_v14  ;;  %10109 = vmatprep.subr.bf16.mxu1 %v13580_v11  ;;  %v13443_v28 = vcombine.low %v1092_v13, %v1096_v14 }
 0x13e   : > { %v1224_v16 = vld [vmem:[%s15654_s25 + $0xee0] sm:$0xff]  ;;  %10110 = vmatpush2.bf16.msra.mxu1 %v13579_v19 }
 0x13f   : > { %v13572_v21 = vcombine.high %v1220_v15, %v1224_v16  ;;  %v1084_v22 = vld [vmem:[%s15654_s25 + $0xa80] sm:$0xff]  ;;  %10070 = vmatprep.subr.bf16.mxu0 %v13444_v20  ;;  %v13571_v29 = vcombine.low %v1220_v15, %v1224_v16 }
 0x140   : > { %v1088_v23 = vld [vmem:[%s15654_s25 + $0xaa0] sm:$0xff]  ;;  %10071 = vmatpush2.bf16.msra.mxu0 %v13443_v28 }
 0x141   : > { %v1212_v25 = vld [vmem:[%s15654_s25 + $0xe80] sm:$0xff]  ;;  %v13436_v30 = vcombine.high %v1084_v22, %v1088_v23  ;;  %10111 = vmatprep.subr.bf16.mxu1 %v13572_v21  ;;  %v13435_v38 = vcombine.low %v1084_v22, %v1088_v23 }
 0x142   : > { %v1216_v26 = vld [vmem:[%s15654_s25 + $0xea0] sm:$0xff]  ;;  %10112 = vmatpush2.bf16.msra.mxu1 %v13571_v29 }
 0x143   : > { %v13564_v31 = vcombine.high %v1212_v25, %v1216_v26  ;;  %v1076_v32 = vld [vmem:[%s15654_s25 + $0xa40] sm:$0xff]  ;;  %10072 = vmatprep.subr.bf16.mxu0 %v13436_v30  ;;  %v13563_v41 = vcombine.low %v1212_v25, %v1216_v26 }
 0x144   : > { %v1080_v33 = vld [vmem:[%s15654_s25 + $0xa60] sm:$0xff]  ;;  %10073 = vmatpush2.bf16.msra.mxu0 %v13435_v38 }
 0x145   : > { %v1204_v34 = vld [vmem:[%s15654_s25 + $0xe40] sm:$0xff]  ;;  %v13428_v42 = vcombine.high %v1076_v32, %v1080_v33  ;;  %10113 = vmatprep.subr.bf16.mxu1 %v13564_v31  ;;  %v13427_v50 = vcombine.low %v1076_v32, %v1080_v33 }
 0x146   : > { %v1208_v37 = vld [vmem:[%s15654_s25 + $0xe60] sm:$0xff]  ;;  %10114 = vmatpush2.bf16.msra.mxu1 %v13563_v41 }
 0x147   : > { %v588_v39 = vld [vmem:[%s15646_s28 + $0x10] sm:$0xff]  ;;  %v13556_v43 = vcombine.high %v1204_v34, %v1208_v37  ;;  %10074 = vmatprep.subr.bf16.mxu0 %v13428_v42  ;;  %v13555_v51 = vcombine.low %v1204_v34, %v1208_v37 }
 0x148   : > { %v1068_v0 = vld [vmem:[%s15654_s25 + $0xa00] sm:$0xff]  ;;  %v632_v6 = vcombine.high %v588_v39, %v588_v39  ;;  %v15863_v57 = vrot.slane %v588_v39, %v15711_v54  ;;  %10075 = vmatpush2.bf16.msra.mxu0 %v13427_v50 }
 0x149   : > { %v1072_v44 = vld [vmem:[%s15654_s25 + $0xa20] sm:$0xff]  ;;  %10115 = vmatprep.subr.bf16.mxu1 %v13556_v43 }
 0x14a   : > { %v1196_v46 = vld [vmem:[%s15654_s25 + $0xe00] sm:$0xff]  ;;  %v13420_v52 = vcombine.high %v1068_v0, %v1072_v44  ;;  %v15868_v60 = vrot.slane %v632_v6, %v15711_v54  ;;  %v13419_v61 = vcombine.low %v1068_v0, %v1072_v44  ;;  %10116 = vmatpush2.bf16.msra.mxu1 %v13555_v51  ;;  %v647_v4 = vcombine.high %v15863_v57, %v15863_v57 }
 0x14b   : > { %v1200_v48 = vld [vmem:[%s15654_s25 + $0xe20] sm:$0xff] }
 0x14c   : > { %v13548_v53 = vcombine.high %v1196_v46, %v1200_v48  ;;  %v1316_v55 = vld [vmem:[%s15654_s25 + $0x11c0] sm:$0xff]  ;;  %10076 = vmatprep.subr.bf16.mxu0 %v13420_v52  ;;  %v13547_v62 = vcombine.low %v1196_v46, %v1200_v48  ;;  %v648_v9 = vcombine.high %v15868_v60, %v15868_v60  ;;  %v15888_v18 = vpack.c.bf16 %v647_v4, %v647_v4 }
 0x14d   : > { %v1320_v56 = vld [vmem:[%s15654_s25 + $0x11e0] sm:$0xff]  ;;  %10077 = vmatpush2.bf16.msra.mxu0 %v13419_v61 }
 0x14e   : > { %v1444_v58 = vld [vmem:[%s15654_s25 + $0x15c0] sm:$0xff]  ;;  %v13668_v63 = vcombine.high %v1316_v55, %v1320_v56  ;;  %10117 = vmatprep.subr.bf16.mxu1 %v13548_v53  ;;  %v13667_v11 = vcombine.low %v1316_v55, %v1320_v56  ;;  %v15893_v20 = vpack.c.bf16 %v648_v9, %v648_v9 }
 0x14f   : > { %v1448_v59 = vld [vmem:[%s15654_s25 + $0x15e0] sm:$0xff]  ;;  %10118 = vmatpush2.bf16.msra.mxu1 %v13547_v62 }
 0x150   : > { %v13796_v1 = vcombine.high %v1444_v58, %v1448_v59  ;;  %v1308_v2 = vld [vmem:[%s15654_s25 + $0x1180] sm:$0xff]  ;;  %10128 = vmatprep.subr.bf16.mxu0 %v13668_v63  ;;  %v13795_v13 = vcombine.low %v1444_v58, %v1448_v59  ;;  %10079 = vmatmul.mubr.bf16.vlgmr.msra.gmra.mxu0 %v15876_v5 }
 0x151   : > { %v1312_v3 = vld [vmem:[%s15654_s25 + $0x11a0] sm:$0xff]  ;;  %10129 = vmatpush1.bf16.msra.mxu0 %v13667_v11  ;;  %10160 = vmatprep.mubr.bf16.mxu0 %v15888_v18 }
 0x152   : > { %v1436_v7 = vld [vmem:[%s15654_s25 + $0x1580] sm:$0xff]  ;;  %v13660_v14 = vcombine.high %v1308_v2, %v1312_v3  ;;  %10169 = vmatprep.subr.bf16.mxu1 %v13796_v1  ;;  %10120 = vmatmul.mubr.bf16.vlgmr.msra.gmra.mxu1 %v15884_v10  ;;  %v13659_v21 = vcombine.low %v1308_v2, %v1312_v3 }
 0x153   : > { %v1440_v8 = vld [vmem:[%s15654_s25 + $0x15a0] sm:$0xff]  ;;  %10170 = vmatpush1.bf16.msra.mxu1 %v13795_v13  ;;  %10201 = vmatprep.mubr.bf16.mxu1 %v15893_v20 }
 0x154   : > { %v13788_v24 = vcombine.high %v1436_v7, %v1440_v8  ;;  %v1300_v15 = vld [vmem:[%s15654_s25 + $0x1140] sm:$0xff]  ;;  %10130 = vmatprep.subr.bf16.mxu0 %v13660_v14  ;;  %v13787_v22 = vcombine.low %v1436_v7, %v1440_v8 }
 0x155   : > { %v1304_v16 = vld [vmem:[%s15654_s25 + $0x1160] sm:$0xff]  ;;  %10131 = vmatpush1.bf16.msra.mxu0 %v13659_v21 }
 0x156   : > { %v1428_v19 = vld [vmem:[%s15654_s25 + $0x1540] sm:$0xff]  ;;  %v13652_v23 = vcombine.high %v1300_v15, %v1304_v16  ;;  %10171 = vmatprep.subr.bf16.mxu1 %v13788_v24  ;;  %v13651_v31 = vcombine.low %v1300_v15, %v1304_v16 }
 0x157   : > { %v1432_v27 = vld [vmem:[%s15654_s25 + $0x1560] sm:$0xff]  ;;  %10172 = vmatpush1.bf16.msra.mxu1 %v13787_v22 }
 0x158   : > { %v13780_v25 = vcombine.high %v1428_v19, %v1432_v27  ;;  %v1292_v26 = vld [vmem:[%s15654_s25 + $0x1100] sm:$0xff]  ;;  %10132 = vmatprep.subr.bf16.mxu0 %v13652_v23  ;;  %v13779_v32 = vcombine.low %v1428_v19, %v1432_v27 }
 0x159   : > { %v1296_v28 = vld [vmem:[%s15654_s25 + $0x1120] sm:$0xff]  ;;  %10133 = vmatpush1.bf16.msra.mxu0 %v13651_v31 }
 0x15a   : > { %v1420_v29 = vld [vmem:[%s15654_s25 + $0x1500] sm:$0xff]  ;;  %v13644_v33 = vcombine.high %v1292_v26, %v1296_v28  ;;  %10173 = vmatprep.subr.bf16.mxu1 %v13780_v25  ;;  %v13643_v42 = vcombine.low %v1292_v26, %v1296_v28 }
 0x15b   : > { %v1424_v30 = vld [vmem:[%s15654_s25 + $0x1520] sm:$0xff]  ;;  %10174 = vmatpush1.bf16.msra.mxu1 %v13779_v32 }
 0x15c   : > { %v13772_v34 = vcombine.high %v1420_v29, %v1424_v30  ;;  %v1284_v37 = vld [vmem:[%s15654_s25 + $0x10c0] sm:$0xff]  ;;  %10134 = vmatprep.subr.bf16.mxu0 %v13644_v33  ;;  %v13771_v43 = vcombine.low %v1420_v29, %v1424_v30 }
 0x15d   : > { %v1288_v38 = vld [vmem:[%s15654_s25 + $0x10e0] sm:$0xff]  ;;  %10135 = vmatpush1.bf16.msra.mxu0 %v13643_v42 }
 0x15e   : > { %v1412_v39 = vld [vmem:[%s15654_s25 + $0x14c0] sm:$0xff]  ;;  %v13636_v0 = vcombine.high %v1284_v37, %v1288_v38  ;;  %10175 = vmatprep.subr.bf16.mxu1 %v13772_v34  ;;  %v13635_v51 = vcombine.low %v1284_v37, %v1288_v38 }
 0x15f   : > { %v1416_v41 = vld [vmem:[%s15654_s25 + $0x14e0] sm:$0xff]  ;;  %10176 = vmatpush1.bf16.msra.mxu1 %v13771_v43 }
 0x160   : > { %v13764_v44 = vcombine.high %v1412_v39, %v1416_v41  ;;  %v1276_v46 = vld [vmem:[%s15654_s25 + $0x1080] sm:$0xff]  ;;  %10136 = vmatprep.subr.bf16.mxu0 %v13636_v0  ;;  %v13763_v52 = vcombine.low %v1412_v39, %v1416_v41 }
 0x161   : > { %v1280_v48 = vld [vmem:[%s15654_s25 + $0x10a0] sm:$0xff]  ;;  %10137 = vmatpush1.bf16.msra.mxu0 %v13635_v51 }
 0x162   : > { %v1404_v6 = vld [vmem:[%s15654_s25 + $0x1480] sm:$0xff]  ;;  %v13628_v53 = vcombine.high %v1276_v46, %v1280_v48  ;;  %10177 = vmatprep.subr.bf16.mxu1 %v13764_v44  ;;  %v13627_v62 = vcombine.low %v1276_v46, %v1280_v48 }
 0x163   : > { %v1408_v50 = vld [vmem:[%s15654_s25 + $0x14a0] sm:$0xff]  ;;  %10178 = vmatpush1.bf16.msra.mxu1 %v13763_v52 }
 0x164   : > { %v13756_v55 = vcombine.high %v1404_v6, %v1408_v50  ;;  %v1268_v56 = vld [vmem:[%s15654_s25 + $0x1040] sm:$0xff]  ;;  %10138 = vmatprep.subr.bf16.mxu0 %v13628_v53  ;;  %v13755_v63 = vcombine.low %v1404_v6, %v1408_v50 }
 0x165   : > { %v1272_v58 = vld [vmem:[%s15654_s25 + $0x1060] sm:$0xff]  ;;  %10139 = vmatpush1.bf16.msra.mxu0 %v13627_v62 }
 0x166   : > { %v1396_v59 = vld [vmem:[%s15654_s25 + $0x1440] sm:$0xff]  ;;  %v13620_v1 = vcombine.high %v1268_v56, %v1272_v58  ;;  %10179 = vmatprep.subr.bf16.mxu1 %v13756_v55  ;;  %v13619_v9 = vcombine.low %v1268_v56, %v1272_v58 }
 0x167   : > { %v1400_v61 = vld [vmem:[%s15654_s25 + $0x1460] sm:$0xff]  ;;  %10180 = vmatpush1.bf16.msra.mxu1 %v13755_v63 }
 0x168   : > { %v13748_v2 = vcombine.high %v1396_v59, %v1400_v61  ;;  %v1260_v3 = vld [vmem:[%s15654_s25 + $0x1000] sm:$0xff]  ;;  %10140 = vmatprep.subr.bf16.mxu0 %v13620_v1  ;;  %v13747_v11 = vcombine.low %v1396_v59, %v1400_v61 }
 0x169   : > { %v1264_v4 = vld [vmem:[%s15654_s25 + $0x1020] sm:$0xff]  ;;  %10141 = vmatpush1.bf16.msra.mxu0 %v13619_v9 }
 0x16a   : > { %v1388_v7 = vld [vmem:[%s15654_s25 + $0x1400] sm:$0xff]  ;;  %v13612_v13 = vcombine.high %v1260_v3, %v1264_v4  ;;  %10181 = vmatprep.subr.bf16.mxu1 %v13748_v2  ;;  %v13611_v27 = vcombine.low %v1260_v3, %v1264_v4 }
 0x16b   : > { %v1392_v8 = vld [vmem:[%s15654_s25 + $0x1420] sm:$0xff]  ;;  %10182 = vmatpush1.bf16.msra.mxu1 %v13747_v11 }
 0x16c   : > { %v13740_v14 = vcombine.high %v1388_v7, %v1392_v8  ;;  %v1380_v24 = vld [vmem:[%s15654_s25 + $0x13c0] sm:$0xff]  ;;  %10142 = vmatprep.subr.bf16.mxu0 %v13612_v13  ;;  %v13739_v21 = vcombine.low %v1388_v7, %v1392_v8 }
 0x16d   : > { %v1384_v15 = vld [vmem:[%s15654_s25 + $0x13e0] sm:$0xff]  ;;  %10143 = vmatpush1.bf16.msra.mxu0 %v13611_v27  ;;  %v589_v27 = vld [vmem:[%s15646_s28 + $0x18] sm:$0xff] }
 0x16e   : > { %v1508_v16 = vld [vmem:[%s15654_s25 + $0x17c0] sm:$0xff]  ;;  %v13732_v22 = vcombine.high %v1380_v24, %v1384_v15  ;;  %10183 = vmatprep.subr.bf16.mxu1 %v13740_v14  ;;  %v13731_v30 = vcombine.low %v1380_v24, %v1384_v15 }
 0x16f   : > { %v1512_v19 = vld [vmem:[%s15654_s25 + $0x17e0] sm:$0xff]  ;;  %10184 = vmatpush1.bf16.msra.mxu1 %v13739_v21 }
 0x170   : > { %v13860_v23 = vcombine.high %v1508_v16, %v1512_v19  ;;  %v1372_v25 = vld [vmem:[%s15654_s25 + $0x1380] sm:$0xff]  ;;  %10144 = vmatprep.subr.bf16.mxu0 %v13732_v22  ;;  %v13859_v31 = vcombine.low %v1508_v16, %v1512_v19 }
 0x171   : > { %v1376_v26 = vld [vmem:[%s15654_s25 + $0x13a0] sm:$0xff]  ;;  %10145 = vmatpush2.bf16.msra.mxu0 %v13731_v30  ;;  %v649_v30 = vcombine.high %v589_v27, %v589_v27 }
 0x172   : > { %v1500_v28 = vld [vmem:[%s15654_s25 + $0x1780] sm:$0xff]  ;;  %v13724_v32 = vcombine.high %v1372_v25, %v1376_v26  ;;  %10185 = vmatprep.subr.bf16.mxu1 %v13860_v23  ;;  %v13723_v41 = vcombine.low %v1372_v25, %v1376_v26 }
 0x173   : > { %v1504_v29 = vld [vmem:[%s15654_s25 + $0x17a0] sm:$0xff]  ;;  %10186 = vmatpush2.bf16.msra.mxu1 %v13859_v31 }
 0x174   : > { %v13852_v33 = vcombine.high %v1500_v28, %v1504_v29  ;;  %v1364_v34 = vld [vmem:[%s15654_s25 + $0x1340] sm:$0xff]  ;;  %10146 = vmatprep.subr.bf16.mxu0 %v13724_v32  ;;  %v13851_v42 = vcombine.low %v1500_v28, %v1504_v29 }
 0x175   : > { %v1368_v37 = vld [vmem:[%s15654_s25 + $0x1360] sm:$0xff]  ;;  %10147 = vmatpush2.bf16.msra.mxu0 %v13723_v41 }
 0x176   : > { %v1492_v38 = vld [vmem:[%s15654_s25 + $0x1740] sm:$0xff]  ;;  %v13716_v43 = vcombine.high %v1364_v34, %v1368_v37  ;;  %10187 = vmatprep.subr.bf16.mxu1 %v13852_v33  ;;  %v13715_v50 = vcombine.low %v1364_v34, %v1368_v37 }
 0x177   : > { %v1496_v39 = vld [vmem:[%s15654_s25 + $0x1760] sm:$0xff]  ;;  %10188 = vmatpush2.bf16.msra.mxu1 %v13851_v42 }
 0x178   : > { %v13844_v0 = vcombine.high %v1492_v38, %v1496_v39  ;;  %v1356_v44 = vld [vmem:[%s15654_s25 + $0x1300] sm:$0xff]  ;;  %10148 = vmatprep.subr.bf16.mxu0 %v13716_v43  ;;  %v13843_v51 = vcombine.low %v1492_v38, %v1496_v39  ;;  %v15954_v39 = vrot.slane %v589_v27, %v15711_v54  ;;  %v15959_v43 = vrot.slane %v649_v30, %v15711_v54 }
 0x179   : > { %v1360_v46 = vld [vmem:[%s15654_s25 + $0x1320] sm:$0xff]  ;;  %10149 = vmatpush2.bf16.msra.mxu0 %v13715_v50 }
 0x17a   : > { %v1484_v48 = vld [vmem:[%s15654_s25 + $0x1700] sm:$0xff]  ;;  %v13708_v52 = vcombine.high %v1356_v44, %v1360_v46  ;;  %10189 = vmatprep.subr.bf16.mxu1 %v13844_v0  ;;  %v13707_v61 = vcombine.low %v1356_v44, %v1360_v46 }
 0x17b   : > { %v1488_v6 = vld [vmem:[%s15654_s25 + $0x1720] sm:$0xff]  ;;  %10190 = vmatpush2.bf16.msra.mxu1 %v13843_v51  ;;  %v664_v51 = vcombine.high %v15954_v39, %v15954_v39 }
 0x17c   : > { %v13836_v53 = vcombine.high %v1484_v48, %v1488_v6  ;;  %v1348_v55 = vld [vmem:[%s15654_s25 + $0x12c0] sm:$0xff]  ;;  %10150 = vmatprep.subr.bf16.mxu0 %v13708_v52  ;;  %v13835_v62 = vcombine.low %v1484_v48, %v1488_v6  ;;  %v15967_v52 = vpack.c.bf16 %v15863_v57, %v15863_v57 }
 0x17d   : > { %v1352_v56 = vld [vmem:[%s15654_s25 + $0x12e0] sm:$0xff]  ;;  %10151 = vmatpush2.bf16.msra.mxu0 %v13707_v61 }
 0x17e   : > { %v1476_v58 = vld [vmem:[%s15654_s25 + $0x16c0] sm:$0xff]  ;;  %v13700_v63 = vcombine.high %v1348_v55, %v1352_v56  ;;  %10191 = vmatprep.subr.bf16.mxu1 %v13836_v53  ;;  %v13699_v8 = vcombine.low %v1348_v55, %v1352_v56  ;;  %v665_v56 = vcombine.high %v15959_v43, %v15959_v43 }
 0x17f   : > { %v1480_v59 = vld [vmem:[%s15654_s25 + $0x16e0] sm:$0xff]  ;;  %10192 = vmatpush2.bf16.msra.mxu1 %v13835_v62 }
 0x180   : > { %v13828_v1 = vcombine.high %v1476_v58, %v1480_v59  ;;  %v1340_v2 = vld [vmem:[%s15654_s25 + $0x1280] sm:$0xff]  ;;  %10152 = vmatprep.subr.bf16.mxu0 %v13700_v63  ;;  %v13827_v9 = vcombine.low %v1476_v58, %v1480_v59  ;;  %v15975_v58 = vpack.c.bf16 %v15868_v60, %v15868_v60 }
 0x181   : > { %v1344_v3 = vld [vmem:[%s15654_s25 + $0x12a0] sm:$0xff]  ;;  %10153 = vmatpush2.bf16.msra.mxu0 %v13699_v8 }
 0x182   : > { %v1468_v4 = vld [vmem:[%s15654_s25 + $0x1680] sm:$0xff]  ;;  %v13692_v11 = vcombine.high %v1340_v2, %v1344_v3  ;;  %10193 = vmatprep.subr.bf16.mxu1 %v13828_v1  ;;  %v13691_v19 = vcombine.low %v1340_v2, %v1344_v3  ;;  %v15979_v2 = vpack.c.bf16 %v664_v51, %v664_v51 }
 0x183   : > { %v1472_v7 = vld [vmem:[%s15654_s25 + $0x16a0] sm:$0xff]  ;;  %10194 = vmatpush2.bf16.msra.mxu1 %v13827_v9 }
 0x184   : > { %v13820_v13 = vcombine.high %v1468_v4, %v1472_v7  ;;  %v1332_v14 = vld [vmem:[%s15654_s25 + $0x1240] sm:$0xff]  ;;  %10154 = vmatprep.subr.bf16.mxu0 %v13692_v11  ;;  %v13819_v21 = vcombine.low %v1468_v4, %v1472_v7  ;;  %v15984_v4 = vpack.c.bf16 %v665_v56, %v665_v56 }
 0x185   : > { %v1336_v24 = vld [vmem:[%s15654_s25 + $0x1260] sm:$0xff]  ;;  %10155 = vmatpush2.bf16.msra.mxu0 %v13691_v19 }
 0x186   : > { %v1460_v15 = vld [vmem:[%s15654_s25 + $0x1640] sm:$0xff]  ;;  %v13684_v22 = vcombine.high %v1332_v14, %v1336_v24  ;;  %10195 = vmatprep.subr.bf16.mxu1 %v13820_v13  ;;  %v13683_v31 = vcombine.low %v1332_v14, %v1336_v24 }
 0x187   : > { %v1464_v16 = vld [vmem:[%s15654_s25 + $0x1660] sm:$0xff]  ;;  %10196 = vmatpush2.bf16.msra.mxu1 %v13819_v21 }
 0x188   : > { %v13812_v23 = vcombine.high %v1460_v15, %v1464_v16  ;;  %v1324_v25 = vld [vmem:[%s15654_s25 + $0x1200] sm:$0xff]  ;;  %10156 = vmatprep.subr.bf16.mxu0 %v13684_v22  ;;  %v13811_v32 = vcombine.low %v1460_v15, %v1464_v16 }
 0x189   : > { %v1328_v26 = vld [vmem:[%s15654_s25 + $0x1220] sm:$0xff]  ;;  %10157 = vmatpush2.bf16.msra.mxu0 %v13683_v31 }
 0x18a   : > { %v1452_v28 = vld [vmem:[%s15654_s25 + $0x1600] sm:$0xff]  ;;  %v13676_v33 = vcombine.high %v1324_v25, %v1328_v26  ;;  %10197 = vmatprep.subr.bf16.mxu1 %v13812_v23  ;;  %v13675_v0 = vcombine.low %v1324_v25, %v1328_v26 }
 0x18b   : > { %v1456_v29 = vld [vmem:[%s15654_s25 + $0x1620] sm:$0xff]  ;;  %10198 = vmatpush2.bf16.msra.mxu1 %v13811_v32 }
 0x18c   : > { %v13804_v34 = vcombine.high %v1452_v28, %v1456_v29  ;;  %v1572_v37 = vld [vmem:[%s15654_s25 + $0x19c0] sm:$0xff]  ;;  %10158 = vmatprep.subr.bf16.mxu0 %v13676_v33  ;;  %v13803_v44 = vcombine.low %v1452_v28, %v1456_v29 }
 0x18d   : > { %v1576_v38 = vld [vmem:[%s15654_s25 + $0x19e0] sm:$0xff]  ;;  %10159 = vmatpush2.bf16.msra.mxu0 %v13675_v0 }
 0x18e   : > { %v1700_v41 = vld [vmem:[%s15654_s25 + $0x1dc0] sm:$0xff]  ;;  %v13924_v46 = vcombine.high %v1572_v37, %v1576_v38  ;;  %10199 = vmatprep.subr.bf16.mxu1 %v13804_v34  ;;  %v13923_v59 = vcombine.low %v1572_v37, %v1576_v38 }
 0x18f   : > { %v1704_v42 = vld [vmem:[%s15654_s25 + $0x1de0] sm:$0xff]  ;;  %10200 = vmatpush2.bf16.msra.mxu1 %v13803_v44 }
 0x190   : > { %v14052_v48 = vcombine.high %v1700_v41, %v1704_v42  ;;  %v1564_v6 = vld [vmem:[%s15654_s25 + $0x1980] sm:$0xff]  ;;  %10210 = vmatprep.subr.bf16.mxu0 %v13924_v46  ;;  %v14051_v61 = vcombine.low %v1700_v41, %v1704_v42  ;;  %10161 = vmatmul.mubr.bf16.vlgmr.msra.gmra.mxu0 %v15967_v52 }
 0x191   : > { %v1568_v50 = vld [vmem:[%s15654_s25 + $0x19a0] sm:$0xff]  ;;  %10211 = vmatpush1.bf16.msra.mxu0 %v13923_v59  ;;  %10242 = vmatprep.mubr.bf16.mxu0 %v15979_v2 }
 0x192   : > { %v1692_v53 = vld [vmem:[%s15654_s25 + $0x1d80] sm:$0xff]  ;;  %v13916_v62 = vcombine.high %v1564_v6, %v1568_v50  ;;  %10251 = vmatprep.subr.bf16.mxu1 %v14052_v48  ;;  %10202 = vmatmul.mubr.bf16.vlgmr.msra.gmra.mxu1 %v15975_v58  ;;  %v13915_v7 = vcombine.low %v1564_v6, %v1568_v50 }
 0x193   : > { %v1696_v55 = vld [vmem:[%s15654_s25 + $0x1da0] sm:$0xff]  ;;  %10252 = vmatpush1.bf16.msra.mxu1 %v14051_v61  ;;  %10283 = vmatprep.mubr.bf16.mxu1 %v15984_v4 }
 0x194   : > { %v14044_v57 = vcombine.high %v1692_v53, %v1696_v55  ;;  %v1556_v63 = vld [vmem:[%s15654_s25 + $0x1940] sm:$0xff]  ;;  %10212 = vmatprep.subr.bf16.mxu0 %v13916_v62  ;;  %v14043_v8 = vcombine.low %v1692_v53, %v1696_v55 }
 0x195   : > { %v1560_v1 = vld [vmem:[%s15654_s25 + $0x1960] sm:$0xff]  ;;  %10213 = vmatpush1.bf16.msra.mxu0 %v13915_v7 }
 0x196   : > { %v1684_v3 = vld [vmem:[%s15654_s25 + $0x1d40] sm:$0xff]  ;;  %v13908_v9 = vcombine.high %v1556_v63, %v1560_v1  ;;  %10253 = vmatprep.subr.bf16.mxu1 %v14044_v57  ;;  %v13907_v16 = vcombine.low %v1556_v63, %v1560_v1 }
 0x197   : > { %v1688_v60 = vld [vmem:[%s15654_s25 + $0x1d60] sm:$0xff]  ;;  %10254 = vmatpush1.bf16.msra.mxu1 %v14043_v8 }
 0x198   : > { %v14036_v11 = vcombine.high %v1684_v3, %v1688_v60  ;;  %v1548_v13 = vld [vmem:[%s15654_s25 + $0x1900] sm:$0xff]  ;;  %10214 = vmatprep.subr.bf16.mxu0 %v13908_v9  ;;  %v14035_v19 = vcombine.low %v1684_v3, %v1688_v60 }
 0x199   : > { %v1552_v14 = vld [vmem:[%s15654_s25 + $0x1920] sm:$0xff]  ;;  %10215 = vmatpush1.bf16.msra.mxu0 %v13907_v16 }
 0x19a   : > { %v1676_v24 = vld [vmem:[%s15654_s25 + $0x1d00] sm:$0xff]  ;;  %v13900_v27 = vcombine.high %v1548_v13, %v1552_v14  ;;  %10255 = vmatprep.subr.bf16.mxu1 %v14036_v11  ;;  %v13899_v28 = vcombine.low %v1548_v13, %v1552_v14 }
 0x19b   : > { %v1680_v15 = vld [vmem:[%s15654_s25 + $0x1d20] sm:$0xff]  ;;  %10256 = vmatpush1.bf16.msra.mxu1 %v14035_v19 }
 0x19c   : > { %v14028_v21 = vcombine.high %v1676_v24, %v1680_v15  ;;  %v1540_v22 = vld [vmem:[%s15654_s25 + $0x18c0] sm:$0xff]  ;;  %10216 = vmatprep.subr.bf16.mxu0 %v13900_v27  ;;  %v14027_v29 = vcombine.low %v1676_v24, %v1680_v15 }
 0x19d   : > { %v1544_v23 = vld [vmem:[%s15654_s25 + $0x18e0] sm:$0xff]  ;;  %10217 = vmatpush1.bf16.msra.mxu0 %v13899_v28 }
 0x19e   : > { %v1668_v25 = vld [vmem:[%s15654_s25 + $0x1cc0] sm:$0xff]  ;;  %v13892_v30 = vcombine.high %v1540_v22, %v1544_v23  ;;  %10257 = vmatprep.subr.bf16.mxu1 %v14028_v21  ;;  %v13891_v38 = vcombine.low %v1540_v22, %v1544_v23 }
 0x19f   : > { %v1672_v26 = vld [vmem:[%s15654_s25 + $0x1ce0] sm:$0xff]  ;;  %10258 = vmatpush1.bf16.msra.mxu1 %v14027_v29 }
 0x1a0   : > { %v14020_v31 = vcombine.high %v1668_v25, %v1672_v26  ;;  %v1532_v32 = vld [vmem:[%s15654_s25 + $0x1880] sm:$0xff]  ;;  %10218 = vmatprep.subr.bf16.mxu0 %v13892_v30  ;;  %v14019_v41 = vcombine.low %v1668_v25, %v1672_v26 }
 0x1a1   : > { %v1536_v33 = vld [vmem:[%s15654_s25 + $0x18a0] sm:$0xff]  ;;  %10219 = vmatpush1.bf16.msra.mxu0 %v13891_v38 }
 0x1a2   : > { %v1660_v34 = vld [vmem:[%s15654_s25 + $0x1c80] sm:$0xff]  ;;  %v13884_v42 = vcombine.high %v1532_v32, %v1536_v33  ;;  %10259 = vmatprep.subr.bf16.mxu1 %v14020_v31  ;;  %v13883_v50 = vcombine.low %v1532_v32, %v1536_v33 }
 0x1a3   : > { %v1664_v37 = vld [vmem:[%s15654_s25 + $0x1ca0] sm:$0xff]  ;;  %10260 = vmatpush1.bf16.msra.mxu1 %v14019_v41 }
 0x1a4   : > { %v14012_v0 = vcombine.high %v1660_v34, %v1664_v37  ;;  %v1524_v44 = vld [vmem:[%s15654_s25 + $0x1840] sm:$0xff]  ;;  %10220 = vmatprep.subr.bf16.mxu0 %v13884_v42  ;;  %v14011_v51 = vcombine.low %v1660_v34, %v1664_v37 }
 0x1a5   : > { %v1528_v46 = vld [vmem:[%s15654_s25 + $0x1860] sm:$0xff]  ;;  %10221 = vmatpush1.bf16.msra.mxu0 %v13883_v50 }
 0x1a6   : > { %v1652_v48 = vld [vmem:[%s15654_s25 + $0x1c40] sm:$0xff]  ;;  %v13876_v53 = vcombine.high %v1524_v44, %v1528_v46  ;;  %10261 = vmatprep.subr.bf16.mxu1 %v14012_v0  ;;  %v13875_v57 = vcombine.low %v1524_v44, %v1528_v46 }
 0x1a7   : > { %v1656_v6 = vld [vmem:[%s15654_s25 + $0x1c60] sm:$0xff]  ;;  %10262 = vmatpush1.bf16.msra.mxu1 %v14011_v51 }
 0x1a8   : > { %v14004_v55 = vcombine.high %v1652_v48, %v1656_v6  ;;  %v1516_v56 = vld [vmem:[%s15654_s25 + $0x1800] sm:$0xff]  ;;  %10222 = vmatprep.subr.bf16.mxu0 %v13876_v53  ;;  %v14003_v63 = vcombine.low %v1652_v48, %v1656_v6 }
 0x1a9   : > { %v1520_v59 = vld [vmem:[%s15654_s25 + $0x1820] sm:$0xff]  ;;  %10223 = vmatpush1.bf16.msra.mxu0 %v13875_v57 }
 0x1aa   : > { %v1644_v61 = vld [vmem:[%s15654_s25 + $0x1c00] sm:$0xff]  ;;  %v13868_v1 = vcombine.high %v1516_v56, %v1520_v59  ;;  %10263 = vmatprep.subr.bf16.mxu1 %v14004_v55  ;;  %v13867_v11 = vcombine.low %v1516_v56, %v1520_v59 }
 0x1ab   : > { %v1648_v62 = vld [vmem:[%s15654_s25 + $0x1c20] sm:$0xff]  ;;  %10264 = vmatpush1.bf16.msra.mxu1 %v14003_v63 }
 0x1ac   : > { %v13996_v3 = vcombine.high %v1644_v61, %v1648_v62  ;;  %v1636_v60 = vld [vmem:[%s15654_s25 + $0x1bc0] sm:$0xff]  ;;  %10224 = vmatprep.subr.bf16.mxu0 %v13868_v1  ;;  %v13995_v13 = vcombine.low %v1644_v61, %v1648_v62 }
 0x1ad   : > { %v1640_v7 = vld [vmem:[%s15654_s25 + $0x1be0] sm:$0xff]  ;;  %10225 = vmatpush1.bf16.msra.mxu0 %v13867_v11 }
 0x1ae   : > { %v1764_v8 = vld [vmem:[%s15654_s25 + $0x1fc0] sm:$0xff]  ;;  %v13988_v14 = vcombine.high %v1636_v60, %v1640_v7  ;;  %10265 = vmatprep.subr.bf16.mxu1 %v13996_v3  ;;  %v13987_v21 = vcombine.low %v1636_v60, %v1640_v7 }
 0x1af   : > { %v1768_v9 = vld [vmem:[%s15654_s25 + $0x1fe0] sm:$0xff]  ;;  %10266 = vmatpush1.bf16.msra.mxu1 %v13995_v13 }
 0x1b0   : > { %v14116_v24 = vcombine.high %v1764_v8, %v1768_v9  ;;  %v1628_v15 = vld [vmem:[%s15654_s25 + $0x1b80] sm:$0xff]  ;;  %10226 = vmatprep.subr.bf16.mxu0 %v13988_v14  ;;  %v14115_v22 = vcombine.low %v1764_v8, %v1768_v9 }
 0x1b1   : > { %v1632_v16 = vld [vmem:[%s15654_s25 + $0x1ba0] sm:$0xff]  ;;  %10227 = vmatpush2.bf16.msra.mxu0 %v13987_v21 }
 0x1b2   : > { %v1756_v19 = vld [vmem:[%s15654_s25 + $0x1f80] sm:$0xff]  ;;  %v13980_v23 = vcombine.high %v1628_v15, %v1632_v16  ;;  %10267 = vmatprep.subr.bf16.mxu1 %v14116_v24  ;;  %v13979_v31 = vcombine.low %v1628_v15, %v1632_v16 }
 0x1b3   : > { %v1760_v27 = vld [vmem:[%s15654_s25 + $0x1fa0] sm:$0xff]  ;;  %10268 = vmatpush2.bf16.msra.mxu1 %v14115_v22 }
 0x1b4   : > { %v14108_v25 = vcombine.high %v1756_v19, %v1760_v27  ;;  %v1620_v26 = vld [vmem:[%s15654_s25 + $0x1b40] sm:$0xff]  ;;  %10228 = vmatprep.subr.bf16.mxu0 %v13980_v23  ;;  %v14107_v32 = vcombine.low %v1756_v19, %v1760_v27 }
 0x1b5   : > { %v1624_v28 = vld [vmem:[%s15654_s25 + $0x1b60] sm:$0xff]  ;;  %10229 = vmatpush2.bf16.msra.mxu0 %v13979_v31 }
 0x1b6   : > { %v1748_v29 = vld [vmem:[%s15654_s25 + $0x1f40] sm:$0xff]  ;;  %v13972_v33 = vcombine.high %v1620_v26, %v1624_v28  ;;  %10269 = vmatprep.subr.bf16.mxu1 %v14108_v25  ;;  %v13971_v0 = vcombine.low %v1620_v26, %v1624_v28 }
 0x1b7   : > { %v1752_v30 = vld [vmem:[%s15654_s25 + $0x1f60] sm:$0xff]  ;;  %10270 = vmatpush2.bf16.msra.mxu1 %v14107_v32 }
 0x1b8   : > { %v14100_v34 = vcombine.high %v1748_v29, %v1752_v30  ;;  %v1612_v37 = vld [vmem:[%s15654_s25 + $0x1b00] sm:$0xff]  ;;  %10230 = vmatprep.subr.bf16.mxu0 %v13972_v33  ;;  %v14099_v44 = vcombine.low %v1748_v29, %v1752_v30 }
 0x1b9   : > { %v1616_v38 = vld [vmem:[%s15654_s25 + $0x1b20] sm:$0xff]  ;;  %10231 = vmatpush2.bf16.msra.mxu0 %v13971_v0 }
 0x1ba   : > { %v1740_v41 = vld [vmem:[%s15654_s25 + $0x1f00] sm:$0xff]  ;;  %v13964_v46 = vcombine.high %v1612_v37, %v1616_v38  ;;  %10271 = vmatprep.subr.bf16.mxu1 %v14100_v34  ;;  %v13963_v55 = vcombine.low %v1612_v37, %v1616_v38 }
 0x1bb   : > { %v1744_v42 = vld [vmem:[%s15654_s25 + $0x1f20] sm:$0xff]  ;;  %10272 = vmatpush2.bf16.msra.mxu1 %v14099_v44 }
 0x1bc   : > { %v14092_v48 = vcombine.high %v1740_v41, %v1744_v42  ;;  %v1604_v6 = vld [vmem:[%s15654_s25 + $0x1ac0] sm:$0xff]  ;;  %10232 = vmatprep.subr.bf16.mxu0 %v13964_v46  ;;  %v14091_v56 = vcombine.low %v1740_v41, %v1744_v42 }
 0x1bd   : > { %v1608_v50 = vld [vmem:[%s15654_s25 + $0x1ae0] sm:$0xff]  ;;  %10233 = vmatpush2.bf16.msra.mxu0 %v13963_v55 }
 0x1be   : > { %v1732_v51 = vld [vmem:[%s15654_s25 + $0x1ec0] sm:$0xff]  ;;  %v13956_v59 = vcombine.high %v1604_v6, %v1608_v50  ;;  %10273 = vmatprep.subr.bf16.mxu1 %v14092_v48  ;;  %v13955_v3 = vcombine.low %v1604_v6, %v1608_v50 }
 0x1bf   : > { %v1736_v53 = vld [vmem:[%s15654_s25 + $0x1ee0] sm:$0xff]  ;;  %10274 = vmatpush2.bf16.msra.mxu1 %v14091_v56 }
 0x1c0   : > { %v14084_v61 = vcombine.high %v1732_v51, %v1736_v53  ;;  %v1596_v62 = vld [vmem:[%s15654_s25 + $0x1a80] sm:$0xff]  ;;  %10234 = vmatprep.subr.bf16.mxu0 %v13956_v59  ;;  %v14083_v60 = vcombine.low %v1732_v51, %v1736_v53  ;;  %v16058_v51 = vpack.c.bf16 %v15954_v39, %v15954_v39  ;;  %v16066_v59 = vpack.c.bf16 %v15959_v43, %v15959_v43 }
 0x1c1   : > { %v1600_v57 = vld [vmem:[%s15654_s25 + $0x1aa0] sm:$0xff]  ;;  %10235 = vmatpush2.bf16.msra.mxu0 %v13955_v3 }
 0x1c2   : > { %v1724_v63 = vld [vmem:[%s15654_s25 + $0x1e80] sm:$0xff]  ;;  %v13948_v7 = vcombine.high %v1596_v62, %v1600_v57  ;;  %10275 = vmatprep.subr.bf16.mxu1 %v14084_v61  ;;  %v13947_v24 = vcombine.low %v1596_v62, %v1600_v57 }
 0x1c3   : > { %v1728_v1 = vld [vmem:[%s15654_s25 + $0x1ea0] sm:$0xff]  ;;  %10276 = vmatpush2.bf16.msra.mxu1 %v14083_v60 }
 0x1c4   : > { %v14076_v8 = vcombine.high %v1724_v63, %v1728_v1  ;;  %v1588_v9 = vld [vmem:[%s15654_s25 + $0x1a40] sm:$0xff]  ;;  %10236 = vmatprep.subr.bf16.mxu0 %v13948_v7  ;;  %v14075_v16 = vcombine.low %v1724_v63, %v1728_v1 }
 0x1c5   : > { %v1592_v11 = vld [vmem:[%s15654_s25 + $0x1a60] sm:$0xff]  ;;  %10237 = vmatpush2.bf16.msra.mxu0 %v13947_v24 }
 0x1c6   : > { %v1716_v13 = vld [vmem:[%s15654_s25 + $0x1e40] sm:$0xff]  ;;  %v13940_v19 = vcombine.high %v1588_v9, %v1592_v11  ;;  %10277 = vmatprep.subr.bf16.mxu1 %v14076_v8  ;;  %v13939_v28 = vcombine.low %v1588_v9, %v1592_v11 }
 0x1c7   : > { %v1720_v14 = vld [vmem:[%s15654_s25 + $0x1e60] sm:$0xff]  ;;  %10278 = vmatpush2.bf16.msra.mxu1 %v14075_v16 }
 0x1c8   : > { %v590_v15 = vld [vmem:[%s15646_s28 + $0x20] sm:$0xff]  ;;  %v14068_v27 = vcombine.high %v1716_v13, %v1720_v14  ;;  %10238 = vmatprep.subr.bf16.mxu0 %v13940_v19  ;;  %v14067_v29 = vcombine.low %v1716_v13, %v1720_v14 }
 0x1c9   : > { %v1580_v21 = vld [vmem:[%s15654_s25 + $0x1a00] sm:$0xff]  ;;  %v666_v26 = vcombine.high %v590_v15, %v590_v15  ;;  %v16045_v34 = vrot.slane %v590_v15, %v15711_v54  ;;  %10239 = vmatpush2.bf16.msra.mxu0 %v13939_v28 }
 0x1ca   : > { %v1584_v22 = vld [vmem:[%s15654_s25 + $0x1a20] sm:$0xff]  ;;  %10279 = vmatprep.subr.bf16.mxu1 %v14068_v27 }
 0x1cb   : > { %v1708_v23 = vld [vmem:[%s15654_s25 + $0x1e00] sm:$0xff]  ;;  %v13932_v30 = vcombine.high %v1580_v21, %v1584_v22  ;;  %v16050_v41 = vrot.slane %v666_v26, %v15711_v54  ;;  %v13931_v42 = vcombine.low %v1580_v21, %v1584_v22  ;;  %10280 = vmatpush2.bf16.msra.mxu1 %v14067_v29  ;;  %v681_v50 = vcombine.high %v16045_v34, %v16045_v34 }
 0x1cc   : > { %v1712_v25 = vld [vmem:[%s15654_s25 + $0x1e20] sm:$0xff] }
 0x1cd   : > { %v14060_v31 = vcombine.high %v1708_v23, %v1712_v25  ;;  %v1828_v32 = vld [vmem:[%s15654_s25 + $0x21c0] sm:$0xff]  ;;  %10240 = vmatprep.subr.bf16.mxu0 %v13932_v30  ;;  %v14059_v0 = vcombine.low %v1708_v23, %v1712_v25  ;;  %v682_v56 = vcombine.high %v16050_v41, %v16050_v41  ;;  %v16070_v3 = vpack.c.bf16 %v681_v50, %v681_v50 }
 0x1ce   : > { %v1832_v33 = vld [vmem:[%s15654_s25 + $0x21e0] sm:$0xff]  ;;  %10241 = vmatpush2.bf16.msra.mxu0 %v13931_v42 }
 0x1cf   : > { %v1956_v37 = vld [vmem:[%s15654_s25 + $0x25c0] sm:$0xff]  ;;  %v14180_v44 = vcombine.high %v1828_v32, %v1832_v33  ;;  %10281 = vmatprep.subr.bf16.mxu1 %v14060_v31  ;;  %v14179_v61 = vcombine.low %v1828_v32, %v1832_v33  ;;  %v9998_v60 = vpop.f32.mrf.mxu0  ;;  %v16075_v43 = vpack.c.bf16 %v682_v56, %v682_v56 }
 0x1d0   : > { %v1960_v38 = vld [vmem:[%s15654_s25 + $0x25e0] sm:$0xff]  ;;  %10282 = vmatpush2.bf16.msra.mxu1 %v14059_v0 }
 0x1d1   : > { %v14308_v46 = vcombine.high %v1956_v37, %v1960_v38  ;;  %v1820_v48 = vld [vmem:[%s15654_s25 + $0x2180] sm:$0xff]  ;;  %10292 = vmatprep.subr.bf16.mxu0 %v14180_v44  ;;  %v14307_v62 = vcombine.low %v1956_v37, %v1960_v38  ;;  %10243 = vmatmul.mubr.bf16.vlgmr.msra.gmra.mxu0 %v16058_v51  ;;  %v10039_v9 = vpop.f32.mrf.mxu1  ;;  %v10000_v14 = vpop.f32.mrf.mxu0 }
 0x1d2   : > { %v1824_v6 = vld [vmem:[%s15654_s25 + $0x21a0] sm:$0xff]  ;;  %10293 = vmatpush1.bf16.msra.mxu0 %v14179_v61  ;;  %v16078_v13 = vadd.f32 %v10039_v9, %v9998_v60  ;;  %10324 = vmatprep.mubr.bf16.mxu0 %v16070_v3 }
 0x1d3   : > { %v1948_v53 = vld [vmem:[%s15654_s25 + $0x2580] sm:$0xff]  ;;  %v14172_v57 = vcombine.high %v1820_v48, %v1824_v6  ;;  %10333 = vmatprep.subr.bf16.mxu1 %v14308_v46  ;;  %10284 = vmatmul.mubr.bf16.vlgmr.msra.gmra.mxu1 %v16066_v59  ;;  %v14171_v11 = vcombine.low %v1820_v48, %v1824_v6  ;;  %v10041_v16 = vpop.f32.mrf.mxu1  ;;  %v10002_v23 = vpop.f32.mrf.mxu0 }
 0x1d4   : > { %v1952_v55 = vld [vmem:[%s15654_s25 + $0x25a0] sm:$0xff]  ;;  %10334 = vmatpush1.bf16.msra.mxu1 %v14307_v62  ;;  %v16083_v22 = vadd.f32 %v10041_v16, %v10000_v14  ;;  %10365 = vmatprep.mubr.bf16.mxu1 %v16075_v43 }
 0x1d5   : > { %v14300_v39 = vcombine.high %v1948_v53, %v1952_v55  ;;  %v1812_v63 = vld [vmem:[%s15654_s25 + $0x2140] sm:$0xff]  ;;  %10294 = vmatprep.subr.bf16.mxu0 %v14172_v57  ;;  %v14299_v24 = vcombine.low %v1948_v53, %v1952_v55  ;;  %v10043_v28 = vpop.f32.mrf.mxu1  ;;  %v10003_v30 = vpop.f32.mrf.mxu0 }
 0x1d6   : > { %v1816_v1 = vld [vmem:[%s15654_s25 + $0x2160] sm:$0xff]  ;;  %10295 = vmatpush1.bf16.msra.mxu0 %v14171_v11 }
 0x1d7   : > { %v1940_v7 = vld [vmem:[%s15654_s25 + $0x2540] sm:$0xff]  ;;  %v14164_v15 = vcombine.high %v1812_v63, %v1816_v1  ;;  %10335 = vmatprep.subr.bf16.mxu1 %v14300_v39  ;;  %v14163_v29 = vcombine.low %v1812_v63, %v1816_v1  ;;  %v10044_v33 = vpop.f32.mrf.mxu1 }
 0x1d8   : > { %v1944_v8 = vld [vmem:[%s15654_s25 + $0x2560] sm:$0xff]  ;;  %10336 = vmatpush1.bf16.msra.mxu1 %v14299_v24 }
 0x1d9   : > { %v14292_v19 = vcombine.high %v1940_v7, %v1944_v8  ;;  %v1804_v27 = vld [vmem:[%s15654_s25 + $0x2100] sm:$0xff]  ;;  %10296 = vmatprep.subr.bf16.mxu0 %v14164_v15  ;;  %v14291_v31 = vcombine.low %v1940_v7, %v1944_v8 }
 0x1da   : > { %v1808_v21 = vld [vmem:[%s15654_s25 + $0x2120] sm:$0xff]  ;;  %10297 = vmatpush1.bf16.msra.mxu0 %v14163_v29 }
 0x1db   : > { %v1932_v25 = vld [vmem:[%s15654_s25 + $0x2500] sm:$0xff]  ;;  %v14156_v32 = vcombine.high %v1804_v27, %v1808_v21  ;;  %10337 = vmatprep.subr.bf16.mxu1 %v14292_v19  ;;  %v14155_v46 = vcombine.low %v1804_v27, %v1808_v21 }
 0x1dc   : > { %v1936_v26 = vld [vmem:[%s15654_s25 + $0x2520] sm:$0xff]  ;;  %10338 = vmatpush1.bf16.msra.mxu1 %v14291_v31 }
 0x1dd   : > { %v14284_v37 = vcombine.high %v1932_v25, %v1936_v26  ;;  %v1796_v38 = vld [vmem:[%s15654_s25 + $0x20c0] sm:$0xff]  ;;  %10298 = vmatprep.subr.bf16.mxu0 %v14156_v32  ;;  %v14283_v48 = vcombine.low %v1932_v25, %v1936_v26 }
 0x1de   : > { %v1800_v42 = vld [vmem:[%s15654_s25 + $0x20e0] sm:$0xff]  ;;  %10299 = vmatpush1.bf16.msra.mxu0 %v14155_v46 }
 0x1df   : > { %v1924_v0 = vld [vmem:[%s15654_s25 + $0x24c0] sm:$0xff]  ;;  %v14148_v6 = vcombine.high %v1796_v38, %v1800_v42  ;;  %10339 = vmatprep.subr.bf16.mxu1 %v14284_v37  ;;  %v14147_v62 = vcombine.low %v1796_v38, %v1800_v42 }
 0x1e0   : > { %v1928_v44 = vld [vmem:[%s15654_s25 + $0x24e0] sm:$0xff]  ;;  %10340 = vmatpush1.bf16.msra.mxu1 %v14283_v48 }
 0x1e1   : > { %v14276_v50 = vcombine.high %v1924_v0, %v1928_v44  ;;  %v1788_v53 = vld [vmem:[%s15654_s25 + $0x2080] sm:$0xff]  ;;  %10300 = vmatprep.subr.bf16.mxu0 %v14148_v6  ;;  %v14275_v57 = vcombine.low %v1924_v0, %v1928_v44 }
 0x1e2   : > { %v1792_v55 = vld [vmem:[%s15654_s25 + $0x20a0] sm:$0xff]  ;;  %10301 = vmatpush1.bf16.msra.mxu0 %v14147_v62 }
 0x1e3   : > { %v1916_v56 = vld [vmem:[%s15654_s25 + $0x2480] sm:$0xff]  ;;  %v14140_v39 = vcombine.high %v1788_v53, %v1792_v55  ;;  %10341 = vmatprep.subr.bf16.mxu1 %v14276_v50  ;;  %v14139_v9 = vcombine.low %v1788_v53, %v1792_v55 }
 0x1e4   : > { %v1920_v61 = vld [vmem:[%s15654_s25 + $0x24a0] sm:$0xff]  ;;  %10342 = vmatpush1.bf16.msra.mxu1 %v14275_v57 }
 0x1e5   : > { %v14268_v63 = vcombine.high %v1916_v56, %v1920_v61  ;;  %v1780_v1 = vld [vmem:[%s15654_s25 + $0x2040] sm:$0xff]  ;;  %10302 = vmatprep.subr.bf16.mxu0 %v14140_v39  ;;  %v14267_v11 = vcombine.low %v1916_v56, %v1920_v61 }
 0x1e6   : > { %v1784_v60 = vld [vmem:[%s15654_s25 + $0x2060] sm:$0xff]  ;;  %10303 = vmatpush1.bf16.msra.mxu0 %v14139_v9 }
 0x1e7   : > { %v1908_v7 = vld [vmem:[%s15654_s25 + $0x2440] sm:$0xff]  ;;  %v14132_v14 = vcombine.high %v1780_v1, %v1784_v60  ;;  %10343 = vmatprep.subr.bf16.mxu1 %v14268_v63  ;;  %v14131_v21 = vcombine.low %v1780_v1, %v1784_v60 }
 0x1e8   : > { %v1912_v8 = vld [vmem:[%s15654_s25 + $0x2460] sm:$0xff]  ;;  %10344 = vmatpush1.bf16.msra.mxu1 %v14267_v11 }
 0x1e9   : > { %v14260_v24 = vcombine.high %v1908_v7, %v1912_v8  ;;  %v1772_v15 = vld [vmem:[%s15654_s25 + $0x2000] sm:$0xff]  ;;  %10304 = vmatprep.subr.bf16.mxu0 %v14132_v14  ;;  %v14259_v23 = vcombine.low %v1908_v7, %v1912_v8 }
 0x1ea   : > { %v1776_v16 = vld [vmem:[%s15654_s25 + $0x2020] sm:$0xff]  ;;  %10305 = vmatpush1.bf16.msra.mxu0 %v14131_v21 }
 0x1eb   : > { %v1900_v19 = vld [vmem:[%s15654_s25 + $0x2400] sm:$0xff]  ;;  %v14124_v25 = vcombine.high %v1772_v15, %v1776_v16  ;;  %10345 = vmatprep.subr.bf16.mxu1 %v14260_v24  ;;  %v14123_v32 = vcombine.low %v1772_v15, %v1776_v16 }
 0x1ec   : > { %v1904_v27 = vld [vmem:[%s15654_s25 + $0x2420] sm:$0xff]  ;;  %10346 = vmatpush1.bf16.msra.mxu1 %v14259_v23 }
 0x1ed   : > { %v14252_v26 = vcombine.high %v1900_v19, %v1904_v27  ;;  %v1892_v28 = vld [vmem:[%s15654_s25 + $0x23c0] sm:$0xff]  ;;  %10306 = vmatprep.subr.bf16.mxu0 %v14124_v25  ;;  %v14251_v33 = vcombine.low %v1900_v19, %v1904_v27 }
 0x1ee   : > { %v1896_v29 = vld [vmem:[%s15654_s25 + $0x23e0] sm:$0xff]  ;;  %10307 = vmatpush1.bf16.msra.mxu0 %v14123_v32 }
 0x1ef   : > { %v2020_v30 = vld [vmem:[%s15654_s25 + $0x27c0] sm:$0xff]  ;;  %v14244_v37 = vcombine.high %v1892_v28, %v1896_v29  ;;  %10347 = vmatprep.subr.bf16.mxu1 %v14252_v26  ;;  %v14243_v48 = vcombine.low %v1892_v28, %v1896_v29 }
 0x1f0   : > { %v2024_v31 = vld [vmem:[%s15654_s25 + $0x27e0] sm:$0xff]  ;;  %10348 = vmatpush1.bf16.msra.mxu1 %v14251_v33 }
 0x1f1   : > { %v14372_v38 = vcombine.high %v2020_v30, %v2024_v31  ;;  %v1884_v42 = vld [vmem:[%s15654_s25 + $0x2380] sm:$0xff]  ;;  %10308 = vmatprep.subr.bf16.mxu0 %v14244_v37  ;;  %v14371_v6 = vcombine.low %v2020_v30, %v2024_v31 }
 0x1f2   : > { %v1888_v0 = vld [vmem:[%s15654_s25 + $0x23a0] sm:$0xff]  ;;  %10309 = vmatpush2.bf16.msra.mxu0 %v14243_v48 }
 0x1f3   : > { %v2012_v44 = vld [vmem:[%s15654_s25 + $0x2780] sm:$0xff]  ;;  %v14236_v50 = vcombine.high %v1884_v42, %v1888_v0  ;;  %10349 = vmatprep.subr.bf16.mxu1 %v14372_v38  ;;  %v14235_v57 = vcombine.low %v1884_v42, %v1888_v0 }
 0x1f4   : > { %v2016_v46 = vld [vmem:[%s15654_s25 + $0x27a0] sm:$0xff]  ;;  %10350 = vmatpush2.bf16.msra.mxu1 %v14371_v6 }
 0x1f5   : > { %v14364_v53 = vcombine.high %v2012_v44, %v2016_v46  ;;  %v1876_v55 = vld [vmem:[%s15654_s25 + $0x2340] sm:$0xff]  ;;  %10310 = vmatprep.subr.bf16.mxu0 %v14236_v50  ;;  %v14363_v39 = vcombine.low %v2012_v44, %v2016_v46  ;;  %v591_v50 = vld [vmem:[%s15646_s28 + $0x28] sm:$0xff] }
 0x1f6   : > { %v1880_v56 = vld [vmem:[%s15654_s25 + $0x2360] sm:$0xff]  ;;  %10311 = vmatpush2.bf16.msra.mxu0 %v14235_v57 }
 0x1f7   : > { %v2004_v61 = vld [vmem:[%s15654_s25 + $0x2740] sm:$0xff]  ;;  %v14228_v63 = vcombine.high %v1876_v55, %v1880_v56  ;;  %10351 = vmatprep.subr.bf16.mxu1 %v14364_v53  ;;  %v14227_v11 = vcombine.low %v1876_v55, %v1880_v56 }
 0x1f8   : > { %v2008_v62 = vld [vmem:[%s15654_s25 + $0x2760] sm:$0xff]  ;;  %10352 = vmatpush2.bf16.msra.mxu1 %v14363_v39 }
 0x1f9   : > { %v14356_v1 = vcombine.high %v2004_v61, %v2008_v62  ;;  %v1868_v60 = vld [vmem:[%s15654_s25 + $0x2300] sm:$0xff]  ;;  %10312 = vmatprep.subr.bf16.mxu0 %v14228_v63  ;;  %v14355_v14 = vcombine.low %v2004_v61, %v2008_v62  ;;  %v683_v63 = vcombine.high %v591_v50, %v591_v50 }
 0x1fa   : > { %v1872_v7 = vld [vmem:[%s15654_s25 + $0x2320] sm:$0xff]  ;;  %10313 = vmatpush2.bf16.msra.mxu0 %v14227_v11 }
 0x1fb   : > { %v1996_v8 = vld [vmem:[%s15654_s25 + $0x2700] sm:$0xff]  ;;  %v14220_v24 = vcombine.high %v1868_v60, %v1872_v7  ;;  %10353 = vmatprep.subr.bf16.mxu1 %v14356_v1  ;;  %v14219_v23 = vcombine.low %v1868_v60, %v1872_v7 }
 0x1fc   : > { %v2000_v9 = vld [vmem:[%s15654_s25 + $0x2720] sm:$0xff]  ;;  %10354 = vmatpush2.bf16.msra.mxu1 %v14355_v14  ;;  %v16140_v14 = vrot.slane %v591_v50, %v15711_v54 }
 0x1fd   : > { %v14348_v15 = vcombine.high %v1996_v8, %v2000_v9  ;;  %v1860_v16 = vld [vmem:[%s15654_s25 + $0x22c0] sm:$0xff]  ;;  %10314 = vmatprep.subr.bf16.mxu0 %v14220_v24  ;;  %v14347_v25 = vcombine.low %v1996_v8, %v2000_v9 }
 0x1fe   : > { %v1864_v19 = vld [vmem:[%s15654_s25 + $0x22e0] sm:$0xff]  ;;  %10315 = vmatpush2.bf16.msra.mxu0 %v14219_v23 }
 0x1ff   : > { %v1988_v27 = vld [vmem:[%s15654_s25 + $0x26c0] sm:$0xff]  ;;  %v14212_v26 = vcombine.high %v1860_v16, %v1864_v19  ;;  %10355 = vmatprep.subr.bf16.mxu1 %v14348_v15  ;;  %v14211_v33 = vcombine.low %v1860_v16, %v1864_v19  ;;  %v16145_v16 = vrot.slane %v683_v63, %v15711_v54 }
 0x200   : > { %v1992_v21 = vld [vmem:[%s15654_s25 + $0x26e0] sm:$0xff]  ;;  %10356 = vmatpush2.bf16.msra.mxu1 %v14347_v25 }
 0x201   : > { %v14340_v28 = vcombine.high %v1988_v27, %v1992_v21  ;;  %v1852_v29 = vld [vmem:[%s15654_s25 + $0x2280] sm:$0xff]  ;;  %10316 = vmatprep.subr.bf16.mxu0 %v14212_v26  ;;  %v14339_v37 = vcombine.low %v1988_v27, %v1992_v21 }
 0x202   : > { %v1856_v30 = vld [vmem:[%s15654_s25 + $0x22a0] sm:$0xff]  ;;  %10317 = vmatpush2.bf16.msra.mxu0 %v14211_v33  ;;  %v16161_v33 = vpack.c.bf16 %v16050_v41, %v16050_v41 }
 0x203   : > { %v1980_v31 = vld [vmem:[%s15654_s25 + $0x2680] sm:$0xff]  ;;  %v14204_v38 = vcombine.high %v1852_v29, %v1856_v30  ;;  %10357 = vmatprep.subr.bf16.mxu1 %v14340_v28  ;;  %v14203_v6 = vcombine.low %v1852_v29, %v1856_v30  ;;  %v698_v28 = vcombine.high %v16140_v14, %v16140_v14  ;;  %v16153_v29 = vpack.c.bf16 %v16045_v34, %v16045_v34 }
 0x204   : > { %v1984_v32 = vld [vmem:[%s15654_s25 + $0x26a0] sm:$0xff]  ;;  %10358 = vmatpush2.bf16.msra.mxu1 %v14339_v37 }
 0x205   : > { %v14332_v42 = vcombine.high %v1980_v31, %v1984_v32  ;;  %v1844_v0 = vld [vmem:[%s15654_s25 + $0x2240] sm:$0xff]  ;;  %10318 = vmatprep.subr.bf16.mxu0 %v14204_v38  ;;  %v14331_v53 = vcombine.low %v1980_v31, %v1984_v32  ;;  %v699_v32 = vcombine.high %v16145_v16, %v16145_v16 }
 0x206   : > { %v1848_v44 = vld [vmem:[%s15654_s25 + $0x2260] sm:$0xff]  ;;  %10319 = vmatpush2.bf16.msra.mxu0 %v14203_v6 }
 0x207   : > { %v1972_v46 = vld [vmem:[%s15654_s25 + $0x2640] sm:$0xff]  ;;  %v14196_v55 = vcombine.high %v1844_v0, %v1848_v44  ;;  %10359 = vmatprep.subr.bf16.mxu1 %v14332_v42  ;;  %v14195_v1 = vcombine.low %v1844_v0, %v1848_v44 }
 0x208   : > { %v1976_v48 = vld [vmem:[%s15654_s25 + $0x2660] sm:$0xff]  ;;  %10360 = vmatpush2.bf16.msra.mxu1 %v14331_v53  ;;  %v16170_v53 = vpack.c.bf16 %v699_v32, %v699_v32 }
 0x209   : > { %v14324_v56 = vcombine.high %v1972_v46, %v1976_v48  ;;  %v1836_v61 = vld [vmem:[%s15654_s25 + $0x2200] sm:$0xff]  ;;  %10320 = vmatprep.subr.bf16.mxu0 %v14196_v55  ;;  %v14323_v60 = vcombine.low %v1972_v46, %v1976_v48  ;;  %v16165_v46 = vpack.c.bf16 %v698_v28, %v698_v28 }
 0x20a   : > { %v1840_v62 = vld [vmem:[%s15654_s25 + $0x2220] sm:$0xff]  ;;  %10321 = vmatpush2.bf16.msra.mxu0 %v14195_v1 }
 0x20b   : > { %v1964_v57 = vld [vmem:[%s15654_s25 + $0x2600] sm:$0xff]  ;;  %v14188_v7 = vcombine.high %v1836_v61, %v1840_v62  ;;  %10361 = vmatprep.subr.bf16.mxu1 %v14324_v56  ;;  %v14187_v19 = vcombine.low %v1836_v61, %v1840_v62 }
 0x20c   : > { %v1968_v39 = vld [vmem:[%s15654_s25 + $0x2620] sm:$0xff]  ;;  %10362 = vmatpush2.bf16.msra.mxu1 %v14323_v60 }
 0x20d   : > { %v14316_v8 = vcombine.high %v1964_v57, %v1968_v39  ;;  %v2084_v9 = vld [vmem:[%s15654_s25 + $0x29c0] sm:$0xff]  ;;  %10322 = vmatprep.subr.bf16.mxu0 %v14188_v7  ;;  %v14315_v27 = vcombine.low %v1964_v57, %v1968_v39 }
 0x20e   : > { %v2088_v11 = vld [vmem:[%s15654_s25 + $0x29e0] sm:$0xff]  ;;  %10323 = vmatpush2.bf16.msra.mxu0 %v14187_v19 }
 0x20f   : > { %v2212_v24 = vld [vmem:[%s15654_s25 + $0x2dc0] sm:$0xff]  ;;  %v14436_v21 = vcombine.high %v2084_v9, %v2088_v11  ;;  %10363 = vmatprep.subr.bf16.mxu1 %v14316_v8  ;;  %v14435_v37 = vcombine.low %v2084_v9, %v2088_v11 }
 0x210   : > { %v2216_v15 = vld [vmem:[%s15654_s25 + $0x2de0] sm:$0xff]  ;;  %10364 = vmatpush2.bf16.msra.mxu1 %v14315_v27  ;;  %v10080_v48 = vpop.f32.mrf.mxu0 }
 0x211   : > { %v14564_v23 = vcombine.high %v2212_v24, %v2216_v15  ;;  %v2076_v25 = vld [vmem:[%s15654_s25 + $0x2980] sm:$0xff]  ;;  %10374 = vmatprep.subr.bf16.mxu0 %v14436_v21  ;;  %v14563_v38 = vcombine.low %v2212_v24, %v2216_v15  ;;  %10325 = vmatmul.mubr.bf16.vlgmr.msra.gmra.mxu0 %v16153_v29  ;;  %v10081_v41 = vadd.f32 %v10080_v48, %v16078_v13 }
 0x212   : > { %v2080_v26 = vld [vmem:[%s15654_s25 + $0x29a0] sm:$0xff]  ;;  %v10121_v55 = vpop.f32.mrf.mxu1  ;;  %10375 = vmatpush1.bf16.msra.mxu0 %v14435_v37  ;;  %v10082_v61 = vpop.f32.mrf.mxu0  ;;  %10406 = vmatprep.mubr.bf16.mxu0 %v16165_v46 }
 0x213   : > { %v2204_v30 = vld [vmem:[%s15654_s25 + $0x2d80] sm:$0xff]  ;;  %v14428_v42 = vcombine.high %v2076_v25, %v2080_v26  ;;  %10415 = vmatprep.subr.bf16.mxu1 %v14564_v23  ;;  %10366 = vmatmul.mubr.bf16.vlgmr.msra.gmra.mxu1 %v16161_v33  ;;  %v14427_v56 = vcombine.low %v2076_v25, %v2080_v26  ;;  %v16174_v39 = vadd.f32 %v10121_v55, %v10081_v41 }
 0x214   : > { %v2208_v31 = vld [vmem:[%s15654_s25 + $0x2da0] sm:$0xff]  ;;  %10416 = vmatpush1.bf16.msra.mxu1 %v14563_v38  ;;  %v10083_v63 = vadd.f32 %v10082_v61, %v16083_v22  ;;  %v10123_v1 = vpop.f32.mrf.mxu1  ;;  %v10084_v8 = vpop.f32.mrf.mxu0  ;;  %10447 = vmatprep.mubr.bf16.mxu1 %v16170_v53 }
 0x215   : > { %v14556_v34 = vcombine.high %v2204_v30, %v2208_v31  ;;  %v2068_v0 = vld [vmem:[%s15654_s25 + $0x2940] sm:$0xff]  ;;  %10376 = vmatprep.subr.bf16.mxu0 %v14428_v42  ;;  %v14555_v62 = vcombine.low %v2204_v30, %v2208_v31 }
 0x216   : > { %v2072_v44 = vld [vmem:[%s15654_s25 + $0x2960] sm:$0xff]  ;;  %v16183_v24 = vadd.f32 %v10123_v1, %v10083_v63  ;;  %v10125_v15 = vpop.f32.mrf.mxu1  ;;  %10377 = vmatpush1.bf16.msra.mxu0 %v14427_v56  ;;  %v10085_v19 = vpop.f32.mrf.mxu0 }
 0x217   : > { %v2196_v6 = vld [vmem:[%s15654_s25 + $0x2d40] sm:$0xff]  ;;  %v14420_v57 = vcombine.high %v2068_v0, %v2072_v44  ;;  %10417 = vmatprep.subr.bf16.mxu1 %v14556_v34  ;;  %v14419_v22 = vcombine.low %v2068_v0, %v2072_v44 }
 0x218   : > { %v2200_v50 = vld [vmem:[%s15654_s25 + $0x2d60] sm:$0xff]  ;;  %10418 = vmatpush1.bf16.msra.mxu1 %v14555_v62  ;;  %v10126_v23 = vpop.f32.mrf.mxu1 }
 0x219   : > { %v14548_v13 = vcombine.high %v2196_v6, %v2200_v50  ;;  %v2060_v60 = vld [vmem:[%s15654_s25 + $0x2900] sm:$0xff]  ;;  %10378 = vmatprep.subr.bf16.mxu0 %v14420_v57  ;;  %v14547_v27 = vcombine.low %v2196_v6, %v2200_v50 }
 0x21a   : > { %v2064_v7 = vld [vmem:[%s15654_s25 + $0x2920] sm:$0xff]  ;;  %10379 = vmatpush1.bf16.msra.mxu0 %v14419_v22 }
 0x21b   : > { %v2188_v9 = vld [vmem:[%s15654_s25 + $0x2d00] sm:$0xff]  ;;  %v14412_v21 = vcombine.high %v2060_v60, %v2064_v7  ;;  %10419 = vmatprep.subr.bf16.mxu1 %v14548_v13  ;;  %v14411_v32 = vcombine.low %v2060_v60, %v2064_v7 }
 0x21c   : > { %v2192_v11 = vld [vmem:[%s15654_s25 + $0x2d20] sm:$0xff]  ;;  %10420 = vmatpush1.bf16.msra.mxu1 %v14547_v27 }
 0x21d   : > { %v14540_v25 = vcombine.high %v2188_v9, %v2192_v11  ;;  %v2052_v26 = vld [vmem:[%s15654_s25 + $0x28c0] sm:$0xff]  ;;  %10380 = vmatprep.subr.bf16.mxu0 %v14412_v21  ;;  %v14539_v37 = vcombine.low %v2188_v9, %v2192_v11 }
 0x21e   : > { %v2056_v28 = vld [vmem:[%s15654_s25 + $0x28e0] sm:$0xff]  ;;  %10381 = vmatpush1.bf16.msra.mxu0 %v14411_v32 }
 0x21f   : > { %v2180_v30 = vld [vmem:[%s15654_s25 + $0x2cc0] sm:$0xff]  ;;  %v14404_v38 = vcombine.high %v2052_v26, %v2056_v28  ;;  %10421 = vmatprep.subr.bf16.mxu1 %v14540_v25  ;;  %v14403_v6 = vcombine.low %v2052_v26, %v2056_v28 }
 0x220   : > { %v2184_v31 = vld [vmem:[%s15654_s25 + $0x2ce0] sm:$0xff]  ;;  %10422 = vmatpush1.bf16.msra.mxu1 %v14539_v37 }
 0x221   : > { %v14532_v42 = vcombine.high %v2180_v30, %v2184_v31  ;;  %v2044_v34 = vld [vmem:[%s15654_s25 + $0x2880] sm:$0xff]  ;;  %10382 = vmatprep.subr.bf16.mxu0 %v14404_v38  ;;  %v14531_v50 = vcombine.low %v2180_v30, %v2184_v31 }
 0x222   : > { %v2048_v0 = vld [vmem:[%s15654_s25 + $0x28a0] sm:$0xff]  ;;  %10383 = vmatpush1.bf16.msra.mxu0 %v14403_v6 }
 0x223   : > { %v2172_v44 = vld [vmem:[%s15654_s25 + $0x2c80] sm:$0xff]  ;;  %v14396_v41 = vcombine.high %v2044_v34, %v2048_v0  ;;  %10423 = vmatprep.subr.bf16.mxu1 %v14532_v42  ;;  %v14395_v63 = vcombine.low %v2044_v34, %v2048_v0 }
 0x224   : > { %v2176_v48 = vld [vmem:[%s15654_s25 + $0x2ca0] sm:$0xff]  ;;  %10424 = vmatpush1.bf16.msra.mxu1 %v14531_v50 }
 0x225   : > { %v14524_v55 = vcombine.high %v2172_v44, %v2176_v48  ;;  %v2036_v56 = vld [vmem:[%s15654_s25 + $0x2840] sm:$0xff]  ;;  %10384 = vmatprep.subr.bf16.mxu0 %v14396_v41  ;;  %v14523_v1 = vcombine.low %v2172_v44, %v2176_v48 }
 0x226   : > { %v2040_v61 = vld [vmem:[%s15654_s25 + $0x2860] sm:$0xff]  ;;  %10385 = vmatpush1.bf16.msra.mxu0 %v14395_v63 }
 0x227   : > { %v2164_v62 = vld [vmem:[%s15654_s25 + $0x2c40] sm:$0xff]  ;;  %v14388_v13 = vcombine.high %v2036_v56, %v2040_v61  ;;  %10425 = vmatprep.subr.bf16.mxu1 %v14524_v55  ;;  %v14387_v15 = vcombine.low %v2036_v56, %v2040_v61 }
 0x228   : > { %v2168_v57 = vld [vmem:[%s15654_s25 + $0x2c60] sm:$0xff]  ;;  %10426 = vmatpush1.bf16.msra.mxu1 %v14523_v1 }
 0x229   : > { %v14516_v60 = vcombine.high %v2164_v62, %v2168_v57  ;;  %v2028_v7 = vld [vmem:[%s15654_s25 + $0x2800] sm:$0xff]  ;;  %10386 = vmatprep.subr.bf16.mxu0 %v14388_v13  ;;  %v14515_v22 = vcombine.low %v2164_v62, %v2168_v57 }
 0x22a   : > { %v2032_v8 = vld [vmem:[%s15654_s25 + $0x2820] sm:$0xff]  ;;  %10387 = vmatpush1.bf16.msra.mxu0 %v14387_v15 }
 0x22b   : > { %v2156_v9 = vld [vmem:[%s15654_s25 + $0x2c00] sm:$0xff]  ;;  %v14380_v19 = vcombine.high %v2028_v7, %v2032_v8  ;;  %10427 = vmatprep.subr.bf16.mxu1 %v14516_v60  ;;  %v14379_v28 = vcombine.low %v2028_v7, %v2032_v8 }
 0x22c   : > { %v2160_v11 = vld [vmem:[%s15654_s25 + $0x2c20] sm:$0xff]  ;;  %10428 = vmatpush1.bf16.msra.mxu1 %v14515_v22 }
 0x22d   : > { %v14508_v27 = vcombine.high %v2156_v9, %v2160_v11  ;;  %v2148_v21 = vld [vmem:[%s15654_s25 + $0x2bc0] sm:$0xff]  ;;  %10388 = vmatprep.subr.bf16.mxu0 %v14380_v19  ;;  %v14507_v30 = vcombine.low %v2156_v9, %v2160_v11 }
 0x22e   : > { %v2152_v23 = vld [vmem:[%s15654_s25 + $0x2be0] sm:$0xff]  ;;  %10389 = vmatpush1.bf16.msra.mxu0 %v14379_v28 }
 0x22f   : > { %v2276_v25 = vld [vmem:[%s15654_s25 + $0x2fc0] sm:$0xff]  ;;  %v14500_v31 = vcombine.high %v2148_v21, %v2152_v23  ;;  %10429 = vmatprep.subr.bf16.mxu1 %v14508_v27  ;;  %v14499_v0 = vcombine.low %v2148_v21, %v2152_v23 }
 0x230   : > { %v2280_v26 = vld [vmem:[%s15654_s25 + $0x2fe0] sm:$0xff]  ;;  %10430 = vmatpush1.bf16.msra.mxu1 %v14507_v30 }
 0x231   : > { %v14628_v32 = vcombine.high %v2276_v25, %v2280_v26  ;;  %v2140_v37 = vld [vmem:[%s15654_s25 + $0x2b80] sm:$0xff]  ;;  %10390 = vmatprep.subr.bf16.mxu0 %v14500_v31  ;;  %v14627_v44 = vcombine.low %v2276_v25, %v2280_v26 }
 0x232   : > { %v2144_v38 = vld [vmem:[%s15654_s25 + $0x2ba0] sm:$0xff]  ;;  %10391 = vmatpush2.bf16.msra.mxu0 %v14499_v0 }
 0x233   : > { %v2268_v42 = vld [vmem:[%s15654_s25 + $0x2f80] sm:$0xff]  ;;  %v14492_v48 = vcombine.high %v2140_v37, %v2144_v38  ;;  %10431 = vmatprep.subr.bf16.mxu1 %v14628_v32  ;;  %v14491_v61 = vcombine.low %v2140_v37, %v2144_v38 }
 0x234   : > { %v2272_v34 = vld [vmem:[%s15654_s25 + $0x2fa0] sm:$0xff]  ;;  %10432 = vmatpush2.bf16.msra.mxu1 %v14627_v44 }
 0x235   : > { %v14620_v6 = vcombine.high %v2268_v42, %v2272_v34  ;;  %v2132_v50 = vld [vmem:[%s15654_s25 + $0x2b40] sm:$0xff]  ;;  %10392 = vmatprep.subr.bf16.mxu0 %v14492_v48  ;;  %v14619_v62 = vcombine.low %v2268_v42, %v2272_v34 }
 0x236   : > { %v2136_v41 = vld [vmem:[%s15654_s25 + $0x2b60] sm:$0xff]  ;;  %10393 = vmatpush2.bf16.msra.mxu0 %v14491_v61 }
 0x237   : > { %v2260_v55 = vld [vmem:[%s15654_s25 + $0x2f40] sm:$0xff]  ;;  %v14484_v57 = vcombine.high %v2132_v50, %v2136_v41  ;;  %10433 = vmatprep.subr.bf16.mxu1 %v14620_v6  ;;  %v14483_v8 = vcombine.low %v2132_v50, %v2136_v41 }
 0x238   : > { %v2264_v56 = vld [vmem:[%s15654_s25 + $0x2f60] sm:$0xff]  ;;  %10434 = vmatpush2.bf16.msra.mxu1 %v14619_v62 }
 0x239   : > { %v14612_v63 = vcombine.high %v2260_v55, %v2264_v56  ;;  %v2124_v1 = vld [vmem:[%s15654_s25 + $0x2b00] sm:$0xff]  ;;  %10394 = vmatprep.subr.bf16.mxu0 %v14484_v57  ;;  %v14611_v9 = vcombine.low %v2260_v55, %v2264_v56 }
 0x23a   : > { %v2128_v13 = vld [vmem:[%s15654_s25 + $0x2b20] sm:$0xff]  ;;  %10395 = vmatpush2.bf16.msra.mxu0 %v14483_v8 }
 0x23b   : > { %v2252_v60 = vld [vmem:[%s15654_s25 + $0x2f00] sm:$0xff]  ;;  %v14476_v11 = vcombine.high %v2124_v1, %v2128_v13  ;;  %10435 = vmatprep.subr.bf16.mxu1 %v14612_v63  ;;  %v14475_v23 = vcombine.low %v2124_v1, %v2128_v13 }
 0x23c   : > { %v2256_v7 = vld [vmem:[%s15654_s25 + $0x2f20] sm:$0xff]  ;;  %10436 = vmatpush2.bf16.msra.mxu1 %v14611_v9  ;;  %v805_v9 = vld [vmem:[%s15654_s25 + $0x1c8] sm:$0xff] }
 0x23d   : > { %v14604_v15 = vcombine.high %v2252_v60, %v2256_v7  ;;  %v2116_v22 = vld [vmem:[%s15654_s25 + $0x2ac0] sm:$0xff]  ;;  %10396 = vmatprep.subr.bf16.mxu0 %v14476_v11  ;;  %v14603_v25 = vcombine.low %v2252_v60, %v2256_v7  ;;  %v809_v11 = vld [vmem:[%s15654_s25 + $0x1e8] sm:$0xff] }
 0x23e   : > { %v2120_v19 = vld [vmem:[%s15654_s25 + $0x2ae0] sm:$0xff]  ;;  %10397 = vmatpush2.bf16.msra.mxu0 %v14475_v23 }
 0x23f   : > { %v2244_v27 = vld [vmem:[%s15654_s25 + $0x2ec0] sm:$0xff]  ;;  %v14468_v26 = vcombine.high %v2116_v22, %v2120_v19  ;;  %10437 = vmatprep.subr.bf16.mxu1 %v14604_v15  ;;  %v14467_v38 = vcombine.low %v2116_v22, %v2120_v19  ;;  %v933_v15 = vld [vmem:[%s15654_s25 + $0x5c8] sm:$0xff] }
 0x240   : > { %v2248_v21 = vld [vmem:[%s15654_s25 + $0x2ee0] sm:$0xff]  ;;  %10438 = vmatpush2.bf16.msra.mxu1 %v14603_v25  ;;  %v937_v22 = vld [vmem:[%s15654_s25 + $0x5e8] sm:$0xff] }
 0x241   : > { %v14596_v28 = vcombine.high %v2244_v27, %v2248_v21  ;;  %v2108_v30 = vld [vmem:[%s15654_s25 + $0x2a80] sm:$0xff]  ;;  %10398 = vmatprep.subr.bf16.mxu0 %v14468_v26  ;;  %v14595_v42 = vcombine.low %v2244_v27, %v2248_v21  ;;  %v13158_v21 = vcombine.high %v805_v9, %v809_v11  ;;  %v13286_v23 = vcombine.high %v933_v15, %v937_v22  ;;  %v797_v25 = vld [vmem:[%s15654_s25 + $0x188] sm:$0xff] }
 0x242   : > { %v2112_v31 = vld [vmem:[%s15654_s25 + $0x2aa0] sm:$0xff]  ;;  %10399 = vmatpush2.bf16.msra.mxu0 %v14467_v38  ;;  %v801_v26 = vld [vmem:[%s15654_s25 + $0x1a8] sm:$0xff]  ;;  %v13285_v38 = vcombine.low %v933_v15, %v937_v22 }
 0x243   : > { %v2236_v32 = vld [vmem:[%s15654_s25 + $0x2e80] sm:$0xff]  ;;  %v14460_v34 = vcombine.high %v2108_v30, %v2112_v31  ;;  %10439 = vmatprep.subr.bf16.mxu1 %v14596_v28  ;;  %v14459_v41 = vcombine.low %v2108_v30, %v2112_v31  ;;  %v16241_v28 = vpack.c.bf16 %v16140_v14, %v16140_v14  ;;  %v925_v30 = vld [vmem:[%s15654_s25 + $0x588] sm:$0xff] }
 0x244   : > { %v2240_v37 = vld [vmem:[%s15654_s25 + $0x2ea0] sm:$0xff]  ;;  %10440 = vmatpush2.bf16.msra.mxu1 %v14595_v42  ;;  %v929_v31 = vld [vmem:[%s15654_s25 + $0x5a8] sm:$0xff]  ;;  %v13150_v42 = vcombine.high %v797_v25, %v801_v26 }
 0x245   : > { %v14588_v0 = vcombine.high %v2236_v32, %v2240_v37  ;;  %v2100_v44 = vld [vmem:[%s15654_s25 + $0x2a40] sm:$0xff]  ;;  %10400 = vmatprep.subr.bf16.mxu0 %v14460_v34  ;;  %v14587_v55 = vcombine.low %v2236_v32, %v2240_v37  ;;  %v16247_v32 = vpack.c.bf16 %v16145_v16, %v16145_v16  ;;  %v13157_v37 = vcombine.low %v805_v9, %v809_v11 }
 0x246   : > { %v2104_v48 = vld [vmem:[%s15654_s25 + $0x2a60] sm:$0xff]  ;;  %10401 = vmatpush2.bf16.msra.mxu0 %v14459_v41  ;;  %v13278_v34 = vcombine.high %v925_v30, %v929_v31  ;;  %v13149_v41 = vcombine.low %v797_v25, %v801_v26  ;;  %v777_v25 = vld [vmem:[%s15654_s25 + $0xe8] sm:$0xff] }
 0x247   : > { %v2228_v6 = vld [vmem:[%s15654_s25 + $0x2e40] sm:$0xff]  ;;  %v14452_v56 = vcombine.high %v2100_v44, %v2104_v48  ;;  %10441 = vmatprep.subr.bf16.mxu1 %v14588_v0  ;;  %v14451_v13 = vcombine.low %v2100_v44, %v2104_v48  ;;  %v789_v0 = vld [vmem:[%s15654_s25 + $0x148] sm:$0xff] }
 0x248   : > { %v2232_v50 = vld [vmem:[%s15654_s25 + $0x2e60] sm:$0xff]  ;;  %10442 = vmatpush2.bf16.msra.mxu1 %v14587_v55  ;;  %v793_v44 = vld [vmem:[%s15654_s25 + $0x168] sm:$0xff] }
 0x249   : > { %v14580_v61 = vcombine.high %v2228_v6, %v2232_v50  ;;  %v2092_v62 = vld [vmem:[%s15654_s25 + $0x2a00] sm:$0xff]  ;;  %10402 = vmatprep.subr.bf16.mxu0 %v14452_v56  ;;  %v14579_v60 = vcombine.low %v2228_v6, %v2232_v50  ;;  %v917_v48 = vld [vmem:[%s15654_s25 + $0x548] sm:$0xff]  ;;  %v13277_v56 = vcombine.low %v925_v30, %v929_v31 }
 0x24a   : > { %v2096_v57 = vld [vmem:[%s15654_s25 + $0x2a20] sm:$0xff]  ;;  %10403 = vmatpush2.bf16.msra.mxu0 %v14451_v13  ;;  %v921_v6 = vld [vmem:[%s15654_s25 + $0x568] sm:$0xff] }
 0x24b   : > { %v2220_v63 = vld [vmem:[%s15654_s25 + $0x2e00] sm:$0xff]  ;;  %v14444_v7 = vcombine.high %v2092_v62, %v2096_v57  ;;  %10443 = vmatprep.subr.bf16.mxu1 %v14580_v61  ;;  %v14443_v19 = vcombine.low %v2092_v62, %v2096_v57  ;;  %v13142_v61 = vcombine.high %v789_v0, %v793_v44  ;;  %v785_v13 = vld [vmem:[%s15654_s25 + $0x128] sm:$0xff]  ;;  %v13269_v22 = vcombine.low %v917_v48, %v921_v6 }
 0x24c   : > { %v2224_v1 = vld [vmem:[%s15654_s25 + $0x2e20] sm:$0xff]  ;;  %10444 = vmatpush2.bf16.msra.mxu1 %v14579_v60  ;;  %v901_v26 = vld [vmem:[%s15654_s25 + $0x4c8] sm:$0xff] }
 0x24d   : > { %v14572_v8 = vcombine.high %v2220_v63, %v2224_v1  ;;  %10404 = vmatprep.subr.bf16.mxu0 %v14444_v7  ;;  %v14571_v27 = vcombine.low %v2220_v63, %v2224_v1  ;;  %v781_v1 = vld [vmem:[%s15654_s25 + $0x108] sm:$0xff] }
 0x24e   : > { %10405 = vmatpush2.bf16.msra.mxu0 %v14443_v19  ;;  %v909_v7 = vld [vmem:[%s15654_s25 + $0x508] sm:$0xff]  ;;  %v13134_v19 = vcombine.high %v781_v1, %v785_v13  ;;  %v13133_v31 = vcombine.low %v781_v1, %v785_v13 }
 0x24f   : > { %10445 = vmatprep.subr.bf16.mxu1 %v14572_v8  ;;  %10456 = vmatprep.subr.bf16.mxu0 %v13158_v21  ;;  %v913_v8 = vld [vmem:[%s15654_s25 + $0x528] sm:$0xff] }
 0x250   : > { %10446 = vmatpush2.bf16.msra.mxu1 %v14571_v27  ;;  %v10162_v14 = vpop.f32.mrf.mxu0  ;;  %v13262_v21 = vcombine.high %v909_v7, %v913_v8  ;;  %v905_v30 = vld [vmem:[%s15654_s25 + $0x4e8] sm:$0xff] }
 0x251   : > { %10497 = vmatprep.subr.bf16.mxu1 %v13286_v23  ;;  %10407 = vmatmul.mubr.bf16.vlgmr.msra.gmra.mxu0 %v16241_v28  ;;  %v10163_v50 = vadd.f32 %v10162_v14, %v16174_v39  ;;  %v13270_v39 = vcombine.high %v917_v48, %v921_v6  ;;  %v773_v23 = vld [vmem:[%s15654_s25 + $0xc8] sm:$0xff]  ;;  %v13253_v6 = vcombine.low %v901_v26, %v905_v30 }
 0x252   : > { %v10203_v16 = vpop.f32.mrf.mxu1  ;;  %10457 = vmatpush1.bf16.msra.mxu0 %v13157_v37  ;;  %v10164_v55 = vpop.f32.mrf.mxu0  ;;  %10488 = vmatprep.mubr.bf16.mxu0 %v15730_v12  ;;  %v13261_v37 = vcombine.low %v909_v7, %v913_v8  ;;  %v897_v14 = vld [vmem:[%s15654_s25 + $0x4a8] sm:$0xff]  ;;  %v13125_v48 = vcombine.low %v773_v23, %v777_v25 }
 0x253   : > { %10448 = vmatmul.mubr.bf16.vlgmr.msra.gmra.mxu1 %v16247_v32  ;;  %10458 = vmatprep.subr.bf16.mxu0 %v13150_v42  ;;  %v16256_v62 = vadd.f32 %v10203_v16, %v10163_v50  ;;  %v10165_v57 = vadd.f32 %v10164_v55, %v16183_v24  ;;  %v13141_v24 = vcombine.low %v789_v0, %v793_v44  ;;  %v769_v0 = vld [vmem:[%s15654_s25 + $0xa8] sm:$0xff] }
 0x254   : > { %10498 = vmatpush1.bf16.msra.mxu1 %v13285_v38  ;;  %v10205_v63 = vpop.f32.mrf.mxu1  ;;  %v10166_v60 = vpop.f32.mrf.mxu0  ;;  %10529 = vmatprep.mubr.bf16.mxu1 %v15737_v17  ;;  %v13126_v38 = vcombine.high %v773_v23, %v777_v25  ;;  %v13254_v42 = vcombine.high %v901_v26, %v905_v30  ;;  %v893_v44 = vld [vmem:[%s15654_s25 + $0x488] sm:$0xff] }
 0x255   : > { %10499 = vmatprep.subr.bf16.mxu1 %v13278_v34  ;;  %v16265_v9 = vadd.f32 %v10205_v63, %v10165_v57  ;;  %v765_v34 = vld [vmem:[%s15654_s25 + $0x88] sm:$0xff]  ;;  %v13246_v16 = vcombine.high %v893_v44, %v897_v14  ;;  %v13245_v63 = vcombine.low %v893_v44, %v897_v14 }
 0x256   : > { %v10207_v11 = vpop.f32.mrf.mxu1  ;;  %10459 = vmatpush1.bf16.msra.mxu0 %v13149_v41  ;;  %v10167_v15 = vpop.f32.mrf.mxu0  ;;  %v13118_v50 = vcombine.high %v765_v34, %v769_v0  ;;  %v757_v41 = vld [vmem:[%s15654_s25 + $0x48] sm:$0xff]  ;;  %v13117_v57 = vcombine.low %v765_v34, %v769_v0 }
 0x257   : > { %10460 = vmatprep.subr.bf16.mxu0 %v13142_v61  ;;  %v761_v55 = vld [vmem:[%s15654_s25 + $0x68] sm:$0xff] }
 0x258   : > { %10500 = vmatpush1.bf16.msra.mxu1 %v13277_v56  ;;  %v10208_v27 = vpop.f32.mrf.mxu1  ;;  %v885_v56 = vld [vmem:[%s15654_s25 + $0x448] sm:$0xff]  ;;  %v13109_v11 = vcombine.low %v757_v41, %v761_v55 }
 0x259   : > { %10501 = vmatprep.subr.bf16.mxu1 %v13270_v39  ;;  %v889_v61 = vld [vmem:[%s15654_s25 + $0x468] sm:$0xff]  ;;  %v13110_v39 = vcombine.high %v757_v41, %v761_v55 }
 0x25a   : > { %10461 = vmatpush1.bf16.msra.mxu0 %v13141_v24  ;;  %v13238_v1 = vcombine.high %v885_v56, %v889_v61  ;;  %v749_v13 = vld [vmem:[%s15654_s25 + $0x8] sm:$0xff]  ;;  %v13237_v24 = vcombine.low %v885_v56, %v889_v61 }
 0x25b   : > { %10462 = vmatprep.subr.bf16.mxu0 %v13134_v19  ;;  %v753_v60 = vld [vmem:[%s15654_s25 + $0x28] sm:$0xff] }
 0x25c   : > { %10502 = vmatpush1.bf16.msra.mxu1 %v13269_v22  ;;  %v877_v7 = vld [vmem:[%s15654_s25 + $0x408] sm:$0xff]  ;;  %v13102_v15 = vcombine.high %v749_v13, %v753_v60  ;;  %v13101_v25 = vcombine.low %v749_v13, %v753_v60 }
 0x25d   : > { %10503 = vmatprep.subr.bf16.mxu1 %v13262_v21  ;;  %v881_v8 = vld [vmem:[%s15654_s25 + $0x428] sm:$0xff] }
 0x25e   : > { %10463 = vmatpush1.bf16.msra.mxu0 %v13133_v31  ;;  %v13230_v22 = vcombine.high %v877_v7, %v881_v8  ;;  %v869_v19 = vld [vmem:[%s15654_s25 + $0x3c8] sm:$0xff]  ;;  %v13229_v26 = vcombine.low %v877_v7, %v881_v8 }
 0x25f   : > { %10464 = vmatprep.subr.bf16.mxu0 %v13126_v38  ;;  %v873_v27 = vld [vmem:[%s15654_s25 + $0x3e8] sm:$0xff] }
 0x260   : > { %10504 = vmatpush1.bf16.msra.mxu1 %v13261_v37  ;;  %v997_v21 = vld [vmem:[%s15654_s25 + $0x7c8] sm:$0xff]  ;;  %v13222_v30 = vcombine.high %v869_v19, %v873_v27  ;;  %v13221_v0 = vcombine.low %v869_v19, %v873_v27 }
 0x261   : > { %10505 = vmatprep.subr.bf16.mxu1 %v13254_v42  ;;  %v1001_v23 = vld [vmem:[%s15654_s25 + $0x7e8] sm:$0xff] }
 0x262   : > { %10465 = vmatpush1.bf16.msra.mxu0 %v13125_v48  ;;  %v13350_v31 = vcombine.high %v997_v21, %v1001_v23  ;;  %v861_v37 = vld [vmem:[%s15654_s25 + $0x388] sm:$0xff]  ;;  %v13349_v44 = vcombine.low %v997_v21, %v1001_v23 }
 0x263   : > { %10466 = vmatprep.subr.bf16.mxu0 %v13118_v50  ;;  %v865_v38 = vld [vmem:[%s15654_s25 + $0x3a8] sm:$0xff] }
 0x264   : > { %10506 = vmatpush1.bf16.msra.mxu1 %v13253_v6  ;;  %v989_v42 = vld [vmem:[%s15654_s25 + $0x788] sm:$0xff]  ;;  %v13214_v14 = vcombine.high %v861_v37, %v865_v38  ;;  %v13213_v55 = vcombine.low %v861_v37, %v865_v38 }
 0x265   : > { %10507 = vmatprep.subr.bf16.mxu1 %v13246_v16  ;;  %v993_v34 = vld [vmem:[%s15654_s25 + $0x7a8] sm:$0xff] }
 0x266   : > { %10467 = vmatpush1.bf16.msra.mxu0 %v13117_v57  ;;  %v13342_v48 = vcombine.high %v989_v42, %v993_v34  ;;  %v853_v6 = vld [vmem:[%s15654_s25 + $0x348] sm:$0xff]  ;;  %v13341_v56 = vcombine.low %v989_v42, %v993_v34 }
 0x267   : > { %10468 = vmatprep.subr.bf16.mxu0 %v13110_v39  ;;  %v857_v50 = vld [vmem:[%s15654_s25 + $0x368] sm:$0xff] }
 0x268   : > { %10508 = vmatpush1.bf16.msra.mxu1 %v13245_v63  ;;  %v981_v16 = vld [vmem:[%s15654_s25 + $0x748] sm:$0xff]  ;;  %v13206_v61 = vcombine.high %v853_v6, %v857_v50  ;;  %v13205_v60 = vcombine.low %v853_v6, %v857_v50 }
 0x269   : > { %10509 = vmatprep.subr.bf16.mxu1 %v13238_v1  ;;  %v985_v41 = vld [vmem:[%s15654_s25 + $0x768] sm:$0xff] }
 0x26a   : > { %10469 = vmatpush1.bf16.msra.mxu0 %v13109_v11  ;;  %v13334_v57 = vcombine.high %v981_v16, %v985_v41  ;;  %v845_v63 = vld [vmem:[%s15654_s25 + $0x308] sm:$0xff]  ;;  %v13333_v7 = vcombine.low %v981_v16, %v985_v41 }
 0x26b   : > { %10470 = vmatprep.subr.bf16.mxu0 %v13102_v15  ;;  %v849_v39 = vld [vmem:[%s15654_s25 + $0x328] sm:$0xff] }
 0x26c   : > { %10510 = vmatpush1.bf16.msra.mxu1 %v13237_v24  ;;  %v973_v1 = vld [vmem:[%s15654_s25 + $0x708] sm:$0xff]  ;;  %v13198_v8 = vcombine.high %v845_v63, %v849_v39  ;;  %v13197_v27 = vcombine.low %v845_v63, %v849_v39 }
 0x26d   : > { %10511 = vmatprep.subr.bf16.mxu1 %v13230_v22  ;;  %v977_v13 = vld [vmem:[%s15654_s25 + $0x728] sm:$0xff] }
 0x26e   : > { %10471 = vmatpush1.bf16.msra.mxu0 %v13101_v25  ;;  %v13326_v11 = vcombine.high %v973_v1, %v977_v13  ;;  %v837_v24 = vld [vmem:[%s15654_s25 + $0x2c8] sm:$0xff]  ;;  %v13325_v21 = vcombine.low %v973_v1, %v977_v13 }
 0x26f   : > { %10472 = vmatprep.subr.bf16.mxu0 %v13222_v30  ;;  %v841_v15 = vld [vmem:[%s15654_s25 + $0x2e8] sm:$0xff] }
 0x270   : > { %10512 = vmatpush1.bf16.msra.mxu1 %v13229_v26  ;;  %v965_v22 = vld [vmem:[%s15654_s25 + $0x6c8] sm:$0xff]  ;;  %v13190_v23 = vcombine.high %v837_v24, %v841_v15  ;;  %v13189_v38 = vcombine.low %v837_v24, %v841_v15 }
 0x271   : > { %10513 = vmatprep.subr.bf16.mxu1 %v13350_v31  ;;  %v969_v19 = vld [vmem:[%s15654_s25 + $0x6e8] sm:$0xff] }
 0x272   : > { %10473 = vmatpush2.bf16.msra.mxu0 %v13221_v0  ;;  %v13318_v25 = vcombine.high %v965_v22, %v969_v19  ;;  %v829_v26 = vld [vmem:[%s15654_s25 + $0x288] sm:$0xff]  ;;  %v13317_v42 = vcombine.low %v965_v22, %v969_v19 }
 0x273   : > { %10474 = vmatprep.subr.bf16.mxu0 %v13214_v14  ;;  %v833_v30 = vld [vmem:[%s15654_s25 + $0x2a8] sm:$0xff] }
 0x274   : > { %10514 = vmatpush2.bf16.msra.mxu1 %v13349_v44  ;;  %v957_v31 = vld [vmem:[%s15654_s25 + $0x688] sm:$0xff]  ;;  %v13182_v34 = vcombine.high %v829_v26, %v833_v30  ;;  %v13181_v50 = vcombine.low %v829_v26, %v833_v30 }
 0x275   : > { %10515 = vmatprep.subr.bf16.mxu1 %v13342_v48  ;;  %v961_v37 = vld [vmem:[%s15654_s25 + $0x6a8] sm:$0xff] }
 0x276   : > { %10475 = vmatpush2.bf16.msra.mxu0 %v13213_v55  ;;  %v13310_v0 = vcombine.high %v957_v31, %v961_v37  ;;  %v821_v44 = vld [vmem:[%s15654_s25 + $0x248] sm:$0xff]  ;;  %v13309_v16 = vcombine.low %v957_v31, %v961_v37 }
 0x277   : > { %10476 = vmatprep.subr.bf16.mxu0 %v13206_v61  ;;  %v825_v14 = vld [vmem:[%s15654_s25 + $0x268] sm:$0xff] }
 0x278   : > { %10516 = vmatpush2.bf16.msra.mxu1 %v13341_v56  ;;  %v949_v48 = vld [vmem:[%s15654_s25 + $0x648] sm:$0xff]  ;;  %v13174_v41 = vcombine.high %v821_v44, %v825_v14  ;;  %v13173_v39 = vcombine.low %v821_v44, %v825_v14 }
 0x279   : > { %10517 = vmatprep.subr.bf16.mxu1 %v13334_v57  ;;  %v953_v6 = vld [vmem:[%s15654_s25 + $0x668] sm:$0xff] }
 0x27a   : > { %10477 = vmatpush2.bf16.msra.mxu0 %v13205_v60  ;;  %v13302_v55 = vcombine.high %v949_v48, %v953_v6  ;;  %v813_v56 = vld [vmem:[%s15654_s25 + $0x208] sm:$0xff]  ;;  %v13301_v1 = vcombine.low %v949_v48, %v953_v6 }
 0x27b   : > { %10478 = vmatprep.subr.bf16.mxu0 %v13198_v8  ;;  %v817_v61 = vld [vmem:[%s15654_s25 + $0x228] sm:$0xff] }
 0x27c   : > { %10518 = vmatpush2.bf16.msra.mxu1 %v13333_v7  ;;  %v941_v57 = vld [vmem:[%s15654_s25 + $0x608] sm:$0xff]  ;;  %v13166_v13 = vcombine.high %v813_v56, %v817_v61  ;;  %v13165_v15 = vcombine.low %v813_v56, %v817_v61 }
 0x27d   : > { %10519 = vmatprep.subr.bf16.mxu1 %v13326_v11  ;;  %v945_v63 = vld [vmem:[%s15654_s25 + $0x628] sm:$0xff] }
 0x27e   : > { %10479 = vmatpush2.bf16.msra.mxu0 %v13197_v27  ;;  %v13294_v60 = vcombine.high %v941_v57, %v945_v63  ;;  %v1061_v7 = vld [vmem:[%s15654_s25 + $0x9c8] sm:$0xff]  ;;  %v13293_v22 = vcombine.low %v941_v57, %v945_v63 }
 0x27f   : > { %10480 = vmatprep.subr.bf16.mxu0 %v13190_v23  ;;  %v1065_v8 = vld [vmem:[%s15654_s25 + $0x9e8] sm:$0xff] }
 0x280   : > { %10520 = vmatpush2.bf16.msra.mxu1 %v13325_v21  ;;  %v1189_v11 = vld [vmem:[%s15654_s25 + $0xdc8] sm:$0xff]  ;;  %v13414_v19 = vcombine.high %v1061_v7, %v1065_v8  ;;  %v13413_v30 = vcombine.low %v1061_v7, %v1065_v8 }
 0x281   : > { %10521 = vmatprep.subr.bf16.mxu1 %v13318_v25  ;;  %v1193_v24 = vld [vmem:[%s15654_s25 + $0xde8] sm:$0xff] }
 0x282   : > { %10481 = vmatpush2.bf16.msra.mxu0 %v13189_v38  ;;  %v13542_v27 = vcombine.high %v1189_v11, %v1193_v24  ;;  %v1053_v21 = vld [vmem:[%s15654_s25 + $0x988] sm:$0xff]  ;;  %v13541_v31 = vcombine.low %v1189_v11, %v1193_v24 }
 0x283   : > { %10482 = vmatprep.subr.bf16.mxu0 %v13182_v34  ;;  %v1057_v23 = vld [vmem:[%s15654_s25 + $0x9a8] sm:$0xff] }
 0x284   : > { %10522 = vmatpush2.bf16.msra.mxu1 %v13317_v42  ;;  %v1181_v25 = vld [vmem:[%s15654_s25 + $0xd88] sm:$0xff]  ;;  %v13406_v37 = vcombine.high %v1053_v21, %v1057_v23 }
 0x285   : > { %10523 = vmatprep.subr.bf16.mxu1 %v13310_v0  ;;  %v1185_v26 = vld [vmem:[%s15654_s25 + $0xda8] sm:$0xff] }
 0x286   : > { %10483 = vmatpush2.bf16.msra.mxu0 %v13181_v50  ;;  %v13534_v38 = vcombine.high %v1181_v25, %v1185_v26  ;;  %v1045_v42 = vld [vmem:[%s15654_s25 + $0x948] sm:$0xff]  ;;  %v13405_v50 = vcombine.low %v1053_v21, %v1057_v23 }
 0x287   : > { %10484 = vmatprep.subr.bf16.mxu0 %v13174_v41  ;;  %v1049_v34 = vld [vmem:[%s15654_s25 + $0x968] sm:$0xff]  ;;  %v13533_v41 = vcombine.low %v1181_v25, %v1185_v26 }
 0x288   : > { %10524 = vmatpush2.bf16.msra.mxu1 %v13309_v16  ;;  %v1173_v44 = vld [vmem:[%s15654_s25 + $0xd48] sm:$0xff] }
 0x289   : > { %10525 = vmatprep.subr.bf16.mxu1 %v13302_v55  ;;  %v1177_v14 = vld [vmem:[%s15654_s25 + $0xd68] sm:$0xff]  ;;  %v13398_v55 = vcombine.high %v1045_v42, %v1049_v34 }
 0x28a   : > { %10485 = vmatpush2.bf16.msra.mxu0 %v13173_v39  ;;  %v1037_v63 = vld [vmem:[%s15654_s25 + $0x908] sm:$0xff]  ;;  %v13525_v24 = vcombine.low %v1173_v44, %v1177_v14 }
 0x28b   : > { %10486 = vmatprep.subr.bf16.mxu0 %v13166_v13  ;;  %v1041_v39 = vld [vmem:[%s15654_s25 + $0x928] sm:$0xff] }
 0x28c   : > { %10526 = vmatpush2.bf16.msra.mxu1 %v13301_v1  ;;  %v1165_v13 = vld [vmem:[%s15654_s25 + $0xd08] sm:$0xff]  ;;  %v13389_v26 = vcombine.low %v1037_v63, %v1041_v39 }
 0x28d   : > { %10527 = vmatprep.subr.bf16.mxu1 %v13294_v60  ;;  %v1169_v60 = vld [vmem:[%s15654_s25 + $0xd28] sm:$0xff] }
 0x28e   : > { %10487 = vmatpush2.bf16.msra.mxu0 %v13165_v15  ;;  %v13390_v15 = vcombine.high %v1037_v63, %v1041_v39  ;;  %v1033_v21 = vld [vmem:[%s15654_s25 + $0x8e8] sm:$0xff] }
 0x28f   : > { %10538 = vmatprep.subr.bf16.mxu0 %v13414_v19  ;;  %v13518_v19 = vcombine.high %v1165_v13, %v1169_v60  ;;  %v1157_v23 = vld [vmem:[%s15654_s25 + $0xcc8] sm:$0xff] }
 0x290   : > { %10528 = vmatpush2.bf16.msra.mxu1 %v13293_v22  ;;  %v1161_v25 = vld [vmem:[%s15654_s25 + $0xce8] sm:$0xff] }
 0x291   : > { %10579 = vmatprep.subr.bf16.mxu1 %v13542_v27  ;;  %v10244_v0 = vpop.f32.mrf.mxu0  ;;  %10489 = vmatmul.mubr.bf16.vlgmr.msra.gmra.mxu0 %v15785_v36  ;;  %v1029_v27 = vld [vmem:[%s15654_s25 + $0x8c8] sm:$0xff] }
 0x292   : > { %v10245_v48 = vadd.f32 %v10244_v0, %v16256_v62  ;;  %10539 = vmatpush1.bf16.msra.mxu0 %v13413_v30  ;;  %v13526_v62 = vcombine.high %v1173_v44, %v1177_v14  ;;  %10570 = vmatprep.mubr.bf16.mxu0 %v15797_v47  ;;  %v13517_v30 = vcombine.low %v1165_v13, %v1169_v60  ;;  %v1153_v0 = vld [vmem:[%s15654_s25 + $0xca8] sm:$0xff] }
 0x293   : > { %v10285_v6 = vpop.f32.mrf.mxu1  ;;  %10530 = vmatmul.mubr.bf16.vlgmr.msra.gmra.mxu1 %v15793_v40  ;;  %v10246_v16 = vpop.f32.mrf.mxu0  ;;  %10540 = vmatprep.subr.bf16.mxu0 %v13406_v37  ;;  %v13510_v37 = vcombine.high %v1157_v23, %v1161_v25  ;;  %v13381_v44 = vcombine.low %v1029_v27, %v1033_v21  ;;  %v13509_v14 = vcombine.low %v1157_v23, %v1161_v25  ;;  %v1005_v39 = vld [vmem:[%s15654_s25 + $0x808] sm:$0xff] }
 0x294   : > { %10580 = vmatpush1.bf16.msra.mxu1 %v13541_v31  ;;  %v16330_v56 = vadd.f32 %v10285_v6, %v10245_v48  ;;  %v10247_v61 = vadd.f32 %v10246_v16, %v16265_v9  ;;  %10611 = vmatprep.mubr.bf16.mxu1 %v15802_v49  ;;  %v13397_v9 = vcombine.low %v1045_v42, %v1049_v34  ;;  %v1025_v42 = vld [vmem:[%s15654_s25 + $0x8a8] sm:$0xff] }
 0x295   : > { %v10287_v57 = vpop.f32.mrf.mxu1  ;;  %10581 = vmatprep.subr.bf16.mxu1 %v13534_v38  ;;  %v10248_v1 = vpop.f32.mrf.mxu0  ;;  %v13382_v31 = vcombine.high %v1029_v27, %v1033_v21  ;;  %v1021_v38 = vld [vmem:[%s15654_s25 + $0x888] sm:$0xff] }
 0x296   : > { %v16339_v7 = vadd.f32 %v10287_v57, %v10247_v61  ;;  %10541 = vmatpush1.bf16.msra.mxu0 %v13405_v50  ;;  %v1149_v34 = vld [vmem:[%s15654_s25 + $0xc88] sm:$0xff]  ;;  %v13374_v48 = vcombine.high %v1021_v38, %v1025_v42  ;;  %v13373_v61 = vcombine.low %v1021_v38, %v1025_v42 }
 0x297   : > { %v10289_v8 = vpop.f32.mrf.mxu1  ;;  %v10249_v11 = vpop.f32.mrf.mxu0  ;;  %10542 = vmatprep.subr.bf16.mxu0 %v13398_v55  ;;  %v13502_v6 = vcombine.high %v1149_v34, %v1153_v0  ;;  %v1013_v50 = vld [vmem:[%s15654_s25 + $0x848] sm:$0xff]  ;;  %v13501_v57 = vcombine.low %v1149_v34, %v1153_v0 }
 0x298   : > { %10582 = vmatpush1.bf16.msra.mxu1 %v13533_v41  ;;  %v1017_v16 = vld [vmem:[%s15654_s25 + $0x868] sm:$0xff] }
 0x299   : > { %v10290_v22 = vpop.f32.mrf.mxu1  ;;  %10583 = vmatprep.subr.bf16.mxu1 %v13526_v62  ;;  %v1141_v41 = vld [vmem:[%s15654_s25 + $0xc48] sm:$0xff]  ;;  %v13366_v62 = vcombine.high %v1013_v50, %v1017_v16  ;;  %v13365_v8 = vcombine.low %v1013_v50, %v1017_v16 }
 0x29a   : > { %10543 = vmatpush1.bf16.msra.mxu0 %v13397_v9  ;;  %v1145_v55 = vld [vmem:[%s15654_s25 + $0xc68] sm:$0xff] }
 0x29b   : > { %10544 = vmatprep.subr.bf16.mxu0 %v13390_v15  ;;  %v13494_v63 = vcombine.high %v1141_v41, %v1145_v55  ;;  %v1009_v1 = vld [vmem:[%s15654_s25 + $0x828] sm:$0xff]  ;;  %v13493_v9 = vcombine.low %v1141_v41, %v1145_v55 }
 0x29c   : > { %10584 = vmatpush1.bf16.msra.mxu1 %v13525_v24  ;;  %v1133_v13 = vld [vmem:[%s15654_s25 + $0xc08] sm:$0xff]  ;;  %v13358_v11 = vcombine.high %v1005_v39, %v1009_v1  ;;  %v13357_v21 = vcombine.low %v1005_v39, %v1009_v1 }
 0x29d   : > { %10585 = vmatprep.subr.bf16.mxu1 %v13518_v19  ;;  %v1137_v60 = vld [vmem:[%s15654_s25 + $0xc28] sm:$0xff] }
 0x29e   : > { %10545 = vmatpush1.bf16.msra.mxu0 %v13389_v26  ;;  %v13486_v24 = vcombine.high %v1133_v13, %v1137_v60  ;;  %v1125_v15 = vld [vmem:[%s15654_s25 + $0xbc8] sm:$0xff]  ;;  %v13485_v23 = vcombine.low %v1133_v13, %v1137_v60 }
 0x29f   : > { %10546 = vmatprep.subr.bf16.mxu0 %v13382_v31  ;;  %v1129_v22 = vld [vmem:[%s15654_s25 + $0xbe8] sm:$0xff] }
 0x2a0   : > { %10586 = vmatpush1.bf16.msra.mxu1 %v13517_v30  ;;  %v1253_v19 = vld [vmem:[%s15654_s25 + $0xfc8] sm:$0xff]  ;;  %v13478_v25 = vcombine.high %v1125_v15, %v1129_v22  ;;  %v13477_v42 = vcombine.low %v1125_v15, %v1129_v22 }
 0x2a1   : > { %10587 = vmatprep.subr.bf16.mxu1 %v13510_v37  ;;  %v1257_v27 = vld [vmem:[%s15654_s25 + $0xfe8] sm:$0xff] }
 0x2a2   : > { %10547 = vmatpush1.bf16.msra.mxu0 %v13381_v44  ;;  %v13606_v26 = vcombine.high %v1253_v19, %v1257_v27  ;;  %v1117_v30 = vld [vmem:[%s15654_s25 + $0xb88] sm:$0xff]  ;;  %v13605_v34 = vcombine.low %v1253_v19, %v1257_v27 }
 0x2a3   : > { %10548 = vmatprep.subr.bf16.mxu0 %v13374_v48  ;;  %v1121_v31 = vld [vmem:[%s15654_s25 + $0xba8] sm:$0xff] }
 0x2a4   : > { %10588 = vmatpush1.bf16.msra.mxu1 %v13509_v14  ;;  %v1245_v37 = vld [vmem:[%s15654_s25 + $0xf88] sm:$0xff]  ;;  %v13470_v0 = vcombine.high %v1117_v30, %v1121_v31  ;;  %v13469_v16 = vcombine.low %v1117_v30, %v1121_v31 }
 0x2a5   : > { %10589 = vmatprep.subr.bf16.mxu1 %v13502_v6  ;;  %v1249_v38 = vld [vmem:[%s15654_s25 + $0xfa8] sm:$0xff] }
 0x2a6   : > { %10549 = vmatpush1.bf16.msra.mxu0 %v13373_v61  ;;  %v13598_v44 = vcombine.high %v1245_v37, %v1249_v38  ;;  %v1109_v14 = vld [vmem:[%s15654_s25 + $0xb48] sm:$0xff]  ;;  %v13597_v41 = vcombine.low %v1245_v37, %v1249_v38 }
 0x2a7   : > { %10550 = vmatprep.subr.bf16.mxu0 %v13366_v62  ;;  %v1113_v48 = vld [vmem:[%s15654_s25 + $0xb68] sm:$0xff] }
 0x2a8   : > { %10590 = vmatpush1.bf16.msra.mxu1 %v13501_v57  ;;  %v1237_v6 = vld [vmem:[%s15654_s25 + $0xf48] sm:$0xff]  ;;  %v13462_v55 = vcombine.high %v1109_v14, %v1113_v48  ;;  %v13461_v1 = vcombine.low %v1109_v14, %v1113_v48 }
 0x2a9   : > { %10591 = vmatprep.subr.bf16.mxu1 %v13494_v63  ;;  %v1241_v50 = vld [vmem:[%s15654_s25 + $0xf68] sm:$0xff] }
 0x2aa   : > { %10551 = vmatpush1.bf16.msra.mxu0 %v13365_v8  ;;  %v13590_v61 = vcombine.high %v1237_v6, %v1241_v50  ;;  %v1101_v57 = vld [vmem:[%s15654_s25 + $0xb08] sm:$0xff]  ;;  %v13589_v13 = vcombine.low %v1237_v6, %v1241_v50 }
 0x2ab   : > { %10552 = vmatprep.subr.bf16.mxu0 %v13358_v11  ;;  %v1105_v62 = vld [vmem:[%s15654_s25 + $0xb28] sm:$0xff] }
 0x2ac   : > { %10592 = vmatpush1.bf16.msra.mxu1 %v13493_v9  ;;  %v1229_v63 = vld [vmem:[%s15654_s25 + $0xf08] sm:$0xff]  ;;  %v13454_v60 = vcombine.high %v1101_v57, %v1105_v62  ;;  %v13453_v22 = vcombine.low %v1101_v57, %v1105_v62 }
 0x2ad   : > { %10593 = vmatprep.subr.bf16.mxu1 %v13486_v24  ;;  %v1233_v39 = vld [vmem:[%s15654_s25 + $0xf28] sm:$0xff] }
 0x2ae   : > { %10553 = vmatpush1.bf16.msra.mxu0 %v13357_v21  ;;  %v13582_v8 = vcombine.high %v1229_v63, %v1233_v39  ;;  %v1093_v9 = vld [vmem:[%s15654_s25 + $0xac8] sm:$0xff]  ;;  %v13581_v19 = vcombine.low %v1229_v63, %v1233_v39 }
 0x2af   : > { %10554 = vmatprep.subr.bf16.mxu0 %v13478_v25  ;;  %v1097_v11 = vld [vmem:[%s15654_s25 + $0xae8] sm:$0xff] }
 0x2b0   : > { %10594 = vmatpush1.bf16.msra.mxu1 %v13485_v23  ;;  %v1221_v24 = vld [vmem:[%s15654_s25 + $0xec8] sm:$0xff]  ;;  %v13446_v27 = vcombine.high %v1093_v9, %v1097_v11  ;;  %v13445_v31 = vcombine.low %v1093_v9, %v1097_v11 }
 0x2b1   : > { %10595 = vmatprep.subr.bf16.mxu1 %v13606_v26  ;;  %v1225_v15 = vld [vmem:[%s15654_s25 + $0xee8] sm:$0xff] }
 0x2b2   : > { %10555 = vmatpush2.bf16.msra.mxu0 %v13477_v42  ;;  %v13574_v21 = vcombine.high %v1221_v24, %v1225_v15  ;;  %v1085_v23 = vld [vmem:[%s15654_s25 + $0xa88] sm:$0xff]  ;;  %v13573_v37 = vcombine.low %v1221_v24, %v1225_v15 }
 0x2b3   : > { %10556 = vmatprep.subr.bf16.mxu0 %v13470_v0  ;;  %v1089_v25 = vld [vmem:[%s15654_s25 + $0xaa8] sm:$0xff] }
 0x2b4   : > { %10596 = vmatpush2.bf16.msra.mxu1 %v13605_v34  ;;  %v1213_v26 = vld [vmem:[%s15654_s25 + $0xe88] sm:$0xff]  ;;  %v13438_v38 = vcombine.high %v1085_v23, %v1089_v25  ;;  %v13437_v48 = vcombine.low %v1085_v23, %v1089_v25 }
 0x2b5   : > { %10597 = vmatprep.subr.bf16.mxu1 %v13598_v44  ;;  %v1217_v30 = vld [vmem:[%s15654_s25 + $0xea8] sm:$0xff] }
 0x2b6   : > { %10557 = vmatpush2.bf16.msra.mxu0 %v13469_v16  ;;  %v13566_v42 = vcombine.high %v1213_v26, %v1217_v30  ;;  %v1077_v34 = vld [vmem:[%s15654_s25 + $0xa48] sm:$0xff]  ;;  %v13565_v6 = vcombine.low %v1213_v26, %v1217_v30 }
 0x2b7   : > { %10558 = vmatprep.subr.bf16.mxu0 %v13462_v55  ;;  %v1081_v0 = vld [vmem:[%s15654_s25 + $0xa68] sm:$0xff] }
 0x2b8   : > { %10598 = vmatpush2.bf16.msra.mxu1 %v13597_v41  ;;  %v1205_v44 = vld [vmem:[%s15654_s25 + $0xe48] sm:$0xff]  ;;  %v13430_v50 = vcombine.high %v1077_v34, %v1081_v0  ;;  %v13429_v62 = vcombine.low %v1077_v34, %v1081_v0 }
 0x2b9   : > { %10599 = vmatprep.subr.bf16.mxu1 %v13590_v61  ;;  %v1209_v14 = vld [vmem:[%s15654_s25 + $0xe68] sm:$0xff] }
 0x2ba   : > { %10559 = vmatpush2.bf16.msra.mxu0 %v13461_v1  ;;  %v13558_v16 = vcombine.high %v1205_v44, %v1209_v14  ;;  %v1069_v41 = vld [vmem:[%s15654_s25 + $0xa08] sm:$0xff]  ;;  %v13557_v63 = vcombine.low %v1205_v44, %v1209_v14 }
 0x2bb   : > { %10560 = vmatprep.subr.bf16.mxu0 %v13454_v60  ;;  %v1073_v55 = vld [vmem:[%s15654_s25 + $0xa28] sm:$0xff] }
 0x2bc   : > { %10600 = vmatpush2.bf16.msra.mxu1 %v13589_v13  ;;  %v1197_v61 = vld [vmem:[%s15654_s25 + $0xe08] sm:$0xff]  ;;  %v13422_v39 = vcombine.high %v1069_v41, %v1073_v55  ;;  %v13421_v11 = vcombine.low %v1069_v41, %v1073_v55 }
 0x2bd   : > { %10601 = vmatprep.subr.bf16.mxu1 %v13582_v8  ;;  %v1201_v57 = vld [vmem:[%s15654_s25 + $0xe28] sm:$0xff] }
 0x2be   : > { %10561 = vmatpush2.bf16.msra.mxu0 %v13453_v22  ;;  %v13550_v1 = vcombine.high %v1197_v61, %v1201_v57  ;;  %v1317_v13 = vld [vmem:[%s15654_s25 + $0x11c8] sm:$0xff]  ;;  %v13549_v24 = vcombine.low %v1197_v61, %v1201_v57 }
 0x2bf   : > { %10562 = vmatprep.subr.bf16.mxu0 %v13446_v27  ;;  %v1321_v60 = vld [vmem:[%s15654_s25 + $0x11e8] sm:$0xff] }
 0x2c0   : > { %10602 = vmatpush2.bf16.msra.mxu1 %v13581_v19  ;;  %v1445_v8 = vld [vmem:[%s15654_s25 + $0x15c8] sm:$0xff]  ;;  %v13670_v15 = vcombine.high %v1317_v13, %v1321_v60  ;;  %v13669_v25 = vcombine.low %v1317_v13, %v1321_v60 }
 0x2c1   : > { %10603 = vmatprep.subr.bf16.mxu1 %v13574_v21  ;;  %v1449_v9 = vld [vmem:[%s15654_s25 + $0x15e8] sm:$0xff] }
 0x2c2   : > { %10563 = vmatpush2.bf16.msra.mxu0 %v13445_v31  ;;  %v13798_v22 = vcombine.high %v1445_v8, %v1449_v9  ;;  %v1309_v19 = vld [vmem:[%s15654_s25 + $0x1188] sm:$0xff]  ;;  %v13797_v26 = vcombine.low %v1445_v8, %v1449_v9 }
 0x2c3   : > { %10564 = vmatprep.subr.bf16.mxu0 %v13438_v38  ;;  %v1313_v27 = vld [vmem:[%s15654_s25 + $0x11a8] sm:$0xff] }
 0x2c4   : > { %10604 = vmatpush2.bf16.msra.mxu1 %v13573_v37  ;;  %v1437_v21 = vld [vmem:[%s15654_s25 + $0x1588] sm:$0xff]  ;;  %v13662_v30 = vcombine.high %v1309_v19, %v1313_v27 }
 0x2c5   : > { %10605 = vmatprep.subr.bf16.mxu1 %v13566_v42  ;;  %v1441_v23 = vld [vmem:[%s15654_s25 + $0x15a8] sm:$0xff] }
 0x2c6   : > { %10565 = vmatpush2.bf16.msra.mxu0 %v13437_v48  ;;  %v13790_v31 = vcombine.high %v1437_v21, %v1441_v23  ;;  %v1301_v37 = vld [vmem:[%s15654_s25 + $0x1148] sm:$0xff]  ;;  %v13661_v48 = vcombine.low %v1309_v19, %v1313_v27 }
 0x2c7   : > { %10566 = vmatprep.subr.bf16.mxu0 %v13430_v50  ;;  %v1305_v38 = vld [vmem:[%s15654_s25 + $0x1168] sm:$0xff]  ;;  %v13789_v50 = vcombine.low %v1437_v21, %v1441_v23 }
 0x2c8   : > { %10606 = vmatpush2.bf16.msra.mxu1 %v13565_v6  ;;  %v1429_v34 = vld [vmem:[%s15654_s25 + $0x1548] sm:$0xff] }
 0x2c9   : > { %10607 = vmatprep.subr.bf16.mxu1 %v13558_v16  ;;  %v1433_v0 = vld [vmem:[%s15654_s25 + $0x1568] sm:$0xff]  ;;  %v13654_v16 = vcombine.high %v1301_v37, %v1305_v38 }
 0x2ca   : > { %10567 = vmatpush2.bf16.msra.mxu0 %v13429_v62  ;;  %v1293_v57 = vld [vmem:[%s15654_s25 + $0x1108] sm:$0xff]  ;;  %v13781_v9 = vcombine.low %v1429_v34, %v1433_v0 }
 0x2cb   : > { %10568 = vmatprep.subr.bf16.mxu0 %v13422_v39  ;;  %v1297_v62 = vld [vmem:[%s15654_s25 + $0x1128] sm:$0xff] }
 0x2cc   : > { %10608 = vmatpush2.bf16.msra.mxu1 %v13557_v63  ;;  %v1421_v39 = vld [vmem:[%s15654_s25 + $0x1508] sm:$0xff]  ;;  %v13645_v23 = vcombine.low %v1293_v57, %v1297_v62 }
 0x2cd   : > { %10609 = vmatprep.subr.bf16.mxu1 %v13550_v1  ;;  %v1425_v1 = vld [vmem:[%s15654_s25 + $0x1528] sm:$0xff] }
 0x2ce   : > { %10569 = vmatpush2.bf16.msra.mxu0 %v13421_v11  ;;  %v13646_v11 = vcombine.high %v1293_v57, %v1297_v62  ;;  %v1289_v19 = vld [vmem:[%s15654_s25 + $0x10e8] sm:$0xff] }
 0x2cf   : > { %10620 = vmatprep.subr.bf16.mxu0 %v13670_v15  ;;  %v13774_v15 = vcombine.high %v1421_v39, %v1425_v1  ;;  %v1413_v27 = vld [vmem:[%s15654_s25 + $0x14c8] sm:$0xff] }
 0x2d0   : > { %10610 = vmatpush2.bf16.msra.mxu1 %v13549_v24  ;;  %v1417_v21 = vld [vmem:[%s15654_s25 + $0x14e8] sm:$0xff] }
 0x2d1   : > { %10661 = vmatprep.subr.bf16.mxu1 %v13798_v22  ;;  %v10326_v42 = vpop.f32.mrf.mxu0  ;;  %10571 = vmatmul.mubr.bf16.vlgmr.msra.gmra.mxu0 %v15876_v5  ;;  %v1285_v22 = vld [vmem:[%s15654_s25 + $0x10c8] sm:$0xff] }
 0x2d2   : > { %v10327_v44 = vadd.f32 %v10326_v42, %v16330_v56  ;;  %10621 = vmatpush1.bf16.msra.mxu0 %v13669_v25  ;;  %v13782_v56 = vcombine.high %v1429_v34, %v1433_v0  ;;  %10652 = vmatprep.mubr.bf16.mxu0 %v15888_v18  ;;  %v13773_v25 = vcombine.low %v1421_v39, %v1425_v1  ;;  %v1409_v42 = vld [vmem:[%s15654_s25 + $0x14a8] sm:$0xff] }
 0x2d3   : > { %v10367_v14 = vpop.f32.mrf.mxu1  ;;  %10612 = vmatmul.mubr.bf16.vlgmr.msra.gmra.mxu1 %v15884_v10  ;;  %v10328_v6 = vpop.f32.mrf.mxu0  ;;  %10622 = vmatprep.subr.bf16.mxu0 %v13662_v30  ;;  %v13766_v30 = vcombine.high %v1413_v27, %v1417_v21  ;;  %v13637_v34 = vcombine.low %v1285_v22, %v1289_v19  ;;  %v13765_v0 = vcombine.low %v1413_v27, %v1417_v21  ;;  %v1261_v62 = vld [vmem:[%s15654_s25 + $0x1008] sm:$0xff] }
 0x2d4   : > { %10662 = vmatpush1.bf16.msra.mxu1 %v13797_v26  ;;  %v16404_v41 = vadd.f32 %v10367_v14, %v10327_v44  ;;  %v10329_v55 = vadd.f32 %v10328_v6, %v16339_v7  ;;  %10693 = vmatprep.mubr.bf16.mxu1 %v15893_v20  ;;  %v13653_v7 = vcombine.low %v1301_v37, %v1305_v38  ;;  %v1281_v37 = vld [vmem:[%s15654_s25 + $0x10a8] sm:$0xff] }
 0x2d5   : > { %v10369_v61 = vpop.f32.mrf.mxu1  ;;  %10663 = vmatprep.subr.bf16.mxu1 %v13790_v31  ;;  %v10330_v63 = vpop.f32.mrf.mxu0  ;;  %v13638_v26 = vcombine.high %v1285_v22, %v1289_v19  ;;  %v1277_v31 = vld [vmem:[%s15654_s25 + $0x1088] sm:$0xff] }
 0x2d6   : > { %v16413_v13 = vadd.f32 %v10369_v61, %v10329_v55  ;;  %10623 = vmatpush1.bf16.msra.mxu0 %v13661_v48  ;;  %v1405_v38 = vld [vmem:[%s15654_s25 + $0x1488] sm:$0xff]  ;;  %v13630_v44 = vcombine.high %v1277_v31, %v1281_v37  ;;  %v13629_v55 = vcombine.low %v1277_v31, %v1281_v37 }
 0x2d7   : > { %v10371_v60 = vpop.f32.mrf.mxu1  ;;  %v10331_v8 = vpop.f32.mrf.mxu0  ;;  %10624 = vmatprep.subr.bf16.mxu0 %v13654_v16  ;;  %v13758_v14 = vcombine.high %v1405_v38, %v1409_v42  ;;  %v1269_v48 = vld [vmem:[%s15654_s25 + $0x1048] sm:$0xff]  ;;  %v13757_v61 = vcombine.low %v1405_v38, %v1409_v42 }
 0x2d8   : > { %10664 = vmatpush1.bf16.msra.mxu1 %v13789_v50  ;;  %v1273_v6 = vld [vmem:[%s15654_s25 + $0x1068] sm:$0xff] }
 0x2d9   : > { %v10372_v24 = vpop.f32.mrf.mxu1  ;;  %10665 = vmatprep.subr.bf16.mxu1 %v13782_v56  ;;  %v1397_v50 = vld [vmem:[%s15654_s25 + $0x1448] sm:$0xff]  ;;  %v13622_v56 = vcombine.high %v1269_v48, %v1273_v6  ;;  %v13621_v60 = vcombine.low %v1269_v48, %v1273_v6 }
 0x2da   : > { %10625 = vmatpush1.bf16.msra.mxu0 %v13653_v7  ;;  %v1401_v16 = vld [vmem:[%s15654_s25 + $0x1468] sm:$0xff] }
 0x2db   : > { %10626 = vmatprep.subr.bf16.mxu0 %v13646_v11  ;;  %v13750_v57 = vcombine.high %v1397_v50, %v1401_v16  ;;  %v1265_v63 = vld [vmem:[%s15654_s25 + $0x1028] sm:$0xff]  ;;  %v13749_v7 = vcombine.low %v1397_v50, %v1401_v16 }
 0x2dc   : > { %10666 = vmatpush1.bf16.msra.mxu1 %v13781_v9  ;;  %v1389_v39 = vld [vmem:[%s15654_s25 + $0x1408] sm:$0xff]  ;;  %v13614_v8 = vcombine.high %v1261_v62, %v1265_v63  ;;  %v13613_v19 = vcombine.low %v1261_v62, %v1265_v63 }
 0x2dd   : > { %10667 = vmatprep.subr.bf16.mxu1 %v13774_v15  ;;  %v1393_v1 = vld [vmem:[%s15654_s25 + $0x1428] sm:$0xff] }
 0x2de   : > { %10627 = vmatpush1.bf16.msra.mxu0 %v13645_v23  ;;  %v13742_v9 = vcombine.high %v1389_v39, %v1393_v1  ;;  %v1381_v11 = vld [vmem:[%s15654_s25 + $0x13c8] sm:$0xff]  ;;  %v13741_v27 = vcombine.low %v1389_v39, %v1393_v1 }
 0x2df   : > { %10628 = vmatprep.subr.bf16.mxu0 %v13638_v26  ;;  %v1385_v24 = vld [vmem:[%s15654_s25 + $0x13e8] sm:$0xff] }
 0x2e0   : > { %10668 = vmatpush1.bf16.msra.mxu1 %v13773_v25  ;;  %v1509_v15 = vld [vmem:[%s15654_s25 + $0x17c8] sm:$0xff]  ;;  %v13734_v21 = vcombine.high %v1381_v11, %v1385_v24  ;;  %v13733_v37 = vcombine.low %v1381_v11, %v1385_v24 }
 0x2e1   : > { %10669 = vmatprep.subr.bf16.mxu1 %v13766_v30  ;;  %v1513_v22 = vld [vmem:[%s15654_s25 + $0x17e8] sm:$0xff] }
 0x2e2   : > { %10629 = vmatpush1.bf16.msra.mxu0 %v13637_v34  ;;  %v13862_v23 = vcombine.high %v1509_v15, %v1513_v22  ;;  %v1373_v25 = vld [vmem:[%s15654_s25 + $0x1388] sm:$0xff]  ;;  %v13861_v38 = vcombine.low %v1509_v15, %v1513_v22 }
 0x2e3   : > { %10630 = vmatprep.subr.bf16.mxu0 %v13630_v44  ;;  %v1377_v26 = vld [vmem:[%s15654_s25 + $0x13a8] sm:$0xff] }
 0x2e4   : > { %10670 = vmatpush1.bf16.msra.mxu1 %v13765_v0  ;;  %v1501_v30 = vld [vmem:[%s15654_s25 + $0x1788] sm:$0xff]  ;;  %v13726_v42 = vcombine.high %v1373_v25, %v1377_v26  ;;  %v13725_v6 = vcombine.low %v1373_v25, %v1377_v26 }
 0x2e5   : > { %10671 = vmatprep.subr.bf16.mxu1 %v13758_v14  ;;  %v1505_v31 = vld [vmem:[%s15654_s25 + $0x17a8] sm:$0xff] }
 0x2e6   : > { %10631 = vmatpush1.bf16.msra.mxu0 %v13629_v55  ;;  %v13854_v34 = vcombine.high %v1501_v30, %v1505_v31  ;;  %v1365_v0 = vld [vmem:[%s15654_s25 + $0x1348] sm:$0xff]  ;;  %v13853_v50 = vcombine.low %v1501_v30, %v1505_v31 }
 0x2e7   : > { %10632 = vmatprep.subr.bf16.mxu0 %v13622_v56  ;;  %v1369_v44 = vld [vmem:[%s15654_s25 + $0x1368] sm:$0xff] }
 0x2e8   : > { %10672 = vmatpush1.bf16.msra.mxu1 %v13757_v61  ;;  %v1493_v14 = vld [vmem:[%s15654_s25 + $0x1748] sm:$0xff]  ;;  %v13718_v16 = vcombine.high %v1365_v0, %v1369_v44  ;;  %v13717_v63 = vcombine.low %v1365_v0, %v1369_v44 }
 0x2e9   : > { %10673 = vmatprep.subr.bf16.mxu1 %v13750_v57  ;;  %v1497_v48 = vld [vmem:[%s15654_s25 + $0x1768] sm:$0xff] }
 0x2ea   : > { %10633 = vmatpush1.bf16.msra.mxu0 %v13621_v60  ;;  %v13846_v55 = vcombine.high %v1493_v14, %v1497_v48  ;;  %v1357_v61 = vld [vmem:[%s15654_s25 + $0x1308] sm:$0xff]  ;;  %v13845_v39 = vcombine.low %v1493_v14, %v1497_v48 }
 0x2eb   : > { %10634 = vmatprep.subr.bf16.mxu0 %v13614_v8  ;;  %v1361_v56 = vld [vmem:[%s15654_s25 + $0x1328] sm:$0xff] }
 0x2ec   : > { %10674 = vmatpush1.bf16.msra.mxu1 %v13749_v7  ;;  %v1485_v57 = vld [vmem:[%s15654_s25 + $0x1708] sm:$0xff]  ;;  %v13710_v1 = vcombine.high %v1357_v61, %v1361_v56  ;;  %v13709_v24 = vcombine.low %v1357_v61, %v1361_v56 }
 0x2ed   : > { %10675 = vmatprep.subr.bf16.mxu1 %v13742_v9  ;;  %v1489_v62 = vld [vmem:[%s15654_s25 + $0x1728] sm:$0xff] }
 0x2ee   : > { %10635 = vmatpush1.bf16.msra.mxu0 %v13613_v19  ;;  %v13838_v60 = vcombine.high %v1485_v57, %v1489_v62  ;;  %v1349_v7 = vld [vmem:[%s15654_s25 + $0x12c8] sm:$0xff]  ;;  %v13837_v15 = vcombine.low %v1485_v57, %v1489_v62 }
 0x2ef   : > { %10636 = vmatprep.subr.bf16.mxu0 %v13734_v21  ;;  %v1353_v8 = vld [vmem:[%s15654_s25 + $0x12e8] sm:$0xff] }
 0x2f0   : > { %10676 = vmatpush1.bf16.msra.mxu1 %v13741_v27  ;;  %v1477_v9 = vld [vmem:[%s15654_s25 + $0x16c8] sm:$0xff]  ;;  %v13702_v22 = vcombine.high %v1349_v7, %v1353_v8  ;;  %v13701_v26 = vcombine.low %v1349_v7, %v1353_v8 }
 0x2f1   : > { %10677 = vmatprep.subr.bf16.mxu1 %v13862_v23  ;;  %v1481_v11 = vld [vmem:[%s15654_s25 + $0x16e8] sm:$0xff] }
 0x2f2   : > { %10637 = vmatpush2.bf16.msra.mxu0 %v13733_v37  ;;  %v13830_v19 = vcombine.high %v1477_v9, %v1481_v11  ;;  %v1341_v27 = vld [vmem:[%s15654_s25 + $0x1288] sm:$0xff]  ;;  %v13829_v30 = vcombine.low %v1477_v9, %v1481_v11 }
 0x2f3   : > { %10638 = vmatprep.subr.bf16.mxu0 %v13726_v42  ;;  %v1345_v21 = vld [vmem:[%s15654_s25 + $0x12a8] sm:$0xff] }
 0x2f4   : > { %10678 = vmatpush2.bf16.msra.mxu1 %v13861_v38  ;;  %v1469_v23 = vld [vmem:[%s15654_s25 + $0x1688] sm:$0xff]  ;;  %v13694_v31 = vcombine.high %v1341_v27, %v1345_v21  ;;  %v13693_v44 = vcombine.low %v1341_v27, %v1345_v21 }
 0x2f5   : > { %10679 = vmatprep.subr.bf16.mxu1 %v13854_v34  ;;  %v1473_v25 = vld [vmem:[%s15654_s25 + $0x16a8] sm:$0xff] }
 0x2f6   : > { %10639 = vmatpush2.bf16.msra.mxu0 %v13725_v6  ;;  %v13822_v37 = vcombine.high %v1469_v23, %v1473_v25  ;;  %v1333_v38 = vld [vmem:[%s15654_s25 + $0x1248] sm:$0xff]  ;;  %v13821_v14 = vcombine.low %v1469_v23, %v1473_v25 }
 0x2f7   : > { %10640 = vmatprep.subr.bf16.mxu0 %v13718_v16  ;;  %v1337_v42 = vld [vmem:[%s15654_s25 + $0x1268] sm:$0xff] }
 0x2f8   : > { %10680 = vmatpush2.bf16.msra.mxu1 %v13853_v50  ;;  %v1461_v34 = vld [vmem:[%s15654_s25 + $0x1648] sm:$0xff]  ;;  %v13686_v48 = vcombine.high %v1333_v38, %v1337_v42  ;;  %v13685_v56 = vcombine.low %v1333_v38, %v1337_v42 }
 0x2f9   : > { %10681 = vmatprep.subr.bf16.mxu1 %v13846_v55  ;;  %v1465_v0 = vld [vmem:[%s15654_s25 + $0x1668] sm:$0xff] }
 0x2fa   : > { %10641 = vmatpush2.bf16.msra.mxu0 %v13717_v63  ;;  %v13814_v6 = vcombine.high %v1461_v34, %v1465_v0  ;;  %v1325_v50 = vld [vmem:[%s15654_s25 + $0x1208] sm:$0xff]  ;;  %v13813_v57 = vcombine.low %v1461_v34, %v1465_v0 }
 0x2fb   : > { %10642 = vmatprep.subr.bf16.mxu0 %v13710_v1  ;;  %v1329_v16 = vld [vmem:[%s15654_s25 + $0x1228] sm:$0xff] }
 0x2fc   : > { %10682 = vmatpush2.bf16.msra.mxu1 %v13845_v39  ;;  %v1453_v55 = vld [vmem:[%s15654_s25 + $0x1608] sm:$0xff]  ;;  %v13678_v62 = vcombine.high %v1325_v50, %v1329_v16  ;;  %v13677_v8 = vcombine.low %v1325_v50, %v1329_v16 }
 0x2fd   : > { %10683 = vmatprep.subr.bf16.mxu1 %v13838_v60  ;;  %v1457_v61 = vld [vmem:[%s15654_s25 + $0x1628] sm:$0xff] }
 0x2fe   : > { %10643 = vmatpush2.bf16.msra.mxu0 %v13709_v24  ;;  %v13806_v63 = vcombine.high %v1453_v55, %v1457_v61  ;;  %v1573_v39 = vld [vmem:[%s15654_s25 + $0x19c8] sm:$0xff]  ;;  %v13805_v9 = vcombine.low %v1453_v55, %v1457_v61 }
 0x2ff   : > { %10644 = vmatprep.subr.bf16.mxu0 %v13702_v22  ;;  %v1577_v1 = vld [vmem:[%s15654_s25 + $0x19e8] sm:$0xff] }
 0x300   : > { %10684 = vmatpush2.bf16.msra.mxu1 %v13837_v15  ;;  %v1701_v60 = vld [vmem:[%s15654_s25 + $0x1dc8] sm:$0xff]  ;;  %v13926_v11 = vcombine.high %v1573_v39, %v1577_v1  ;;  %v13925_v21 = vcombine.low %v1573_v39, %v1577_v1 }
 0x301   : > { %10685 = vmatprep.subr.bf16.mxu1 %v13830_v19  ;;  %v1705_v7 = vld [vmem:[%s15654_s25 + $0x1de8] sm:$0xff] }
 0x302   : > { %10645 = vmatpush2.bf16.msra.mxu0 %v13701_v26  ;;  %v14054_v24 = vcombine.high %v1701_v60, %v1705_v7  ;;  %v1565_v15 = vld [vmem:[%s15654_s25 + $0x1988] sm:$0xff]  ;;  %v14053_v23 = vcombine.low %v1701_v60, %v1705_v7 }
 0x303   : > { %10646 = vmatprep.subr.bf16.mxu0 %v13694_v31  ;;  %v1569_v22 = vld [vmem:[%s15654_s25 + $0x19a8] sm:$0xff] }
 0x304   : > { %10686 = vmatpush2.bf16.msra.mxu1 %v13829_v30  ;;  %v1693_v19 = vld [vmem:[%s15654_s25 + $0x1d88] sm:$0xff]  ;;  %v13918_v25 = vcombine.high %v1565_v15, %v1569_v22 }
 0x305   : > { %10687 = vmatprep.subr.bf16.mxu1 %v13822_v37  ;;  %v1697_v27 = vld [vmem:[%s15654_s25 + $0x1da8] sm:$0xff] }
 0x306   : > { %10647 = vmatpush2.bf16.msra.mxu0 %v13693_v44  ;;  %v14046_v26 = vcombine.high %v1693_v19, %v1697_v27  ;;  %v1557_v30 = vld [vmem:[%s15654_s25 + $0x1948] sm:$0xff]  ;;  %v13917_v44 = vcombine.low %v1565_v15, %v1569_v22 }
 0x307   : > { %10648 = vmatprep.subr.bf16.mxu0 %v13686_v48  ;;  %v1561_v31 = vld [vmem:[%s15654_s25 + $0x1968] sm:$0xff]  ;;  %v14045_v48 = vcombine.low %v1693_v19, %v1697_v27 }
 0x308   : > { %10688 = vmatpush2.bf16.msra.mxu1 %v13821_v14  ;;  %v1685_v38 = vld [vmem:[%s15654_s25 + $0x1d48] sm:$0xff] }
 0x309   : > { %10689 = vmatprep.subr.bf16.mxu1 %v13814_v6  ;;  %v1689_v42 = vld [vmem:[%s15654_s25 + $0x1d68] sm:$0xff]  ;;  %v13910_v6 = vcombine.high %v1557_v30, %v1561_v31 }
 0x30a   : > { %10649 = vmatpush2.bf16.msra.mxu0 %v13685_v56  ;;  %v1549_v61 = vld [vmem:[%s15654_s25 + $0x1908] sm:$0xff]  ;;  %v14037_v7 = vcombine.low %v1685_v38, %v1689_v42 }
 0x30b   : > { %10650 = vmatprep.subr.bf16.mxu0 %v13678_v62  ;;  %v1553_v56 = vld [vmem:[%s15654_s25 + $0x1928] sm:$0xff] }
 0x30c   : > { %10690 = vmatpush2.bf16.msra.mxu1 %v13813_v57  ;;  %v1677_v62 = vld [vmem:[%s15654_s25 + $0x1d08] sm:$0xff] }
 0x30d   : > { %10691 = vmatprep.subr.bf16.mxu1 %v13806_v63  ;;  %v1681_v63 = vld [vmem:[%s15654_s25 + $0x1d28] sm:$0xff] }
 0x30e   : > { %10651 = vmatpush2.bf16.msra.mxu0 %v13677_v8  ;;  %v13902_v8 = vcombine.high %v1549_v61, %v1553_v56  ;;  %v1541_v15 = vld [vmem:[%s15654_s25 + $0x18c8] sm:$0xff] }
 0x30f   : > { %10702 = vmatprep.subr.bf16.mxu0 %v13926_v11  ;;  %v1545_v22 = vld [vmem:[%s15654_s25 + $0x18e8] sm:$0xff] }
 0x310   : > { %10692 = vmatpush2.bf16.msra.mxu1 %v13805_v9  ;;  %v1669_v19 = vld [vmem:[%s15654_s25 + $0x1cc8] sm:$0xff] }
 0x311   : > { %10743 = vmatprep.subr.bf16.mxu1 %v14054_v24  ;;  %v10408_v37 = vpop.f32.mrf.mxu0  ;;  %10653 = vmatmul.mubr.bf16.vlgmr.msra.gmra.mxu0 %v15967_v52  ;;  %v14030_v24 = vcombine.high %v1677_v62, %v1681_v63  ;;  %v1673_v27 = vld [vmem:[%s15654_s25 + $0x1ce8] sm:$0xff] }
 0x312   : > { %v10409_v34 = vadd.f32 %v10408_v37, %v16404_v41  ;;  %10703 = vmatpush1.bf16.msra.mxu0 %v13925_v21  ;;  %v14038_v41 = vcombine.high %v1685_v38, %v1689_v42  ;;  %10734 = vmatprep.mubr.bf16.mxu0 %v15979_v2  ;;  %v13901_v21 = vcombine.low %v1549_v61, %v1553_v56  ;;  %v1661_v37 = vld [vmem:[%s15654_s25 + $0x1c88] sm:$0xff] }
 0x313   : > { %v10449_v0 = vpop.f32.mrf.mxu1  ;;  %10694 = vmatmul.mubr.bf16.vlgmr.msra.gmra.mxu1 %v15975_v58  ;;  %v10410_v14 = vpop.f32.mrf.mxu0  ;;  %10704 = vmatprep.subr.bf16.mxu0 %v13918_v25  ;;  %v13894_v25 = vcombine.high %v1541_v15, %v1545_v22  ;;  %v1665_v38 = vld [vmem:[%s15654_s25 + $0x1ca8] sm:$0xff]  ;;  %v13893_v42 = vcombine.low %v1541_v15, %v1545_v22 }
 0x314   : > { %10744 = vmatpush1.bf16.msra.mxu1 %v14053_v23  ;;  %v16478_v50 = vadd.f32 %v10449_v0, %v10409_v34  ;;  %v10411_v16 = vadd.f32 %v10410_v14, %v16413_v13  ;;  %10775 = vmatprep.mubr.bf16.mxu1 %v15984_v4  ;;  %v13909_v13 = vcombine.low %v1557_v30, %v1561_v31  ;;  %v1533_v30 = vld [vmem:[%s15654_s25 + $0x1888] sm:$0xff] }
 0x315   : > { %v10451_v55 = vpop.f32.mrf.mxu1  ;;  %10745 = vmatprep.subr.bf16.mxu1 %v14046_v26  ;;  %v10412_v57 = vpop.f32.mrf.mxu0  ;;  %v14029_v23 = vcombine.low %v1677_v62, %v1681_v63  ;;  %v14022_v26 = vcombine.high %v1669_v19, %v1673_v27  ;;  %v1537_v31 = vld [vmem:[%s15654_s25 + $0x18a8] sm:$0xff]  ;;  %v14021_v34 = vcombine.low %v1669_v19, %v1673_v27 }
 0x316   : > { %v16487_v39 = vadd.f32 %v10451_v55, %v10411_v16  ;;  %10705 = vmatpush1.bf16.msra.mxu0 %v13917_v44  ;;  %v13886_v0 = vcombine.high %v1533_v30, %v1537_v31  ;;  %v14014_v44 = vcombine.high %v1661_v37, %v1665_v38  ;;  %v1525_v14 = vld [vmem:[%s15654_s25 + $0x1848] sm:$0xff]  ;;  %v13885_v55 = vcombine.low %v1533_v30, %v1537_v31 }
 0x317   : > { %v10453_v1 = vpop.f32.mrf.mxu1  ;;  %v10413_v60 = vpop.f32.mrf.mxu0  ;;  %10706 = vmatprep.subr.bf16.mxu0 %v13910_v6  ;;  %v1653_v6 = vld [vmem:[%s15654_s25 + $0x1c48] sm:$0xff] }
 0x318   : > { %10746 = vmatpush1.bf16.msra.mxu1 %v14045_v48  ;;  %v11940_v9 = vcombine.low %v16478_v50, %v16487_v39  ;;  %v1529_v48 = vld [vmem:[%s15654_s25 + $0x1868] sm:$0xff]  ;;  %v1662_v50 = vld [vmem:[%s15654_s25 + $0x1c90] sm:$0xff] }
 0x319   : > { %v10454_v11 = vpop.f32.mrf.mxu1  ;;  %10747 = vmatprep.subr.bf16.mxu1 %v14038_v41  ;;  %v1657_v16 = vld [vmem:[%s15654_s25 + $0x1c68] sm:$0xff]  ;;  %v14013_v41 = vcombine.low %v1661_v37, %v1665_v38  ;;  %v13878_v61 = vcombine.high %v1525_v14, %v1529_v48  ;;  %v1666_v39 = vld [vmem:[%s15654_s25 + $0x1cb0] sm:$0xff] }
 0x31a   : > { %10707 = vmatpush1.bf16.msra.mxu0 %v13909_v13  ;;  %v14006_v56 = vcombine.high %v1653_v6, %v1657_v16  ;;  %v1517_v57 = vld [vmem:[%s15654_s25 + $0x1808] sm:$0xff]  ;;  %v13877_v13 = vcombine.low %v1525_v14, %v1529_v48  ;;  %v14005_v60 = vcombine.low %v1653_v6, %v1657_v16 }
 0x31b   : > { %10708 = vmatprep.subr.bf16.mxu0 %v13902_v8  ;;  %v1521_v62 = vld [vmem:[%s15654_s25 + $0x1828] sm:$0xff] }
 0x31c   : > { %10748 = vmatpush1.bf16.msra.mxu1 %v14037_v7  ;;  %v1645_v63 = vld [vmem:[%s15654_s25 + $0x1c08] sm:$0xff]  ;;  %v13870_v7 = vcombine.high %v1517_v57, %v1521_v62  ;;  %v13869_v19 = vcombine.low %v1517_v57, %v1521_v62 }
 0x31d   : > { %10749 = vmatprep.subr.bf16.mxu1 %v14030_v24  ;;  %v1649_v1 = vld [vmem:[%s15654_s25 + $0x1c28] sm:$0xff] }
 0x31e   : > { %10709 = vmatpush1.bf16.msra.mxu0 %v13901_v21  ;;  %v13998_v8 = vcombine.high %v1645_v63, %v1649_v1  ;;  %v1637_v11 = vld [vmem:[%s15654_s25 + $0x1bc8] sm:$0xff]  ;;  %v13997_v27 = vcombine.low %v1645_v63, %v1649_v1 }
 0x31f   : > { %10710 = vmatprep.subr.bf16.mxu0 %v13894_v25  ;;  %v1641_v24 = vld [vmem:[%s15654_s25 + $0x1be8] sm:$0xff] }
 0x320   : > { %10750 = vmatpush1.bf16.msra.mxu1 %v14029_v23  ;;  %v1765_v15 = vld [vmem:[%s15654_s25 + $0x1fc8] sm:$0xff]  ;;  %v13990_v21 = vcombine.high %v1637_v11, %v1641_v24  ;;  %v13989_v37 = vcombine.low %v1637_v11, %v1641_v24 }
 0x321   : > { %10751 = vmatprep.subr.bf16.mxu1 %v14022_v26  ;;  %v1769_v22 = vld [vmem:[%s15654_s25 + $0x1fe8] sm:$0xff] }
 0x322   : > { %10711 = vmatpush1.bf16.msra.mxu0 %v13893_v42  ;;  %v14118_v23 = vcombine.high %v1765_v15, %v1769_v22  ;;  %v1629_v25 = vld [vmem:[%s15654_s25 + $0x1b88] sm:$0xff]  ;;  %v14117_v38 = vcombine.low %v1765_v15, %v1769_v22 }
 0x323   : > { %10712 = vmatprep.subr.bf16.mxu0 %v13886_v0  ;;  %v1633_v26 = vld [vmem:[%s15654_s25 + $0x1ba8] sm:$0xff] }
 0x324   : > { %10752 = vmatpush1.bf16.msra.mxu1 %v14021_v34  ;;  %v1757_v30 = vld [vmem:[%s15654_s25 + $0x1f88] sm:$0xff]  ;;  %v13982_v42 = vcombine.high %v1629_v25, %v1633_v26  ;;  %v13981_v6 = vcombine.low %v1629_v25, %v1633_v26 }
 0x325   : > { %10753 = vmatprep.subr.bf16.mxu1 %v14014_v44  ;;  %v1761_v31 = vld [vmem:[%s15654_s25 + $0x1fa8] sm:$0xff] }
 0x326   : > { %10713 = vmatpush1.bf16.msra.mxu0 %v13885_v55  ;;  %v14110_v34 = vcombine.high %v1757_v30, %v1761_v31  ;;  %v1621_v0 = vld [vmem:[%s15654_s25 + $0x1b48] sm:$0xff]  ;;  %v14109_v16 = vcombine.low %v1757_v30, %v1761_v31 }
 0x327   : > { %10714 = vmatprep.subr.bf16.mxu0 %v13878_v61  ;;  %v1625_v44 = vld [vmem:[%s15654_s25 + $0x1b68] sm:$0xff] }
 0x328   : > { %10754 = vmatpush1.bf16.msra.mxu1 %v14013_v41  ;;  %v1749_v14 = vld [vmem:[%s15654_s25 + $0x1f48] sm:$0xff]  ;;  %v13974_v55 = vcombine.high %v1621_v0, %v1625_v44  ;;  %v13973_v63 = vcombine.low %v1621_v0, %v1625_v44 }
 0x329   : > { %10755 = vmatprep.subr.bf16.mxu1 %v14006_v56  ;;  %v1753_v48 = vld [vmem:[%s15654_s25 + $0x1f68] sm:$0xff] }
 0x32a   : > { %10715 = vmatpush1.bf16.msra.mxu0 %v13877_v13  ;;  %v14102_v41 = vcombine.high %v1749_v14, %v1753_v48  ;;  %v1613_v61 = vld [vmem:[%s15654_s25 + $0x1b08] sm:$0xff]  ;;  %v14101_v1 = vcombine.low %v1749_v14, %v1753_v48 }
 0x32b   : > { %10716 = vmatprep.subr.bf16.mxu0 %v13870_v7  ;;  %v1617_v56 = vld [vmem:[%s15654_s25 + $0x1b28] sm:$0xff] }
 0x32c   : > { %10756 = vmatpush1.bf16.msra.mxu1 %v14005_v60  ;;  %v1741_v57 = vld [vmem:[%s15654_s25 + $0x1f08] sm:$0xff]  ;;  %v13966_v13 = vcombine.high %v1613_v61, %v1617_v56  ;;  %v13965_v15 = vcombine.low %v1613_v61, %v1617_v56 }
 0x32d   : > { %10757 = vmatprep.subr.bf16.mxu1 %v13998_v8  ;;  %v1745_v62 = vld [vmem:[%s15654_s25 + $0x1f28] sm:$0xff] }
 0x32e   : > { %10717 = vmatpush1.bf16.msra.mxu0 %v13869_v19  ;;  %v14094_v60 = vcombine.high %v1741_v57, %v1745_v62  ;;  %v1605_v7 = vld [vmem:[%s15654_s25 + $0x1ac8] sm:$0xff]  ;;  %v14093_v22 = vcombine.low %v1741_v57, %v1745_v62 }
 0x32f   : > { %10718 = vmatprep.subr.bf16.mxu0 %v13990_v21  ;;  %v1609_v8 = vld [vmem:[%s15654_s25 + $0x1ae8] sm:$0xff] }
 0x330   : > { %10758 = vmatpush1.bf16.msra.mxu1 %v13997_v27  ;;  %v1733_v11 = vld [vmem:[%s15654_s25 + $0x1ec8] sm:$0xff]  ;;  %v13958_v19 = vcombine.high %v1605_v7, %v1609_v8  ;;  %v13957_v30 = vcombine.low %v1605_v7, %v1609_v8 }
 0x331   : > { %10759 = vmatprep.subr.bf16.mxu1 %v14118_v23  ;;  %v1737_v24 = vld [vmem:[%s15654_s25 + $0x1ee8] sm:$0xff] }
 0x332   : > { %10719 = vmatpush2.bf16.msra.mxu0 %v13989_v37  ;;  %v14086_v27 = vcombine.high %v1733_v11, %v1737_v24  ;;  %v1597_v21 = vld [vmem:[%s15654_s25 + $0x1a88] sm:$0xff]  ;;  %v14085_v31 = vcombine.low %v1733_v11, %v1737_v24 }
 0x333   : > { %10720 = vmatprep.subr.bf16.mxu0 %v13982_v42  ;;  %v1601_v23 = vld [vmem:[%s15654_s25 + $0x1aa8] sm:$0xff] }
 0x334   : > { %10760 = vmatpush2.bf16.msra.mxu1 %v14117_v38  ;;  %v1725_v25 = vld [vmem:[%s15654_s25 + $0x1e88] sm:$0xff]  ;;  %v13950_v37 = vcombine.high %v1597_v21, %v1601_v23  ;;  %v13949_v14 = vcombine.low %v1597_v21, %v1601_v23 }
 0x335   : > { %10761 = vmatprep.subr.bf16.mxu1 %v14110_v34  ;;  %v1729_v26 = vld [vmem:[%s15654_s25 + $0x1ea8] sm:$0xff] }
 0x336   : > { %10721 = vmatpush2.bf16.msra.mxu0 %v13981_v6  ;;  %v14078_v38 = vcombine.high %v1725_v25, %v1729_v26  ;;  %v1589_v42 = vld [vmem:[%s15654_s25 + $0x1a48] sm:$0xff]  ;;  %v14077_v48 = vcombine.low %v1725_v25, %v1729_v26 }
 0x337   : > { %10722 = vmatprep.subr.bf16.mxu0 %v13974_v55  ;;  %v1593_v34 = vld [vmem:[%s15654_s25 + $0x1a68] sm:$0xff] }
 0x338   : > { %10762 = vmatpush2.bf16.msra.mxu1 %v14109_v16  ;;  %v1717_v0 = vld [vmem:[%s15654_s25 + $0x1e48] sm:$0xff]  ;;  %v13942_v6 = vcombine.high %v1589_v42, %v1593_v34  ;;  %v13941_v57 = vcombine.low %v1589_v42, %v1593_v34 }
 0x339   : > { %10763 = vmatprep.subr.bf16.mxu1 %v14102_v41  ;;  %v1721_v44 = vld [vmem:[%s15654_s25 + $0x1e68] sm:$0xff] }
 0x33a   : > { %10723 = vmatpush2.bf16.msra.mxu0 %v13973_v63  ;;  %v14070_v16 = vcombine.high %v1717_v0, %v1721_v44  ;;  %v1581_v55 = vld [vmem:[%s15654_s25 + $0x1a08] sm:$0xff]  ;;  %v14069_v62 = vcombine.low %v1717_v0, %v1721_v44 }
 0x33b   : > { %10724 = vmatprep.subr.bf16.mxu0 %v13966_v13  ;;  %v1585_v41 = vld [vmem:[%s15654_s25 + $0x1a28] sm:$0xff] }
 0x33c   : > { %10764 = vmatpush2.bf16.msra.mxu1 %v14101_v1  ;;  %v1709_v61 = vld [vmem:[%s15654_s25 + $0x1e08] sm:$0xff]  ;;  %v13934_v63 = vcombine.high %v1581_v55, %v1585_v41  ;;  %v13933_v11 = vcombine.low %v1581_v55, %v1585_v41 }
 0x33d   : > { %10765 = vmatprep.subr.bf16.mxu1 %v14094_v60  ;;  %v1713_v56 = vld [vmem:[%s15654_s25 + $0x1e28] sm:$0xff] }
 0x33e   : > { %10725 = vmatpush2.bf16.msra.mxu0 %v13965_v15  ;;  %v14062_v1 = vcombine.high %v1709_v61, %v1713_v56  ;;  %v1829_v13 = vld [vmem:[%s15654_s25 + $0x21c8] sm:$0xff]  ;;  %v14061_v24 = vcombine.low %v1709_v61, %v1713_v56 }
 0x33f   : > { %10726 = vmatprep.subr.bf16.mxu0 %v13958_v19  ;;  %v1833_v60 = vld [vmem:[%s15654_s25 + $0x21e8] sm:$0xff] }
 0x340   : > { %10766 = vmatpush2.bf16.msra.mxu1 %v14093_v22  ;;  %v1957_v7 = vld [vmem:[%s15654_s25 + $0x25c8] sm:$0xff]  ;;  %v14182_v15 = vcombine.high %v1829_v13, %v1833_v60  ;;  %v14181_v25 = vcombine.low %v1829_v13, %v1833_v60 }
 0x341   : > { %10767 = vmatprep.subr.bf16.mxu1 %v14086_v27  ;;  %v1961_v8 = vld [vmem:[%s15654_s25 + $0x25e8] sm:$0xff] }
 0x342   : > { %10727 = vmatpush2.bf16.msra.mxu0 %v13957_v30  ;;  %v14310_v22 = vcombine.high %v1957_v7, %v1961_v8  ;;  %v1821_v19 = vld [vmem:[%s15654_s25 + $0x2188] sm:$0xff]  ;;  %v14309_v26 = vcombine.low %v1957_v7, %v1961_v8 }
 0x343   : > { %10728 = vmatprep.subr.bf16.mxu0 %v13950_v37  ;;  %v1825_v27 = vld [vmem:[%s15654_s25 + $0x21a8] sm:$0xff] }
 0x344   : > { %10768 = vmatpush2.bf16.msra.mxu1 %v14085_v31  ;;  %v1949_v21 = vld [vmem:[%s15654_s25 + $0x2588] sm:$0xff]  ;;  %v14174_v30 = vcombine.high %v1821_v19, %v1825_v27 }
 0x345   : > { %10769 = vmatprep.subr.bf16.mxu1 %v14078_v38  ;;  %v1953_v23 = vld [vmem:[%s15654_s25 + $0x25a8] sm:$0xff] }
 0x346   : > { %10729 = vmatpush2.bf16.msra.mxu0 %v13949_v14  ;;  %v14302_v31 = vcombine.high %v1949_v21, %v1953_v23  ;;  %v1813_v37 = vld [vmem:[%s15654_s25 + $0x2148] sm:$0xff]  ;;  %v14173_v14 = vcombine.low %v1821_v19, %v1825_v27 }
 0x347   : > { %10730 = vmatprep.subr.bf16.mxu0 %v13942_v6  ;;  %v1817_v38 = vld [vmem:[%s15654_s25 + $0x2168] sm:$0xff] }
 0x348   : > { %10770 = vmatpush2.bf16.msra.mxu1 %v14077_v48  ;;  %v1941_v34 = vld [vmem:[%s15654_s25 + $0x2548] sm:$0xff]  ;;  %v14166_v55 = vcombine.high %v1813_v37, %v1817_v38  ;;  %v14165_v7 = vcombine.low %v1813_v37, %v1817_v38 }
 0x349   : > { %10771 = vmatprep.subr.bf16.mxu1 %v14070_v16  ;;  %v1945_v0 = vld [vmem:[%s15654_s25 + $0x2568] sm:$0xff]  ;;  %v14301_v16 = vcombine.low %v1949_v21, %v1953_v23 }
 0x34a   : > { %10731 = vmatpush2.bf16.msra.mxu0 %v13941_v57  ;;  %v14294_v61 = vcombine.high %v1941_v34, %v1945_v0  ;;  %v1805_v56 = vld [vmem:[%s15654_s25 + $0x2108] sm:$0xff] }
 0x34b   : > { %10732 = vmatprep.subr.bf16.mxu0 %v13934_v63  ;;  %v1809_v57 = vld [vmem:[%s15654_s25 + $0x2128] sm:$0xff] }
 0x34c   : > { %10772 = vmatpush2.bf16.msra.mxu1 %v14069_v62  ;;  %v1937_v13 = vld [vmem:[%s15654_s25 + $0x2528] sm:$0xff] }
 0x34d   : > { %10773 = vmatprep.subr.bf16.mxu1 %v14062_v1  ;;  %v1933_v1 = vld [vmem:[%s15654_s25 + $0x2508] sm:$0xff] }
 0x34e   : > { %10733 = vmatpush2.bf16.msra.mxu0 %v13933_v11  ;;  %v14293_v11 = vcombine.low %v1941_v34, %v1945_v0  ;;  %v1797_v19 = vld [vmem:[%s15654_s25 + $0x20c8] sm:$0xff] }
 0x34f   : > { %10784 = vmatprep.subr.bf16.mxu0 %v14182_v15  ;;  %v1801_v27 = vld [vmem:[%s15654_s25 + $0x20e8] sm:$0xff] }
 0x350   : > { %10774 = vmatpush2.bf16.msra.mxu1 %v14061_v24  ;;  %v14158_v24 = vcombine.high %v1805_v56, %v1809_v57  ;;  %v1925_v21 = vld [vmem:[%s15654_s25 + $0x24c8] sm:$0xff]  ;;  %v14149_v0 = vcombine.low %v1797_v19, %v1801_v27 }
 0x351   : > { %10825 = vmatprep.subr.bf16.mxu1 %v14310_v22  ;;  %v10490_v42 = vpop.f32.mrf.mxu0  ;;  %10735 = vmatmul.mubr.bf16.vlgmr.msra.gmra.mxu0 %v16058_v51  ;;  %v14286_v22 = vcombine.high %v1933_v1, %v1937_v13  ;;  %v1929_v23 = vld [vmem:[%s15654_s25 + $0x24e8] sm:$0xff] }
 0x352   : > { %10785 = vmatpush1.bf16.msra.mxu0 %v14181_v25  ;;  %10816 = vmatprep.mubr.bf16.mxu0 %v16070_v3  ;;  %v14157_v25 = vcombine.low %v1805_v56, %v1809_v57  ;;  %v1789_v37 = vld [vmem:[%s15654_s25 + $0x2088] sm:$0xff] }
 0x353   : > { %v10531_v44 = vpop.f32.mrf.mxu1  ;;  %10776 = vmatmul.mubr.bf16.vlgmr.msra.gmra.mxu1 %v16066_v59  ;;  %v10492_v6 = vpop.f32.mrf.mxu0  ;;  %10786 = vmatprep.subr.bf16.mxu0 %v14174_v30  ;;  %v14150_v30 = vcombine.high %v1797_v19, %v1801_v27  ;;  %v1793_v38 = vld [vmem:[%s15654_s25 + $0x20a8] sm:$0xff] }
 0x354   : > { %v16553_v48 = vadd.f32 %v10531_v44, %v10490_v42  ;;  %10826 = vmatpush1.bf16.msra.mxu1 %v14309_v26  ;;  %10857 = vmatprep.mubr.bf16.mxu1 %v16075_v43  ;;  %v14285_v26 = vcombine.low %v1933_v1, %v1937_v13  ;;  %v1917_v42 = vld [vmem:[%s15654_s25 + $0x2488] sm:$0xff]  ;;  %v14277_v44 = vcombine.low %v1925_v21, %v1929_v23 }
 0x355   : > { %v10533_v41 = vpop.f32.mrf.mxu1  ;;  %10827 = vmatprep.subr.bf16.mxu1 %v14302_v31  ;;  %v10494_v63 = vpop.f32.mrf.mxu0  ;;  %v14278_v31 = vcombine.high %v1925_v21, %v1929_v23  ;;  %v1921_v34 = vld [vmem:[%s15654_s25 + $0x24a8] sm:$0xff]  ;;  %v14141_v56 = vcombine.low %v1789_v37, %v1793_v38 }
 0x356   : > { %v16558_v62 = vadd.f32 %v10533_v41, %v10492_v6  ;;  %10787 = vmatpush1.bf16.msra.mxu0 %v14173_v14  ;;  %v14142_v14 = vcombine.high %v1789_v37, %v1793_v38  ;;  %v14270_v6 = vcombine.high %v1917_v42, %v1921_v34  ;;  %v1909_v41 = vld [vmem:[%s15654_s25 + $0x2448] sm:$0xff]  ;;  %v14269_v57 = vcombine.low %v1917_v42, %v1921_v34 }
 0x357   : > { %v10535_v60 = vpop.f32.mrf.mxu1  ;;  %v10495_v8 = vpop.f32.mrf.mxu0  ;;  %10788 = vmatprep.subr.bf16.mxu0 %v14166_v55  ;;  %v1785_v55 = vld [vmem:[%s15654_s25 + $0x2068] sm:$0xff] }
 0x358   : > { %10828 = vmatpush1.bf16.msra.mxu1 %v14301_v16  ;;  %v1781_v16 = vld [vmem:[%s15654_s25 + $0x2048] sm:$0xff] }
 0x359   : > { %v10536_v15 = vpop.f32.mrf.mxu1  ;;  %10829 = vmatprep.subr.bf16.mxu1 %v14294_v61  ;;  %v1913_v61 = vld [vmem:[%s15654_s25 + $0x2468] sm:$0xff]  ;;  %v14134_v63 = vcombine.high %v1781_v16, %v1785_v55 }
 0x35a   : > { %10789 = vmatpush1.bf16.msra.mxu0 %v14165_v7  ;;  %v14262_v1 = vcombine.high %v1909_v41, %v1913_v61  ;;  %v1773_v13 = vld [vmem:[%s15654_s25 + $0x2008] sm:$0xff] }
 0x35b   : > { %10790 = vmatprep.subr.bf16.mxu0 %v14158_v24  ;;  %v1777_v60 = vld [vmem:[%s15654_s25 + $0x2028] sm:$0xff]  ;;  %v14261_v24 = vcombine.low %v1909_v41, %v1913_v61 }
 0x35c   : > { %10830 = vmatpush1.bf16.msra.mxu1 %v14293_v11  ;;  %v1901_v7 = vld [vmem:[%s15654_s25 + $0x2408] sm:$0xff]  ;;  %v14133_v11 = vcombine.low %v1781_v16, %v1785_v55  ;;  %v14126_v15 = vcombine.high %v1773_v13, %v1777_v60 }
 0x35d   : > { %10831 = vmatprep.subr.bf16.mxu1 %v14286_v22  ;;  %v1905_v8 = vld [vmem:[%s15654_s25 + $0x2428] sm:$0xff] }
 0x35e   : > { %10791 = vmatpush1.bf16.msra.mxu0 %v14157_v25  ;;  %v14254_v22 = vcombine.high %v1901_v7, %v1905_v8  ;;  %v1893_v19 = vld [vmem:[%s15654_s25 + $0x23c8] sm:$0xff]  ;;  %v14125_v25 = vcombine.low %v1773_v13, %v1777_v60 }
 0x35f   : > { %10792 = vmatprep.subr.bf16.mxu0 %v14150_v30  ;;  %v1897_v27 = vld [vmem:[%s15654_s25 + $0x23e8] sm:$0xff] }
 0x360   : > { %10832 = vmatpush1.bf16.msra.mxu1 %v14285_v26  ;;  %v2021_v21 = vld [vmem:[%s15654_s25 + $0x27c8] sm:$0xff]  ;;  %v14253_v26 = vcombine.low %v1901_v7, %v1905_v8  ;;  %v14246_v30 = vcombine.high %v1893_v19, %v1897_v27 }
 0x361   : > { %10833 = vmatprep.subr.bf16.mxu1 %v14278_v31  ;;  %v2025_v23 = vld [vmem:[%s15654_s25 + $0x27e8] sm:$0xff] }
 0x362   : > { %10793 = vmatpush1.bf16.msra.mxu0 %v14149_v0  ;;  %v14374_v31 = vcombine.high %v2021_v21, %v2025_v23  ;;  %v1885_v37 = vld [vmem:[%s15654_s25 + $0x2388] sm:$0xff]  ;;  %v14245_v0 = vcombine.low %v1893_v19, %v1897_v27 }
 0x363   : > { %10794 = vmatprep.subr.bf16.mxu0 %v14142_v14  ;;  %v1889_v38 = vld [vmem:[%s15654_s25 + $0x23a8] sm:$0xff] }
 0x364   : > { %10834 = vmatpush1.bf16.msra.mxu1 %v14277_v44  ;;  %v2013_v42 = vld [vmem:[%s15654_s25 + $0x2788] sm:$0xff]  ;;  %v14373_v44 = vcombine.low %v2021_v21, %v2025_v23  ;;  %v14238_v14 = vcombine.high %v1885_v37, %v1889_v38 }
 0x365   : > { %10835 = vmatprep.subr.bf16.mxu1 %v14270_v6  ;;  %v2017_v34 = vld [vmem:[%s15654_s25 + $0x27a8] sm:$0xff] }
 0x366   : > { %10795 = vmatpush1.bf16.msra.mxu0 %v14141_v56  ;;  %v14366_v6 = vcombine.high %v2013_v42, %v2017_v34  ;;  %v1877_v16 = vld [vmem:[%s15654_s25 + $0x2348] sm:$0xff]  ;;  %v14237_v56 = vcombine.low %v1885_v37, %v1889_v38 }
 0x367   : > { %10796 = vmatprep.subr.bf16.mxu0 %v14134_v63  ;;  %v1881_v55 = vld [vmem:[%s15654_s25 + $0x2368] sm:$0xff] }
 0x368   : > { %10836 = vmatpush1.bf16.msra.mxu1 %v14269_v57  ;;  %v2005_v41 = vld [vmem:[%s15654_s25 + $0x2748] sm:$0xff]  ;;  %v14365_v57 = vcombine.low %v2013_v42, %v2017_v34  ;;  %v14230_v63 = vcombine.high %v1877_v16, %v1881_v55 }
 0x369   : > { %10837 = vmatprep.subr.bf16.mxu1 %v14262_v1  ;;  %v2009_v61 = vld [vmem:[%s15654_s25 + $0x2768] sm:$0xff] }
 0x36a   : > { %10797 = vmatpush1.bf16.msra.mxu0 %v14133_v11  ;;  %v14358_v1 = vcombine.high %v2005_v41, %v2009_v61  ;;  %v1869_v13 = vld [vmem:[%s15654_s25 + $0x2308] sm:$0xff]  ;;  %v14229_v11 = vcombine.low %v1877_v16, %v1881_v55 }
 0x36b   : > { %10798 = vmatprep.subr.bf16.mxu0 %v14126_v15  ;;  %v1873_v60 = vld [vmem:[%s15654_s25 + $0x2328] sm:$0xff] }
 0x36c   : > { %10838 = vmatpush1.bf16.msra.mxu1 %v14261_v24  ;;  %v1997_v7 = vld [vmem:[%s15654_s25 + $0x2708] sm:$0xff]  ;;  %v14357_v24 = vcombine.low %v2005_v41, %v2009_v61  ;;  %v14222_v15 = vcombine.high %v1869_v13, %v1873_v60 }
 0x36d   : > { %10839 = vmatprep.subr.bf16.mxu1 %v14254_v22  ;;  %v2001_v8 = vld [vmem:[%s15654_s25 + $0x2728] sm:$0xff] }
 0x36e   : > { %10799 = vmatpush1.bf16.msra.mxu0 %v14125_v25  ;;  %v14350_v22 = vcombine.high %v1997_v7, %v2001_v8  ;;  %v1861_v19 = vld [vmem:[%s15654_s25 + $0x22c8] sm:$0xff]  ;;  %v14221_v25 = vcombine.low %v1869_v13, %v1873_v60 }
 0x36f   : > { %10800 = vmatprep.subr.bf16.mxu0 %v14246_v30  ;;  %v1865_v27 = vld [vmem:[%s15654_s25 + $0x22e8] sm:$0xff] }
 0x370   : > { %10840 = vmatpush1.bf16.msra.mxu1 %v14253_v26  ;;  %v1989_v21 = vld [vmem:[%s15654_s25 + $0x26c8] sm:$0xff]  ;;  %v14349_v26 = vcombine.low %v1997_v7, %v2001_v8  ;;  %v14214_v30 = vcombine.high %v1861_v19, %v1865_v27 }
 0x371   : > { %10841 = vmatprep.subr.bf16.mxu1 %v14374_v31  ;;  %v1993_v23 = vld [vmem:[%s15654_s25 + $0x26e8] sm:$0xff] }
 0x372   : > { %10801 = vmatpush2.bf16.msra.mxu0 %v14245_v0  ;;  %v14342_v31 = vcombine.high %v1989_v21, %v1993_v23  ;;  %v1853_v37 = vld [vmem:[%s15654_s25 + $0x2288] sm:$0xff]  ;;  %v14213_v0 = vcombine.low %v1861_v19, %v1865_v27 }
 0x373   : > { %10802 = vmatprep.subr.bf16.mxu0 %v14238_v14  ;;  %v1857_v38 = vld [vmem:[%s15654_s25 + $0x22a8] sm:$0xff] }
 0x374   : > { %10842 = vmatpush2.bf16.msra.mxu1 %v14373_v44  ;;  %v1981_v42 = vld [vmem:[%s15654_s25 + $0x2688] sm:$0xff]  ;;  %v14341_v44 = vcombine.low %v1989_v21, %v1993_v23  ;;  %v14206_v14 = vcombine.high %v1853_v37, %v1857_v38 }
 0x375   : > { %10843 = vmatprep.subr.bf16.mxu1 %v14366_v6  ;;  %v1985_v34 = vld [vmem:[%s15654_s25 + $0x26a8] sm:$0xff] }
 0x376   : > { %10803 = vmatpush2.bf16.msra.mxu0 %v14237_v56  ;;  %v14334_v6 = vcombine.high %v1981_v42, %v1985_v34  ;;  %v1845_v16 = vld [vmem:[%s15654_s25 + $0x2248] sm:$0xff]  ;;  %v14205_v56 = vcombine.low %v1853_v37, %v1857_v38 }
 0x377   : > { %10804 = vmatprep.subr.bf16.mxu0 %v14230_v63  ;;  %v1849_v55 = vld [vmem:[%s15654_s25 + $0x2268] sm:$0xff] }
 0x378   : > { %10844 = vmatpush2.bf16.msra.mxu1 %v14365_v57  ;;  %v1973_v41 = vld [vmem:[%s15654_s25 + $0x2648] sm:$0xff]  ;;  %v14333_v57 = vcombine.low %v1981_v42, %v1985_v34  ;;  %v14198_v63 = vcombine.high %v1845_v16, %v1849_v55 }
 0x379   : > { %10845 = vmatprep.subr.bf16.mxu1 %v14358_v1  ;;  %v1977_v61 = vld [vmem:[%s15654_s25 + $0x2668] sm:$0xff] }
 0x37a   : > { %10805 = vmatpush2.bf16.msra.mxu0 %v14229_v11  ;;  %v14326_v1 = vcombine.high %v1973_v41, %v1977_v61  ;;  %v1837_v13 = vld [vmem:[%s15654_s25 + $0x2208] sm:$0xff]  ;;  %v14197_v11 = vcombine.low %v1845_v16, %v1849_v55 }
 0x37b   : > { %10806 = vmatprep.subr.bf16.mxu0 %v14222_v15  ;;  %v1841_v60 = vld [vmem:[%s15654_s25 + $0x2228] sm:$0xff] }
 0x37c   : > { %10846 = vmatpush2.bf16.msra.mxu1 %v14357_v24  ;;  %v1965_v7 = vld [vmem:[%s15654_s25 + $0x2608] sm:$0xff]  ;;  %v14325_v24 = vcombine.low %v1973_v41, %v1977_v61  ;;  %v14190_v15 = vcombine.high %v1837_v13, %v1841_v60 }
 0x37d   : > { %10847 = vmatprep.subr.bf16.mxu1 %v14350_v22  ;;  %v1969_v8 = vld [vmem:[%s15654_s25 + $0x2628] sm:$0xff] }
 0x37e   : > { %10807 = vmatpush2.bf16.msra.mxu0 %v14221_v25  ;;  %v14318_v22 = vcombine.high %v1965_v7, %v1969_v8  ;;  %v2085_v19 = vld [vmem:[%s15654_s25 + $0x29c8] sm:$0xff]  ;;  %v14189_v25 = vcombine.low %v1837_v13, %v1841_v60 }
 0x37f   : > { %10808 = vmatprep.subr.bf16.mxu0 %v14214_v30  ;;  %v2089_v27 = vld [vmem:[%s15654_s25 + $0x29e8] sm:$0xff] }
 0x380   : > { %10848 = vmatpush2.bf16.msra.mxu1 %v14349_v26  ;;  %v2213_v21 = vld [vmem:[%s15654_s25 + $0x2dc8] sm:$0xff]  ;;  %v14317_v26 = vcombine.low %v1965_v7, %v1969_v8  ;;  %v14438_v30 = vcombine.high %v2085_v19, %v2089_v27 }
 0x381   : > { %10849 = vmatprep.subr.bf16.mxu1 %v14342_v31  ;;  %v2217_v23 = vld [vmem:[%s15654_s25 + $0x2de8] sm:$0xff] }
 0x382   : > { %10809 = vmatpush2.bf16.msra.mxu0 %v14213_v0  ;;  %v14566_v31 = vcombine.high %v2213_v21, %v2217_v23  ;;  %v2077_v37 = vld [vmem:[%s15654_s25 + $0x2988] sm:$0xff]  ;;  %v14437_v0 = vcombine.low %v2085_v19, %v2089_v27 }
 0x383   : > { %10810 = vmatprep.subr.bf16.mxu0 %v14206_v14  ;;  %v2081_v38 = vld [vmem:[%s15654_s25 + $0x29a8] sm:$0xff] }
 0x384   : > { %10850 = vmatpush2.bf16.msra.mxu1 %v14341_v44  ;;  %v2205_v42 = vld [vmem:[%s15654_s25 + $0x2d88] sm:$0xff]  ;;  %v14565_v44 = vcombine.low %v2213_v21, %v2217_v23  ;;  %v14430_v14 = vcombine.high %v2077_v37, %v2081_v38 }
 0x385   : > { %10851 = vmatprep.subr.bf16.mxu1 %v14334_v6  ;;  %v2209_v34 = vld [vmem:[%s15654_s25 + $0x2da8] sm:$0xff] }
 0x386   : > { %10811 = vmatpush2.bf16.msra.mxu0 %v14205_v56  ;;  %v14558_v6 = vcombine.high %v2205_v42, %v2209_v34  ;;  %v2069_v16 = vld [vmem:[%s15654_s25 + $0x2948] sm:$0xff]  ;;  %v14557_v60 = vcombine.low %v2205_v42, %v2209_v34 }
 0x387   : > { %10812 = vmatprep.subr.bf16.mxu0 %v14198_v63  ;;  %v2073_v55 = vld [vmem:[%s15654_s25 + $0x2968] sm:$0xff] }
 0x388   : > { %10852 = vmatpush2.bf16.msra.mxu1 %v14333_v57  ;;  %v2197_v61 = vld [vmem:[%s15654_s25 + $0x2d48] sm:$0xff]  ;;  %v14422_v7 = vcombine.high %v2069_v16, %v2073_v55 }
 0x389   : > { %10853 = vmatprep.subr.bf16.mxu1 %v14326_v1  ;;  %v2201_v56 = vld [vmem:[%s15654_s25 + $0x2d68] sm:$0xff]  ;;  %v14429_v1 = vcombine.low %v2077_v37, %v2081_v38 }
 0x38a   : > { %10813 = vmatpush2.bf16.msra.mxu0 %v14197_v11  ;;  %v2189_v27 = vld [vmem:[%s15654_s25 + $0x2d08] sm:$0xff] }
 0x38b   : > { %10814 = vmatprep.subr.bf16.mxu0 %v14190_v15  ;;  %v2061_v15 = vld [vmem:[%s15654_s25 + $0x2908] sm:$0xff] }
 0x38c   : > { %10854 = vmatpush2.bf16.msra.mxu1 %v14325_v24  ;;  %v2193_v21 = vld [vmem:[%s15654_s25 + $0x2d28] sm:$0xff] }
 0x38d   : > { %10855 = vmatprep.subr.bf16.mxu1 %v14318_v22  ;;  %v2065_v22 = vld [vmem:[%s15654_s25 + $0x2928] sm:$0xff]  ;;  %v14542_v38 = vcombine.high %v2189_v27, %v2193_v21 }
 0x38e   : > { %10815 = vmatpush2.bf16.msra.mxu0 %v14189_v25  ;;  %v2053_v42 = vld [vmem:[%s15654_s25 + $0x28c8] sm:$0xff] }
 0x38f   : > { %10866 = vmatprep.subr.bf16.mxu0 %v14438_v30  ;;  %v14549_v30 = vcombine.low %v2197_v61, %v2201_v56  ;;  %v2057_v34 = vld [vmem:[%s15654_s25 + $0x28e8] sm:$0xff] }
 0x390   : > { %10856 = vmatpush2.bf16.msra.mxu1 %v14317_v26 }
 0x391   : > { %10907 = vmatprep.subr.bf16.mxu1 %v14566_v31  ;;  %v10572_v41 = vpop.f32.mrf.mxu0  ;;  %10817 = vmatmul.mubr.bf16.vlgmr.msra.gmra.mxu0 %v16153_v29  ;;  %v14414_v31 = vcombine.high %v2061_v15, %v2065_v22 }
 0x392   : > { %v10573_v57 = vadd.f32 %v10572_v41, %v16553_v48  ;;  %10867 = vmatpush1.bf16.msra.mxu0 %v14437_v0  ;;  %v14550_v48 = vcombine.high %v2197_v61, %v2201_v56  ;;  %10898 = vmatprep.mubr.bf16.mxu0 %v16165_v46  ;;  %v2181_v0 = vld [vmem:[%s15654_s25 + $0x2cc8] sm:$0xff] }
 0x393   : > { %v10613_v63 = vpop.f32.mrf.mxu1  ;;  %10858 = vmatmul.mubr.bf16.vlgmr.msra.gmra.mxu1 %v16161_v33  ;;  %v10574_v13 = vpop.f32.mrf.mxu0  ;;  %10868 = vmatprep.subr.bf16.mxu0 %v14430_v14  ;;  %v14413_v14 = vcombine.low %v2061_v15, %v2065_v22  ;;  %v2045_v41 = vld [vmem:[%s15654_s25 + $0x2888] sm:$0xff] }
 0x394   : > { %10908 = vmatpush1.bf16.msra.mxu1 %v14565_v44  ;;  %v16626_v8 = vadd.f32 %v10613_v63, %v10573_v57  ;;  %v10575_v11 = vadd.f32 %v10574_v13, %v16558_v62  ;;  %10939 = vmatprep.mubr.bf16.mxu1 %v16170_v53  ;;  %v14421_v62 = vcombine.low %v2069_v16, %v2073_v55  ;;  %v2185_v44 = vld [vmem:[%s15654_s25 + $0x2ce8] sm:$0xff] }
 0x395   : > { %v10615_v24 = vpop.f32.mrf.mxu1  ;;  %10909 = vmatprep.subr.bf16.mxu1 %v14558_v6  ;;  %v10576_v19 = vpop.f32.mrf.mxu0  ;;  %v14541_v6 = vcombine.low %v2189_v27, %v2193_v21  ;;  %v14406_v16 = vcombine.high %v2053_v42, %v2057_v34  ;;  %v14534_v55 = vcombine.high %v2181_v0, %v2185_v44  ;;  %v2049_v61 = vld [vmem:[%s15654_s25 + $0x28a8] sm:$0xff]  ;;  %v14405_v63 = vcombine.low %v2053_v42, %v2057_v34 }
 0x396   : > { %v16635_v23 = vadd.f32 %v10615_v24, %v10575_v11  ;;  %10869 = vmatpush1.bf16.msra.mxu0 %v14429_v1  ;;  %v2173_v56 = vld [vmem:[%s15654_s25 + $0x2c88] sm:$0xff]  ;;  %v14533_v1 = vcombine.low %v2181_v0, %v2185_v44  ;;  %v14398_v13 = vcombine.high %v2045_v41, %v2049_v61  ;;  %v14397_v15 = vcombine.low %v2045_v41, %v2049_v61 }
 0x397   : > { %v10617_v25 = vpop.f32.mrf.mxu1  ;;  %v10577_v26 = vpop.f32.mrf.mxu0  ;;  %10870 = vmatprep.subr.bf16.mxu0 %v14422_v7  ;;  %v2177_v57 = vld [vmem:[%s15654_s25 + $0x2ca8] sm:$0xff] }
 0x398   : > { %10910 = vmatpush1.bf16.msra.mxu1 %v14557_v60  ;;  %v14526_v60 = vcombine.high %v2173_v56, %v2177_v57  ;;  %v2037_v7 = vld [vmem:[%s15654_s25 + $0x2848] sm:$0xff]  ;;  %v14525_v22 = vcombine.low %v2173_v56, %v2177_v57 }
 0x399   : > { %v10618_v37 = vpop.f32.mrf.mxu1  ;;  %10911 = vmatprep.subr.bf16.mxu1 %v14550_v48  ;;  %v2041_v11 = vld [vmem:[%s15654_s25 + $0x2868] sm:$0xff] }
 0x39a   : > { %10871 = vmatpush1.bf16.msra.mxu0 %v14421_v62  ;;  %v2165_v24 = vld [vmem:[%s15654_s25 + $0x2c48] sm:$0xff]  ;;  %v14390_v19 = vcombine.high %v2037_v7, %v2041_v11 }
 0x39b   : > { %10872 = vmatprep.subr.bf16.mxu0 %v14414_v31  ;;  %v2169_v48 = vld [vmem:[%s15654_s25 + $0x2c68] sm:$0xff] }
 0x39c   : > { %10912 = vmatpush1.bf16.msra.mxu1 %v14549_v30  ;;  %v14518_v27 = vcombine.high %v2165_v24, %v2169_v48  ;;  %v2029_v21 = vld [vmem:[%s15654_s25 + $0x2808] sm:$0xff]  ;;  %v14389_v30 = vcombine.low %v2037_v7, %v2041_v11  ;;  %v14517_v31 = vcombine.low %v2165_v24, %v2169_v48 }
 0x39d   : > { %10913 = vmatprep.subr.bf16.mxu1 %v14542_v38  ;;  %v2033_v25 = vld [vmem:[%s15654_s25 + $0x2828] sm:$0xff] }
 0x39e   : > { %10873 = vmatpush1.bf16.msra.mxu0 %v14413_v14  ;;  %v2157_v62 = vld [vmem:[%s15654_s25 + $0x2c08] sm:$0xff]  ;;  %v14382_v37 = vcombine.high %v2029_v21, %v2033_v25  ;;  %v14381_v14 = vcombine.low %v2029_v21, %v2033_v25 }
 0x39f   : > { %10874 = vmatprep.subr.bf16.mxu0 %v14406_v16  ;;  %v2161_v26 = vld [vmem:[%s15654_s25 + $0x2c28] sm:$0xff] }
 0x3a0   : > { %10914 = vmatpush1.bf16.msra.mxu1 %v14541_v6  ;;  %v14510_v38 = vcombine.high %v2157_v62, %v2161_v26  ;;  %v2149_v42 = vld [vmem:[%s15654_s25 + $0x2bc8] sm:$0xff]  ;;  %v14509_v6 = vcombine.low %v2157_v62, %v2161_v26 }
 0x3a1   : > { %10915 = vmatprep.subr.bf16.mxu1 %v14534_v55  ;;  %v2153_v34 = vld [vmem:[%s15654_s25 + $0x2be8] sm:$0xff] }
 0x3a2   : > { %10875 = vmatpush1.bf16.msra.mxu0 %v14405_v63  ;;  %v2277_v0 = vld [vmem:[%s15654_s25 + $0x2fc8] sm:$0xff]  ;;  %v14502_v16 = vcombine.high %v2149_v42, %v2153_v34  ;;  %v14501_v63 = vcombine.low %v2149_v42, %v2153_v34 }
 0x3a3   : > { %10876 = vmatprep.subr.bf16.mxu0 %v14398_v13  ;;  %v2281_v44 = vld [vmem:[%s15654_s25 + $0x2fe8] sm:$0xff] }
 0x3a4   : > { %10916 = vmatpush1.bf16.msra.mxu1 %v14533_v1  ;;  %v14630_v55 = vcombine.high %v2277_v0, %v2281_v44  ;;  %v2141_v41 = vld [vmem:[%s15654_s25 + $0x2b88] sm:$0xff]  ;;  %v14629_v1 = vcombine.low %v2277_v0, %v2281_v44 }
 0x3a5   : > { %10917 = vmatprep.subr.bf16.mxu1 %v14526_v60  ;;  %v2145_v61 = vld [vmem:[%s15654_s25 + $0x2ba8] sm:$0xff] }
 0x3a6   : > { %10877 = vmatpush1.bf16.msra.mxu0 %v14397_v15  ;;  %v2269_v56 = vld [vmem:[%s15654_s25 + $0x2f88] sm:$0xff]  ;;  %v14494_v13 = vcombine.high %v2141_v41, %v2145_v61  ;;  %v14493_v15 = vcombine.low %v2141_v41, %v2145_v61 }
 0x3a7   : > { %10878 = vmatprep.subr.bf16.mxu0 %v14390_v19  ;;  %v2273_v57 = vld [vmem:[%s15654_s25 + $0x2fa8] sm:$0xff] }
 0x3a8   : > { %10918 = vmatpush1.bf16.msra.mxu1 %v14525_v22  ;;  %v14622_v60 = vcombine.high %v2269_v56, %v2273_v57  ;;  %v2133_v7 = vld [vmem:[%s15654_s25 + $0x2b48] sm:$0xff]  ;;  %v14621_v22 = vcombine.low %v2269_v56, %v2273_v57 }
 0x3a9   : > { %10919 = vmatprep.subr.bf16.mxu1 %v14518_v27  ;;  %v2137_v11 = vld [vmem:[%s15654_s25 + $0x2b68] sm:$0xff] }
 0x3aa   : > { %10879 = vmatpush1.bf16.msra.mxu0 %v14389_v30  ;;  %v2261_v24 = vld [vmem:[%s15654_s25 + $0x2f48] sm:$0xff]  ;;  %v14486_v19 = vcombine.high %v2133_v7, %v2137_v11  ;;  %v14485_v30 = vcombine.low %v2133_v7, %v2137_v11 }
 0x3ab   : > { %10880 = vmatprep.subr.bf16.mxu0 %v14382_v37  ;;  %v2265_v48 = vld [vmem:[%s15654_s25 + $0x2f68] sm:$0xff] }
 0x3ac   : > { %10920 = vmatpush1.bf16.msra.mxu1 %v14517_v31  ;;  %v14614_v27 = vcombine.high %v2261_v24, %v2265_v48  ;;  %v2125_v21 = vld [vmem:[%s15654_s25 + $0x2b08] sm:$0xff]  ;;  %v14613_v31 = vcombine.low %v2261_v24, %v2265_v48 }
 0x3ad   : > { %10921 = vmatprep.subr.bf16.mxu1 %v14510_v38  ;;  %v2129_v25 = vld [vmem:[%s15654_s25 + $0x2b28] sm:$0xff] }
 0x3ae   : > { %10881 = vmatpush1.bf16.msra.mxu0 %v14381_v14  ;;  %v2253_v62 = vld [vmem:[%s15654_s25 + $0x2f08] sm:$0xff]  ;;  %v14478_v37 = vcombine.high %v2125_v21, %v2129_v25  ;;  %v14477_v14 = vcombine.low %v2125_v21, %v2129_v25 }
 0x3af   : > { %10882 = vmatprep.subr.bf16.mxu0 %v14502_v16  ;;  %v2257_v26 = vld [vmem:[%s15654_s25 + $0x2f28] sm:$0xff] }
 0x3b0   : > { %10922 = vmatpush1.bf16.msra.mxu1 %v14509_v6  ;;  %v14606_v38 = vcombine.high %v2253_v62, %v2257_v26  ;;  %v2117_v42 = vld [vmem:[%s15654_s25 + $0x2ac8] sm:$0xff]  ;;  %v14605_v6 = vcombine.low %v2253_v62, %v2257_v26 }
 0x3b1   : > { %10923 = vmatprep.subr.bf16.mxu1 %v14630_v55  ;;  %v2121_v34 = vld [vmem:[%s15654_s25 + $0x2ae8] sm:$0xff] }
 0x3b2   : > { %10883 = vmatpush2.bf16.msra.mxu0 %v14501_v63  ;;  %v2245_v0 = vld [vmem:[%s15654_s25 + $0x2ec8] sm:$0xff]  ;;  %v14470_v16 = vcombine.high %v2117_v42, %v2121_v34  ;;  %v14469_v63 = vcombine.low %v2117_v42, %v2121_v34  ;;  %v806_v42 = vld [vmem:[%s15654_s25 + $0x1d0] sm:$0xff] }
 0x3b3   : > { %10884 = vmatprep.subr.bf16.mxu0 %v14494_v13  ;;  %v2249_v44 = vld [vmem:[%s15654_s25 + $0x2ee8] sm:$0xff]  ;;  %v810_v34 = vld [vmem:[%s15654_s25 + $0x1f0] sm:$0xff] }
 0x3b4   : > { %10924 = vmatpush2.bf16.msra.mxu1 %v14629_v1  ;;  %v14598_v55 = vcombine.high %v2245_v0, %v2249_v44  ;;  %v2109_v41 = vld [vmem:[%s15654_s25 + $0x2a88] sm:$0xff]  ;;  %v14597_v1 = vcombine.low %v2245_v0, %v2249_v44  ;;  %v934_v0 = vld [vmem:[%s15654_s25 + $0x5d0] sm:$0xff] }
 0x3b5   : > { %10925 = vmatprep.subr.bf16.mxu1 %v14622_v60  ;;  %v2113_v61 = vld [vmem:[%s15654_s25 + $0x2aa8] sm:$0xff]  ;;  %v938_v44 = vld [vmem:[%s15654_s25 + $0x5f0] sm:$0xff] }
 0x3b6   : > { %10885 = vmatpush2.bf16.msra.mxu0 %v14493_v15  ;;  %v2237_v56 = vld [vmem:[%s15654_s25 + $0x2e88] sm:$0xff]  ;;  %v14462_v13 = vcombine.high %v2109_v41, %v2113_v61  ;;  %v14461_v15 = vcombine.low %v2109_v41, %v2113_v61  ;;  %v798_v41 = vld [vmem:[%s15654_s25 + $0x190] sm:$0xff] }
 0x3b7   : > { %10886 = vmatprep.subr.bf16.mxu0 %v14486_v19  ;;  %v2241_v57 = vld [vmem:[%s15654_s25 + $0x2ea8] sm:$0xff]  ;;  %v802_v61 = vld [vmem:[%s15654_s25 + $0x1b0] sm:$0xff] }
 0x3b8   : > { %10926 = vmatpush2.bf16.msra.mxu1 %v14621_v22  ;;  %v14590_v60 = vcombine.high %v2237_v56, %v2241_v57  ;;  %v2101_v7 = vld [vmem:[%s15654_s25 + $0x2a48] sm:$0xff]  ;;  %v14589_v22 = vcombine.low %v2237_v56, %v2241_v57  ;;  %v926_v56 = vld [vmem:[%s15654_s25 + $0x590] sm:$0xff] }
 0x3b9   : > { %10927 = vmatprep.subr.bf16.mxu1 %v14614_v27  ;;  %v2105_v11 = vld [vmem:[%s15654_s25 + $0x2a68] sm:$0xff]  ;;  %v930_v57 = vld [vmem:[%s15654_s25 + $0x5b0] sm:$0xff] }
 0x3ba   : > { %10887 = vmatpush2.bf16.msra.mxu0 %v14485_v30  ;;  %v2229_v24 = vld [vmem:[%s15654_s25 + $0x2e48] sm:$0xff]  ;;  %v14454_v19 = vcombine.high %v2101_v7, %v2105_v11  ;;  %v14453_v30 = vcombine.low %v2101_v7, %v2105_v11  ;;  %v790_v7 = vld [vmem:[%s15654_s25 + $0x150] sm:$0xff] }
 0x3bb   : > { %10888 = vmatprep.subr.bf16.mxu0 %v14478_v37  ;;  %v2233_v48 = vld [vmem:[%s15654_s25 + $0x2e68] sm:$0xff]  ;;  %v794_v11 = vld [vmem:[%s15654_s25 + $0x170] sm:$0xff] }
 0x3bc   : > { %10928 = vmatpush2.bf16.msra.mxu1 %v14613_v31  ;;  %v14582_v27 = vcombine.high %v2229_v24, %v2233_v48  ;;  %v2093_v21 = vld [vmem:[%s15654_s25 + $0x2a08] sm:$0xff]  ;;  %v14581_v31 = vcombine.low %v2229_v24, %v2233_v48  ;;  %v918_v48 = vld [vmem:[%s15654_s25 + $0x550] sm:$0xff] }
 0x3bd   : > { %10929 = vmatprep.subr.bf16.mxu1 %v14606_v38  ;;  %v2097_v25 = vld [vmem:[%s15654_s25 + $0x2a28] sm:$0xff] }
 0x3be   : > { %10889 = vmatpush2.bf16.msra.mxu0 %v14477_v14  ;;  %v2221_v62 = vld [vmem:[%s15654_s25 + $0x2e08] sm:$0xff]  ;;  %v14446_v37 = vcombine.high %v2093_v21, %v2097_v25  ;;  %v14445_v14 = vcombine.low %v2093_v21, %v2097_v25  ;;  %v13279_v25 = vcombine.low %v926_v56, %v930_v57 }
 0x3bf   : > { %10890 = vmatprep.subr.bf16.mxu0 %v14470_v16  ;;  %v2225_v26 = vld [vmem:[%s15654_s25 + $0x2e28] sm:$0xff]  ;;  %v13160_v16 = vcombine.high %v806_v42, %v810_v34 }
 0x3c0   : > { %10930 = vmatpush2.bf16.msra.mxu1 %v14605_v6  ;;  %v14574_v38 = vcombine.high %v2221_v62, %v2225_v26  ;;  %v14573_v6 = vcombine.low %v2221_v62, %v2225_v26  ;;  %v13144_v62 = vcombine.high %v790_v7, %v794_v11 }
 0x3c1   : > { %10931 = vmatprep.subr.bf16.mxu1 %v14598_v55  ;;  %v13288_v55 = vcombine.high %v934_v0, %v938_v44 }
 0x3c2   : > { %10891 = vmatpush2.bf16.msra.mxu0 %v14469_v63  ;;  %v13159_v63 = vcombine.low %v806_v42, %v810_v34  ;;  %v910_v34 = vld [vmem:[%s15654_s25 + $0x510] sm:$0xff] }
 0x3c3   : > { %10892 = vmatprep.subr.bf16.mxu0 %v14462_v13  ;;  %v13152_v13 = vcombine.high %v798_v41, %v802_v61 }
 0x3c4   : > { %10932 = vmatpush2.bf16.msra.mxu1 %v14597_v1  ;;  %v13287_v1 = vcombine.low %v934_v0, %v938_v44  ;;  %v914_v0 = vld [vmem:[%s15654_s25 + $0x530] sm:$0xff] }
 0x3c5   : > { %10933 = vmatprep.subr.bf16.mxu1 %v14590_v60  ;;  %v13280_v60 = vcombine.high %v926_v56, %v930_v57  ;;  %v774_v56 = vld [vmem:[%s15654_s25 + $0xd0] sm:$0xff] }
 0x3c6   : > { %10893 = vmatpush2.bf16.msra.mxu0 %v14461_v15  ;;  %v922_v15 = vld [vmem:[%s15654_s25 + $0x570] sm:$0xff] }
 0x3c7   : > { %10894 = vmatprep.subr.bf16.mxu0 %v14454_v19  ;;  %v778_v57 = vld [vmem:[%s15654_s25 + $0xf0] sm:$0xff] }
 0x3c8   : > { %10934 = vmatpush2.bf16.msra.mxu1 %v14589_v22 }
 0x3c9   : > { %10935 = vmatprep.subr.bf16.mxu1 %v14582_v27  ;;  %v13151_v27 = vcombine.low %v798_v41, %v802_v61  ;;  %v13264_v61 = vcombine.high %v910_v34, %v914_v0 }
 0x3ca   : > { %10895 = vmatpush2.bf16.msra.mxu0 %v14453_v30 }
 0x3cb   : > { %10896 = vmatprep.subr.bf16.mxu0 %v14446_v37  ;;  %v782_v37 = vld [vmem:[%s15654_s25 + $0x110] sm:$0xff] }
 0x3cc   : > { %10936 = vmatpush2.bf16.msra.mxu1 %v14581_v31 }
 0x3cd   : > { %10937 = vmatprep.subr.bf16.mxu1 %v14574_v38  ;;  %v786_v38 = vld [vmem:[%s15654_s25 + $0x130] sm:$0xff] }
 0x3ce   : > { %10897 = vmatpush2.bf16.msra.mxu0 %v14445_v14 }
 0x3cf   : > { %10948 = vmatprep.subr.bf16.mxu0 %v13160_v16  ;;  %v13271_v16 = vcombine.low %v918_v48, %v922_v15 }
 0x3d0   : > { %10938 = vmatpush2.bf16.msra.mxu1 %v14573_v6 }
 0x3d1   : > { %10989 = vmatprep.subr.bf16.mxu1 %v13288_v55  ;;  %v10654_v24 = vpop.f32.mrf.mxu0  ;;  %10899 = vmatmul.mubr.bf16.vlgmr.msra.gmra.mxu0 %v16241_v28  ;;  %v13136_v55 = vcombine.high %v782_v37, %v786_v38 }
 0x3d2   : > { %v10655_v22 = vadd.f32 %v10654_v24, %v16626_v8  ;;  %10949 = vmatpush1.bf16.msra.mxu0 %v13159_v63  ;;  %v13272_v8 = vcombine.high %v918_v48, %v922_v15  ;;  %10980 = vmatprep.mubr.bf16.mxu0 %v15730_v12  ;;  %v902_v63 = vld [vmem:[%s15654_s25 + $0x4d0] sm:$0xff] }
 0x3d3   : > { %v10695_v19 = vpop.f32.mrf.mxu1  ;;  %10940 = vmatmul.mubr.bf16.vlgmr.msra.gmra.mxu1 %v16247_v32  ;;  %v10656_v21 = vpop.f32.mrf.mxu0  ;;  %10950 = vmatprep.subr.bf16.mxu0 %v13152_v13  ;;  %v13135_v13 = vcombine.low %v782_v37, %v786_v38  ;;  %v766_v24 = vld [vmem:[%s15654_s25 + $0x90] sm:$0xff] }
 0x3d4   : > { %10990 = vmatpush1.bf16.msra.mxu1 %v13287_v1  ;;  %v16700_v26 = vadd.f32 %v10695_v19, %v10655_v22  ;;  %v10657_v30 = vadd.f32 %v10656_v21, %v16635_v23  ;;  %11021 = vmatprep.mubr.bf16.mxu1 %v15737_v17  ;;  %v13143_v23 = vcombine.low %v790_v7, %v794_v11  ;;  %v906_v1 = vld [vmem:[%s15654_s25 + $0x4f0] sm:$0xff] }
 0x3d5   : > { %v10697_v31 = vpop.f32.mrf.mxu1  ;;  %10991 = vmatprep.subr.bf16.mxu1 %v13280_v60  ;;  %v10658_v42 = vpop.f32.mrf.mxu0  ;;  %v13263_v60 = vcombine.low %v910_v34, %v914_v0  ;;  %v13128_v7 = vcombine.high %v774_v56, %v778_v57  ;;  %v13256_v11 = vcombine.high %v902_v63, %v906_v1  ;;  %v770_v48 = vld [vmem:[%s15654_s25 + $0xb0] sm:$0xff]  ;;  %v13127_v19 = vcombine.low %v774_v56, %v778_v57 }
 0x3d6   : > { %v16709_v44 = vadd.f32 %v10697_v31, %v10657_v30  ;;  %10951 = vmatpush1.bf16.msra.mxu0 %v13151_v27  ;;  %v894_v15 = vld [vmem:[%s15654_s25 + $0x490] sm:$0xff]  ;;  %v13255_v27 = vcombine.low %v902_v63, %v906_v1  ;;  %v13120_v21 = vcombine.high %v766_v24, %v770_v48  ;;  %v13119_v37 = vcombine.low %v766_v24, %v770_v48 }
 0x3d7   : > { %v10699_v14 = vpop.f32.mrf.mxu1  ;;  %v10659_v6 = vpop.f32.mrf.mxu0  ;;  %10952 = vmatprep.subr.bf16.mxu0 %v13144_v62  ;;  %v898_v22 = vld [vmem:[%s15654_s25 + $0x4b0] sm:$0xff] }
 0x3d8   : > { %10992 = vmatpush1.bf16.msra.mxu1 %v13279_v25  ;;  %v13248_v25 = vcombine.high %v894_v15, %v898_v22  ;;  %v758_v62 = vld [vmem:[%s15654_s25 + $0x50] sm:$0xff]  ;;  %v13247_v38 = vcombine.low %v894_v15, %v898_v22 }
 0x3d9   : > { %v10700_v41 = vpop.f32.mrf.mxu1  ;;  %10993 = vmatprep.subr.bf16.mxu1 %v13272_v8  ;;  %v762_v30 = vld [vmem:[%s15654_s25 + $0x70] sm:$0xff] }
 0x3da   : > { %10953 = vmatpush1.bf16.msra.mxu0 %v13143_v23  ;;  %v886_v31 = vld [vmem:[%s15654_s25 + $0x450] sm:$0xff]  ;;  %v13112_v42 = vcombine.high %v758_v62, %v762_v30 }
 0x3db   : > { %10954 = vmatprep.subr.bf16.mxu0 %v13136_v55  ;;  %v890_v8 = vld [vmem:[%s15654_s25 + $0x470] sm:$0xff] }
 0x3dc   : > { %10994 = vmatpush1.bf16.msra.mxu1 %v13271_v16  ;;  %v13240_v34 = vcombine.high %v886_v31, %v890_v8  ;;  %v750_v0 = vld [vmem:[%s15654_s25 + $0x10] sm:$0xff]  ;;  %v13111_v16 = vcombine.low %v758_v62, %v762_v30  ;;  %v13239_v55 = vcombine.low %v886_v31, %v890_v8 }
 0x3dd   : > { %10995 = vmatprep.subr.bf16.mxu1 %v13264_v61  ;;  %v754_v14 = vld [vmem:[%s15654_s25 + $0x30] sm:$0xff] }
 0x3de   : > { %10955 = vmatpush1.bf16.msra.mxu0 %v13135_v13  ;;  %v878_v23 = vld [vmem:[%s15654_s25 + $0x410] sm:$0xff]  ;;  %v13104_v41 = vcombine.high %v750_v0, %v754_v14  ;;  %v13103_v13 = vcombine.low %v750_v0, %v754_v14 }
 0x3df   : > { %10956 = vmatprep.subr.bf16.mxu0 %v13128_v7  ;;  %v882_v6 = vld [vmem:[%s15654_s25 + $0x430] sm:$0xff] }
 0x3e0   : > { %10996 = vmatpush1.bf16.msra.mxu1 %v13263_v60  ;;  %v13232_v61 = vcombine.high %v878_v23, %v882_v6  ;;  %v870_v56 = vld [vmem:[%s15654_s25 + $0x3d0] sm:$0xff]  ;;  %v13231_v60 = vcombine.low %v878_v23, %v882_v6 }
 0x3e1   : > { %10997 = vmatprep.subr.bf16.mxu1 %v13256_v11  ;;  %v874_v57 = vld [vmem:[%s15654_s25 + $0x3f0] sm:$0xff] }
 0x3e2   : > { %10957 = vmatpush1.bf16.msra.mxu0 %v13127_v19  ;;  %v998_v63 = vld [vmem:[%s15654_s25 + $0x7d0] sm:$0xff]  ;;  %v13224_v7 = vcombine.high %v870_v56, %v874_v57  ;;  %v13223_v19 = vcombine.low %v870_v56, %v874_v57 }
 0x3e3   : > { %10958 = vmatprep.subr.bf16.mxu0 %v13120_v21  ;;  %v1002_v1 = vld [vmem:[%s15654_s25 + $0x7f0] sm:$0xff] }
 0x3e4   : > { %10998 = vmatpush1.bf16.msra.mxu1 %v13255_v27  ;;  %v13352_v11 = vcombine.high %v998_v63, %v1002_v1  ;;  %v862_v24 = vld [vmem:[%s15654_s25 + $0x390] sm:$0xff]  ;;  %v13351_v27 = vcombine.low %v998_v63, %v1002_v1 }
 0x3e5   : > { %10999 = vmatprep.subr.bf16.mxu1 %v13248_v25  ;;  %v866_v48 = vld [vmem:[%s15654_s25 + $0x3b0] sm:$0xff] }
 0x3e6   : > { %10959 = vmatpush1.bf16.msra.mxu0 %v13119_v37  ;;  %v990_v15 = vld [vmem:[%s15654_s25 + $0x790] sm:$0xff]  ;;  %v13216_v21 = vcombine.high %v862_v24, %v866_v48  ;;  %v13215_v37 = vcombine.low %v862_v24, %v866_v48 }
 0x3e7   : > { %10960 = vmatprep.subr.bf16.mxu0 %v13112_v42  ;;  %v994_v22 = vld [vmem:[%s15654_s25 + $0x7b0] sm:$0xff] }
 0x3e8   : > { %11000 = vmatpush1.bf16.msra.mxu1 %v13247_v38  ;;  %v13344_v25 = vcombine.high %v990_v15, %v994_v22  ;;  %v854_v62 = vld [vmem:[%s15654_s25 + $0x350] sm:$0xff]  ;;  %v13343_v38 = vcombine.low %v990_v15, %v994_v22 }
 0x3e9   : > { %11001 = vmatprep.subr.bf16.mxu1 %v13240_v34  ;;  %v858_v30 = vld [vmem:[%s15654_s25 + $0x370] sm:$0xff] }
 0x3ea   : > { %10961 = vmatpush1.bf16.msra.mxu0 %v13111_v16  ;;  %v982_v31 = vld [vmem:[%s15654_s25 + $0x750] sm:$0xff]  ;;  %v13208_v42 = vcombine.high %v854_v62, %v858_v30  ;;  %v13207_v16 = vcombine.low %v854_v62, %v858_v30 }
 0x3eb   : > { %10962 = vmatprep.subr.bf16.mxu0 %v13104_v41  ;;  %v986_v8 = vld [vmem:[%s15654_s25 + $0x770] sm:$0xff] }
 0x3ec   : > { %11002 = vmatpush1.bf16.msra.mxu1 %v13239_v55  ;;  %v13336_v34 = vcombine.high %v982_v31, %v986_v8  ;;  %v846_v0 = vld [vmem:[%s15654_s25 + $0x310] sm:$0xff]  ;;  %v13335_v55 = vcombine.low %v982_v31, %v986_v8 }
 0x3ed   : > { %11003 = vmatprep.subr.bf16.mxu1 %v13232_v61  ;;  %v850_v14 = vld [vmem:[%s15654_s25 + $0x330] sm:$0xff] }
 0x3ee   : > { %10963 = vmatpush1.bf16.msra.mxu0 %v13103_v13  ;;  %v974_v23 = vld [vmem:[%s15654_s25 + $0x710] sm:$0xff]  ;;  %v13200_v41 = vcombine.high %v846_v0, %v850_v14  ;;  %v13199_v13 = vcombine.low %v846_v0, %v850_v14 }
 0x3ef   : > { %10964 = vmatprep.subr.bf16.mxu0 %v13224_v7  ;;  %v978_v6 = vld [vmem:[%s15654_s25 + $0x730] sm:$0xff] }
 0x3f0   : > { %11004 = vmatpush1.bf16.msra.mxu1 %v13231_v60  ;;  %v13328_v61 = vcombine.high %v974_v23, %v978_v6  ;;  %v838_v56 = vld [vmem:[%s15654_s25 + $0x2d0] sm:$0xff]  ;;  %v13327_v60 = vcombine.low %v974_v23, %v978_v6 }
 0x3f1   : > { %11005 = vmatprep.subr.bf16.mxu1 %v13352_v11  ;;  %v842_v57 = vld [vmem:[%s15654_s25 + $0x2f0] sm:$0xff] }
 0x3f2   : > { %10965 = vmatpush2.bf16.msra.mxu0 %v13223_v19  ;;  %v966_v63 = vld [vmem:[%s15654_s25 + $0x6d0] sm:$0xff]  ;;  %v13192_v7 = vcombine.high %v838_v56, %v842_v57  ;;  %v13191_v19 = vcombine.low %v838_v56, %v842_v57 }
 0x3f3   : > { %10966 = vmatprep.subr.bf16.mxu0 %v13216_v21  ;;  %v970_v1 = vld [vmem:[%s15654_s25 + $0x6f0] sm:$0xff] }
 0x3f4   : > { %11006 = vmatpush2.bf16.msra.mxu1 %v13351_v27  ;;  %v13320_v11 = vcombine.high %v966_v63, %v970_v1  ;;  %v830_v24 = vld [vmem:[%s15654_s25 + $0x290] sm:$0xff]  ;;  %v13319_v27 = vcombine.low %v966_v63, %v970_v1 }
 0x3f5   : > { %11007 = vmatprep.subr.bf16.mxu1 %v13344_v25  ;;  %v834_v48 = vld [vmem:[%s15654_s25 + $0x2b0] sm:$0xff] }
 0x3f6   : > { %10967 = vmatpush2.bf16.msra.mxu0 %v13215_v37  ;;  %v958_v15 = vld [vmem:[%s15654_s25 + $0x690] sm:$0xff]  ;;  %v13184_v21 = vcombine.high %v830_v24, %v834_v48  ;;  %v13183_v37 = vcombine.low %v830_v24, %v834_v48 }
 0x3f7   : > { %10968 = vmatprep.subr.bf16.mxu0 %v13208_v42  ;;  %v962_v22 = vld [vmem:[%s15654_s25 + $0x6b0] sm:$0xff] }
 0x3f8   : > { %11008 = vmatpush2.bf16.msra.mxu1 %v13343_v38  ;;  %v13312_v25 = vcombine.high %v958_v15, %v962_v22  ;;  %v822_v62 = vld [vmem:[%s15654_s25 + $0x250] sm:$0xff]  ;;  %v13311_v38 = vcombine.low %v958_v15, %v962_v22 }
 0x3f9   : > { %11009 = vmatprep.subr.bf16.mxu1 %v13336_v34  ;;  %v826_v30 = vld [vmem:[%s15654_s25 + $0x270] sm:$0xff] }
 0x3fa   : > { %10969 = vmatpush2.bf16.msra.mxu0 %v13207_v16  ;;  %v950_v31 = vld [vmem:[%s15654_s25 + $0x650] sm:$0xff]  ;;  %v13176_v42 = vcombine.high %v822_v62, %v826_v30  ;;  %v13175_v16 = vcombine.low %v822_v62, %v826_v30 }
 0x3fb   : > { %10970 = vmatprep.subr.bf16.mxu0 %v13200_v41  ;;  %v954_v8 = vld [vmem:[%s15654_s25 + $0x670] sm:$0xff] }
 0x3fc   : > { %11010 = vmatpush2.bf16.msra.mxu1 %v13335_v55  ;;  %v13304_v34 = vcombine.high %v950_v31, %v954_v8  ;;  %v814_v0 = vld [vmem:[%s15654_s25 + $0x210] sm:$0xff]  ;;  %v13303_v55 = vcombine.low %v950_v31, %v954_v8 }
 0x3fd   : > { %11011 = vmatprep.subr.bf16.mxu1 %v13328_v61  ;;  %v818_v14 = vld [vmem:[%s15654_s25 + $0x230] sm:$0xff] }
 0x3fe   : > { %10971 = vmatpush2.bf16.msra.mxu0 %v13199_v13  ;;  %v942_v23 = vld [vmem:[%s15654_s25 + $0x610] sm:$0xff]  ;;  %v13168_v41 = vcombine.high %v814_v0, %v818_v14  ;;  %v13167_v13 = vcombine.low %v814_v0, %v818_v14 }
 0x3ff   : > { %10972 = vmatprep.subr.bf16.mxu0 %v13192_v7  ;;  %v946_v6 = vld [vmem:[%s15654_s25 + $0x630] sm:$0xff] }
 0x400   : > { %11012 = vmatpush2.bf16.msra.mxu1 %v13327_v60  ;;  %v13296_v61 = vcombine.high %v942_v23, %v946_v6  ;;  %v1062_v56 = vld [vmem:[%s15654_s25 + $0x9d0] sm:$0xff]  ;;  %v13295_v60 = vcombine.low %v942_v23, %v946_v6 }
 0x401   : > { %11013 = vmatprep.subr.bf16.mxu1 %v13320_v11  ;;  %v1066_v57 = vld [vmem:[%s15654_s25 + $0x9f0] sm:$0xff] }
 0x402   : > { %10973 = vmatpush2.bf16.msra.mxu0 %v13191_v19  ;;  %v1190_v63 = vld [vmem:[%s15654_s25 + $0xdd0] sm:$0xff]  ;;  %v13416_v7 = vcombine.high %v1062_v56, %v1066_v57  ;;  %v13415_v19 = vcombine.low %v1062_v56, %v1066_v57 }
 0x403   : > { %10974 = vmatprep.subr.bf16.mxu0 %v13184_v21  ;;  %v1194_v1 = vld [vmem:[%s15654_s25 + $0xdf0] sm:$0xff] }
 0x404   : > { %11014 = vmatpush2.bf16.msra.mxu1 %v13319_v27  ;;  %v13544_v11 = vcombine.high %v1190_v63, %v1194_v1  ;;  %v1054_v24 = vld [vmem:[%s15654_s25 + $0x990] sm:$0xff]  ;;  %v13543_v27 = vcombine.low %v1190_v63, %v1194_v1 }
 0x405   : > { %11015 = vmatprep.subr.bf16.mxu1 %v13312_v25  ;;  %v1058_v48 = vld [vmem:[%s15654_s25 + $0x9b0] sm:$0xff] }
 0x406   : > { %10975 = vmatpush2.bf16.msra.mxu0 %v13183_v37  ;;  %v1182_v15 = vld [vmem:[%s15654_s25 + $0xd90] sm:$0xff]  ;;  %v13408_v21 = vcombine.high %v1054_v24, %v1058_v48 }
 0x407   : > { %10976 = vmatprep.subr.bf16.mxu0 %v13176_v42  ;;  %v1186_v22 = vld [vmem:[%s15654_s25 + $0xdb0] sm:$0xff] }
 0x408   : > { %11016 = vmatpush2.bf16.msra.mxu1 %v13311_v38  ;;  %v13536_v25 = vcombine.high %v1182_v15, %v1186_v22  ;;  %v1046_v62 = vld [vmem:[%s15654_s25 + $0x950] sm:$0xff]  ;;  %v13535_v14 = vcombine.low %v1182_v15, %v1186_v22 }
 0x409   : > { %11017 = vmatprep.subr.bf16.mxu1 %v13304_v34  ;;  %v1050_v30 = vld [vmem:[%s15654_s25 + $0x970] sm:$0xff]  ;;  %v13407_v34 = vcombine.low %v1054_v24, %v1058_v48 }
 0x40a   : > { %10977 = vmatpush2.bf16.msra.mxu0 %v13175_v16  ;;  %v1174_v8 = vld [vmem:[%s15654_s25 + $0xd50] sm:$0xff]  ;;  %v13400_v23 = vcombine.high %v1046_v62, %v1050_v30 }
 0x40b   : > { %10978 = vmatprep.subr.bf16.mxu0 %v13168_v41  ;;  %v1178_v37 = vld [vmem:[%s15654_s25 + $0xd70] sm:$0xff] }
 0x40c   : > { %11018 = vmatpush2.bf16.msra.mxu1 %v13303_v55  ;;  %v1038_v41 = vld [vmem:[%s15654_s25 + $0x910] sm:$0xff] }
 0x40d   : > { %11019 = vmatprep.subr.bf16.mxu1 %v13296_v61  ;;  %v1042_v61 = vld [vmem:[%s15654_s25 + $0x930] sm:$0xff] }
 0x40e   : > { %10979 = vmatpush2.bf16.msra.mxu0 %v13167_v13  ;;  %v1166_v57 = vld [vmem:[%s15654_s25 + $0xd10] sm:$0xff] }
 0x40f   : > { %11030 = vmatprep.subr.bf16.mxu0 %v13416_v7  ;;  %v1170_v63 = vld [vmem:[%s15654_s25 + $0xd30] sm:$0xff]  ;;  %v13527_v7 = vcombine.low %v1174_v8, %v1178_v37 }
 0x410   : > { %11020 = vmatpush2.bf16.msra.mxu1 %v13295_v60  ;;  %v13520_v48 = vcombine.high %v1166_v57, %v1170_v63  ;;  %v1030_v15 = vld [vmem:[%s15654_s25 + $0x8d0] sm:$0xff] }
 0x411   : > { %11071 = vmatprep.subr.bf16.mxu1 %v13544_v11  ;;  %v10736_v31 = vpop.f32.mrf.mxu0  ;;  %10981 = vmatmul.mubr.bf16.vlgmr.msra.gmra.mxu0 %v15785_v36  ;;  %v13392_v11 = vcombine.high %v1038_v41, %v1042_v61  ;;  %v1034_v22 = vld [vmem:[%s15654_s25 + $0x8f0] sm:$0xff] }
 0x412   : > { %v10737_v38 = vadd.f32 %v10736_v31, %v16700_v26  ;;  %11031 = vmatpush1.bf16.msra.mxu0 %v13415_v19  ;;  %v13528_v26 = vcombine.high %v1174_v8, %v1178_v37  ;;  %11062 = vmatprep.mubr.bf16.mxu0 %v15797_v47  ;;  %v1158_v19 = vld [vmem:[%s15654_s25 + $0xcd0] sm:$0xff] }
 0x413   : > { %v10777_v42 = vpop.f32.mrf.mxu1  ;;  %11022 = vmatmul.mubr.bf16.vlgmr.msra.gmra.mxu1 %v15793_v40  ;;  %v10738_v0 = vpop.f32.mrf.mxu0  ;;  %11032 = vmatprep.subr.bf16.mxu0 %v13408_v21  ;;  %v13391_v21 = vcombine.low %v1038_v41, %v1042_v61  ;;  %v1022_v31 = vld [vmem:[%s15654_s25 + $0x890] sm:$0xff] }
 0x414   : > { %11072 = vmatpush1.bf16.msra.mxu1 %v13543_v27  ;;  %v16774_v6 = vadd.f32 %v10777_v42, %v10737_v38  ;;  %v10739_v16 = vadd.f32 %v10738_v0, %v16709_v44  ;;  %11103 = vmatprep.mubr.bf16.mxu1 %v15802_v49  ;;  %v13399_v44 = vcombine.low %v1046_v62, %v1050_v30  ;;  %v1162_v27 = vld [vmem:[%s15654_s25 + $0xcf0] sm:$0xff] }
 0x415   : > { %v10779_v55 = vpop.f32.mrf.mxu1  ;;  %11073 = vmatprep.subr.bf16.mxu1 %v13536_v25  ;;  %v10740_v56 = vpop.f32.mrf.mxu0  ;;  %v13519_v25 = vcombine.low %v1166_v57, %v1170_v63  ;;  %v13384_v62 = vcombine.high %v1030_v15, %v1034_v22  ;;  %v13512_v30 = vcombine.high %v1158_v19, %v1162_v27  ;;  %v1026_v8 = vld [vmem:[%s15654_s25 + $0x8b0] sm:$0xff]  ;;  %v13383_v42 = vcombine.low %v1030_v15, %v1034_v22 }
 0x416   : > { %v16783_v1 = vadd.f32 %v10779_v55, %v10739_v16  ;;  %11033 = vmatpush1.bf16.msra.mxu0 %v13407_v34  ;;  %v1150_v37 = vld [vmem:[%s15654_s25 + $0xc90] sm:$0xff]  ;;  %v13511_v34 = vcombine.low %v1158_v19, %v1162_v27  ;;  %v13376_v0 = vcombine.high %v1022_v31, %v1026_v8  ;;  %v13375_v41 = vcombine.low %v1022_v31, %v1026_v8 }
 0x417   : > { %v10781_v13 = vpop.f32.mrf.mxu1  ;;  %v10741_v60 = vpop.f32.mrf.mxu0  ;;  %11034 = vmatprep.subr.bf16.mxu0 %v13400_v23  ;;  %v1154_v38 = vld [vmem:[%s15654_s25 + $0xcb0] sm:$0xff] }
 0x418   : > { %11074 = vmatpush1.bf16.msra.mxu1 %v13535_v14  ;;  %v13504_v14 = vcombine.high %v1150_v37, %v1154_v38  ;;  %v1014_v23 = vld [vmem:[%s15654_s25 + $0x850] sm:$0xff]  ;;  %v13503_v61 = vcombine.low %v1150_v37, %v1154_v38 }
 0x419   : > { %v10782_v24 = vpop.f32.mrf.mxu1  ;;  %11075 = vmatprep.subr.bf16.mxu1 %v13528_v26  ;;  %v1018_v16 = vld [vmem:[%s15654_s25 + $0x870] sm:$0xff] }
 0x41a   : > { %11035 = vmatpush1.bf16.msra.mxu0 %v13399_v44  ;;  %v1142_v55 = vld [vmem:[%s15654_s25 + $0xc50] sm:$0xff]  ;;  %v13368_v56 = vcombine.high %v1014_v23, %v1018_v16 }
 0x41b   : > { %11036 = vmatprep.subr.bf16.mxu0 %v13392_v11  ;;  %v1146_v26 = vld [vmem:[%s15654_s25 + $0xc70] sm:$0xff] }
 0x41c   : > { %11076 = vmatpush1.bf16.msra.mxu1 %v13527_v7  ;;  %v13496_v57 = vcombine.high %v1142_v55, %v1146_v26  ;;  %v1006_v63 = vld [vmem:[%s15654_s25 + $0x810] sm:$0xff]  ;;  %v13367_v7 = vcombine.low %v1014_v23, %v1018_v16  ;;  %v13495_v11 = vcombine.low %v1142_v55, %v1146_v26 }
 0x41d   : > { %11077 = vmatprep.subr.bf16.mxu1 %v13520_v48  ;;  %v1010_v13 = vld [vmem:[%s15654_s25 + $0x830] sm:$0xff] }
 0x41e   : > { %11037 = vmatpush1.bf16.msra.mxu0 %v13391_v21  ;;  %v1134_v44 = vld [vmem:[%s15654_s25 + $0xc10] sm:$0xff]  ;;  %v13360_v24 = vcombine.high %v1006_v63, %v1010_v13  ;;  %v13359_v21 = vcombine.low %v1006_v63, %v1010_v13 }
 0x41f   : > { %11038 = vmatprep.subr.bf16.mxu0 %v13384_v62  ;;  %v1138_v60 = vld [vmem:[%s15654_s25 + $0xc30] sm:$0xff] }
 0x420   : > { %11078 = vmatpush1.bf16.msra.mxu1 %v13519_v25  ;;  %v13488_v48 = vcombine.high %v1134_v44, %v1138_v60  ;;  %v1126_v15 = vld [vmem:[%s15654_s25 + $0xbd0] sm:$0xff]  ;;  %v13487_v25 = vcombine.low %v1134_v44, %v1138_v60 }
 0x421   : > { %11079 = vmatprep.subr.bf16.mxu1 %v13512_v30  ;;  %v1130_v22 = vld [vmem:[%s15654_s25 + $0xbf0] sm:$0xff] }
 0x422   : > { %11039 = vmatpush1.bf16.msra.mxu0 %v13383_v42  ;;  %v1254_v19 = vld [vmem:[%s15654_s25 + $0xfd0] sm:$0xff]  ;;  %v13480_v62 = vcombine.high %v1126_v15, %v1130_v22  ;;  %v13479_v42 = vcombine.low %v1126_v15, %v1130_v22 }
 0x423   : > { %11040 = vmatprep.subr.bf16.mxu0 %v13376_v0  ;;  %v1258_v27 = vld [vmem:[%s15654_s25 + $0xff0] sm:$0xff] }
 0x424   : > { %11080 = vmatpush1.bf16.msra.mxu1 %v13511_v34  ;;  %v13608_v30 = vcombine.high %v1254_v19, %v1258_v27  ;;  %v1118_v31 = vld [vmem:[%s15654_s25 + $0xb90] sm:$0xff]  ;;  %v13607_v34 = vcombine.low %v1254_v19, %v1258_v27 }
 0x425   : > { %11081 = vmatprep.subr.bf16.mxu1 %v13504_v14  ;;  %v1122_v8 = vld [vmem:[%s15654_s25 + $0xbb0] sm:$0xff] }
 0x426   : > { %11041 = vmatpush1.bf16.msra.mxu0 %v13375_v41  ;;  %v1246_v37 = vld [vmem:[%s15654_s25 + $0xf90] sm:$0xff]  ;;  %v13472_v0 = vcombine.high %v1118_v31, %v1122_v8  ;;  %v13471_v41 = vcombine.low %v1118_v31, %v1122_v8 }
 0x427   : > { %11042 = vmatprep.subr.bf16.mxu0 %v13368_v56  ;;  %v1250_v38 = vld [vmem:[%s15654_s25 + $0xfb0] sm:$0xff] }
 0x428   : > { %11082 = vmatpush1.bf16.msra.mxu1 %v13503_v61  ;;  %v13600_v14 = vcombine.high %v1246_v37, %v1250_v38  ;;  %v1110_v23 = vld [vmem:[%s15654_s25 + $0xb50] sm:$0xff]  ;;  %v13599_v61 = vcombine.low %v1246_v37, %v1250_v38 }
 0x429   : > { %11083 = vmatprep.subr.bf16.mxu1 %v13496_v57  ;;  %v1114_v16 = vld [vmem:[%s15654_s25 + $0xb70] sm:$0xff] }
 0x42a   : > { %11043 = vmatpush1.bf16.msra.mxu0 %v13367_v7  ;;  %v1238_v55 = vld [vmem:[%s15654_s25 + $0xf50] sm:$0xff]  ;;  %v13464_v56 = vcombine.high %v1110_v23, %v1114_v16  ;;  %v13463_v7 = vcombine.low %v1110_v23, %v1114_v16 }
 0x42b   : > { %11044 = vmatprep.subr.bf16.mxu0 %v13360_v24  ;;  %v1242_v26 = vld [vmem:[%s15654_s25 + $0xf70] sm:$0xff] }
 0x42c   : > { %11084 = vmatpush1.bf16.msra.mxu1 %v13495_v11  ;;  %v13592_v57 = vcombine.high %v1238_v55, %v1242_v26  ;;  %v1102_v63 = vld [vmem:[%s15654_s25 + $0xb10] sm:$0xff]  ;;  %v13591_v11 = vcombine.low %v1238_v55, %v1242_v26 }
 0x42d   : > { %11085 = vmatprep.subr.bf16.mxu1 %v13488_v48  ;;  %v1106_v13 = vld [vmem:[%s15654_s25 + $0xb30] sm:$0xff] }
 0x42e   : > { %11045 = vmatpush1.bf16.msra.mxu0 %v13359_v21  ;;  %v1230_v44 = vld [vmem:[%s15654_s25 + $0xf10] sm:$0xff]  ;;  %v13456_v24 = vcombine.high %v1102_v63, %v1106_v13  ;;  %v13455_v21 = vcombine.low %v1102_v63, %v1106_v13 }
 0x42f   : > { %11046 = vmatprep.subr.bf16.mxu0 %v13480_v62  ;;  %v1234_v60 = vld [vmem:[%s15654_s25 + $0xf30] sm:$0xff] }
 0x430   : > { %11086 = vmatpush1.bf16.msra.mxu1 %v13487_v25  ;;  %v13584_v48 = vcombine.high %v1230_v44, %v1234_v60  ;;  %v1094_v15 = vld [vmem:[%s15654_s25 + $0xad0] sm:$0xff]  ;;  %v13583_v25 = vcombine.low %v1230_v44, %v1234_v60 }
 0x431   : > { %11087 = vmatprep.subr.bf16.mxu1 %v13608_v30  ;;  %v1098_v22 = vld [vmem:[%s15654_s25 + $0xaf0] sm:$0xff] }
 0x432   : > { %11047 = vmatpush2.bf16.msra.mxu0 %v13479_v42  ;;  %v1222_v19 = vld [vmem:[%s15654_s25 + $0xed0] sm:$0xff]  ;;  %v13448_v62 = vcombine.high %v1094_v15, %v1098_v22  ;;  %v13447_v42 = vcombine.low %v1094_v15, %v1098_v22 }
 0x433   : > { %11048 = vmatprep.subr.bf16.mxu0 %v13472_v0  ;;  %v1226_v27 = vld [vmem:[%s15654_s25 + $0xef0] sm:$0xff] }
 0x434   : > { %11088 = vmatpush2.bf16.msra.mxu1 %v13607_v34  ;;  %v13576_v30 = vcombine.high %v1222_v19, %v1226_v27  ;;  %v1086_v31 = vld [vmem:[%s15654_s25 + $0xa90] sm:$0xff]  ;;  %v13575_v34 = vcombine.low %v1222_v19, %v1226_v27 }
 0x435   : > { %11089 = vmatprep.subr.bf16.mxu1 %v13600_v14  ;;  %v1090_v8 = vld [vmem:[%s15654_s25 + $0xab0] sm:$0xff] }
 0x436   : > { %11049 = vmatpush2.bf16.msra.mxu0 %v13471_v41  ;;  %v1214_v37 = vld [vmem:[%s15654_s25 + $0xe90] sm:$0xff]  ;;  %v13440_v0 = vcombine.high %v1086_v31, %v1090_v8  ;;  %v13439_v41 = vcombine.low %v1086_v31, %v1090_v8 }
 0x437   : > { %11050 = vmatprep.subr.bf16.mxu0 %v13464_v56  ;;  %v1218_v38 = vld [vmem:[%s15654_s25 + $0xeb0] sm:$0xff] }
 0x438   : > { %11090 = vmatpush2.bf16.msra.mxu1 %v13599_v61  ;;  %v13568_v14 = vcombine.high %v1214_v37, %v1218_v38  ;;  %v1078_v23 = vld [vmem:[%s15654_s25 + $0xa50] sm:$0xff]  ;;  %v13567_v61 = vcombine.low %v1214_v37, %v1218_v38 }
 0x439   : > { %11091 = vmatprep.subr.bf16.mxu1 %v13592_v57  ;;  %v1082_v16 = vld [vmem:[%s15654_s25 + $0xa70] sm:$0xff] }
 0x43a   : > { %11051 = vmatpush2.bf16.msra.mxu0 %v13463_v7  ;;  %v1206_v55 = vld [vmem:[%s15654_s25 + $0xe50] sm:$0xff]  ;;  %v13432_v56 = vcombine.high %v1078_v23, %v1082_v16  ;;  %v13431_v7 = vcombine.low %v1078_v23, %v1082_v16 }
 0x43b   : > { %11052 = vmatprep.subr.bf16.mxu0 %v13456_v24  ;;  %v1210_v26 = vld [vmem:[%s15654_s25 + $0xe70] sm:$0xff] }
 0x43c   : > { %11092 = vmatpush2.bf16.msra.mxu1 %v13591_v11  ;;  %v13560_v57 = vcombine.high %v1206_v55, %v1210_v26  ;;  %v1070_v63 = vld [vmem:[%s15654_s25 + $0xa10] sm:$0xff]  ;;  %v13559_v11 = vcombine.low %v1206_v55, %v1210_v26 }
 0x43d   : > { %11093 = vmatprep.subr.bf16.mxu1 %v13584_v48  ;;  %v1074_v13 = vld [vmem:[%s15654_s25 + $0xa30] sm:$0xff] }
 0x43e   : > { %11053 = vmatpush2.bf16.msra.mxu0 %v13455_v21  ;;  %v1198_v44 = vld [vmem:[%s15654_s25 + $0xe10] sm:$0xff]  ;;  %v13424_v24 = vcombine.high %v1070_v63, %v1074_v13  ;;  %v13423_v21 = vcombine.low %v1070_v63, %v1074_v13 }
 0x43f   : > { %11054 = vmatprep.subr.bf16.mxu0 %v13448_v62  ;;  %v1202_v60 = vld [vmem:[%s15654_s25 + $0xe30] sm:$0xff] }
 0x440   : > { %11094 = vmatpush2.bf16.msra.mxu1 %v13583_v25  ;;  %v13552_v48 = vcombine.high %v1198_v44, %v1202_v60  ;;  %v1318_v15 = vld [vmem:[%s15654_s25 + $0x11d0] sm:$0xff]  ;;  %v13551_v25 = vcombine.low %v1198_v44, %v1202_v60 }
 0x441   : > { %11095 = vmatprep.subr.bf16.mxu1 %v13576_v30  ;;  %v1322_v22 = vld [vmem:[%s15654_s25 + $0x11f0] sm:$0xff] }
 0x442   : > { %11055 = vmatpush2.bf16.msra.mxu0 %v13447_v42  ;;  %v1446_v19 = vld [vmem:[%s15654_s25 + $0x15d0] sm:$0xff]  ;;  %v13672_v62 = vcombine.high %v1318_v15, %v1322_v22  ;;  %v13671_v42 = vcombine.low %v1318_v15, %v1322_v22 }
 0x443   : > { %11056 = vmatprep.subr.bf16.mxu0 %v13440_v0  ;;  %v1450_v27 = vld [vmem:[%s15654_s25 + $0x15f0] sm:$0xff] }
 0x444   : > { %11096 = vmatpush2.bf16.msra.mxu1 %v13575_v34  ;;  %v13800_v30 = vcombine.high %v1446_v19, %v1450_v27  ;;  %v1310_v31 = vld [vmem:[%s15654_s25 + $0x1190] sm:$0xff]  ;;  %v13799_v34 = vcombine.low %v1446_v19, %v1450_v27 }
 0x445   : > { %11097 = vmatprep.subr.bf16.mxu1 %v13568_v14  ;;  %v1314_v8 = vld [vmem:[%s15654_s25 + $0x11b0] sm:$0xff] }
 0x446   : > { %11057 = vmatpush2.bf16.msra.mxu0 %v13439_v41  ;;  %v1438_v37 = vld [vmem:[%s15654_s25 + $0x1590] sm:$0xff]  ;;  %v13664_v0 = vcombine.high %v1310_v31, %v1314_v8 }
 0x447   : > { %11058 = vmatprep.subr.bf16.mxu0 %v13432_v56  ;;  %v1442_v38 = vld [vmem:[%s15654_s25 + $0x15b0] sm:$0xff]  ;;  %v13663_v56 = vcombine.low %v1310_v31, %v1314_v8 }
 0x448   : > { %11098 = vmatpush2.bf16.msra.mxu1 %v13567_v61  ;;  %v13792_v14 = vcombine.high %v1438_v37, %v1442_v38  ;;  %v1302_v23 = vld [vmem:[%s15654_s25 + $0x1150] sm:$0xff]  ;;  %v13791_v63 = vcombine.low %v1438_v37, %v1442_v38 }
 0x449   : > { %11099 = vmatprep.subr.bf16.mxu1 %v13560_v57  ;;  %v1306_v16 = vld [vmem:[%s15654_s25 + $0x1170] sm:$0xff] }
 0x44a   : > { %11059 = vmatpush2.bf16.msra.mxu0 %v13431_v7  ;;  %v1430_v26 = vld [vmem:[%s15654_s25 + $0x1550] sm:$0xff]  ;;  %v13656_v13 = vcombine.high %v1302_v23, %v1306_v16  ;;  %v13655_v19 = vcombine.low %v1302_v23, %v1306_v16 }
 0x44b   : > { %11060 = vmatprep.subr.bf16.mxu0 %v13424_v24  ;;  %v1434_v41 = vld [vmem:[%s15654_s25 + $0x1570] sm:$0xff] }
 0x44c   : > { %11100 = vmatpush2.bf16.msra.mxu1 %v13559_v11  ;;  %v13784_v60 = vcombine.high %v1430_v26, %v1434_v41  ;;  %v1294_v7 = vld [vmem:[%s15654_s25 + $0x1110] sm:$0xff] }
 0x44d   : > { %11101 = vmatprep.subr.bf16.mxu1 %v13552_v48  ;;  %v1298_v11 = vld [vmem:[%s15654_s25 + $0x1130] sm:$0xff] }
 0x44e   : > { %11061 = vmatpush2.bf16.msra.mxu0 %v13423_v21  ;;  %v1422_v48 = vld [vmem:[%s15654_s25 + $0x1510] sm:$0xff]  ;;  %v13783_v21 = vcombine.low %v1430_v26, %v1434_v41 }
 0x44f   : > { %11112 = vmatprep.subr.bf16.mxu0 %v13672_v62  ;;  %v1426_v15 = vld [vmem:[%s15654_s25 + $0x1530] sm:$0xff] }
 0x450   : > { %11102 = vmatpush2.bf16.msra.mxu1 %v13551_v25  ;;  %v13648_v25 = vcombine.high %v1294_v7, %v1298_v11  ;;  %v1286_v31 = vld [vmem:[%s15654_s25 + $0x10d0] sm:$0xff] }
 0x451   : > { %11153 = vmatprep.subr.bf16.mxu1 %v13800_v30  ;;  %v16843_v55 = vpop.f32.mrf.mxu0  ;;  %11063 = vmatmul.mubr.bf16.vlgmr.msra.gmra.mxu0 %v15876_v5  ;;  %v13776_v30 = vcombine.high %v1422_v48, %v1426_v15  ;;  %v1290_v8 = vld [vmem:[%s15654_s25 + $0x10f0] sm:$0xff] }
 0x452   : > { %11113 = vmatpush1.bf16.msra.mxu0 %v13671_v42  ;;  %11144 = vmatprep.mubr.bf16.mxu0 %v15888_v18  ;;  %v1414_v37 = vld [vmem:[%s15654_s25 + $0x14d0] sm:$0xff]  ;;  %v13647_v42 = vcombine.low %v1294_v7, %v1298_v11 }
 0x453   : > { %v16848_v61 = vpop.f32.mrf.mxu1  ;;  %11104 = vmatmul.mubr.bf16.vlgmr.msra.gmra.mxu1 %v15884_v10  ;;  %v16851_v57 = vpop.f32.mrf.mxu0  ;;  %11114 = vmatprep.subr.bf16.mxu0 %v13664_v0  ;;  %v1418_v38 = vld [vmem:[%s15654_s25 + $0x14f0] sm:$0xff]  ;;  %v13640_v0 = vcombine.high %v1286_v31, %v1290_v8 }
 0x454   : > { %11154 = vmatpush1.bf16.msra.mxu1 %v13799_v34  ;;  %11185 = vmatprep.mubr.bf16.mxu1 %v15893_v20  ;;  %v13775_v34 = vcombine.low %v1422_v48, %v1426_v15  ;;  %v1278_v23 = vld [vmem:[%s15654_s25 + $0x1090] sm:$0xff] }
 0x455   : > { %v16853_v44 = vpop.f32.mrf.mxu1  ;;  %11155 = vmatprep.subr.bf16.mxu1 %v13792_v14  ;;  %v10822_v24 = vpop.f32.mrf.mxu0  ;;  %v13768_v14 = vcombine.high %v1414_v37, %v1418_v38  ;;  %v1282_v16 = vld [vmem:[%s15654_s25 + $0x10b0] sm:$0xff] }
 0x456   : > { %11115 = vmatpush1.bf16.msra.mxu0 %v13663_v56  ;;  %v1406_v26 = vld [vmem:[%s15654_s25 + $0x1490] sm:$0xff]  ;;  %v13639_v56 = vcombine.low %v1286_v31, %v1290_v8  ;;  %v13631_v15 = vcombine.low %v1278_v23, %v1282_v16 }
 0x457   : > { %v10863_v22 = vpop.f32.mrf.mxu1  ;;  %v10823_v27 = vpop.f32.mrf.mxu0  ;;  %11116 = vmatprep.subr.bf16.mxu0 %v13656_v13  ;;  %v1410_v41 = vld [vmem:[%s15654_s25 + $0x14b0] sm:$0xff]  ;;  %v13632_v13 = vcombine.high %v1278_v23, %v1282_v16 }
 0x458   : > { %11156 = vmatpush1.bf16.msra.mxu1 %v13791_v63  ;;  %v13767_v63 = vcombine.low %v1414_v37, %v1418_v38  ;;  %v1270_v7 = vld [vmem:[%s15654_s25 + $0x1050] sm:$0xff]  ;;  %v13759_v22 = vcombine.low %v1406_v26, %v1410_v41 }
 0x459   : > { %v10864_v62 = vpop.f32.mrf.mxu1  ;;  %11157 = vmatprep.subr.bf16.mxu1 %v13784_v60  ;;  %v13760_v60 = vcombine.high %v1406_v26, %v1410_v41  ;;  %v1274_v11 = vld [vmem:[%s15654_s25 + $0x1070] sm:$0xff] }
 0x45a   : > { %11117 = vmatpush1.bf16.msra.mxu0 %v13655_v19  ;;  %v1398_v24 = vld [vmem:[%s15654_s25 + $0x1450] sm:$0xff]  ;;  %v13624_v19 = vcombine.high %v1270_v7, %v1274_v11  ;;  %v13623_v31 = vcombine.low %v1270_v7, %v1274_v11 }
 0x45b   : > { %11118 = vmatprep.subr.bf16.mxu0 %v13648_v25  ;;  %v1402_v48 = vld [vmem:[%s15654_s25 + $0x1470] sm:$0xff] }
 0x45c   : > { %11158 = vmatpush1.bf16.msra.mxu1 %v13783_v21  ;;  %v13752_v27 = vcombine.high %v1398_v24, %v1402_v48  ;;  %v1262_v21 = vld [vmem:[%s15654_s25 + $0x1010] sm:$0xff]  ;;  %v13751_v8 = vcombine.low %v1398_v24, %v1402_v48 }
 0x45d   : > { %11159 = vmatprep.subr.bf16.mxu1 %v13776_v30  ;;  %v1266_v25 = vld [vmem:[%s15654_s25 + $0x1030] sm:$0xff] }
 0x45e   : > { %11119 = vmatpush1.bf16.msra.mxu0 %v13647_v42  ;;  %v1390_v62 = vld [vmem:[%s15654_s25 + $0x1410] sm:$0xff]  ;;  %v13616_v37 = vcombine.high %v1262_v21, %v1266_v25  ;;  %v13615_v23 = vcombine.low %v1262_v21, %v1266_v25 }
 0x45f   : > { %11120 = vmatprep.subr.bf16.mxu0 %v13640_v0  ;;  %v1394_v30 = vld [vmem:[%s15654_s25 + $0x1430] sm:$0xff] }
 0x460   : > { %11160 = vmatpush1.bf16.msra.mxu1 %v13775_v34  ;;  %v13744_v38 = vcombine.high %v1390_v62, %v1394_v30  ;;  %v1382_v42 = vld [vmem:[%s15654_s25 + $0x13d0] sm:$0xff]  ;;  %v13743_v16 = vcombine.low %v1390_v62, %v1394_v30 }
 0x461   : > { %11161 = vmatprep.subr.bf16.mxu1 %v13768_v14  ;;  %v1386_v34 = vld [vmem:[%s15654_s25 + $0x13f0] sm:$0xff] }
 0x462   : > { %11121 = vmatpush1.bf16.msra.mxu0 %v13639_v56  ;;  %v1510_v0 = vld [vmem:[%s15654_s25 + $0x17d0] sm:$0xff]  ;;  %v13736_v26 = vcombine.high %v1382_v42, %v1386_v34  ;;  %v13735_v7 = vcombine.low %v1382_v42, %v1386_v34 }
 0x463   : > { %11122 = vmatprep.subr.bf16.mxu0 %v13632_v13  ;;  %v1514_v14 = vld [vmem:[%s15654_s25 + $0x17f0] sm:$0xff] }
 0x464   : > { %11162 = vmatpush1.bf16.msra.mxu1 %v13767_v63  ;;  %v13864_v41 = vcombine.high %v1510_v0, %v1514_v14  ;;  %v1374_v56 = vld [vmem:[%s15654_s25 + $0x1390] sm:$0xff]  ;;  %v13863_v11 = vcombine.low %v1510_v0, %v1514_v14 }
 0x465   : > { %11163 = vmatprep.subr.bf16.mxu1 %v13760_v60  ;;  %v1378_v63 = vld [vmem:[%s15654_s25 + $0x13b0] sm:$0xff] }
 0x466   : > { %11123 = vmatpush1.bf16.msra.mxu0 %v13631_v15  ;;  %v1502_v13 = vld [vmem:[%s15654_s25 + $0x1790] sm:$0xff]  ;;  %v13728_v24 = vcombine.high %v1374_v56, %v1378_v63  ;;  %v13727_v21 = vcombine.low %v1374_v56, %v1378_v63 }
 0x467   : > { %11124 = vmatprep.subr.bf16.mxu0 %v13624_v19  ;;  %v1506_v60 = vld [vmem:[%s15654_s25 + $0x17b0] sm:$0xff] }
 0x468   : > { %11164 = vmatpush1.bf16.msra.mxu1 %v13759_v22  ;;  %v13856_v48 = vcombine.high %v1502_v13, %v1506_v60  ;;  %v1366_v15 = vld [vmem:[%s15654_s25 + $0x1350] sm:$0xff]  ;;  %v13855_v25 = vcombine.low %v1502_v13, %v1506_v60 }
 0x469   : > { %11165 = vmatprep.subr.bf16.mxu1 %v13752_v27  ;;  %v1370_v22 = vld [vmem:[%s15654_s25 + $0x1370] sm:$0xff] }
 0x46a   : > { %11125 = vmatpush1.bf16.msra.mxu0 %v13623_v31  ;;  %v1494_v19 = vld [vmem:[%s15654_s25 + $0x1750] sm:$0xff]  ;;  %v13720_v62 = vcombine.high %v1366_v15, %v1370_v22  ;;  %v13719_v42 = vcombine.low %v1366_v15, %v1370_v22 }
 0x46b   : > { %11126 = vmatprep.subr.bf16.mxu0 %v13616_v37  ;;  %v1498_v27 = vld [vmem:[%s15654_s25 + $0x1770] sm:$0xff] }
 0x46c   : > { %11166 = vmatpush1.bf16.msra.mxu1 %v13751_v8  ;;  %v13848_v30 = vcombine.high %v1494_v19, %v1498_v27  ;;  %v1358_v31 = vld [vmem:[%s15654_s25 + $0x1310] sm:$0xff]  ;;  %v13847_v34 = vcombine.low %v1494_v19, %v1498_v27 }
 0x46d   : > { %11167 = vmatprep.subr.bf16.mxu1 %v13744_v38  ;;  %v1362_v8 = vld [vmem:[%s15654_s25 + $0x1330] sm:$0xff] }
 0x46e   : > { %11127 = vmatpush1.bf16.msra.mxu0 %v13615_v23  ;;  %v1486_v37 = vld [vmem:[%s15654_s25 + $0x1710] sm:$0xff]  ;;  %v13712_v0 = vcombine.high %v1358_v31, %v1362_v8  ;;  %v13711_v56 = vcombine.low %v1358_v31, %v1362_v8 }
 0x46f   : > { %11128 = vmatprep.subr.bf16.mxu0 %v13736_v26  ;;  %v1490_v38 = vld [vmem:[%s15654_s25 + $0x1730] sm:$0xff] }
 0x470   : > { %11168 = vmatpush1.bf16.msra.mxu1 %v13743_v16  ;;  %v13840_v14 = vcombine.high %v1486_v37, %v1490_v38  ;;  %v1350_v23 = vld [vmem:[%s15654_s25 + $0x12d0] sm:$0xff]  ;;  %v13839_v63 = vcombine.low %v1486_v37, %v1490_v38 }
 0x471   : > { %11169 = vmatprep.subr.bf16.mxu1 %v13864_v41  ;;  %v1354_v16 = vld [vmem:[%s15654_s25 + $0x12f0] sm:$0xff] }
 0x472   : > { %11129 = vmatpush2.bf16.msra.mxu0 %v13735_v7  ;;  %v1478_v26 = vld [vmem:[%s15654_s25 + $0x16d0] sm:$0xff]  ;;  %v13704_v13 = vcombine.high %v1350_v23, %v1354_v16  ;;  %v13703_v15 = vcombine.low %v1350_v23, %v1354_v16 }
 0x473   : > { %11130 = vmatprep.subr.bf16.mxu0 %v13728_v24  ;;  %v1482_v41 = vld [vmem:[%s15654_s25 + $0x16f0] sm:$0xff] }
 0x474   : > { %11170 = vmatpush2.bf16.msra.mxu1 %v13863_v11  ;;  %v13832_v60 = vcombine.high %v1478_v26, %v1482_v41  ;;  %v1342_v7 = vld [vmem:[%s15654_s25 + $0x1290] sm:$0xff]  ;;  %v13831_v22 = vcombine.low %v1478_v26, %v1482_v41 }
 0x475   : > { %11171 = vmatprep.subr.bf16.mxu1 %v13856_v48  ;;  %v1346_v11 = vld [vmem:[%s15654_s25 + $0x12b0] sm:$0xff] }
 0x476   : > { %11131 = vmatpush2.bf16.msra.mxu0 %v13727_v21  ;;  %v1470_v24 = vld [vmem:[%s15654_s25 + $0x1690] sm:$0xff]  ;;  %v13696_v19 = vcombine.high %v1342_v7, %v1346_v11  ;;  %v13695_v31 = vcombine.low %v1342_v7, %v1346_v11 }
 0x477   : > { %11132 = vmatprep.subr.bf16.mxu0 %v13720_v62  ;;  %v1474_v48 = vld [vmem:[%s15654_s25 + $0x16b0] sm:$0xff] }
 0x478   : > { %11172 = vmatpush2.bf16.msra.mxu1 %v13855_v25  ;;  %v13824_v27 = vcombine.high %v1470_v24, %v1474_v48  ;;  %v1334_v21 = vld [vmem:[%s15654_s25 + $0x1250] sm:$0xff]  ;;  %v13823_v8 = vcombine.low %v1470_v24, %v1474_v48  ;;  %v10819_v48 = vadd.f32 %v16843_v55, %v16774_v6 }
 0x479   : > { %11173 = vmatprep.subr.bf16.mxu1 %v13848_v30  ;;  %v1338_v25 = vld [vmem:[%s15654_s25 + $0x1270] sm:$0xff] }
 0x47a   : > { %11133 = vmatpush2.bf16.msra.mxu0 %v13719_v42  ;;  %v1462_v62 = vld [vmem:[%s15654_s25 + $0x1650] sm:$0xff]  ;;  %v13688_v37 = vcombine.high %v1334_v21, %v1338_v25  ;;  %v13687_v23 = vcombine.low %v1334_v21, %v1338_v25  ;;  %v10821_v25 = vadd.f32 %v16851_v57, %v16783_v1  ;;  %v10860_v6 = vadd.f32 %v16848_v61, %v10819_v48 }
 0x47b   : > { %11134 = vmatprep.subr.bf16.mxu0 %v13712_v0  ;;  %v1466_v30 = vld [vmem:[%s15654_s25 + $0x1670] sm:$0xff] }
 0x47c   : > { %11174 = vmatpush2.bf16.msra.mxu1 %v13847_v34  ;;  %v13816_v38 = vcombine.high %v1462_v62, %v1466_v30  ;;  %v1326_v42 = vld [vmem:[%s15654_s25 + $0x1210] sm:$0xff]  ;;  %v13815_v16 = vcombine.low %v1462_v62, %v1466_v30  ;;  %v10862_v1 = vadd.f32 %v16853_v44, %v10821_v25 }
 0x47d   : > { %11175 = vmatprep.subr.bf16.mxu1 %v13840_v14  ;;  %v1330_v34 = vld [vmem:[%s15654_s25 + $0x1230] sm:$0xff] }
 0x47e   : > { %11135 = vmatpush2.bf16.msra.mxu0 %v13711_v56  ;;  %v1454_v0 = vld [vmem:[%s15654_s25 + $0x1610] sm:$0xff]  ;;  %v13680_v26 = vcombine.high %v1326_v42, %v1330_v34  ;;  %v13679_v7 = vcombine.low %v1326_v42, %v1330_v34 }
 0x47f   : > { %11136 = vmatprep.subr.bf16.mxu0 %v13704_v13  ;;  %v1458_v14 = vld [vmem:[%s15654_s25 + $0x1630] sm:$0xff] }
 0x480   : > { %11176 = vmatpush2.bf16.msra.mxu1 %v13839_v63  ;;  %v13808_v41 = vcombine.high %v1454_v0, %v1458_v14  ;;  %v1574_v56 = vld [vmem:[%s15654_s25 + $0x19d0] sm:$0xff]  ;;  %v13807_v11 = vcombine.low %v1454_v0, %v1458_v14 }
 0x481   : > { %11177 = vmatprep.subr.bf16.mxu1 %v13832_v60  ;;  %v1578_v63 = vld [vmem:[%s15654_s25 + $0x19f0] sm:$0xff] }
 0x482   : > { %11137 = vmatpush2.bf16.msra.mxu0 %v13703_v15  ;;  %v1702_v13 = vld [vmem:[%s15654_s25 + $0x1dd0] sm:$0xff]  ;;  %v13928_v24 = vcombine.high %v1574_v56, %v1578_v63  ;;  %v13927_v62 = vcombine.low %v1574_v56, %v1578_v63 }
 0x483   : > { %11138 = vmatprep.subr.bf16.mxu0 %v13696_v19  ;;  %v1706_v60 = vld [vmem:[%s15654_s25 + $0x1df0] sm:$0xff] }
 0x484   : > { %11178 = vmatpush2.bf16.msra.mxu1 %v13831_v22  ;;  %v14056_v15 = vcombine.high %v1702_v13, %v1706_v60  ;;  %v1566_v22 = vld [vmem:[%s15654_s25 + $0x1990] sm:$0xff]  ;;  %v14055_v30 = vcombine.low %v1702_v13, %v1706_v60 }
 0x485   : > { %11179 = vmatprep.subr.bf16.mxu1 %v13824_v27  ;;  %v1570_v19 = vld [vmem:[%s15654_s25 + $0x19b0] sm:$0xff] }
 0x486   : > { %11139 = vmatpush2.bf16.msra.mxu0 %v13695_v31  ;;  %v1694_v27 = vld [vmem:[%s15654_s25 + $0x1d90] sm:$0xff]  ;;  %v13920_v31 = vcombine.high %v1566_v22, %v1570_v19  ;;  %v13919_v61 = vcombine.low %v1566_v22, %v1570_v19 }
 0x487   : > { %11140 = vmatprep.subr.bf16.mxu0 %v13688_v37  ;;  %v1698_v21 = vld [vmem:[%s15654_s25 + $0x1db0] sm:$0xff] }
 0x488   : > { %11180 = vmatpush2.bf16.msra.mxu1 %v13823_v8  ;;  %v14048_v55 = vcombine.high %v1694_v27, %v1698_v21  ;;  %v1558_v8 = vld [vmem:[%s15654_s25 + $0x1950] sm:$0xff] }
 0x489   : > { %11181 = vmatprep.subr.bf16.mxu1 %v13816_v38  ;;  %v1562_v37 = vld [vmem:[%s15654_s25 + $0x1970] sm:$0xff] }
 0x48a   : > { %11141 = vmatpush2.bf16.msra.mxu0 %v13687_v23  ;;  %v1686_v42 = vld [vmem:[%s15654_s25 + $0x1d50] sm:$0xff]  ;;  %v14047_v23 = vcombine.low %v1694_v27, %v1698_v21 }
 0x48b   : > { %11142 = vmatprep.subr.bf16.mxu0 %v13680_v26  ;;  %v1690_v34 = vld [vmem:[%s15654_s25 + $0x1d70] sm:$0xff] }
 0x48c   : > { %11182 = vmatpush2.bf16.msra.mxu1 %v13815_v16  ;;  %v13912_v16 = vcombine.high %v1558_v8, %v1562_v37  ;;  %v14040_v56 = vcombine.high %v1686_v42, %v1690_v34  ;;  %v1550_v63 = vld [vmem:[%s15654_s25 + $0x1910] sm:$0xff]  ;;  %v14039_v19 = vcombine.low %v1686_v42, %v1690_v34 }
 0x48d   : > { %11183 = vmatprep.subr.bf16.mxu1 %v13808_v41  ;;  %v1554_v44 = vld [vmem:[%s15654_s25 + $0x1930] sm:$0xff] }
 0x48e   : > { %11143 = vmatpush2.bf16.msra.mxu0 %v13679_v7  ;;  %v1678_v60 = vld [vmem:[%s15654_s25 + $0x1d10] sm:$0xff]  ;;  %v13904_v27 = vcombine.high %v1550_v63, %v1554_v44 }
 0x48f   : > { %11194 = vmatprep.subr.bf16.mxu0 %v13928_v24  ;;  %v1682_v7 = vld [vmem:[%s15654_s25 + $0x1d30] sm:$0xff] }
 0x490   : > { %11184 = vmatpush2.bf16.msra.mxu1 %v13807_v11  ;;  %v584_v42 = vld [vmem:[#allocation2] sm:$0xff]  ;;  %v14031_v34 = vcombine.low %v1678_v60, %v1682_v7 }
 0x491   : > { %11235 = vmatprep.subr.bf16.mxu1 %v14056_v15  ;;  %v10900_v38 = vpop.f32.mrf.mxu0  ;;  %11145 = vmatmul.mubr.bf16.vlgmr.msra.gmra.mxu0 %v15967_v52  ;;  %v13911_v15 = vcombine.low %v1558_v8, %v1562_v37  ;;  %v11948_v8 = vrot.slane %v11940_v9, %v15711_v54 }
 0x492   : > { %v10901_v57 = vadd.f32 %v10900_v38, %v10860_v6  ;;  %11195 = vmatpush1.bf16.msra.mxu0 %v13927_v62  ;;  %11226 = vmatprep.mubr.bf16.mxu0 %v15979_v2  ;;  %v14032_v62 = vcombine.high %v1678_v60, %v1682_v7  ;;  %v1670_v6 = vld [vmem:[%s15654_s25 + $0x1cd0] sm:$0xff]  ;;  %v13903_v38 = vcombine.low %v1550_v63, %v1554_v44 }
 0x493   : > { %v10941_v0 = vpop.f32.mrf.mxu1  ;;  %11186 = vmatmul.mubr.bf16.vlgmr.msra.gmra.mxu1 %v15975_v58  ;;  %v10902_v14 = vpop.f32.mrf.mxu0  ;;  %11196 = vmatprep.subr.bf16.mxu0 %v13920_v31  ;;  %v1546_v31 = vld [vmem:[%s15654_s25 + $0x18f0] sm:$0xff]  ;;  %v14015_v7 = vcombine.low %v1662_v50, %v1666_v39 }
 0x494   : > { %11236 = vmatpush1.bf16.msra.mxu1 %v14055_v30  ;;  %v10903_v26 = vadd.f32 %v10902_v14, %v10862_v1  ;;  %11267 = vmatprep.mubr.bf16.mxu1 %v15984_v4  ;;  %v10942_v11 = vadd.f32 %v10941_v0, %v10901_v57  ;;  %v1542_v30 = vld [vmem:[%s15654_s25 + $0x18d0] sm:$0xff] }
 0x495   : > { %v10943_v41 = vpop.f32.mrf.mxu1  ;;  %11237 = vmatprep.subr.bf16.mxu1 %v14048_v55  ;;  %v10904_v13 = vpop.f32.mrf.mxu0  ;;  %v1674_v55 = vld [vmem:[%s15654_s25 + $0x1cf0] sm:$0xff]  ;;  %v13896_v1 = vcombine.high %v1542_v30, %v1546_v31 }
 0x496   : > { %v10944_v24 = vadd.f32 %v10943_v41, %v10903_v26  ;;  %11197 = vmatpush1.bf16.msra.mxu0 %v13919_v61  ;;  %v14024_v0 = vcombine.high %v1670_v6, %v1674_v55  ;;  %v1534_v61 = vld [vmem:[%s15654_s25 + $0x1890] sm:$0xff]  ;;  %v14016_v41 = vcombine.high %v1662_v50, %v1666_v39 }
 0x497   : > { %v10945_v48 = vpop.f32.mrf.mxu1  ;;  %v10905_v22 = vpop.f32.mrf.mxu0  ;;  %11198 = vmatprep.subr.bf16.mxu0 %v13912_v16  ;;  %v1538_v14 = vld [vmem:[%s15654_s25 + $0x18b0] sm:$0xff]  ;;  %v14023_v16 = vcombine.low %v1670_v6, %v1674_v55 }
 0x498   : > { %11238 = vmatpush1.bf16.msra.mxu1 %v14047_v23  ;;  %v11941_v21 = vcombine.low %v10942_v11, %v10944_v24  ;;  %v13895_v23 = vcombine.low %v1542_v30, %v1546_v31  ;;  %v13888_v26 = vcombine.high %v1534_v61, %v1538_v14  ;;  %v1530_v63 = vld [vmem:[%s15654_s25 + $0x1870] sm:$0xff]  ;;  %v13887_v60 = vcombine.low %v1534_v61, %v1538_v14 }
 0x499   : > { %v10946_v25 = vpop.f32.mrf.mxu1  ;;  %11239 = vmatprep.subr.bf16.mxu1 %v14040_v56  ;;  %v1526_v56 = vld [vmem:[%s15654_s25 + $0x1850] sm:$0xff] }
 0x49a   : > { %v11955_v37 = vrot.slane %v11941_v21, %v15711_v54  ;;  %11199 = vmatpush1.bf16.msra.mxu0 %v13911_v15  ;;  %v1654_v44 = vld [vmem:[%s15654_s25 + $0x1c50] sm:$0xff]  ;;  %v13880_v11 = vcombine.high %v1526_v56, %v1530_v63 }
 0x49b   : > { %11200 = vmatprep.subr.bf16.mxu0 %v13904_v27  ;;  %v1658_v13 = vld [vmem:[%s15654_s25 + $0x1c70] sm:$0xff]  ;;  %v13879_v27 = vcombine.low %v1526_v56, %v1530_v63 }
 0x49c   : > { %11240 = vmatpush1.bf16.msra.mxu1 %v14039_v19  ;;  %v11956_v57 = vcombine.low %v11948_v8, %v11955_v37  ;;  %v14008_v24 = vcombine.high %v1654_v44, %v1658_v13  ;;  %v1518_v48 = vld [vmem:[%s15654_s25 + $0x1810] sm:$0xff]  ;;  %v14007_v21 = vcombine.low %v1654_v44, %v1658_v13 }
 0x49d   : > { %11241 = vmatprep.subr.bf16.mxu1 %v14032_v62  ;;  %v1522_v15 = vld [vmem:[%s15654_s25 + $0x1830] sm:$0xff] }
 0x49e   : > { %v11976_v9 = vadd.f32 %v11956_v57, %v584_v42  ;;  %11201 = vmatpush1.bf16.msra.mxu0 %v13903_v38  ;;  %v1646_v22 = vld [vmem:[%s15654_s25 + $0x1c10] sm:$0xff]  ;;  %v13872_v25 = vcombine.high %v1518_v48, %v1522_v15  ;;  %v13871_v8 = vcombine.low %v1518_v48, %v1522_v15 }
 0x49f   : > { %11202 = vmatprep.subr.bf16.mxu0 %v13896_v1  ;;  %v1650_v19 = vld [vmem:[%s15654_s25 + $0x1c30] sm:$0xff] }
 0x4a0   : > { %11242 = vmatpush1.bf16.msra.mxu1 %v14031_v34  ;;  %11978 = vst [vmem:[#allocation2] sm:$0xff] %v11976_v9  ;;  %v14000_v62 = vcombine.high %v1646_v22, %v1650_v19  ;;  %v1638_v30 = vld [vmem:[%s15654_s25 + $0x1bd0] sm:$0xff]  ;;  %v13999_v37 = vcombine.low %v1646_v22, %v1650_v19 }
 0x4a1   : > { %11243 = vmatprep.subr.bf16.mxu1 %v14024_v0  ;;  %v1642_v31 = vld [vmem:[%s15654_s25 + $0x1bf0] sm:$0xff] }
 0x4a2   : > { %11203 = vmatpush1.bf16.msra.mxu0 %v13895_v23  ;;  %v1766_v6 = vld [vmem:[%s15654_s25 + $0x1fd0] sm:$0xff]  ;;  %v13992_v38 = vcombine.high %v1638_v30, %v1642_v31  ;;  %v13991_v61 = vcombine.low %v1638_v30, %v1642_v31 }
 0x4a3   : > { %11204 = vmatprep.subr.bf16.mxu0 %v13888_v26  ;;  %v1770_v55 = vld [vmem:[%s15654_s25 + $0x1ff0] sm:$0xff] }
 0x4a4   : > { %11244 = vmatpush1.bf16.msra.mxu1 %v14023_v16  ;;  %v14120_v42 = vcombine.high %v1766_v6, %v1770_v55  ;;  %v1630_v34 = vld [vmem:[%s15654_s25 + $0x1b90] sm:$0xff]  ;;  %v14119_v14 = vcombine.low %v1766_v6, %v1770_v55 }
 0x4a5   : > { %11245 = vmatprep.subr.bf16.mxu1 %v14016_v41  ;;  %v1634_v1 = vld [vmem:[%s15654_s25 + $0x1bb0] sm:$0xff] }
 0x4a6   : > { %11205 = vmatpush1.bf16.msra.mxu0 %v13887_v60  ;;  %v1758_v57 = vld [vmem:[%s15654_s25 + $0x1f90] sm:$0xff]  ;;  %v13984_v50 = vcombine.high %v1630_v34, %v1634_v1  ;;  %v13983_v41 = vcombine.low %v1630_v34, %v1634_v1 }
 0x4a7   : > { %11206 = vmatprep.subr.bf16.mxu0 %v13880_v11  ;;  %v1762_v0 = vld [vmem:[%s15654_s25 + $0x1fb0] sm:$0xff] }
 0x4a8   : > { %11246 = vmatpush1.bf16.msra.mxu1 %v14015_v7  ;;  %v14112_v39 = vcombine.high %v1758_v57, %v1762_v0  ;;  %v1622_v9 = vld [vmem:[%s15654_s25 + $0x1b50] sm:$0xff]  ;;  %v14111_v56 = vcombine.low %v1758_v57, %v1762_v0 }
 0x4a9   : > { %11247 = vmatprep.subr.bf16.mxu1 %v14008_v24  ;;  %v1626_v23 = vld [vmem:[%s15654_s25 + $0x1b70] sm:$0xff] }
 0x4aa   : > { %11207 = vmatpush1.bf16.msra.mxu0 %v13879_v27  ;;  %v1750_v16 = vld [vmem:[%s15654_s25 + $0x1f50] sm:$0xff]  ;;  %v13976_v63 = vcombine.high %v1622_v9, %v1626_v23  ;;  %v13975_v24 = vcombine.low %v1622_v9, %v1626_v23 }
 0x4ab   : > { %11208 = vmatprep.subr.bf16.mxu0 %v13872_v25  ;;  %v1754_v26 = vld [vmem:[%s15654_s25 + $0x1f70] sm:$0xff] }
 0x4ac   : > { %11248 = vmatpush1.bf16.msra.mxu1 %v14007_v21  ;;  %v14104_v44 = vcombine.high %v1750_v16, %v1754_v26  ;;  %v1614_v13 = vld [vmem:[%s15654_s25 + $0x1b10] sm:$0xff]  ;;  %v14103_v48 = vcombine.low %v1750_v16, %v1754_v26 }
 0x4ad   : > { %11249 = vmatprep.subr.bf16.mxu1 %v14000_v62  ;;  %v1618_v60 = vld [vmem:[%s15654_s25 + $0x1b30] sm:$0xff] }
 0x4ae   : > { %11209 = vmatpush1.bf16.msra.mxu0 %v13871_v8  ;;  %v1742_v7 = vld [vmem:[%s15654_s25 + $0x1f10] sm:$0xff]  ;;  %v13968_v15 = vcombine.high %v1614_v13, %v1618_v60  ;;  %v13967_v62 = vcombine.low %v1614_v13, %v1618_v60 }
 0x4af   : > { %11210 = vmatprep.subr.bf16.mxu0 %v13992_v38  ;;  %v1746_v11 = vld [vmem:[%s15654_s25 + $0x1f30] sm:$0xff] }
 0x4b0   : > { %11250 = vmatpush1.bf16.msra.mxu1 %v13999_v37  ;;  %v14096_v22 = vcombine.high %v1742_v7, %v1746_v11  ;;  %v1606_v19 = vld [vmem:[%s15654_s25 + $0x1ad0] sm:$0xff]  ;;  %v14095_v30 = vcombine.low %v1742_v7, %v1746_v11 }
 0x4b1   : > { %11251 = vmatprep.subr.bf16.mxu1 %v14120_v42  ;;  %v1610_v27 = vld [vmem:[%s15654_s25 + $0x1af0] sm:$0xff] }
 0x4b2   : > { %11211 = vmatpush2.bf16.msra.mxu0 %v13991_v61  ;;  %v1734_v21 = vld [vmem:[%s15654_s25 + $0x1ed0] sm:$0xff]  ;;  %v13960_v31 = vcombine.high %v1606_v19, %v1610_v27  ;;  %v13959_v42 = vcombine.low %v1606_v19, %v1610_v27 }
 0x4b3   : > { %11212 = vmatprep.subr.bf16.mxu0 %v13984_v50  ;;  %v1738_v25 = vld [vmem:[%s15654_s25 + $0x1ef0] sm:$0xff] }
 0x4b4   : > { %11252 = vmatpush2.bf16.msra.mxu1 %v14119_v14  ;;  %v14088_v6 = vcombine.high %v1734_v21, %v1738_v25  ;;  %v1598_v55 = vld [vmem:[%s15654_s25 + $0x1a90] sm:$0xff]  ;;  %v14087_v34 = vcombine.low %v1734_v21, %v1738_v25 }
 0x4b5   : > { %11253 = vmatprep.subr.bf16.mxu1 %v14112_v39  ;;  %v1602_v8 = vld [vmem:[%s15654_s25 + $0x1ab0] sm:$0xff] }
 0x4b6   : > { %11213 = vmatpush2.bf16.msra.mxu0 %v13983_v41  ;;  %v1726_v37 = vld [vmem:[%s15654_s25 + $0x1e90] sm:$0xff]  ;;  %v13952_v1 = vcombine.high %v1598_v55, %v1602_v8  ;;  %v13951_v39 = vcombine.low %v1598_v55, %v1602_v8 }
 0x4b7   : > { %11214 = vmatprep.subr.bf16.mxu0 %v13976_v63  ;;  %v1730_v38 = vld [vmem:[%s15654_s25 + $0x1eb0] sm:$0xff] }
 0x4b8   : > { %11254 = vmatpush2.bf16.msra.mxu1 %v14111_v56  ;;  %v14080_v57 = vcombine.high %v1726_v37, %v1730_v38  ;;  %v1590_v0 = vld [vmem:[%s15654_s25 + $0x1a50] sm:$0xff]  ;;  %v14079_v9 = vcombine.low %v1726_v37, %v1730_v38 }
 0x4b9   : > { %11255 = vmatprep.subr.bf16.mxu1 %v14104_v44  ;;  %v1594_v61 = vld [vmem:[%s15654_s25 + $0x1a70] sm:$0xff] }
 0x4ba   : > { %11215 = vmatpush2.bf16.msra.mxu0 %v13975_v24  ;;  %v1718_v14 = vld [vmem:[%s15654_s25 + $0x1e50] sm:$0xff]  ;;  %v13944_v23 = vcombine.high %v1590_v0, %v1594_v61  ;;  %v13943_v44 = vcombine.low %v1590_v0, %v1594_v61 }
 0x4bb   : > { %11216 = vmatprep.subr.bf16.mxu0 %v13968_v15  ;;  %v1722_v50 = vld [vmem:[%s15654_s25 + $0x1e70] sm:$0xff] }
 0x4bc   : > { %11256 = vmatpush2.bf16.msra.mxu1 %v14103_v48  ;;  %v14072_v16 = vcombine.high %v1718_v14, %v1722_v50  ;;  %v1582_v26 = vld [vmem:[%s15654_s25 + $0x1a10] sm:$0xff]  ;;  %v14071_v13 = vcombine.low %v1718_v14, %v1722_v50 }
 0x4bd   : > { %11257 = vmatprep.subr.bf16.mxu1 %v14096_v22  ;;  %v1586_v41 = vld [vmem:[%s15654_s25 + $0x1a30] sm:$0xff] }
 0x4be   : > { %11217 = vmatpush2.bf16.msra.mxu0 %v13967_v62  ;;  %v1710_v56 = vld [vmem:[%s15654_s25 + $0x1e10] sm:$0xff]  ;;  %v13936_v60 = vcombine.high %v1582_v26, %v1586_v41  ;;  %v13935_v22 = vcombine.low %v1582_v26, %v1586_v41 }
 0x4bf   : > { %11218 = vmatprep.subr.bf16.mxu0 %v13960_v31  ;;  %v1714_v63 = vld [vmem:[%s15654_s25 + $0x1e30] sm:$0xff] }
 0x4c0   : > { %11258 = vmatpush2.bf16.msra.mxu1 %v14095_v30  ;;  %v14064_v7 = vcombine.high %v1710_v56, %v1714_v63  ;;  %v1830_v11 = vld [vmem:[%s15654_s25 + $0x21d0] sm:$0xff]  ;;  %v14063_v19 = vcombine.low %v1710_v56, %v1714_v63 }
 0x4c1   : > { %11259 = vmatprep.subr.bf16.mxu1 %v14088_v6  ;;  %v1834_v24 = vld [vmem:[%s15654_s25 + $0x21f0] sm:$0xff] }
 0x4c2   : > { %11219 = vmatpush2.bf16.msra.mxu0 %v13959_v42  ;;  %v1958_v48 = vld [vmem:[%s15654_s25 + $0x25d0] sm:$0xff]  ;;  %v14184_v27 = vcombine.high %v1830_v11, %v1834_v24  ;;  %v14183_v6 = vcombine.low %v1830_v11, %v1834_v24 }
 0x4c3   : > { %11220 = vmatprep.subr.bf16.mxu0 %v13952_v1  ;;  %v1962_v15 = vld [vmem:[%s15654_s25 + $0x25f0] sm:$0xff] }
 0x4c4   : > { %11260 = vmatpush2.bf16.msra.mxu1 %v14087_v34  ;;  %v14312_v21 = vcombine.high %v1958_v48, %v1962_v15  ;;  %v1822_v25 = vld [vmem:[%s15654_s25 + $0x2190] sm:$0xff]  ;;  %v14311_v55 = vcombine.low %v1958_v48, %v1962_v15 }
 0x4c5   : > { %11261 = vmatprep.subr.bf16.mxu1 %v14080_v57  ;;  %v1826_v62 = vld [vmem:[%s15654_s25 + $0x21b0] sm:$0xff] }
 0x4c6   : > { %11221 = vmatpush2.bf16.msra.mxu0 %v13951_v39  ;;  %v1950_v30 = vld [vmem:[%s15654_s25 + $0x2590] sm:$0xff]  ;;  %v14176_v8 = vcombine.high %v1822_v25, %v1826_v62  ;;  %v14175_v61 = vcombine.low %v1822_v25, %v1826_v62 }
 0x4c7   : > { %11222 = vmatprep.subr.bf16.mxu0 %v13944_v23  ;;  %v1954_v31 = vld [vmem:[%s15654_s25 + $0x25b0] sm:$0xff] }
 0x4c8   : > { %11262 = vmatpush2.bf16.msra.mxu1 %v14079_v9  ;;  %v14304_v37 = vcombine.high %v1950_v30, %v1954_v31  ;;  %v1814_v38 = vld [vmem:[%s15654_s25 + $0x2150] sm:$0xff]  ;;  %v14303_v39 = vcombine.low %v1950_v30, %v1954_v31 }
 0x4c9   : > { %11263 = vmatprep.subr.bf16.mxu1 %v14072_v16  ;;  %v1818_v42 = vld [vmem:[%s15654_s25 + $0x2170] sm:$0xff] }
 0x4ca   : > { %11223 = vmatpush2.bf16.msra.mxu0 %v13943_v44  ;;  %v1942_v1 = vld [vmem:[%s15654_s25 + $0x2550] sm:$0xff]  ;;  %v14168_v9 = vcombine.high %v1814_v38, %v1818_v42 }
 0x4cb   : > { %11224 = vmatprep.subr.bf16.mxu0 %v13936_v60  ;;  %v1946_v57 = vld [vmem:[%s15654_s25 + $0x2570] sm:$0xff] }
 0x4cc   : > { %11264 = vmatpush2.bf16.msra.mxu1 %v14071_v13  ;;  %v14296_v16 = vcombine.high %v1942_v1, %v1946_v57  ;;  %v1806_v26 = vld [vmem:[%s15654_s25 + $0x2110] sm:$0xff]  ;;  %v14295_v24 = vcombine.low %v1942_v1, %v1946_v57 }
 0x4cd   : > { %11265 = vmatprep.subr.bf16.mxu1 %v14064_v7  ;;  %v1810_v41 = vld [vmem:[%s15654_s25 + $0x2130] sm:$0xff]  ;;  %v14167_v7 = vcombine.low %v1814_v38, %v1818_v42 }
 0x4ce   : > { %11225 = vmatpush2.bf16.msra.mxu0 %v13935_v22  ;;  %v1934_v44 = vld [vmem:[%s15654_s25 + $0x2510] sm:$0xff]  ;;  %v14160_v48 = vcombine.high %v1806_v26, %v1810_v41  ;;  %v14159_v62 = vcombine.low %v1806_v26, %v1810_v41 }
 0x4cf   : > { %11276 = vmatprep.subr.bf16.mxu0 %v14184_v27  ;;  %v1938_v13 = vld [vmem:[%s15654_s25 + $0x2530] sm:$0xff] }
 0x4d0   : > { %11266 = vmatpush2.bf16.msra.mxu1 %v14063_v19  ;;  %v14288_v22 = vcombine.high %v1934_v44, %v1938_v13  ;;  %v1798_v19 = vld [vmem:[%s15654_s25 + $0x20d0] sm:$0xff]  ;;  %v14287_v30 = vcombine.low %v1934_v44, %v1938_v13 }
 0x4d1   : > { %11317 = vmatprep.subr.bf16.mxu1 %v14312_v21  ;;  %v10982_v34 = vpop.f32.mrf.mxu0  ;;  %11227 = vmatmul.mubr.bf16.vlgmr.msra.gmra.mxu0 %v16058_v51  ;;  %v1802_v27 = vld [vmem:[%s15654_s25 + $0x20f0] sm:$0xff] }
 0x4d2   : > { %11277 = vmatpush1.bf16.msra.mxu0 %v14183_v6  ;;  %11308 = vmatprep.mubr.bf16.mxu0 %v16070_v3  ;;  %v1926_v21 = vld [vmem:[%s15654_s25 + $0x24d0] sm:$0xff]  ;;  %v14152_v31 = vcombine.high %v1798_v19, %v1802_v27  ;;  %v14151_v42 = vcombine.low %v1798_v19, %v1802_v27 }
 0x4d3   : > { %v11023_v0 = vpop.f32.mrf.mxu1  ;;  %11268 = vmatmul.mubr.bf16.vlgmr.msra.gmra.mxu1 %v16066_v59  ;;  %v10984_v50 = vpop.f32.mrf.mxu0  ;;  %11278 = vmatprep.subr.bf16.mxu0 %v14176_v8  ;;  %v1930_v25 = vld [vmem:[%s15654_s25 + $0x24f0] sm:$0xff] }
 0x4d4   : > { %v17002_v14 = vadd.f32 %v11023_v0, %v10982_v34  ;;  %11318 = vmatpush1.bf16.msra.mxu1 %v14311_v55  ;;  %11349 = vmatprep.mubr.bf16.mxu1 %v16075_v43  ;;  %v14280_v6 = vcombine.high %v1926_v21, %v1930_v25  ;;  %v1790_v55 = vld [vmem:[%s15654_s25 + $0x2090] sm:$0xff]  ;;  %v14279_v34 = vcombine.low %v1926_v21, %v1930_v25 }
 0x4d5   : > { %v11025_v23 = vpop.f32.mrf.mxu1  ;;  %11319 = vmatprep.subr.bf16.mxu1 %v14304_v37  ;;  %v10986_v63 = vpop.f32.mrf.mxu0  ;;  %v1794_v8 = vld [vmem:[%s15654_s25 + $0x20b0] sm:$0xff] }
 0x4d6   : > { %v17007_v56 = vadd.f32 %v11025_v23, %v10984_v50  ;;  %11279 = vmatpush1.bf16.msra.mxu0 %v14175_v61  ;;  %v1918_v37 = vld [vmem:[%s15654_s25 + $0x2490] sm:$0xff]  ;;  %v14144_v1 = vcombine.high %v1790_v55, %v1794_v8 }
 0x4d7   : > { %v11027_v60 = vpop.f32.mrf.mxu1  ;;  %v10987_v11 = vpop.f32.mrf.mxu0  ;;  %11280 = vmatprep.subr.bf16.mxu0 %v14168_v9  ;;  %v1922_v38 = vld [vmem:[%s15654_s25 + $0x24b0] sm:$0xff]  ;;  %v14143_v9 = vcombine.low %v1790_v55, %v1794_v8 }
 0x4d8   : > { %11320 = vmatpush1.bf16.msra.mxu1 %v14303_v39  ;;  %v14272_v57 = vcombine.high %v1918_v37, %v1922_v38  ;;  %v1782_v0 = vld [vmem:[%s15654_s25 + $0x2050] sm:$0xff]  ;;  %v14271_v23 = vcombine.low %v1918_v37, %v1922_v38 }
 0x4d9   : > { %v11028_v15 = vpop.f32.mrf.mxu1  ;;  %11321 = vmatprep.subr.bf16.mxu1 %v14296_v16  ;;  %v1786_v61 = vld [vmem:[%s15654_s25 + $0x2070] sm:$0xff] }
 0x4da   : > { %11281 = vmatpush1.bf16.msra.mxu0 %v14167_v7  ;;  %v1910_v50 = vld [vmem:[%s15654_s25 + $0x2450] sm:$0xff]  ;;  %v14136_v16 = vcombine.high %v1782_v0, %v1786_v61  ;;  %v14135_v60 = vcombine.low %v1782_v0, %v1786_v61 }
 0x4db   : > { %11282 = vmatprep.subr.bf16.mxu0 %v14160_v48  ;;  %v1914_v39 = vld [vmem:[%s15654_s25 + $0x2470] sm:$0xff] }
 0x4dc   : > { %11322 = vmatpush1.bf16.msra.mxu1 %v14295_v24  ;;  %v14264_v26 = vcombine.high %v1910_v50, %v1914_v39  ;;  %v1774_v41 = vld [vmem:[%s15654_s25 + $0x2010] sm:$0xff]  ;;  %v14263_v7 = vcombine.low %v1910_v50, %v1914_v39 }
 0x4dd   : > { %11323 = vmatprep.subr.bf16.mxu1 %v14288_v22  ;;  %v1778_v63 = vld [vmem:[%s15654_s25 + $0x2030] sm:$0xff] }
 0x4de   : > { %11283 = vmatpush1.bf16.msra.mxu0 %v14159_v62  ;;  %v1902_v44 = vld [vmem:[%s15654_s25 + $0x2410] sm:$0xff]  ;;  %v14128_v11 = vcombine.high %v1774_v41, %v1778_v63  ;;  %v14127_v27 = vcombine.low %v1774_v41, %v1778_v63 }
 0x4df   : > { %11284 = vmatprep.subr.bf16.mxu0 %v14152_v31  ;;  %v1906_v13 = vld [vmem:[%s15654_s25 + $0x2430] sm:$0xff] }
 0x4e0   : > { %11324 = vmatpush1.bf16.msra.mxu1 %v14287_v30  ;;  %v14256_v24 = vcombine.high %v1902_v44, %v1906_v13  ;;  %v1894_v48 = vld [vmem:[%s15654_s25 + $0x23d0] sm:$0xff]  ;;  %v14255_v21 = vcombine.low %v1902_v44, %v1906_v13 }
 0x4e1   : > { %11325 = vmatprep.subr.bf16.mxu1 %v14280_v6  ;;  %v1898_v15 = vld [vmem:[%s15654_s25 + $0x23f0] sm:$0xff] }
 0x4e2   : > { %11285 = vmatpush1.bf16.msra.mxu0 %v14151_v42  ;;  %v2022_v22 = vld [vmem:[%s15654_s25 + $0x27d0] sm:$0xff]  ;;  %v14248_v25 = vcombine.high %v1894_v48, %v1898_v15  ;;  %v14247_v8 = vcombine.low %v1894_v48, %v1898_v15 }
 0x4e3   : > { %11286 = vmatprep.subr.bf16.mxu0 %v14144_v1  ;;  %v2026_v19 = vld [vmem:[%s15654_s25 + $0x27f0] sm:$0xff] }
 0x4e4   : > { %11326 = vmatpush1.bf16.msra.mxu1 %v14279_v34  ;;  %v14376_v62 = vcombine.high %v2022_v22, %v2026_v19  ;;  %v1886_v30 = vld [vmem:[%s15654_s25 + $0x2390] sm:$0xff]  ;;  %v14375_v37 = vcombine.low %v2022_v22, %v2026_v19 }
 0x4e5   : > { %11327 = vmatprep.subr.bf16.mxu1 %v14272_v57  ;;  %v1890_v31 = vld [vmem:[%s15654_s25 + $0x23b0] sm:$0xff] }
 0x4e6   : > { %11287 = vmatpush1.bf16.msra.mxu0 %v14143_v9  ;;  %v2014_v6 = vld [vmem:[%s15654_s25 + $0x2790] sm:$0xff]  ;;  %v14240_v38 = vcombine.high %v1886_v30, %v1890_v31  ;;  %v14239_v61 = vcombine.low %v1886_v30, %v1890_v31 }
 0x4e7   : > { %11288 = vmatprep.subr.bf16.mxu0 %v14136_v16  ;;  %v2018_v55 = vld [vmem:[%s15654_s25 + $0x27b0] sm:$0xff] }
 0x4e8   : > { %11328 = vmatpush1.bf16.msra.mxu1 %v14271_v23  ;;  %v14368_v42 = vcombine.high %v2014_v6, %v2018_v55  ;;  %v1878_v34 = vld [vmem:[%s15654_s25 + $0x2350] sm:$0xff]  ;;  %v14367_v50 = vcombine.low %v2014_v6, %v2018_v55 }
 0x4e9   : > { %11329 = vmatprep.subr.bf16.mxu1 %v14264_v26  ;;  %v1882_v1 = vld [vmem:[%s15654_s25 + $0x2370] sm:$0xff] }
 0x4ea   : > { %11289 = vmatpush1.bf16.msra.mxu0 %v14135_v60  ;;  %v2006_v57 = vld [vmem:[%s15654_s25 + $0x2750] sm:$0xff]  ;;  %v14232_v39 = vcombine.high %v1878_v34, %v1882_v1  ;;  %v14231_v63 = vcombine.low %v1878_v34, %v1882_v1 }
 0x4eb   : > { %11290 = vmatprep.subr.bf16.mxu0 %v14128_v11  ;;  %v2010_v0 = vld [vmem:[%s15654_s25 + $0x2770] sm:$0xff] }
 0x4ec   : > { %11330 = vmatpush1.bf16.msra.mxu1 %v14263_v7  ;;  %v14360_v9 = vcombine.high %v2006_v57, %v2010_v0  ;;  %v1870_v23 = vld [vmem:[%s15654_s25 + $0x2310] sm:$0xff]  ;;  %v14359_v44 = vcombine.low %v2006_v57, %v2010_v0 }
 0x4ed   : > { %11331 = vmatprep.subr.bf16.mxu1 %v14256_v24  ;;  %v1874_v16 = vld [vmem:[%s15654_s25 + $0x2330] sm:$0xff] }
 0x4ee   : > { %11291 = vmatpush1.bf16.msra.mxu0 %v14127_v27  ;;  %v1998_v26 = vld [vmem:[%s15654_s25 + $0x2710] sm:$0xff]  ;;  %v14224_v13 = vcombine.high %v1870_v23, %v1874_v16  ;;  %v14223_v15 = vcombine.low %v1870_v23, %v1874_v16 }
 0x4ef   : > { %11292 = vmatprep.subr.bf16.mxu0 %v14248_v25  ;;  %v2002_v41 = vld [vmem:[%s15654_s25 + $0x2730] sm:$0xff] }
 0x4f0   : > { %11332 = vmatpush1.bf16.msra.mxu1 %v14255_v21  ;;  %v14352_v60 = vcombine.high %v1998_v26, %v2002_v41  ;;  %v1862_v7 = vld [vmem:[%s15654_s25 + $0x22d0] sm:$0xff]  ;;  %v14351_v22 = vcombine.low %v1998_v26, %v2002_v41 }
 0x4f1   : > { %11333 = vmatprep.subr.bf16.mxu1 %v14376_v62  ;;  %v1866_v11 = vld [vmem:[%s15654_s25 + $0x22f0] sm:$0xff] }
 0x4f2   : > { %11293 = vmatpush2.bf16.msra.mxu0 %v14247_v8  ;;  %v1990_v24 = vld [vmem:[%s15654_s25 + $0x26d0] sm:$0xff]  ;;  %v14216_v19 = vcombine.high %v1862_v7, %v1866_v11  ;;  %v14215_v31 = vcombine.low %v1862_v7, %v1866_v11 }
 0x4f3   : > { %11294 = vmatprep.subr.bf16.mxu0 %v14240_v38  ;;  %v1994_v48 = vld [vmem:[%s15654_s25 + $0x26f0] sm:$0xff] }
 0x4f4   : > { %11334 = vmatpush2.bf16.msra.mxu1 %v14375_v37  ;;  %v14344_v27 = vcombine.high %v1990_v24, %v1994_v48  ;;  %v1854_v21 = vld [vmem:[%s15654_s25 + $0x2290] sm:$0xff]  ;;  %v14343_v6 = vcombine.low %v1990_v24, %v1994_v48 }
 0x4f5   : > { %11335 = vmatprep.subr.bf16.mxu1 %v14368_v42  ;;  %v1858_v25 = vld [vmem:[%s15654_s25 + $0x22b0] sm:$0xff] }
 0x4f6   : > { %11295 = vmatpush2.bf16.msra.mxu0 %v14239_v61  ;;  %v1982_v62 = vld [vmem:[%s15654_s25 + $0x2690] sm:$0xff]  ;;  %v14208_v55 = vcombine.high %v1854_v21, %v1858_v25  ;;  %v14207_v1 = vcombine.low %v1854_v21, %v1858_v25 }
 0x4f7   : > { %11296 = vmatprep.subr.bf16.mxu0 %v14232_v39  ;;  %v1986_v30 = vld [vmem:[%s15654_s25 + $0x26b0] sm:$0xff] }
 0x4f8   : > { %11336 = vmatpush2.bf16.msra.mxu1 %v14367_v50  ;;  %v14336_v8 = vcombine.high %v1982_v62, %v1986_v30  ;;  %v1846_v37 = vld [vmem:[%s15654_s25 + $0x2250] sm:$0xff]  ;;  %v14335_v57 = vcombine.low %v1982_v62, %v1986_v30 }
 0x4f9   : > { %11337 = vmatprep.subr.bf16.mxu1 %v14360_v9  ;;  %v1850_v38 = vld [vmem:[%s15654_s25 + $0x2270] sm:$0xff] }
 0x4fa   : > { %11297 = vmatpush2.bf16.msra.mxu0 %v14231_v63  ;;  %v1974_v42 = vld [vmem:[%s15654_s25 + $0x2650] sm:$0xff]  ;;  %v14200_v0 = vcombine.high %v1846_v37, %v1850_v38  ;;  %v14199_v16 = vcombine.low %v1846_v37, %v1850_v38 }
 0x4fb   : > { %11298 = vmatprep.subr.bf16.mxu0 %v14224_v13  ;;  %v1978_v34 = vld [vmem:[%s15654_s25 + $0x2670] sm:$0xff] }
 0x4fc   : > { %11338 = vmatpush2.bf16.msra.mxu1 %v14359_v44  ;;  %v14328_v61 = vcombine.high %v1974_v42, %v1978_v34  ;;  %v1838_v50 = vld [vmem:[%s15654_s25 + $0x2210] sm:$0xff]  ;;  %v14327_v26 = vcombine.low %v1974_v42, %v1978_v34 }
 0x4fd   : > { %11339 = vmatprep.subr.bf16.mxu1 %v14352_v60  ;;  %v1842_v39 = vld [vmem:[%s15654_s25 + $0x2230] sm:$0xff] }
 0x4fe   : > { %11299 = vmatpush2.bf16.msra.mxu0 %v14223_v15  ;;  %v1966_v9 = vld [vmem:[%s15654_s25 + $0x2610] sm:$0xff]  ;;  %v14192_v41 = vcombine.high %v1838_v50, %v1842_v39  ;;  %v14191_v11 = vcombine.low %v1838_v50, %v1842_v39 }
 0x4ff   : > { %11300 = vmatprep.subr.bf16.mxu0 %v14216_v19  ;;  %v1970_v23 = vld [vmem:[%s15654_s25 + $0x2630] sm:$0xff] }
 0x500   : > { %11340 = vmatpush2.bf16.msra.mxu1 %v14351_v22  ;;  %v14320_v63 = vcombine.high %v1966_v9, %v1970_v23  ;;  %v2086_v44 = vld [vmem:[%s15654_s25 + $0x29d0] sm:$0xff]  ;;  %v14319_v24 = vcombine.low %v1966_v9, %v1970_v23 }
 0x501   : > { %11341 = vmatprep.subr.bf16.mxu1 %v14344_v27  ;;  %v2090_v13 = vld [vmem:[%s15654_s25 + $0x29f0] sm:$0xff] }
 0x502   : > { %11301 = vmatpush2.bf16.msra.mxu0 %v14215_v31  ;;  %v2214_v60 = vld [vmem:[%s15654_s25 + $0x2dd0] sm:$0xff]  ;;  %v14440_v48 = vcombine.high %v2086_v44, %v2090_v13  ;;  %v14439_v25 = vcombine.low %v2086_v44, %v2090_v13 }
 0x503   : > { %11302 = vmatprep.subr.bf16.mxu0 %v14208_v55  ;;  %v2218_v7 = vld [vmem:[%s15654_s25 + $0x2df0] sm:$0xff] }
 0x504   : > { %11342 = vmatpush2.bf16.msra.mxu1 %v14343_v6  ;;  %v14568_v15 = vcombine.high %v2214_v60, %v2218_v7  ;;  %v2078_v22 = vld [vmem:[%s15654_s25 + $0x2990] sm:$0xff]  ;;  %v14567_v62 = vcombine.low %v2214_v60, %v2218_v7 }
 0x505   : > { %11343 = vmatprep.subr.bf16.mxu1 %v14336_v8  ;;  %v2082_v19 = vld [vmem:[%s15654_s25 + $0x29b0] sm:$0xff] }
 0x506   : > { %11303 = vmatpush2.bf16.msra.mxu0 %v14207_v1  ;;  %v2206_v27 = vld [vmem:[%s15654_s25 + $0x2d90] sm:$0xff]  ;;  %v14432_v30 = vcombine.high %v2078_v22, %v2082_v19  ;;  %v14431_v1 = vcombine.low %v2078_v22, %v2082_v19 }
 0x507   : > { %11304 = vmatprep.subr.bf16.mxu0 %v14200_v0  ;;  %v2210_v21 = vld [vmem:[%s15654_s25 + $0x2db0] sm:$0xff] }
 0x508   : > { %11344 = vmatpush2.bf16.msra.mxu1 %v14335_v57  ;;  %v14560_v31 = vcombine.high %v2206_v27, %v2210_v21  ;;  %v2070_v6 = vld [vmem:[%s15654_s25 + $0x2950] sm:$0xff]  ;;  %v14559_v0 = vcombine.low %v2206_v27, %v2210_v21 }
 0x509   : > { %11345 = vmatprep.subr.bf16.mxu1 %v14328_v61  ;;  %v2074_v55 = vld [vmem:[%s15654_s25 + $0x2970] sm:$0xff] }
 0x50a   : > { %11305 = vmatpush2.bf16.msra.mxu0 %v14199_v16  ;;  %v2198_v37 = vld [vmem:[%s15654_s25 + $0x2d50] sm:$0xff]  ;;  %v14424_v61 = vcombine.high %v2070_v6, %v2074_v55 }
 0x50b   : > { %11306 = vmatprep.subr.bf16.mxu0 %v14192_v41  ;;  %v2202_v38 = vld [vmem:[%s15654_s25 + $0x2d70] sm:$0xff] }
 0x50c   : > { %11346 = vmatpush2.bf16.msra.mxu1 %v14327_v26  ;;  %v2062_v23 = vld [vmem:[%s15654_s25 + $0x2910] sm:$0xff]  ;;  %v14551_v7 = vcombine.low %v2198_v37, %v2202_v38 }
 0x50d   : > { %11347 = vmatprep.subr.bf16.mxu1 %v14320_v63  ;;  %v2066_v16 = vld [vmem:[%s15654_s25 + $0x2930] sm:$0xff] }
 0x50e   : > { %11307 = vmatpush2.bf16.msra.mxu0 %v14191_v11  ;;  %v2190_v41 = vld [vmem:[%s15654_s25 + $0x2d10] sm:$0xff]  ;;  %v14416_v11 = vcombine.high %v2062_v23, %v2066_v16  ;;  %v14415_v21 = vcombine.low %v2062_v23, %v2066_v16 }
 0x50f   : > { %11358 = vmatprep.subr.bf16.mxu0 %v14440_v48  ;;  %v2194_v63 = vld [vmem:[%s15654_s25 + $0x2d30] sm:$0xff] }
 0x510   : > { %11348 = vmatpush2.bf16.msra.mxu1 %v14319_v24  ;;  %v14544_v48 = vcombine.high %v2190_v41, %v2194_v63  ;;  %v2058_v22 = vld [vmem:[%s15654_s25 + $0x28f0] sm:$0xff] }
 0x511   : > { %11399 = vmatprep.subr.bf16.mxu1 %v14568_v15  ;;  %v11064_v8 = vpop.f32.mrf.mxu0  ;;  %11309 = vmatmul.mubr.bf16.vlgmr.msra.gmra.mxu0 %v16153_v29  ;;  %v2054_v15 = vld [vmem:[%s15654_s25 + $0x28d0] sm:$0xff] }
 0x512   : > { %v11065_v42 = vadd.f32 %v11064_v8, %v17002_v14  ;;  %11359 = vmatpush1.bf16.msra.mxu0 %v14439_v25  ;;  %v14552_v14 = vcombine.high %v2198_v37, %v2202_v38  ;;  %11390 = vmatprep.mubr.bf16.mxu0 %v16165_v46  ;;  %v2182_v19 = vld [vmem:[%s15654_s25 + $0x2cd0] sm:$0xff]  ;;  %v14543_v25 = vcombine.low %v2190_v41, %v2194_v63 }
 0x513   : > { %v11105_v34 = vpop.f32.mrf.mxu1  ;;  %11350 = vmatmul.mubr.bf16.vlgmr.msra.gmra.mxu1 %v16161_v33  ;;  %v11066_v57 = vpop.f32.mrf.mxu0  ;;  %11360 = vmatprep.subr.bf16.mxu0 %v14432_v30  ;;  %v2186_v27 = vld [vmem:[%s15654_s25 + $0x2cf0] sm:$0xff]  ;;  %v14407_v37 = vcombine.low %v2054_v15, %v2058_v22 }
 0x514   : > { %11400 = vmatpush1.bf16.msra.mxu1 %v14567_v62  ;;  %v17075_v50 = vadd.f32 %v11105_v34, %v11065_v42  ;;  %v11067_v39 = vadd.f32 %v11066_v57, %v17007_v56  ;;  %11431 = vmatprep.mubr.bf16.mxu1 %v16170_v53  ;;  %v14423_v56 = vcombine.low %v2070_v6, %v2074_v55  ;;  %v2050_v6 = vld [vmem:[%s15654_s25 + $0x28b0] sm:$0xff] }
 0x515   : > { %v11107_v9 = vpop.f32.mrf.mxu1  ;;  %11401 = vmatprep.subr.bf16.mxu1 %v14560_v31  ;;  %v11068_v26 = vpop.f32.mrf.mxu0  ;;  %v14408_v62 = vcombine.high %v2054_v15, %v2058_v22  ;;  %v14536_v30 = vcombine.high %v2182_v19, %v2186_v27  ;;  %v2046_v31 = vld [vmem:[%s15654_s25 + $0x2890] sm:$0xff]  ;;  %v14535_v38 = vcombine.low %v2182_v19, %v2186_v27 }
 0x516   : > { %v17084_v44 = vadd.f32 %v11107_v9, %v11067_v39  ;;  %11361 = vmatpush1.bf16.msra.mxu0 %v14431_v1  ;;  %v2174_v55 = vld [vmem:[%s15654_s25 + $0x2c90] sm:$0xff]  ;;  %v14400_v42 = vcombine.high %v2046_v31, %v2050_v6  ;;  %v14399_v39 = vcombine.low %v2046_v31, %v2050_v6 }
 0x517   : > { %v11109_v13 = vpop.f32.mrf.mxu1  ;;  %v11069_v60 = vpop.f32.mrf.mxu0  ;;  %11362 = vmatprep.subr.bf16.mxu0 %v14424_v61  ;;  %v2178_v8 = vld [vmem:[%s15654_s25 + $0x2cb0] sm:$0xff] }
 0x518   : > { %11402 = vmatpush1.bf16.msra.mxu1 %v14559_v0  ;;  %v14528_v34 = vcombine.high %v2174_v55, %v2178_v8  ;;  %v2038_v1 = vld [vmem:[%s15654_s25 + $0x2850] sm:$0xff]  ;;  %v14527_v9 = vcombine.low %v2174_v55, %v2178_v8 }
 0x519   : > { %v11110_v24 = vpop.f32.mrf.mxu1  ;;  %11403 = vmatprep.subr.bf16.mxu1 %v14552_v14  ;;  %v2042_v57 = vld [vmem:[%s15654_s25 + $0x2870] sm:$0xff] }
 0x51a   : > { %11363 = vmatpush1.bf16.msra.mxu0 %v14423_v56  ;;  %v2166_v0 = vld [vmem:[%s15654_s25 + $0x2c50] sm:$0xff]  ;;  %v14392_v14 = vcombine.high %v2038_v1, %v2042_v57  ;;  %v14391_v13 = vcombine.low %v2038_v1, %v2042_v57 }
 0x51b   : > { %11364 = vmatprep.subr.bf16.mxu0 %v14416_v11  ;;  %v2170_v61 = vld [vmem:[%s15654_s25 + $0x2c70] sm:$0xff] }
 0x51c   : > { %11404 = vmatpush1.bf16.msra.mxu1 %v14551_v7  ;;  %v14520_v23 = vcombine.high %v2166_v0, %v2170_v61  ;;  %v2030_v16 = vld [vmem:[%s15654_s25 + $0x2810] sm:$0xff]  ;;  %v14519_v56 = vcombine.low %v2166_v0, %v2170_v61 }
 0x51d   : > { %11405 = vmatprep.subr.bf16.mxu1 %v14544_v48  ;;  %v2034_v26 = vld [vmem:[%s15654_s25 + $0x2830] sm:$0xff] }
 0x51e   : > { %11365 = vmatpush1.bf16.msra.mxu0 %v14415_v21  ;;  %v2158_v41 = vld [vmem:[%s15654_s25 + $0x2c10] sm:$0xff]  ;;  %v14384_v60 = vcombine.high %v2030_v16, %v2034_v26  ;;  %v14383_v22 = vcombine.low %v2030_v16, %v2034_v26 }
 0x51f   : > { %11366 = vmatprep.subr.bf16.mxu0 %v14408_v62  ;;  %v2162_v63 = vld [vmem:[%s15654_s25 + $0x2c30] sm:$0xff] }
 0x520   : > { %11406 = vmatpush1.bf16.msra.mxu1 %v14543_v25  ;;  %v14512_v7 = vcombine.high %v2158_v41, %v2162_v63  ;;  %v2150_v11 = vld [vmem:[%s15654_s25 + $0x2bd0] sm:$0xff]  ;;  %v14511_v19 = vcombine.low %v2158_v41, %v2162_v63 }
 0x521   : > { %11407 = vmatprep.subr.bf16.mxu1 %v14536_v30  ;;  %v2154_v24 = vld [vmem:[%s15654_s25 + $0x2bf0] sm:$0xff] }
 0x522   : > { %11367 = vmatpush1.bf16.msra.mxu0 %v14407_v37  ;;  %v2278_v48 = vld [vmem:[%s15654_s25 + $0x2fd0] sm:$0xff]  ;;  %v14504_v27 = vcombine.high %v2150_v11, %v2154_v24  ;;  %v14503_v6 = vcombine.low %v2150_v11, %v2154_v24 }
 0x523   : > { %11368 = vmatprep.subr.bf16.mxu0 %v14400_v42  ;;  %v2282_v15 = vld [vmem:[%s15654_s25 + $0x2ff0] sm:$0xff] }
 0x524   : > { %11408 = vmatpush1.bf16.msra.mxu1 %v14535_v38  ;;  %v14632_v21 = vcombine.high %v2278_v48, %v2282_v15  ;;  %v2142_v25 = vld [vmem:[%s15654_s25 + $0x2b90] sm:$0xff]  ;;  %v14631_v55 = vcombine.low %v2278_v48, %v2282_v15 }
 0x525   : > { %11409 = vmatprep.subr.bf16.mxu1 %v14528_v34  ;;  %v2146_v62 = vld [vmem:[%s15654_s25 + $0x2bb0] sm:$0xff] }
 0x526   : > { %11369 = vmatpush1.bf16.msra.mxu0 %v14399_v39  ;;  %v2270_v30 = vld [vmem:[%s15654_s25 + $0x2f90] sm:$0xff]  ;;  %v14496_v8 = vcombine.high %v2142_v25, %v2146_v62  ;;  %v14495_v57 = vcombine.low %v2142_v25, %v2146_v62 }
 0x527   : > { %11370 = vmatprep.subr.bf16.mxu0 %v14392_v14  ;;  %v2274_v31 = vld [vmem:[%s15654_s25 + $0x2fb0] sm:$0xff] }
 0x528   : > { %11410 = vmatpush1.bf16.msra.mxu1 %v14527_v9  ;;  %v14624_v37 = vcombine.high %v2270_v30, %v2274_v31  ;;  %v2134_v38 = vld [vmem:[%s15654_s25 + $0x2b50] sm:$0xff]  ;;  %v14623_v0 = vcombine.low %v2270_v30, %v2274_v31 }
 0x529   : > { %11411 = vmatprep.subr.bf16.mxu1 %v14520_v23  ;;  %v2138_v42 = vld [vmem:[%s15654_s25 + $0x2b70] sm:$0xff] }
 0x52a   : > { %11371 = vmatpush1.bf16.msra.mxu0 %v14391_v13  ;;  %v2262_v34 = vld [vmem:[%s15654_s25 + $0x2f50] sm:$0xff]  ;;  %v14488_v61 = vcombine.high %v2134_v38, %v2138_v42  ;;  %v14487_v26 = vcombine.low %v2134_v38, %v2138_v42 }
 0x52b   : > { %11372 = vmatprep.subr.bf16.mxu0 %v14384_v60  ;;  %v2266_v1 = vld [vmem:[%s15654_s25 + $0x2f70] sm:$0xff] }
 0x52c   : > { %11412 = vmatpush1.bf16.msra.mxu1 %v14519_v56  ;;  %v14616_v39 = vcombine.high %v2262_v34, %v2266_v1  ;;  %v2126_v9 = vld [vmem:[%s15654_s25 + $0x2b10] sm:$0xff]  ;;  %v14615_v41 = vcombine.low %v2262_v34, %v2266_v1 }
 0x52d   : > { %11413 = vmatprep.subr.bf16.mxu1 %v14512_v7  ;;  %v2130_v14 = vld [vmem:[%s15654_s25 + $0x2b30] sm:$0xff] }
 0x52e   : > { %11373 = vmatpush1.bf16.msra.mxu0 %v14383_v22  ;;  %v2254_v23 = vld [vmem:[%s15654_s25 + $0x2f10] sm:$0xff]  ;;  %v14480_v63 = vcombine.high %v2126_v9, %v2130_v14  ;;  %v14479_v24 = vcombine.low %v2126_v9, %v2130_v14 }
 0x52f   : > { %11374 = vmatprep.subr.bf16.mxu0 %v14504_v27  ;;  %v2258_v16 = vld [vmem:[%s15654_s25 + $0x2f30] sm:$0xff] }
 0x530   : > { %11414 = vmatpush1.bf16.msra.mxu1 %v14511_v19  ;;  %v14608_v13 = vcombine.high %v2254_v23, %v2258_v16  ;;  %v2118_v56 = vld [vmem:[%s15654_s25 + $0x2ad0] sm:$0xff]  ;;  %v14607_v48 = vcombine.low %v2254_v23, %v2258_v16 }
 0x531   : > { %11415 = vmatprep.subr.bf16.mxu1 %v14632_v21  ;;  %v2122_v60 = vld [vmem:[%s15654_s25 + $0x2af0] sm:$0xff] }
 0x532   : > { %11375 = vmatpush2.bf16.msra.mxu0 %v14503_v6  ;;  %v2246_v7 = vld [vmem:[%s15654_s25 + $0x2ed0] sm:$0xff]  ;;  %v14472_v15 = vcombine.high %v2118_v56, %v2122_v60  ;;  %v14471_v62 = vcombine.low %v2118_v56, %v2122_v60  ;;  %v939_v56 = vld [vmem:[%s15654_s25 + $0x5f8] sm:$0xff] }
 0x533   : > { %11376 = vmatprep.subr.bf16.mxu0 %v14496_v8  ;;  %v2250_v11 = vld [vmem:[%s15654_s25 + $0x2ef0] sm:$0xff] }
 0x534   : > { %11416 = vmatpush2.bf16.msra.mxu1 %v14631_v55  ;;  %v14600_v22 = vcombine.high %v2246_v7, %v2250_v11  ;;  %v2110_v19 = vld [vmem:[%s15654_s25 + $0x2a90] sm:$0xff]  ;;  %v14599_v30 = vcombine.low %v2246_v7, %v2250_v11 }
 0x535   : > { %11417 = vmatprep.subr.bf16.mxu1 %v14624_v37  ;;  %v2114_v27 = vld [vmem:[%s15654_s25 + $0x2ab0] sm:$0xff] }
 0x536   : > { %11377 = vmatpush2.bf16.msra.mxu0 %v14495_v57  ;;  %v2238_v21 = vld [vmem:[%s15654_s25 + $0x2e90] sm:$0xff]  ;;  %v14464_v31 = vcombine.high %v2110_v19, %v2114_v27  ;;  %v14463_v42 = vcombine.low %v2110_v19, %v2114_v27  ;;  %v931_v19 = vld [vmem:[%s15654_s25 + $0x5b8] sm:$0xff] }
 0x537   : > { %11378 = vmatprep.subr.bf16.mxu0 %v14488_v61  ;;  %v2242_v25 = vld [vmem:[%s15654_s25 + $0x2eb0] sm:$0xff] }
 0x538   : > { %11418 = vmatpush2.bf16.msra.mxu1 %v14623_v0  ;;  %v14592_v6 = vcombine.high %v2238_v21, %v2242_v25  ;;  %v2102_v55 = vld [vmem:[%s15654_s25 + $0x2a50] sm:$0xff]  ;;  %v14591_v34 = vcombine.low %v2238_v21, %v2242_v25 }
 0x539   : > { %11419 = vmatprep.subr.bf16.mxu1 %v14616_v39  ;;  %v2106_v8 = vld [vmem:[%s15654_s25 + $0x2a70] sm:$0xff] }
 0x53a   : > { %11379 = vmatpush2.bf16.msra.mxu0 %v14487_v26  ;;  %v2230_v37 = vld [vmem:[%s15654_s25 + $0x2e50] sm:$0xff]  ;;  %v14456_v1 = vcombine.high %v2102_v55, %v2106_v8  ;;  %v14455_v14 = vcombine.low %v2102_v55, %v2106_v8  ;;  %v919_v55 = vld [vmem:[%s15654_s25 + $0x558] sm:$0xff] }
 0x53b   : > { %11380 = vmatprep.subr.bf16.mxu0 %v14480_v63  ;;  %v2234_v38 = vld [vmem:[%s15654_s25 + $0x2e70] sm:$0xff]  ;;  %v811_v63 = vld [vmem:[%s15654_s25 + $0x1f8] sm:$0xff] }
 0x53c   : > { %11420 = vmatpush2.bf16.msra.mxu1 %v14615_v41  ;;  %v14584_v57 = vcombine.high %v2230_v37, %v2234_v38  ;;  %v2094_v0 = vld [vmem:[%s15654_s25 + $0x2a10] sm:$0xff]  ;;  %v14583_v23 = vcombine.low %v2230_v37, %v2234_v38  ;;  %v807_v41 = vld [vmem:[%s15654_s25 + $0x1d8] sm:$0xff] }
 0x53d   : > { %11421 = vmatprep.subr.bf16.mxu1 %v14608_v13  ;;  %v2098_v61 = vld [vmem:[%s15654_s25 + $0x2a30] sm:$0xff]  ;;  %v935_v13 = vld [vmem:[%s15654_s25 + $0x5d8] sm:$0xff]  ;;  %v13162_v11 = vcombine.high %v807_v41, %v811_v63  ;;  %v13161_v27 = vcombine.low %v807_v41, %v811_v63 }
 0x53e   : > { %11381 = vmatpush2.bf16.msra.mxu0 %v14479_v24  ;;  %v2222_v39 = vld [vmem:[%s15654_s25 + $0x2e10] sm:$0xff]  ;;  %v14448_v16 = vcombine.high %v2094_v0, %v2098_v61  ;;  %v14447_v60 = vcombine.low %v2094_v0, %v2098_v61  ;;  %v13290_v24 = vcombine.high %v935_v13, %v939_v56  ;;  %v13289_v21 = vcombine.low %v935_v13, %v939_v56  ;;  %v923_v8 = vld [vmem:[%s15654_s25 + $0x578] sm:$0xff] }
 0x53f   : > { %11382 = vmatprep.subr.bf16.mxu0 %v14472_v15  ;;  %v2226_v9 = vld [vmem:[%s15654_s25 + $0x2e30] sm:$0xff]  ;;  %v803_v15 = vld [vmem:[%s15654_s25 + $0x1b8] sm:$0xff]  ;;  %v13273_v56 = vcombine.low %v919_v55, %v923_v8 }
 0x540   : > { %11422 = vmatpush2.bf16.msra.mxu1 %v14607_v48  ;;  %v14576_v26 = vcombine.high %v2222_v39, %v2226_v9  ;;  %v14575_v7 = vcombine.low %v2222_v39, %v2226_v9  ;;  %v799_v48 = vld [vmem:[%s15654_s25 + $0x198] sm:$0xff] }
 0x541   : > { %11423 = vmatprep.subr.bf16.mxu1 %v14600_v22  ;;  %v927_v22 = vld [vmem:[%s15654_s25 + $0x598] sm:$0xff]  ;;  %v13154_v25 = vcombine.high %v799_v48, %v803_v15 }
 0x542   : > { %11383 = vmatpush2.bf16.msra.mxu0 %v14471_v62  ;;  %v13282_v62 = vcombine.high %v927_v22, %v931_v19  ;;  %v783_v9 = vld [vmem:[%s15654_s25 + $0x118] sm:$0xff] }
 0x543   : > { %11384 = vmatprep.subr.bf16.mxu0 %v14464_v31  ;;  %v795_v31 = vld [vmem:[%s15654_s25 + $0x178] sm:$0xff] }
 0x544   : > { %11424 = vmatpush2.bf16.msra.mxu1 %v14599_v30  ;;  %v791_v30 = vld [vmem:[%s15654_s25 + $0x158] sm:$0xff] }
 0x545   : > { %11425 = vmatprep.subr.bf16.mxu1 %v14592_v6 }
 0x546   : > { %11385 = vmatpush2.bf16.msra.mxu0 %v14463_v42  ;;  %v13153_v42 = vcombine.low %v799_v48, %v803_v15  ;;  %v907_v48 = vld [vmem:[%s15654_s25 + $0x4f8] sm:$0xff] }
 0x547   : > { %11386 = vmatprep.subr.bf16.mxu0 %v14456_v1  ;;  %v13281_v1 = vcombine.low %v927_v22, %v931_v19 }
 0x548   : > { %11426 = vmatpush2.bf16.msra.mxu1 %v14591_v34 }
 0x549   : > { %11427 = vmatprep.subr.bf16.mxu1 %v14584_v57  ;;  %v13146_v57 = vcombine.high %v791_v30, %v795_v31 }
 0x54a   : > { %11387 = vmatpush2.bf16.msra.mxu0 %v14455_v14  ;;  %v787_v14 = vld [vmem:[%s15654_s25 + $0x138] sm:$0xff] }
 0x54b   : > { %11388 = vmatprep.subr.bf16.mxu0 %v14448_v16  ;;  %v911_v16 = vld [vmem:[%s15654_s25 + $0x518] sm:$0xff]  ;;  %v13137_v15 = vcombine.low %v783_v9, %v787_v14 }
 0x54c   : > { %11428 = vmatpush2.bf16.msra.mxu1 %v14583_v23 }
 0x54d   : > { %11429 = vmatprep.subr.bf16.mxu1 %v14576_v26  ;;  %v915_v26 = vld [vmem:[%s15654_s25 + $0x538] sm:$0xff] }
 0x54e   : > { %11389 = vmatpush2.bf16.msra.mxu0 %v14447_v60  ;;  %v13138_v60 = vcombine.high %v783_v9, %v787_v14  ;;  %v13265_v22 = vcombine.low %v911_v16, %v915_v26  ;;  %v755_v9 = vld [vmem:[%s15654_s25 + $0x38] sm:$0xff] }
 0x54f   : > { %11440 = vmatprep.subr.bf16.mxu0 %v13162_v11  ;;  %v775_v11 = vld [vmem:[%s15654_s25 + $0xd8] sm:$0xff] }
 0x550   : > { %11430 = vmatpush2.bf16.msra.mxu1 %v14575_v7  ;;  %v13266_v7 = vcombine.high %v911_v16, %v915_v26  ;;  %v879_v14 = vld [vmem:[%s15654_s25 + $0x418] sm:$0xff] }
 0x551   : > { %11481 = vmatprep.subr.bf16.mxu1 %v13290_v24  ;;  %v11146_v6 = vpop.f32.mrf.mxu0  ;;  %11391 = vmatmul.mubr.bf16.vlgmr.msra.gmra.mxu0 %v16241_v28  ;;  %v903_v24 = vld [vmem:[%s15654_s25 + $0x4d8] sm:$0xff] }
 0x552   : > { %v11147_v37 = vadd.f32 %v11146_v6, %v17075_v50  ;;  %11441 = vmatpush1.bf16.msra.mxu0 %v13161_v27  ;;  %v13274_v50 = vcombine.high %v919_v55, %v923_v8  ;;  %11472 = vmatprep.mubr.bf16.mxu0 %v15730_v12  ;;  %v13258_v27 = vcombine.high %v903_v24, %v907_v48 }
 0x553   : > { %v11187_v38 = vpop.f32.mrf.mxu1  ;;  %11432 = vmatmul.mubr.bf16.vlgmr.msra.gmra.mxu1 %v16247_v32  ;;  %v11148_v34 = vpop.f32.mrf.mxu0  ;;  %11442 = vmatprep.subr.bf16.mxu0 %v13154_v25  ;;  %v771_v25 = vld [vmem:[%s15654_s25 + $0xb8] sm:$0xff]  ;;  %v13257_v6 = vcombine.low %v903_v24, %v907_v48 }
 0x554   : > { %11482 = vmatpush1.bf16.msra.mxu1 %v13289_v21  ;;  %v17149_v0 = vadd.f32 %v11187_v38, %v11147_v37  ;;  %v11149_v61 = vadd.f32 %v11148_v34, %v17084_v44  ;;  %11513 = vmatprep.mubr.bf16.mxu1 %v15737_v17  ;;  %v13145_v44 = vcombine.low %v791_v30, %v795_v31  ;;  %v779_v17 = vld [vmem:[%s15654_s25 + $0xf8] sm:$0xff] }
 0x555   : > { %v11189_v39 = vpop.f32.mrf.mxu1  ;;  %11483 = vmatprep.subr.bf16.mxu1 %v13282_v62  ;;  %v11150_v23 = vpop.f32.mrf.mxu0  ;;  %v13130_v19 = vcombine.high %v775_v11, %v779_v17  ;;  %v767_v21 = vld [vmem:[%s15654_s25 + $0x98] sm:$0xff]  ;;  %v13129_v31 = vcombine.low %v775_v11, %v779_v17 }
 0x556   : > { %v17158_v41 = vadd.f32 %v11189_v39, %v11149_v61  ;;  %11443 = vmatpush1.bf16.msra.mxu0 %v13153_v42  ;;  %v895_v62 = vld [vmem:[%s15654_s25 + $0x498] sm:$0xff]  ;;  %v13122_v55 = vcombine.high %v767_v21, %v771_v25 }
 0x557   : > { %v11191_v63 = vpop.f32.mrf.mxu1  ;;  %v11151_v13 = vpop.f32.mrf.mxu0  ;;  %11444 = vmatprep.subr.bf16.mxu0 %v13146_v57  ;;  %v899_v30 = vld [vmem:[%s15654_s25 + $0x4b8] sm:$0xff] }
 0x558   : > { %11484 = vmatpush1.bf16.msra.mxu1 %v13281_v1  ;;  %v13250_v8 = vcombine.high %v895_v62, %v899_v30  ;;  %v759_v37 = vld [vmem:[%s15654_s25 + $0x58] sm:$0xff]  ;;  %v13121_v1 = vcombine.low %v767_v21, %v771_v25  ;;  %v13249_v57 = vcombine.low %v895_v62, %v899_v30 }
 0x559   : > { %v11192_v12 = vpop.f32.mrf.mxu1  ;;  %11485 = vmatprep.subr.bf16.mxu1 %v13274_v50  ;;  %v763_v38 = vld [vmem:[%s15654_s25 + $0x78] sm:$0xff] }
 0x55a   : > { %11445 = vmatpush1.bf16.msra.mxu0 %v13145_v44  ;;  %v887_v42 = vld [vmem:[%s15654_s25 + $0x458] sm:$0xff]  ;;  %v13114_v61 = vcombine.high %v759_v37, %v763_v38  ;;  %v13113_v16 = vcombine.low %v759_v37, %v763_v38 }
 0x55b   : > { %11446 = vmatprep.subr.bf16.mxu0 %v13138_v60  ;;  %v891_v34 = vld [vmem:[%s15654_s25 + $0x478] sm:$0xff] }
 0x55c   : > { %11486 = vmatpush1.bf16.msra.mxu1 %v13273_v56  ;;  %v13242_v39 = vcombine.high %v887_v42, %v891_v34  ;;  %v751_v50 = vld [vmem:[%s15654_s25 + $0x18] sm:$0xff]  ;;  %v13241_v26 = vcombine.low %v887_v42, %v891_v34 }
 0x55d   : > { %11487 = vmatprep.subr.bf16.mxu1 %v13266_v7  ;;  %v883_v23 = vld [vmem:[%s15654_s25 + $0x438] sm:$0xff]  ;;  %v13106_v63 = vcombine.high %v751_v50, %v755_v9  ;;  %v13105_v7 = vcombine.low %v751_v50, %v755_v9 }
 0x55e   : > { %11447 = vmatpush1.bf16.msra.mxu0 %v13137_v15  ;;  %v13234_v44 = vcombine.high %v879_v14, %v883_v23  ;;  %v871_v13 = vld [vmem:[%s15654_s25 + $0x3d8] sm:$0xff]  ;;  %v13233_v11 = vcombine.low %v879_v14, %v883_v23 }
 0x55f   : > { %11448 = vmatprep.subr.bf16.mxu0 %v13130_v19  ;;  %v875_v56 = vld [vmem:[%s15654_s25 + $0x3f8] sm:$0xff] }
 0x560   : > { %11488 = vmatpush1.bf16.msra.mxu1 %v13265_v22  ;;  %v999_v60 = vld [vmem:[%s15654_s25 + $0x7d8] sm:$0xff]  ;;  %v13226_v17 = vcombine.high %v871_v13, %v875_v56 }
 0x561   : > { %11489 = vmatprep.subr.bf16.mxu1 %v13258_v27  ;;  %v1003_v12 = vld [vmem:[%s15654_s25 + $0x7f8] sm:$0xff]  ;;  %v13225_v27 = vcombine.low %v871_v13, %v875_v56 }
 0x562   : > { %11449 = vmatpush1.bf16.msra.mxu0 %v13129_v31  ;;  %v13354_v24 = vcombine.high %v999_v60, %v1003_v12  ;;  %v863_v48 = vld [vmem:[%s15654_s25 + $0x398] sm:$0xff]  ;;  %v13353_v21 = vcombine.low %v999_v60, %v1003_v12 }
 0x563   : > { %11450 = vmatprep.subr.bf16.mxu0 %v13122_v55  ;;  %v867_v15 = vld [vmem:[%s15654_s25 + $0x3b8] sm:$0xff] }
 0x564   : > { %11490 = vmatpush1.bf16.msra.mxu1 %v13257_v6  ;;  %v991_v22 = vld [vmem:[%s15654_s25 + $0x798] sm:$0xff]  ;;  %v13218_v25 = vcombine.high %v863_v48, %v867_v15 }
 0x565   : > { %11491 = vmatprep.subr.bf16.mxu1 %v13250_v8  ;;  %v995_v19 = vld [vmem:[%s15654_s25 + $0x7b8] sm:$0xff]  ;;  %v13217_v8 = vcombine.low %v863_v48, %v867_v15 }
 0x566   : > { %11451 = vmatpush1.bf16.msra.mxu0 %v13121_v1  ;;  %v13346_v62 = vcombine.high %v991_v22, %v995_v19  ;;  %v855_v30 = vld [vmem:[%s15654_s25 + $0x358] sm:$0xff]  ;;  %v13345_v37 = vcombine.low %v991_v22, %v995_v19 }
 0x567   : > { %11452 = vmatprep.subr.bf16.mxu0 %v13114_v61  ;;  %v859_v31 = vld [vmem:[%s15654_s25 + $0x378] sm:$0xff] }
 0x568   : > { %11492 = vmatpush1.bf16.msra.mxu1 %v13249_v57  ;;  %v983_v6 = vld [vmem:[%s15654_s25 + $0x758] sm:$0xff]  ;;  %v13210_v38 = vcombine.high %v855_v30, %v859_v31 }
 0x569   : > { %11493 = vmatprep.subr.bf16.mxu1 %v13242_v39  ;;  %v987_v55 = vld [vmem:[%s15654_s25 + $0x778] sm:$0xff]  ;;  %v13209_v39 = vcombine.low %v855_v30, %v859_v31 }
 0x56a   : > { %11453 = vmatpush1.bf16.msra.mxu0 %v13113_v16  ;;  %v13338_v42 = vcombine.high %v983_v6, %v987_v55  ;;  %v847_v34 = vld [vmem:[%s15654_s25 + $0x318] sm:$0xff]  ;;  %v13337_v50 = vcombine.low %v983_v6, %v987_v55 }
 0x56b   : > { %11454 = vmatprep.subr.bf16.mxu0 %v13106_v63  ;;  %v851_v1 = vld [vmem:[%s15654_s25 + $0x338] sm:$0xff] }
 0x56c   : > { %11494 = vmatpush1.bf16.msra.mxu1 %v13241_v26  ;;  %v975_v57 = vld [vmem:[%s15654_s25 + $0x718] sm:$0xff]  ;;  %v13202_v9 = vcombine.high %v847_v34, %v851_v1 }
 0x56d   : > { %11495 = vmatprep.subr.bf16.mxu1 %v13234_v44  ;;  %v979_v61 = vld [vmem:[%s15654_s25 + $0x738] sm:$0xff]  ;;  %v13201_v44 = vcombine.low %v847_v34, %v851_v1 }
 0x56e   : > { %11455 = vmatpush1.bf16.msra.mxu0 %v13105_v7  ;;  %v13330_v14 = vcombine.high %v975_v57, %v979_v61  ;;  %v839_v23 = vld [vmem:[%s15654_s25 + $0x2d8] sm:$0xff]  ;;  %v13329_v13 = vcombine.low %v975_v57, %v979_v61 }
 0x56f   : > { %11456 = vmatprep.subr.bf16.mxu0 %v13226_v17  ;;  %v843_v16 = vld [vmem:[%s15654_s25 + $0x2f8] sm:$0xff] }
 0x570   : > { %11496 = vmatpush1.bf16.msra.mxu1 %v13233_v11  ;;  %v967_v26 = vld [vmem:[%s15654_s25 + $0x6d8] sm:$0xff]  ;;  %v13194_v56 = vcombine.high %v839_v23, %v843_v16 }
 0x571   : > { %11497 = vmatprep.subr.bf16.mxu1 %v13354_v24  ;;  %v971_v63 = vld [vmem:[%s15654_s25 + $0x6f8] sm:$0xff]  ;;  %v13193_v24 = vcombine.low %v839_v23, %v843_v16 }
 0x572   : > { %11457 = vmatpush2.bf16.msra.mxu0 %v13225_v27  ;;  %v13322_v60 = vcombine.high %v967_v26, %v971_v63  ;;  %v831_v12 = vld [vmem:[%s15654_s25 + $0x298] sm:$0xff]  ;;  %v13321_v48 = vcombine.low %v967_v26, %v971_v63 }
 0x573   : > { %11458 = vmatprep.subr.bf16.mxu0 %v13218_v25  ;;  %v835_v7 = vld [vmem:[%s15654_s25 + $0x2b8] sm:$0xff] }
 0x574   : > { %11498 = vmatpush2.bf16.msra.mxu1 %v13353_v21  ;;  %v959_v11 = vld [vmem:[%s15654_s25 + $0x698] sm:$0xff]  ;;  %v13186_v15 = vcombine.high %v831_v12, %v835_v7 }
 0x575   : > { %11499 = vmatprep.subr.bf16.mxu1 %v13346_v62  ;;  %v963_v17 = vld [vmem:[%s15654_s25 + $0x6b8] sm:$0xff]  ;;  %v13185_v62 = vcombine.low %v831_v12, %v835_v7 }
 0x576   : > { %11459 = vmatpush2.bf16.msra.mxu0 %v13217_v8  ;;  %v13314_v22 = vcombine.high %v959_v11, %v963_v17  ;;  %v823_v19 = vld [vmem:[%s15654_s25 + $0x258] sm:$0xff]  ;;  %v13313_v30 = vcombine.low %v959_v11, %v963_v17 }
 0x577   : > { %11460 = vmatprep.subr.bf16.mxu0 %v13210_v38  ;;  %v827_v27 = vld [vmem:[%s15654_s25 + $0x278] sm:$0xff] }
 0x578   : > { %11500 = vmatpush2.bf16.msra.mxu1 %v13345_v37  ;;  %v951_v21 = vld [vmem:[%s15654_s25 + $0x658] sm:$0xff]  ;;  %v13178_v31 = vcombine.high %v823_v19, %v827_v27 }
 0x579   : > { %11501 = vmatprep.subr.bf16.mxu1 %v13338_v42  ;;  %v955_v25 = vld [vmem:[%s15654_s25 + $0x678] sm:$0xff]  ;;  %v13177_v42 = vcombine.low %v823_v19, %v827_v27 }
 0x57a   : > { %11461 = vmatpush2.bf16.msra.mxu0 %v13209_v39  ;;  %v13306_v6 = vcombine.high %v951_v21, %v955_v25  ;;  %v815_v55 = vld [vmem:[%s15654_s25 + $0x218] sm:$0xff]  ;;  %v13305_v34 = vcombine.low %v951_v21, %v955_v25 }
 0x57b   : > { %11462 = vmatprep.subr.bf16.mxu0 %v13202_v9  ;;  %v819_v8 = vld [vmem:[%s15654_s25 + $0x238] sm:$0xff] }
 0x57c   : > { %11502 = vmatpush2.bf16.msra.mxu1 %v13337_v50  ;;  %v943_v37 = vld [vmem:[%s15654_s25 + $0x618] sm:$0xff]  ;;  %v13170_v1 = vcombine.high %v815_v55, %v819_v8 }
 0x57d   : > { %11503 = vmatprep.subr.bf16.mxu1 %v13330_v14  ;;  %v947_v38 = vld [vmem:[%s15654_s25 + $0x638] sm:$0xff]  ;;  %v13169_v14 = vcombine.low %v815_v55, %v819_v8 }
 0x57e   : > { %11463 = vmatpush2.bf16.msra.mxu0 %v13201_v44  ;;  %v13298_v57 = vcombine.high %v943_v37, %v947_v38  ;;  %v1063_v61 = vld [vmem:[%s15654_s25 + $0x9d8] sm:$0xff]  ;;  %v13297_v23 = vcombine.low %v943_v37, %v947_v38 }
 0x57f   : > { %11464 = vmatprep.subr.bf16.mxu0 %v13194_v56  ;;  %v1067_v39 = vld [vmem:[%s15654_s25 + $0x9f8] sm:$0xff] }
 0x580   : > { %11504 = vmatpush2.bf16.msra.mxu1 %v13329_v13  ;;  %v1191_v50 = vld [vmem:[%s15654_s25 + $0xdd8] sm:$0xff]  ;;  %v13418_v16 = vcombine.high %v1063_v61, %v1067_v39 }
 0x581   : > { %11505 = vmatprep.subr.bf16.mxu1 %v13322_v60  ;;  %v1195_v9 = vld [vmem:[%s15654_s25 + $0xdf8] sm:$0xff]  ;;  %v13417_v60 = vcombine.low %v1063_v61, %v1067_v39 }
 0x582   : > { %11465 = vmatpush2.bf16.msra.mxu0 %v13193_v24  ;;  %v13546_v26 = vcombine.high %v1191_v50, %v1195_v9  ;;  %v1055_v63 = vld [vmem:[%s15654_s25 + $0x998] sm:$0xff]  ;;  %v13545_v12 = vcombine.low %v1191_v50, %v1195_v9 }
 0x583   : > { %11466 = vmatprep.subr.bf16.mxu0 %v13186_v15  ;;  %v1059_v44 = vld [vmem:[%s15654_s25 + $0x9b8] sm:$0xff] }
 0x584   : > { %11506 = vmatpush2.bf16.msra.mxu1 %v13321_v48  ;;  %v1183_v13 = vld [vmem:[%s15654_s25 + $0xd98] sm:$0xff]  ;;  %v13410_v7 = vcombine.high %v1055_v63, %v1059_v44  ;;  %v13409_v21 = vcombine.low %v1055_v63, %v1059_v44 }
 0x585   : > { %11507 = vmatprep.subr.bf16.mxu1 %v13314_v22  ;;  %v1187_v56 = vld [vmem:[%s15654_s25 + $0xdb8] sm:$0xff] }
 0x586   : > { %11467 = vmatpush2.bf16.msra.mxu0 %v13185_v62  ;;  %v13538_v11 = vcombine.high %v1183_v13, %v1187_v56  ;;  %v1047_v17 = vld [vmem:[%s15654_s25 + $0x958] sm:$0xff]  ;;  %v13537_v62 = vcombine.low %v1183_v13, %v1187_v56 }
 0x587   : > { %11468 = vmatprep.subr.bf16.mxu0 %v13178_v31  ;;  %v1051_v24 = vld [vmem:[%s15654_s25 + $0x978] sm:$0xff] }
 0x588   : > { %11508 = vmatpush2.bf16.msra.mxu1 %v13313_v30  ;;  %v1175_v15 = vld [vmem:[%s15654_s25 + $0xd58] sm:$0xff]  ;;  %v13402_v30 = vcombine.high %v1047_v17, %v1051_v24 }
 0x589   : > { %11509 = vmatprep.subr.bf16.mxu1 %v13306_v6  ;;  %v1179_v22 = vld [vmem:[%s15654_s25 + $0xd78] sm:$0xff] }
 0x58a   : > { %11469 = vmatpush2.bf16.msra.mxu0 %v13177_v42  ;;  %v1039_v55 = vld [vmem:[%s15654_s25 + $0x918] sm:$0xff] }
 0x58b   : > { %11470 = vmatprep.subr.bf16.mxu0 %v13170_v1  ;;  %v1043_v8 = vld [vmem:[%s15654_s25 + $0x938] sm:$0xff] }
 0x58c   : > { %11510 = vmatpush2.bf16.msra.mxu1 %v13305_v34  ;;  %v1167_v37 = vld [vmem:[%s15654_s25 + $0xd18] sm:$0xff]  ;;  %v13394_v61 = vcombine.high %v1039_v55, %v1043_v8 }
 0x58d   : > { %11511 = vmatprep.subr.bf16.mxu1 %v13298_v57  ;;  %v1171_v38 = vld [vmem:[%s15654_s25 + $0xd38] sm:$0xff]  ;;  %v13529_v57 = vcombine.low %v1175_v15, %v1179_v22 }
 0x58e   : > { %11471 = vmatpush2.bf16.msra.mxu0 %v13169_v14  ;;  %v13522_v39 = vcombine.high %v1167_v37, %v1171_v38  ;;  %v1031_v50 = vld [vmem:[%s15654_s25 + $0x8d8] sm:$0xff] }
 0x58f   : > { %11522 = vmatprep.subr.bf16.mxu0 %v13418_v16  ;;  %v1159_v9 = vld [vmem:[%s15654_s25 + $0xcd8] sm:$0xff]  ;;  %v13521_v16 = vcombine.low %v1167_v37, %v1171_v38 }
 0x590   : > { %11512 = vmatpush2.bf16.msra.mxu1 %v13297_v23  ;;  %v1163_v14 = vld [vmem:[%s15654_s25 + $0xcf8] sm:$0xff]  ;;  %v13393_v23 = vcombine.low %v1039_v55, %v1043_v8 }
 0x591   : > { %11563 = vmatprep.subr.bf16.mxu1 %v13546_v26  ;;  %v11228_v48 = vpop.f32.mrf.mxu0  ;;  %11473 = vmatmul.mubr.bf16.vlgmr.msra.gmra.mxu0 %v15785_v36  ;;  %v13514_v63 = vcombine.high %v1159_v9, %v1163_v14  ;;  %v1023_v44 = vld [vmem:[%s15654_s25 + $0x898] sm:$0xff] }
 0x592   : > { %v11229_v19 = vadd.f32 %v11228_v48, %v17149_v0  ;;  %11523 = vmatpush1.bf16.msra.mxu0 %v13417_v60  ;;  %v13530_v0 = vcombine.high %v1175_v15, %v1179_v22  ;;  %11554 = vmatprep.mubr.bf16.mxu0 %v15797_v47  ;;  %v1027_v13 = vld [vmem:[%s15654_s25 + $0x8b8] sm:$0xff] }
 0x593   : > { %v11269_v27 = vpop.f32.mrf.mxu1  ;;  %11514 = vmatmul.mubr.bf16.vlgmr.msra.gmra.mxu1 %v15793_v40  ;;  %v11230_v25 = vpop.f32.mrf.mxu0  ;;  %11524 = vmatprep.subr.bf16.mxu0 %v13410_v7  ;;  %v1151_v56 = vld [vmem:[%s15654_s25 + $0xc98] sm:$0xff]  ;;  %v13513_v7 = vcombine.low %v1159_v9, %v1163_v14 }
 0x594   : > { %11564 = vmatpush1.bf16.msra.mxu1 %v13545_v12  ;;  %v17223_v31 = vadd.f32 %v11269_v27, %v11229_v19  ;;  %v11231_v36 = vadd.f32 %v11230_v25, %v17158_v41  ;;  %11595 = vmatprep.mubr.bf16.mxu1 %v15802_v49  ;;  %v13401_v41 = vcombine.low %v1047_v17, %v1051_v24  ;;  %v1035_v49 = vld [vmem:[%s15654_s25 + $0x8f8] sm:$0xff] }
 0x595   : > { %v11271_v6 = vpop.f32.mrf.mxu1  ;;  %11565 = vmatprep.subr.bf16.mxu1 %v13538_v11  ;;  %v11232_v40 = vpop.f32.mrf.mxu0  ;;  %v13386_v26 = vcombine.high %v1031_v50, %v1035_v49  ;;  %v1155_v60 = vld [vmem:[%s15654_s25 + $0xcb8] sm:$0xff]  ;;  %v13385_v12 = vcombine.low %v1031_v50, %v1035_v49  ;;  %v13378_v11 = vcombine.high %v1023_v44, %v1027_v13  ;;  %v13377_v19 = vcombine.low %v1023_v44, %v1027_v13 }
 0x596   : > { %v17232_v42 = vadd.f32 %v11271_v6, %v11231_v36  ;;  %11525 = vmatpush1.bf16.msra.mxu0 %v13409_v21  ;;  %v13506_v17 = vcombine.high %v1151_v56, %v1155_v60  ;;  %v1015_v24 = vld [vmem:[%s15654_s25 + $0x858] sm:$0xff]  ;;  %v13505_v27 = vcombine.low %v1151_v56, %v1155_v60 }
 0x597   : > { %v11273_v34 = vpop.f32.mrf.mxu1  ;;  %v11233_v1 = vpop.f32.mrf.mxu0  ;;  %11526 = vmatprep.subr.bf16.mxu0 %v13402_v30  ;;  %v1019_v48 = vld [vmem:[%s15654_s25 + $0x878] sm:$0xff] }
 0x598   : > { %11566 = vmatpush1.bf16.msra.mxu1 %v13537_v62  ;;  %v1143_v15 = vld [vmem:[%s15654_s25 + $0xc58] sm:$0xff]  ;;  %v13370_v21 = vcombine.high %v1015_v24, %v1019_v48 }
 0x599   : > { %v11274_v47 = vpop.f32.mrf.mxu1  ;;  %11567 = vmatprep.subr.bf16.mxu1 %v13530_v0  ;;  %v1147_v22 = vld [vmem:[%s15654_s25 + $0xc78] sm:$0xff]  ;;  %v13369_v0 = vcombine.low %v1015_v24, %v1019_v48 }
 0x59a   : > { %11527 = vmatpush1.bf16.msra.mxu0 %v13401_v41  ;;  %v13498_v25 = vcombine.high %v1143_v15, %v1147_v22  ;;  %v1007_v62 = vld [vmem:[%s15654_s25 + $0x818] sm:$0xff]  ;;  %v13497_v55 = vcombine.low %v1143_v15, %v1147_v22 }
 0x59b   : > { %11528 = vmatprep.subr.bf16.mxu0 %v13394_v61  ;;  %v1011_v30 = vld [vmem:[%s15654_s25 + $0x838] sm:$0xff] }
 0x59c   : > { %11568 = vmatpush1.bf16.msra.mxu1 %v13529_v57  ;;  %v1135_v36 = vld [vmem:[%s15654_s25 + $0xc18] sm:$0xff]  ;;  %v13362_v8 = vcombine.high %v1007_v62, %v1011_v30  ;;  %v13361_v1 = vcombine.low %v1007_v62, %v1011_v30 }
 0x59d   : > { %11569 = vmatprep.subr.bf16.mxu1 %v13522_v39  ;;  %v1139_v6 = vld [vmem:[%s15654_s25 + $0xc38] sm:$0xff] }
 0x59e   : > { %11529 = vmatpush1.bf16.msra.mxu0 %v13393_v23  ;;  %v13490_v40 = vcombine.high %v1135_v36, %v1139_v6  ;;  %v1127_v37 = vld [vmem:[%s15654_s25 + $0xbd8] sm:$0xff]  ;;  %v13489_v57 = vcombine.low %v1135_v36, %v1139_v6 }
 0x59f   : > { %11530 = vmatprep.subr.bf16.mxu0 %v13386_v26  ;;  %v1131_v38 = vld [vmem:[%s15654_s25 + $0xbf8] sm:$0xff] }
 0x5a0   : > { %11570 = vmatpush1.bf16.msra.mxu1 %v13521_v16  ;;  %v1255_v34 = vld [vmem:[%s15654_s25 + $0xfd8] sm:$0xff]  ;;  %v13482_v61 = vcombine.high %v1127_v37, %v1131_v38  ;;  %v13481_v14 = vcombine.low %v1127_v37, %v1131_v38 }
 0x5a1   : > { %11571 = vmatprep.subr.bf16.mxu1 %v13514_v63  ;;  %v1259_v41 = vld [vmem:[%s15654_s25 + $0xff8] sm:$0xff] }
 0x5a2   : > { %11531 = vmatpush1.bf16.msra.mxu0 %v13385_v12  ;;  %v13610_v47 = vcombine.high %v1255_v34, %v1259_v41  ;;  %v1119_v39 = vld [vmem:[%s15654_s25 + $0xb98] sm:$0xff]  ;;  %v13609_v23 = vcombine.low %v1255_v34, %v1259_v41 }
 0x5a3   : > { %11532 = vmatprep.subr.bf16.mxu0 %v13378_v11  ;;  %v1123_v50 = vld [vmem:[%s15654_s25 + $0xbb8] sm:$0xff] }
 0x5a4   : > { %11572 = vmatpush1.bf16.msra.mxu1 %v13513_v7  ;;  %v1247_v49 = vld [vmem:[%s15654_s25 + $0xf98] sm:$0xff]  ;;  %v13474_v16 = vcombine.high %v1119_v39, %v1123_v50  ;;  %v13473_v60 = vcombine.low %v1119_v39, %v1123_v50 }
 0x5a5   : > { %11573 = vmatprep.subr.bf16.mxu1 %v13506_v17  ;;  %v1251_v9 = vld [vmem:[%s15654_s25 + $0xfb8] sm:$0xff] }
 0x5a6   : > { %11533 = vmatpush1.bf16.msra.mxu0 %v13377_v19  ;;  %v13602_v26 = vcombine.high %v1247_v49, %v1251_v9  ;;  %v1111_v63 = vld [vmem:[%s15654_s25 + $0xb58] sm:$0xff]  ;;  %v13601_v12 = vcombine.low %v1247_v49, %v1251_v9 }
 0x5a7   : > { %11534 = vmatprep.subr.bf16.mxu0 %v13370_v21  ;;  %v1115_v44 = vld [vmem:[%s15654_s25 + $0xb78] sm:$0xff] }
 0x5a8   : > { %11574 = vmatpush1.bf16.msra.mxu1 %v13505_v27  ;;  %v1239_v13 = vld [vmem:[%s15654_s25 + $0xf58] sm:$0xff]  ;;  %v13466_v7 = vcombine.high %v1111_v63, %v1115_v44  ;;  %v13465_v22 = vcombine.low %v1111_v63, %v1115_v44 }
 0x5a9   : > { %11575 = vmatprep.subr.bf16.mxu1 %v13498_v25  ;;  %v1243_v56 = vld [vmem:[%s15654_s25 + $0xf78] sm:$0xff] }
 0x5aa   : > { %11535 = vmatpush1.bf16.msra.mxu0 %v13369_v0  ;;  %v13594_v11 = vcombine.high %v1239_v13, %v1243_v56  ;;  %v1103_v17 = vld [vmem:[%s15654_s25 + $0xb18] sm:$0xff]  ;;  %v13593_v19 = vcombine.low %v1239_v13, %v1243_v56 }
 0x5ab   : > { %11536 = vmatprep.subr.bf16.mxu0 %v13362_v8  ;;  %v1107_v24 = vld [vmem:[%s15654_s25 + $0xb38] sm:$0xff] }
 0x5ac   : > { %11576 = vmatpush1.bf16.msra.mxu1 %v13497_v55  ;;  %v1231_v48 = vld [vmem:[%s15654_s25 + $0xf18] sm:$0xff]  ;;  %v13458_v27 = vcombine.high %v1103_v17, %v1107_v24  ;;  %v13457_v6 = vcombine.low %v1103_v17, %v1107_v24 }
 0x5ad   : > { %11577 = vmatprep.subr.bf16.mxu1 %v13490_v40  ;;  %v1235_v15 = vld [vmem:[%s15654_s25 + $0xf38] sm:$0xff] }
 0x5ae   : > { %11537 = vmatpush1.bf16.msra.mxu0 %v13361_v1  ;;  %v13586_v21 = vcombine.high %v1231_v48, %v1235_v15  ;;  %v1095_v25 = vld [vmem:[%s15654_s25 + $0xad8] sm:$0xff]  ;;  %v13585_v0 = vcombine.low %v1231_v48, %v1235_v15 }
 0x5af   : > { %11538 = vmatprep.subr.bf16.mxu0 %v13482_v61  ;;  %v1099_v62 = vld [vmem:[%s15654_s25 + $0xaf8] sm:$0xff] }
 0x5b0   : > { %11578 = vmatpush1.bf16.msra.mxu1 %v13489_v57  ;;  %v1223_v30 = vld [vmem:[%s15654_s25 + $0xed8] sm:$0xff]  ;;  %v13450_v55 = vcombine.high %v1095_v25, %v1099_v62  ;;  %v13449_v41 = vcombine.low %v1095_v25, %v1099_v62 }
 0x5b1   : > { %11579 = vmatprep.subr.bf16.mxu1 %v13610_v47  ;;  %v1227_v36 = vld [vmem:[%s15654_s25 + $0xef8] sm:$0xff] }
 0x5b2   : > { %11539 = vmatpush2.bf16.msra.mxu0 %v13481_v14  ;;  %v13578_v8 = vcombine.high %v1223_v30, %v1227_v36  ;;  %v1087_v40 = vld [vmem:[%s15654_s25 + $0xa98] sm:$0xff]  ;;  %v13577_v1 = vcombine.low %v1223_v30, %v1227_v36 }
 0x5b3   : > { %11540 = vmatprep.subr.bf16.mxu0 %v13474_v16  ;;  %v1091_v37 = vld [vmem:[%s15654_s25 + $0xab8] sm:$0xff] }
 0x5b4   : > { %11580 = vmatpush2.bf16.msra.mxu1 %v13609_v23  ;;  %v1215_v38 = vld [vmem:[%s15654_s25 + $0xe98] sm:$0xff]  ;;  %v13442_v57 = vcombine.high %v1087_v40, %v1091_v37  ;;  %v13441_v9 = vcombine.low %v1087_v40, %v1091_v37 }
 0x5b5   : > { %11581 = vmatprep.subr.bf16.mxu1 %v13602_v26  ;;  %v1219_v34 = vld [vmem:[%s15654_s25 + $0xeb8] sm:$0xff] }
 0x5b6   : > { %11541 = vmatpush2.bf16.msra.mxu0 %v13473_v60  ;;  %v13570_v61 = vcombine.high %v1215_v38, %v1219_v34  ;;  %v1079_v47 = vld [vmem:[%s15654_s25 + $0xa58] sm:$0xff]  ;;  %v13569_v14 = vcombine.low %v1215_v38, %v1219_v34 }
 0x5b7   : > { %11542 = vmatprep.subr.bf16.mxu0 %v13466_v7  ;;  %v1083_v39 = vld [vmem:[%s15654_s25 + $0xa78] sm:$0xff] }
 0x5b8   : > { %11582 = vmatpush2.bf16.msra.mxu1 %v13601_v12  ;;  %v1207_v50 = vld [vmem:[%s15654_s25 + $0xe58] sm:$0xff]  ;;  %v13434_v23 = vcombine.high %v1079_v47, %v1083_v39  ;;  %v13433_v56 = vcombine.low %v1079_v47, %v1083_v39 }
 0x5b9   : > { %11583 = vmatprep.subr.bf16.mxu1 %v13594_v11  ;;  %v1211_v49 = vld [vmem:[%s15654_s25 + $0xe78] sm:$0xff] }
 0x5ba   : > { %11543 = vmatpush2.bf16.msra.mxu0 %v13465_v22  ;;  %v13562_v16 = vcombine.high %v1207_v50, %v1211_v49  ;;  %v1071_v26 = vld [vmem:[%s15654_s25 + $0xa18] sm:$0xff]  ;;  %v13561_v60 = vcombine.low %v1207_v50, %v1211_v49 }
 0x5bb   : > { %11544 = vmatprep.subr.bf16.mxu0 %v13458_v27  ;;  %v1075_v63 = vld [vmem:[%s15654_s25 + $0xa38] sm:$0xff] }
 0x5bc   : > { %11584 = vmatpush2.bf16.msra.mxu1 %v13593_v19  ;;  %v1199_v44 = vld [vmem:[%s15654_s25 + $0xe18] sm:$0xff]  ;;  %v13426_v12 = vcombine.high %v1071_v26, %v1075_v63  ;;  %v13425_v15 = vcombine.low %v1071_v26, %v1075_v63 }
 0x5bd   : > { %11585 = vmatprep.subr.bf16.mxu1 %v13586_v21  ;;  %v1203_v13 = vld [vmem:[%s15654_s25 + $0xe38] sm:$0xff] }
 0x5be   : > { %11545 = vmatpush2.bf16.msra.mxu0 %v13457_v6  ;;  %v13554_v7 = vcombine.high %v1199_v44, %v1203_v13  ;;  %v1319_v11 = vld [vmem:[%s15654_s25 + $0x11d8] sm:$0xff]  ;;  %v13553_v22 = vcombine.low %v1199_v44, %v1203_v13 }
 0x5bf   : > { %11546 = vmatprep.subr.bf16.mxu0 %v13450_v55  ;;  %v1323_v17 = vld [vmem:[%s15654_s25 + $0x11f8] sm:$0xff] }
 0x5c0   : > { %11586 = vmatpush2.bf16.msra.mxu1 %v13585_v0  ;;  %v1447_v24 = vld [vmem:[%s15654_s25 + $0x15d8] sm:$0xff]  ;;  %v13674_v19 = vcombine.high %v1319_v11, %v1323_v17  ;;  %v13673_v36 = vcombine.low %v1319_v11, %v1323_v17 }
 0x5c1   : > { %11587 = vmatprep.subr.bf16.mxu1 %v13578_v8  ;;  %v1451_v48 = vld [vmem:[%s15654_s25 + $0x15f8] sm:$0xff] }
 0x5c2   : > { %11547 = vmatpush2.bf16.msra.mxu0 %v13449_v41  ;;  %v13802_v27 = vcombine.high %v1447_v24, %v1451_v48  ;;  %v1311_v21 = vld [vmem:[%s15654_s25 + $0x1198] sm:$0xff]  ;;  %v13801_v6 = vcombine.low %v1447_v24, %v1451_v48 }
 0x5c3   : > { %11548 = vmatprep.subr.bf16.mxu0 %v13442_v57  ;;  %v1315_v25 = vld [vmem:[%s15654_s25 + $0x11b8] sm:$0xff] }
 0x5c4   : > { %11588 = vmatpush2.bf16.msra.mxu1 %v13577_v1  ;;  %v1439_v62 = vld [vmem:[%s15654_s25 + $0x1598] sm:$0xff]  ;;  %v13666_v0 = vcombine.high %v1311_v21, %v1315_v25  ;;  %v13665_v57 = vcombine.low %v1311_v21, %v1315_v25 }
 0x5c5   : > { %11589 = vmatprep.subr.bf16.mxu1 %v13570_v61  ;;  %v1443_v30 = vld [vmem:[%s15654_s25 + $0x15b8] sm:$0xff] }
 0x5c6   : > { %11549 = vmatpush2.bf16.msra.mxu0 %v13441_v9  ;;  %v13794_v55 = vcombine.high %v1439_v62, %v1443_v30  ;;  %v1303_v8 = vld [vmem:[%s15654_s25 + $0x1158] sm:$0xff]  ;;  %v13793_v47 = vcombine.low %v1439_v62, %v1443_v30 }
 0x5c7   : > { %11550 = vmatprep.subr.bf16.mxu0 %v13434_v23  ;;  %v1307_v40 = vld [vmem:[%s15654_s25 + $0x1178] sm:$0xff] }
 0x5c8   : > { %11590 = vmatpush2.bf16.msra.mxu1 %v13569_v14  ;;  %v1431_v38 = vld [vmem:[%s15654_s25 + $0x1558] sm:$0xff]  ;;  %v13658_v39 = vcombine.high %v1303_v8, %v1307_v40 }
 0x5c9   : > { %11591 = vmatprep.subr.bf16.mxu1 %v13562_v16  ;;  %v1435_v34 = vld [vmem:[%s15654_s25 + $0x1578] sm:$0xff] }
 0x5ca   : > { %11551 = vmatpush2.bf16.msra.mxu0 %v13433_v56  ;;  %v1295_v9 = vld [vmem:[%s15654_s25 + $0x1118] sm:$0xff]  ;;  %v13785_v13 = vcombine.low %v1431_v38, %v1435_v34 }
 0x5cb   : > { %11552 = vmatprep.subr.bf16.mxu0 %v13426_v12  ;;  %v1299_v14 = vld [vmem:[%s15654_s25 + $0x1138] sm:$0xff] }
 0x5cc   : > { %11592 = vmatpush2.bf16.msra.mxu1 %v13561_v60  ;;  %v1423_v23 = vld [vmem:[%s15654_s25 + $0x1518] sm:$0xff]  ;;  %v13650_v56 = vcombine.high %v1295_v9, %v1299_v14  ;;  %v13649_v17 = vcombine.low %v1295_v9, %v1299_v14 }
 0x5cd   : > { %11593 = vmatprep.subr.bf16.mxu1 %v13554_v7  ;;  %v1427_v16 = vld [vmem:[%s15654_s25 + $0x1538] sm:$0xff] }
 0x5ce   : > { %11553 = vmatpush2.bf16.msra.mxu0 %v13425_v15  ;;  %v13778_v60 = vcombine.high %v1423_v23, %v1427_v16  ;;  %v1287_v12 = vld [vmem:[%s15654_s25 + $0x10d8] sm:$0xff]  ;;  %v13777_v24 = vcombine.low %v1423_v23, %v1427_v16 }
 0x5cf   : > { %11604 = vmatprep.subr.bf16.mxu0 %v13674_v19  ;;  %v1415_v7 = vld [vmem:[%s15654_s25 + $0x14d8] sm:$0xff] }
 0x5d0   : > { %11594 = vmatpush2.bf16.msra.mxu1 %v13553_v22  ;;  %v1419_v11 = vld [vmem:[%s15654_s25 + $0x14f8] sm:$0xff] }
 0x5d1   : > { %11645 = vmatprep.subr.bf16.mxu1 %v13802_v27  ;;  %v11310_v37 = vpop.f32.mrf.mxu0  ;;  %11555 = vmatmul.mubr.bf16.vlgmr.msra.gmra.mxu0 %v15876_v5  ;;  %v13770_v15 = vcombine.high %v1415_v7, %v1419_v11  ;;  %v1279_v22 = vld [vmem:[%s15654_s25 + $0x1098] sm:$0xff]  ;;  %v13769_v62 = vcombine.low %v1415_v7, %v1419_v11 }
 0x5d2   : > { %v11311_v41 = vadd.f32 %v11310_v37, %v17223_v31  ;;  %11605 = vmatpush1.bf16.msra.mxu0 %v13673_v36  ;;  %v13786_v31 = vcombine.high %v1431_v38, %v1435_v34  ;;  %11636 = vmatprep.mubr.bf16.mxu0 %v15888_v18  ;;  %v1283_v19 = vld [vmem:[%s15654_s25 + $0x10b8] sm:$0xff] }
 0x5d3   : > { %v11351_v1 = vpop.f32.mrf.mxu1  ;;  %11596 = vmatmul.mubr.bf16.vlgmr.msra.gmra.mxu1 %v15884_v10  ;;  %v11312_v61 = vpop.f32.mrf.mxu0  ;;  %11606 = vmatprep.subr.bf16.mxu0 %v13666_v0  ;;  %v1407_v27 = vld [vmem:[%s15654_s25 + $0x1498] sm:$0xff]  ;;  %v13634_v30 = vcombine.high %v1279_v22, %v1283_v19 }
 0x5d4   : > { %11646 = vmatpush1.bf16.msra.mxu1 %v13801_v6  ;;  %v17297_v50 = vadd.f32 %v11351_v1, %v11311_v41  ;;  %v11313_v5 = vadd.f32 %v11312_v61, %v17232_v42  ;;  %11677 = vmatprep.mubr.bf16.mxu1 %v15893_v20  ;;  %v13657_v42 = vcombine.low %v1303_v8, %v1307_v40  ;;  %v1291_v20 = vld [vmem:[%s15654_s25 + $0x10f8] sm:$0xff] }
 0x5d5   : > { %v11353_v49 = vpop.f32.mrf.mxu1  ;;  %11647 = vmatprep.subr.bf16.mxu1 %v13794_v55  ;;  %v11314_v10 = vpop.f32.mrf.mxu0  ;;  %v13642_v48 = vcombine.high %v1287_v12, %v1291_v20  ;;  %v1411_v21 = vld [vmem:[%s15654_s25 + $0x14b8] sm:$0xff]  ;;  %v13641_v25 = vcombine.low %v1287_v12, %v1291_v20  ;;  %v13633_v40 = vcombine.low %v1279_v22, %v1283_v19 }
 0x5d6   : > { %v17306_v26 = vadd.f32 %v11353_v49, %v11313_v5  ;;  %11607 = vmatpush1.bf16.msra.mxu0 %v13665_v57  ;;  %v13762_v36 = vcombine.high %v1407_v27, %v1411_v21  ;;  %v1271_v6 = vld [vmem:[%s15654_s25 + $0x1058] sm:$0xff]  ;;  %v13761_v37 = vcombine.low %v1407_v27, %v1411_v21 }
 0x5d7   : > { %v11355_v63 = vpop.f32.mrf.mxu1  ;;  %v11315_v44 = vpop.f32.mrf.mxu0  ;;  %11608 = vmatprep.subr.bf16.mxu0 %v13658_v39  ;;  %v1275_v0 = vld [vmem:[%s15654_s25 + $0x1078] sm:$0xff] }
 0x5d8   : > { %11648 = vmatpush1.bf16.msra.mxu1 %v13793_v47  ;;  %v1399_v55 = vld [vmem:[%s15654_s25 + $0x1458] sm:$0xff]  ;;  %v13626_v38 = vcombine.high %v1271_v6, %v1275_v0  ;;  %v13625_v47 = vcombine.low %v1271_v6, %v1275_v0 }
 0x5d9   : > { %v11356_v18 = vpop.f32.mrf.mxu1  ;;  %11649 = vmatprep.subr.bf16.mxu1 %v13786_v31  ;;  %v1403_v8 = vld [vmem:[%s15654_s25 + $0x1478] sm:$0xff] }
 0x5da   : > { %11609 = vmatpush1.bf16.msra.mxu0 %v13657_v42  ;;  %v13754_v34 = vcombine.high %v1399_v55, %v1403_v8  ;;  %v1263_v41 = vld [vmem:[%s15654_s25 + $0x1018] sm:$0xff]  ;;  %v13753_v39 = vcombine.low %v1399_v55, %v1403_v8 }
 0x5db   : > { %11610 = vmatprep.subr.bf16.mxu0 %v13650_v56  ;;  %v1267_v1 = vld [vmem:[%s15654_s25 + $0x1038] sm:$0xff] }
 0x5dc   : > { %11650 = vmatpush1.bf16.msra.mxu1 %v13785_v13  ;;  %v1391_v57 = vld [vmem:[%s15654_s25 + $0x1418] sm:$0xff]  ;;  %v13618_v5 = vcombine.high %v1263_v41, %v1267_v1  ;;  %v13617_v23 = vcombine.low %v1263_v41, %v1267_v1 }
 0x5dd   : > { %11651 = vmatprep.subr.bf16.mxu1 %v13778_v60  ;;  %v1395_v61 = vld [vmem:[%s15654_s25 + $0x1438] sm:$0xff] }
 0x5de   : > { %11611 = vmatpush1.bf16.msra.mxu0 %v13649_v17  ;;  %v13746_v49 = vcombine.high %v1391_v57, %v1395_v61  ;;  %v1383_v31 = vld [vmem:[%s15654_s25 + $0x13d8] sm:$0xff]  ;;  %v13745_v16 = vcombine.low %v1391_v57, %v1395_v61 }
 0x5df   : > { %11612 = vmatprep.subr.bf16.mxu0 %v13642_v48  ;;  %v1387_v9 = vld [vmem:[%s15654_s25 + $0x13f8] sm:$0xff] }
 0x5e0   : > { %11652 = vmatpush1.bf16.msra.mxu1 %v13777_v24  ;;  %v1511_v14 = vld [vmem:[%s15654_s25 + $0x17d8] sm:$0xff]  ;;  %v13738_v63 = vcombine.high %v1383_v31, %v1387_v9  ;;  %v13737_v60 = vcombine.low %v1383_v31, %v1387_v9 }
 0x5e1   : > { %11653 = vmatprep.subr.bf16.mxu1 %v13770_v15  ;;  %v1515_v10 = vld [vmem:[%s15654_s25 + $0x17f8] sm:$0xff] }
 0x5e2   : > { %11613 = vmatpush1.bf16.msra.mxu0 %v13641_v25  ;;  %v13866_v42 = vcombine.high %v1511_v14, %v1515_v10  ;;  %v1375_v44 = vld [vmem:[%s15654_s25 + $0x1398] sm:$0xff]  ;;  %v13865_v12 = vcombine.low %v1511_v14, %v1515_v10 }
 0x5e3   : > { %11614 = vmatprep.subr.bf16.mxu0 %v13634_v30  ;;  %v1379_v13 = vld [vmem:[%s15654_s25 + $0x13b8] sm:$0xff] }
 0x5e4   : > { %11654 = vmatpush1.bf16.msra.mxu1 %v13769_v62  ;;  %v1503_v56 = vld [vmem:[%s15654_s25 + $0x1798] sm:$0xff]  ;;  %v13730_v20 = vcombine.high %v1375_v44, %v1379_v13  ;;  %v13729_v15 = vcombine.low %v1375_v44, %v1379_v13 }
 0x5e5   : > { %11655 = vmatprep.subr.bf16.mxu1 %v13762_v36  ;;  %v1507_v18 = vld [vmem:[%s15654_s25 + $0x17b8] sm:$0xff] }
 0x5e6   : > { %11615 = vmatpush1.bf16.msra.mxu0 %v13633_v40  ;;  %v13858_v7 = vcombine.high %v1503_v56, %v1507_v18  ;;  %v1367_v11 = vld [vmem:[%s15654_s25 + $0x1358] sm:$0xff]  ;;  %v13857_v22 = vcombine.low %v1503_v56, %v1507_v18 }
 0x5e7   : > { %11616 = vmatprep.subr.bf16.mxu0 %v13626_v38  ;;  %v1371_v17 = vld [vmem:[%s15654_s25 + $0x1378] sm:$0xff] }
 0x5e8   : > { %11656 = vmatpush1.bf16.msra.mxu1 %v13761_v37  ;;  %v1495_v24 = vld [vmem:[%s15654_s25 + $0x1758] sm:$0xff]  ;;  %v13722_v19 = vcombine.high %v1367_v11, %v1371_v17  ;;  %v13721_v36 = vcombine.low %v1367_v11, %v1371_v17 }
 0x5e9   : > { %11657 = vmatprep.subr.bf16.mxu1 %v13754_v34  ;;  %v1499_v48 = vld [vmem:[%s15654_s25 + $0x1778] sm:$0xff] }
 0x5ea   : > { %11617 = vmatpush1.bf16.msra.mxu0 %v13625_v47  ;;  %v13850_v27 = vcombine.high %v1495_v24, %v1499_v48  ;;  %v1359_v21 = vld [vmem:[%s15654_s25 + $0x1318] sm:$0xff]  ;;  %v13849_v6 = vcombine.low %v1495_v24, %v1499_v48 }
 0x5eb   : > { %11618 = vmatprep.subr.bf16.mxu0 %v13618_v5  ;;  %v1363_v25 = vld [vmem:[%s15654_s25 + $0x1338] sm:$0xff] }
 0x5ec   : > { %11658 = vmatpush1.bf16.msra.mxu1 %v13753_v39  ;;  %v1487_v62 = vld [vmem:[%s15654_s25 + $0x1718] sm:$0xff]  ;;  %v13714_v0 = vcombine.high %v1359_v21, %v1363_v25  ;;  %v13713_v34 = vcombine.low %v1359_v21, %v1363_v25 }
 0x5ed   : > { %11659 = vmatprep.subr.bf16.mxu1 %v13746_v49  ;;  %v1491_v30 = vld [vmem:[%s15654_s25 + $0x1738] sm:$0xff] }
 0x5ee   : > { %11619 = vmatpush1.bf16.msra.mxu0 %v13617_v23  ;;  %v13842_v55 = vcombine.high %v1487_v62, %v1491_v30  ;;  %v1351_v8 = vld [vmem:[%s15654_s25 + $0x12d8] sm:$0xff]  ;;  %v13841_v41 = vcombine.low %v1487_v62, %v1491_v30 }
 0x5ef   : > { %11620 = vmatprep.subr.bf16.mxu0 %v13738_v63  ;;  %v1355_v40 = vld [vmem:[%s15654_s25 + $0x12f8] sm:$0xff] }
 0x5f0   : > { %11660 = vmatpush1.bf16.msra.mxu1 %v13745_v16  ;;  %v1479_v37 = vld [vmem:[%s15654_s25 + $0x16d8] sm:$0xff]  ;;  %v13706_v1 = vcombine.high %v1351_v8, %v1355_v40  ;;  %v13705_v49 = vcombine.low %v1351_v8, %v1355_v40 }
 0x5f1   : > { %11661 = vmatprep.subr.bf16.mxu1 %v13866_v42  ;;  %v1483_v38 = vld [vmem:[%s15654_s25 + $0x16f8] sm:$0xff] }
 0x5f2   : > { %11621 = vmatpush2.bf16.msra.mxu0 %v13737_v60  ;;  %v13834_v57 = vcombine.high %v1479_v37, %v1483_v38  ;;  %v1343_v61 = vld [vmem:[%s15654_s25 + $0x1298] sm:$0xff]  ;;  %v13833_v31 = vcombine.low %v1479_v37, %v1483_v38 }
 0x5f3   : > { %11622 = vmatprep.subr.bf16.mxu0 %v13730_v20  ;;  %v1347_v47 = vld [vmem:[%s15654_s25 + $0x12b8] sm:$0xff] }
 0x5f4   : > { %11662 = vmatpush2.bf16.msra.mxu1 %v13865_v12  ;;  %v1471_v39 = vld [vmem:[%s15654_s25 + $0x1698] sm:$0xff]  ;;  %v13698_v9 = vcombine.high %v1343_v61, %v1347_v47  ;;  %v13697_v42 = vcombine.low %v1343_v61, %v1347_v47 }
 0x5f5   : > { %11663 = vmatprep.subr.bf16.mxu1 %v13858_v7  ;;  %v1475_v5 = vld [vmem:[%s15654_s25 + $0x16b8] sm:$0xff] }
 0x5f6   : > { %11623 = vmatpush2.bf16.msra.mxu0 %v13729_v15  ;;  %v13826_v14 = vcombine.high %v1471_v39, %v1475_v5  ;;  %v1335_v10 = vld [vmem:[%s15654_s25 + $0x1258] sm:$0xff]  ;;  %v13825_v44 = vcombine.low %v1471_v39, %v1475_v5 }
 0x5f7   : > { %11624 = vmatprep.subr.bf16.mxu0 %v13722_v19  ;;  %v1339_v23 = vld [vmem:[%s15654_s25 + $0x1278] sm:$0xff] }
 0x5f8   : > { %11664 = vmatpush2.bf16.msra.mxu1 %v13857_v22  ;;  %v1463_v16 = vld [vmem:[%s15654_s25 + $0x1658] sm:$0xff]  ;;  %v13690_v13 = vcombine.high %v1335_v10, %v1339_v23  ;;  %v13689_v7 = vcombine.low %v1335_v10, %v1339_v23 }
 0x5f9   : > { %11665 = vmatprep.subr.bf16.mxu1 %v13850_v27  ;;  %v1467_v63 = vld [vmem:[%s15654_s25 + $0x1678] sm:$0xff] }
 0x5fa   : > { %11625 = vmatpush2.bf16.msra.mxu0 %v13721_v36  ;;  %v13818_v56 = vcombine.high %v1463_v16, %v1467_v63  ;;  %v1327_v18 = vld [vmem:[%s15654_s25 + $0x1218] sm:$0xff]  ;;  %v13817_v11 = vcombine.low %v1463_v16, %v1467_v63 }
 0x5fb   : > { %11626 = vmatprep.subr.bf16.mxu0 %v13714_v0  ;;  %v1331_v60 = vld [vmem:[%s15654_s25 + $0x1238] sm:$0xff] }
 0x5fc   : > { %11666 = vmatpush2.bf16.msra.mxu1 %v13849_v6  ;;  %v1455_v12 = vld [vmem:[%s15654_s25 + $0x1618] sm:$0xff]  ;;  %v13682_v17 = vcombine.high %v1327_v18, %v1331_v60  ;;  %v13681_v27 = vcombine.low %v1327_v18, %v1331_v60 }
 0x5fd   : > { %11667 = vmatprep.subr.bf16.mxu1 %v13842_v55  ;;  %v1459_v20 = vld [vmem:[%s15654_s25 + $0x1638] sm:$0xff] }
 0x5fe   : > { %11627 = vmatpush2.bf16.msra.mxu0 %v13713_v34  ;;  %v13810_v24 = vcombine.high %v1455_v12, %v1459_v20  ;;  %v1575_v48 = vld [vmem:[%s15654_s25 + $0x19d8] sm:$0xff]  ;;  %v13809_v21 = vcombine.low %v1455_v12, %v1459_v20 }
 0x5ff   : > { %11628 = vmatprep.subr.bf16.mxu0 %v13706_v1  ;;  %v1579_v15 = vld [vmem:[%s15654_s25 + $0x19f8] sm:$0xff] }
 0x600   : > { %11668 = vmatpush2.bf16.msra.mxu1 %v13841_v41  ;;  %v1703_v22 = vld [vmem:[%s15654_s25 + $0x1dd8] sm:$0xff]  ;;  %v13930_v25 = vcombine.high %v1575_v48, %v1579_v15  ;;  %v13929_v55 = vcombine.low %v1575_v48, %v1579_v15 }
 0x601   : > { %11669 = vmatprep.subr.bf16.mxu1 %v13834_v57  ;;  %v1707_v19 = vld [vmem:[%s15654_s25 + $0x1df8] sm:$0xff] }
 0x602   : > { %11629 = vmatpush2.bf16.msra.mxu0 %v13705_v49  ;;  %v14058_v62 = vcombine.high %v1703_v22, %v1707_v19  ;;  %v1567_v30 = vld [vmem:[%s15654_s25 + $0x1998] sm:$0xff]  ;;  %v14057_v8 = vcombine.low %v1703_v22, %v1707_v19 }
 0x603   : > { %11630 = vmatprep.subr.bf16.mxu0 %v13698_v9  ;;  %v1571_v36 = vld [vmem:[%s15654_s25 + $0x19b8] sm:$0xff] }
 0x604   : > { %11670 = vmatpush2.bf16.msra.mxu1 %v13833_v31  ;;  %v1695_v6 = vld [vmem:[%s15654_s25 + $0x1d98] sm:$0xff]  ;;  %v13922_v40 = vcombine.high %v1567_v30, %v1571_v36  ;;  %v13921_v39 = vcombine.low %v1567_v30, %v1571_v36 }
 0x605   : > { %11671 = vmatprep.subr.bf16.mxu1 %v13826_v14  ;;  %v1699_v0 = vld [vmem:[%s15654_s25 + $0x1db8] sm:$0xff] }
 0x606   : > { %11631 = vmatpush2.bf16.msra.mxu0 %v13697_v42  ;;  %v14050_v37 = vcombine.high %v1695_v6, %v1699_v0  ;;  %v1559_v38 = vld [vmem:[%s15654_s25 + $0x1958] sm:$0xff]  ;;  %v14049_v49 = vcombine.low %v1695_v6, %v1699_v0 }
 0x607   : > { %11632 = vmatprep.subr.bf16.mxu0 %v13690_v13  ;;  %v1563_v34 = vld [vmem:[%s15654_s25 + $0x1978] sm:$0xff] }
 0x608   : > { %11672 = vmatpush2.bf16.msra.mxu1 %v13825_v44  ;;  %v1687_v1 = vld [vmem:[%s15654_s25 + $0x1d58] sm:$0xff]  ;;  %v13914_v31 = vcombine.high %v1559_v38, %v1563_v34 }
 0x609   : > { %11673 = vmatprep.subr.bf16.mxu1 %v13818_v56  ;;  %v1691_v57 = vld [vmem:[%s15654_s25 + $0x1d78] sm:$0xff] }
 0x60a   : > { %11633 = vmatpush2.bf16.msra.mxu0 %v13689_v7  ;;  %v1551_v10 = vld [vmem:[%s15654_s25 + $0x1918] sm:$0xff]  ;;  %v14041_v56 = vcombine.low %v1687_v1, %v1691_v57 }
 0x60b   : > { %11634 = vmatprep.subr.bf16.mxu0 %v13682_v17  ;;  %v1555_v23 = vld [vmem:[%s15654_s25 + $0x1938] sm:$0xff] }
 0x60c   : > { %11674 = vmatpush2.bf16.msra.mxu1 %v13817_v11  ;;  %v1679_v16 = vld [vmem:[%s15654_s25 + $0x1d18] sm:$0xff]  ;;  %v13906_v18 = vcombine.high %v1551_v10, %v1555_v23  ;;  %v13905_v17 = vcombine.low %v1551_v10, %v1555_v23 }
 0x60d   : > { %11675 = vmatprep.subr.bf16.mxu1 %v13810_v24  ;;  %v1683_v63 = vld [vmem:[%s15654_s25 + $0x1d38] sm:$0xff] }
 0x60e   : > { %11635 = vmatpush2.bf16.msra.mxu0 %v13681_v27  ;;  %v1543_v12 = vld [vmem:[%s15654_s25 + $0x18d8] sm:$0xff]  ;;  %v14033_v24 = vcombine.low %v1679_v16, %v1683_v63 }
 0x60f   : > { %11686 = vmatprep.subr.bf16.mxu0 %v13930_v25  ;;  %v1547_v20 = vld [vmem:[%s15654_s25 + $0x18f8] sm:$0xff] }
 0x610   : > { %11676 = vmatpush2.bf16.msra.mxu1 %v13809_v21  ;;  %v1671_v7 = vld [vmem:[%s15654_s25 + $0x1cd8] sm:$0xff]  ;;  %v13898_v48 = vcombine.high %v1543_v12, %v1547_v20  ;;  %v13897_v25 = vcombine.low %v1543_v12, %v1547_v20 }
 0x611   : > { %11727 = vmatprep.subr.bf16.mxu1 %v14058_v62  ;;  %v11392_v41 = vpop.f32.mrf.mxu0  ;;  %11637 = vmatmul.mubr.bf16.vlgmr.msra.gmra.mxu0 %v15967_v52  ;;  %v1675_v11 = vld [vmem:[%s15654_s25 + $0x1cf8] sm:$0xff] }
 0x612   : > { %v11393_v61 = vadd.f32 %v11392_v41, %v17297_v50  ;;  %11687 = vmatpush1.bf16.msra.mxu0 %v13929_v55  ;;  %v14042_v50 = vcombine.high %v1687_v1, %v1691_v57  ;;  %11718 = vmatprep.mubr.bf16.mxu0 %v15979_v2  ;;  %v14026_v15 = vcombine.high %v1671_v7, %v1675_v11  ;;  %v1535_v22 = vld [vmem:[%s15654_s25 + $0x1898] sm:$0xff] }
 0x613   : > { %v11433_v47 = vpop.f32.mrf.mxu1  ;;  %11678 = vmatmul.mubr.bf16.vlgmr.msra.gmra.mxu1 %v15975_v58  ;;  %v11394_v5 = vpop.f32.mrf.mxu0  ;;  %11688 = vmatprep.subr.bf16.mxu0 %v13922_v40  ;;  %v1539_v19 = vld [vmem:[%s15654_s25 + $0x18b8] sm:$0xff]  ;;  %v14025_v62 = vcombine.low %v1671_v7, %v1675_v11 }
 0x614   : > { %11728 = vmatpush1.bf16.msra.mxu1 %v14057_v8  ;;  %v17371_v9 = vadd.f32 %v11433_v47, %v11393_v61  ;;  %v11395_v52 = vadd.f32 %v11394_v5, %v17306_v26  ;;  %11759 = vmatprep.mubr.bf16.mxu1 %v15984_v4  ;;  %v13913_v26 = vcombine.low %v1559_v38, %v1563_v34  ;;  %v1663_v27 = vld [vmem:[%s15654_s25 + $0x1c98] sm:$0xff] }
 0x615   : > { %v11435_v14 = vpop.f32.mrf.mxu1  ;;  %11729 = vmatprep.subr.bf16.mxu1 %v14050_v37  ;;  %v11396_v58 = vpop.f32.mrf.mxu0  ;;  %v14034_v4 = vcombine.high %v1679_v16, %v1683_v63  ;;  %v1667_v21 = vld [vmem:[%s15654_s25 + $0x1cb8] sm:$0xff]  ;;  %v13890_v30 = vcombine.high %v1535_v22, %v1539_v19  ;;  %v13889_v40 = vcombine.low %v1535_v22, %v1539_v19 }
 0x616   : > { %v17380_v42 = vadd.f32 %v11435_v14, %v11395_v52  ;;  %11689 = vmatpush1.bf16.msra.mxu0 %v13921_v39  ;;  %v14018_v36 = vcombine.high %v1663_v27, %v1667_v21  ;;  %v1527_v6 = vld [vmem:[%s15654_s25 + $0x1858] sm:$0xff]  ;;  %v14017_v37 = vcombine.low %v1663_v27, %v1667_v21 }
 0x617   : > { %v11437_v44 = vpop.f32.mrf.mxu1  ;;  %v11397_v13 = vpop.f32.mrf.mxu0  ;;  %11690 = vmatprep.subr.bf16.mxu0 %v13914_v31  ;;  %v1531_v0 = vld [vmem:[%s15654_s25 + $0x1878] sm:$0xff] }
 0x618   : > { %11730 = vmatpush1.bf16.msra.mxu1 %v14049_v49  ;;  %v11957_v2 = vcombine.low %v17371_v9, %v17380_v42  ;;  %v1655_v55 = vld [vmem:[%s15654_s25 + $0x1c58] sm:$0xff]  ;;  %v13882_v38 = vcombine.high %v1527_v6, %v1531_v0  ;;  %v13881_v47 = vcombine.low %v1527_v6, %v1531_v0 }
 0x619   : > { %v11438_v60 = vpop.f32.mrf.mxu1  ;;  %11731 = vmatprep.subr.bf16.mxu1 %v14042_v50  ;;  %v1659_v8 = vld [vmem:[%s15654_s25 + $0x1c78] sm:$0xff] }
 0x61a   : > { %11691 = vmatpush1.bf16.msra.mxu0 %v13913_v26  ;;  %v14010_v34 = vcombine.high %v1655_v55, %v1659_v8  ;;  %v1519_v41 = vld [vmem:[%s15654_s25 + $0x1818] sm:$0xff]  ;;  %v14009_v39 = vcombine.low %v1655_v55, %v1659_v8 }
 0x61b   : > { %11692 = vmatprep.subr.bf16.mxu0 %v13906_v18  ;;  %v1523_v1 = vld [vmem:[%s15654_s25 + $0x1838] sm:$0xff] }
 0x61c   : > { %11732 = vmatpush1.bf16.msra.mxu1 %v14041_v56  ;;  %v1647_v57 = vld [vmem:[%s15654_s25 + $0x1c18] sm:$0xff]  ;;  %v13874_v5 = vcombine.high %v1519_v41, %v1523_v1  ;;  %v13873_v10 = vcombine.low %v1519_v41, %v1523_v1 }
 0x61d   : > { %11733 = vmatprep.subr.bf16.mxu1 %v14034_v4  ;;  %v1651_v61 = vld [vmem:[%s15654_s25 + $0x1c38] sm:$0xff] }
 0x61e   : > { %11693 = vmatpush1.bf16.msra.mxu0 %v13905_v17  ;;  %v14002_v49 = vcombine.high %v1647_v57, %v1651_v61  ;;  %v1639_v31 = vld [vmem:[%s15654_s25 + $0x1bd8] sm:$0xff]  ;;  %v14001_v23 = vcombine.low %v1647_v57, %v1651_v61 }
 0x61f   : > { %11694 = vmatprep.subr.bf16.mxu0 %v13898_v48  ;;  %v1643_v52 = vld [vmem:[%s15654_s25 + $0x1bf8] sm:$0xff] }
 0x620   : > { %11734 = vmatpush1.bf16.msra.mxu1 %v14033_v24  ;;  %v1767_v14 = vld [vmem:[%s15654_s25 + $0x1fd8] sm:$0xff]  ;;  %v13994_v58 = vcombine.high %v1639_v31, %v1643_v52  ;;  %v13993_v56 = vcombine.low %v1639_v31, %v1643_v52 }
 0x621   : > { %11735 = vmatprep.subr.bf16.mxu1 %v14026_v15  ;;  %v1771_v50 = vld [vmem:[%s15654_s25 + $0x1ff8] sm:$0xff] }
 0x622   : > { %11695 = vmatpush1.bf16.msra.mxu0 %v13897_v25  ;;  %v14122_v16 = vcombine.high %v1767_v14, %v1771_v50  ;;  %v1631_v63 = vld [vmem:[%s15654_s25 + $0x1b98] sm:$0xff]  ;;  %v14121_v18 = vcombine.low %v1767_v14, %v1771_v50 }
 0x623   : > { %11696 = vmatprep.subr.bf16.mxu0 %v13890_v30  ;;  %v1635_v44 = vld [vmem:[%s15654_s25 + $0x1bb8] sm:$0xff] }
 0x624   : > { %11736 = vmatpush1.bf16.msra.mxu1 %v14025_v62  ;;  %v1759_v26 = vld [vmem:[%s15654_s25 + $0x1f98] sm:$0xff]  ;;  %v13986_v60 = vcombine.high %v1631_v63, %v1635_v44  ;;  %v13985_v17 = vcombine.low %v1631_v63, %v1635_v44 }
 0x625   : > { %11737 = vmatprep.subr.bf16.mxu1 %v14018_v36  ;;  %v1763_v13 = vld [vmem:[%s15654_s25 + $0x1fb8] sm:$0xff] }
 0x626   : > { %11697 = vmatpush1.bf16.msra.mxu0 %v13889_v40  ;;  %v14114_v4 = vcombine.high %v1759_v26, %v1763_v13  ;;  %v1623_v12 = vld [vmem:[%s15654_s25 + $0x1b58] sm:$0xff]  ;;  %v14113_v24 = vcombine.low %v1759_v26, %v1763_v13 }
 0x627   : > { %11698 = vmatprep.subr.bf16.mxu0 %v13882_v38  ;;  %v1627_v20 = vld [vmem:[%s15654_s25 + $0x1b78] sm:$0xff] }
 0x628   : > { %11738 = vmatpush1.bf16.msra.mxu1 %v14017_v37  ;;  %v1751_v7 = vld [vmem:[%s15654_s25 + $0x1f58] sm:$0xff]  ;;  %v13978_v48 = vcombine.high %v1623_v12, %v1627_v20  ;;  %v13977_v25 = vcombine.low %v1623_v12, %v1627_v20 }
 0x629   : > { %11739 = vmatprep.subr.bf16.mxu1 %v14010_v34  ;;  %v1755_v11 = vld [vmem:[%s15654_s25 + $0x1f78] sm:$0xff] }
 0x62a   : > { %11699 = vmatpush1.bf16.msra.mxu0 %v13881_v47  ;;  %v14106_v15 = vcombine.high %v1751_v7, %v1755_v11  ;;  %v1615_v22 = vld [vmem:[%s15654_s25 + $0x1b18] sm:$0xff]  ;;  %v14105_v62 = vcombine.low %v1751_v7, %v1755_v11 }
 0x62b   : > { %11700 = vmatprep.subr.bf16.mxu0 %v13874_v5  ;;  %v1619_v19 = vld [vmem:[%s15654_s25 + $0x1b38] sm:$0xff] }
 0x62c   : > { %11740 = vmatpush1.bf16.msra.mxu1 %v14009_v39  ;;  %v1743_v27 = vld [vmem:[%s15654_s25 + $0x1f18] sm:$0xff]  ;;  %v13970_v30 = vcombine.high %v1615_v22, %v1619_v19  ;;  %v13969_v40 = vcombine.low %v1615_v22, %v1619_v19 }
 0x62d   : > { %11741 = vmatprep.subr.bf16.mxu1 %v14002_v49  ;;  %v1747_v21 = vld [vmem:[%s15654_s25 + $0x1f38] sm:$0xff] }
 0x62e   : > { %11701 = vmatpush1.bf16.msra.mxu0 %v13873_v10  ;;  %v14098_v36 = vcombine.high %v1743_v27, %v1747_v21  ;;  %v1607_v6 = vld [vmem:[%s15654_s25 + $0x1ad8] sm:$0xff]  ;;  %v14097_v37 = vcombine.low %v1743_v27, %v1747_v21 }
 0x62f   : > { %11702 = vmatprep.subr.bf16.mxu0 %v13994_v58  ;;  %v1611_v0 = vld [vmem:[%s15654_s25 + $0x1af8] sm:$0xff] }
 0x630   : > { %11742 = vmatpush1.bf16.msra.mxu1 %v14001_v23  ;;  %v1735_v55 = vld [vmem:[%s15654_s25 + $0x1ed8] sm:$0xff]  ;;  %v13962_v38 = vcombine.high %v1607_v6, %v1611_v0  ;;  %v13961_v47 = vcombine.low %v1607_v6, %v1611_v0 }
 0x631   : > { %11743 = vmatprep.subr.bf16.mxu1 %v14122_v16  ;;  %v1739_v8 = vld [vmem:[%s15654_s25 + $0x1ef8] sm:$0xff] }
 0x632   : > { %11703 = vmatpush2.bf16.msra.mxu0 %v13993_v56  ;;  %v14090_v34 = vcombine.high %v1735_v55, %v1739_v8  ;;  %v1599_v41 = vld [vmem:[%s15654_s25 + $0x1a98] sm:$0xff]  ;;  %v14089_v39 = vcombine.low %v1735_v55, %v1739_v8 }
 0x633   : > { %11704 = vmatprep.subr.bf16.mxu0 %v13986_v60  ;;  %v1603_v1 = vld [vmem:[%s15654_s25 + $0x1ab8] sm:$0xff] }
 0x634   : > { %11744 = vmatpush2.bf16.msra.mxu1 %v14121_v18  ;;  %v1727_v57 = vld [vmem:[%s15654_s25 + $0x1e98] sm:$0xff]  ;;  %v13954_v5 = vcombine.high %v1599_v41, %v1603_v1  ;;  %v13953_v10 = vcombine.low %v1599_v41, %v1603_v1 }
 0x635   : > { %11745 = vmatprep.subr.bf16.mxu1 %v14114_v4  ;;  %v1731_v61 = vld [vmem:[%s15654_s25 + $0x1eb8] sm:$0xff] }
 0x636   : > { %11705 = vmatpush2.bf16.msra.mxu0 %v13985_v17  ;;  %v14082_v49 = vcombine.high %v1727_v57, %v1731_v61  ;;  %v1591_v31 = vld [vmem:[%s15654_s25 + $0x1a58] sm:$0xff]  ;;  %v14081_v23 = vcombine.low %v1727_v57, %v1731_v61 }
 0x637   : > { %11706 = vmatprep.subr.bf16.mxu0 %v13978_v48  ;;  %v1595_v52 = vld [vmem:[%s15654_s25 + $0x1a78] sm:$0xff] }
 0x638   : > { %11746 = vmatpush2.bf16.msra.mxu1 %v14113_v24  ;;  %v1719_v14 = vld [vmem:[%s15654_s25 + $0x1e58] sm:$0xff]  ;;  %v13946_v58 = vcombine.high %v1591_v31, %v1595_v52  ;;  %v13945_v56 = vcombine.low %v1591_v31, %v1595_v52 }
 0x639   : > { %11747 = vmatprep.subr.bf16.mxu1 %v14106_v15  ;;  %v1723_v50 = vld [vmem:[%s15654_s25 + $0x1e78] sm:$0xff] }
 0x63a   : > { %11707 = vmatpush2.bf16.msra.mxu0 %v13977_v25  ;;  %v14074_v16 = vcombine.high %v1719_v14, %v1723_v50  ;;  %v1583_v63 = vld [vmem:[%s15654_s25 + $0x1a18] sm:$0xff]  ;;  %v14073_v18 = vcombine.low %v1719_v14, %v1723_v50 }
 0x63b   : > { %11708 = vmatprep.subr.bf16.mxu0 %v13970_v30  ;;  %v1587_v44 = vld [vmem:[%s15654_s25 + $0x1a38] sm:$0xff] }
 0x63c   : > { %11748 = vmatpush2.bf16.msra.mxu1 %v14105_v62  ;;  %v1711_v26 = vld [vmem:[%s15654_s25 + $0x1e18] sm:$0xff]  ;;  %v13938_v60 = vcombine.high %v1583_v63, %v1587_v44  ;;  %v13937_v17 = vcombine.low %v1583_v63, %v1587_v44 }
 0x63d   : > { %11749 = vmatprep.subr.bf16.mxu1 %v14098_v36  ;;  %v1715_v13 = vld [vmem:[%s15654_s25 + $0x1e38] sm:$0xff] }
 0x63e   : > { %11709 = vmatpush2.bf16.msra.mxu0 %v13969_v40  ;;  %v14066_v4 = vcombine.high %v1711_v26, %v1715_v13  ;;  %v1831_v12 = vld [vmem:[%s15654_s25 + $0x21d8] sm:$0xff]  ;;  %v14065_v24 = vcombine.low %v1711_v26, %v1715_v13 }
 0x63f   : > { %11710 = vmatprep.subr.bf16.mxu0 %v13962_v38  ;;  %v1835_v20 = vld [vmem:[%s15654_s25 + $0x21f8] sm:$0xff] }
 0x640   : > { %11750 = vmatpush2.bf16.msra.mxu1 %v14097_v37  ;;  %v1959_v7 = vld [vmem:[%s15654_s25 + $0x25d8] sm:$0xff]  ;;  %v14186_v48 = vcombine.high %v1831_v12, %v1835_v20  ;;  %v14185_v25 = vcombine.low %v1831_v12, %v1835_v20 }
 0x641   : > { %11751 = vmatprep.subr.bf16.mxu1 %v14090_v34  ;;  %v1963_v11 = vld [vmem:[%s15654_s25 + $0x25f8] sm:$0xff] }
 0x642   : > { %11711 = vmatpush2.bf16.msra.mxu0 %v13961_v47  ;;  %v14314_v15 = vcombine.high %v1959_v7, %v1963_v11  ;;  %v1823_v22 = vld [vmem:[%s15654_s25 + $0x2198] sm:$0xff]  ;;  %v14313_v62 = vcombine.low %v1959_v7, %v1963_v11 }
 0x643   : > { %11712 = vmatprep.subr.bf16.mxu0 %v13954_v5  ;;  %v1827_v19 = vld [vmem:[%s15654_s25 + $0x21b8] sm:$0xff] }
 0x644   : > { %11752 = vmatpush2.bf16.msra.mxu1 %v14089_v39  ;;  %v1951_v27 = vld [vmem:[%s15654_s25 + $0x2598] sm:$0xff]  ;;  %v14178_v30 = vcombine.high %v1823_v22, %v1827_v19  ;;  %v14177_v38 = vcombine.low %v1823_v22, %v1827_v19 }
 0x645   : > { %11753 = vmatprep.subr.bf16.mxu1 %v14082_v49  ;;  %v1955_v21 = vld [vmem:[%s15654_s25 + $0x25b8] sm:$0xff] }
 0x646   : > { %11713 = vmatpush2.bf16.msra.mxu0 %v13953_v10  ;;  %v14306_v36 = vcombine.high %v1951_v27, %v1955_v21  ;;  %v1815_v6 = vld [vmem:[%s15654_s25 + $0x2158] sm:$0xff]  ;;  %v14305_v1 = vcombine.low %v1951_v27, %v1955_v21 }
 0x647   : > { %11714 = vmatprep.subr.bf16.mxu0 %v13946_v58  ;;  %v1819_v0 = vld [vmem:[%s15654_s25 + $0x2178] sm:$0xff] }
 0x648   : > { %11754 = vmatpush2.bf16.msra.mxu1 %v14081_v23  ;;  %v1943_v8 = vld [vmem:[%s15654_s25 + $0x2558] sm:$0xff]  ;;  %v14170_v57 = vcombine.high %v1815_v6, %v1819_v0  ;;  %v14169_v14 = vcombine.low %v1815_v6, %v1819_v0 }
 0x649   : > { %11755 = vmatprep.subr.bf16.mxu1 %v14074_v16  ;;  %v1947_v40 = vld [vmem:[%s15654_s25 + $0x2578] sm:$0xff] }
 0x64a   : > { %11715 = vmatpush2.bf16.msra.mxu0 %v13945_v56  ;;  %v1807_v47 = vld [vmem:[%s15654_s25 + $0x2118] sm:$0xff]  ;;  %v14297_v10 = vcombine.low %v1943_v8, %v1947_v40 }
 0x64b   : > { %11716 = vmatprep.subr.bf16.mxu0 %v13938_v60  ;;  %v1811_v39 = vld [vmem:[%s15654_s25 + $0x2138] sm:$0xff] }
 0x64c   : > { %11756 = vmatpush2.bf16.msra.mxu1 %v14073_v18  ;;  %v1935_v49 = vld [vmem:[%s15654_s25 + $0x2518] sm:$0xff]  ;;  %v14162_v23 = vcombine.high %v1807_v47, %v1811_v39 }
 0x64d   : > { %11757 = vmatprep.subr.bf16.mxu1 %v14066_v4  ;;  %v1939_v31 = vld [vmem:[%s15654_s25 + $0x2538] sm:$0xff] }
 0x64e   : > { %11717 = vmatpush2.bf16.msra.mxu0 %v13937_v17  ;;  %v14290_v58 = vcombine.high %v1935_v49, %v1939_v31  ;;  %v1799_v16 = vld [vmem:[%s15654_s25 + $0x20d8] sm:$0xff]  ;;  %v14289_v13 = vcombine.low %v1935_v49, %v1939_v31 }
 0x64f   : > { %11768 = vmatprep.subr.bf16.mxu0 %v14186_v48  ;;  %v1803_v63 = vld [vmem:[%s15654_s25 + $0x20f8] sm:$0xff] }
 0x650   : > { %11758 = vmatpush2.bf16.msra.mxu1 %v14065_v24  ;;  %v1927_v44 = vld [vmem:[%s15654_s25 + $0x24d8] sm:$0xff]  ;;  %v14154_v56 = vcombine.high %v1799_v16, %v1803_v63  ;;  %v14153_v7 = vcombine.low %v1799_v16, %v1803_v63 }
 0x651   : > { %11809 = vmatprep.subr.bf16.mxu1 %v14314_v15  ;;  %v11474_v55 = vpop.f32.mrf.mxu0  ;;  %11719 = vmatmul.mubr.bf16.vlgmr.msra.gmra.mxu0 %v16058_v51  ;;  %v14298_v51 = vcombine.high %v1943_v8, %v1947_v40  ;;  %v1931_v26 = vld [vmem:[%s15654_s25 + $0x24f8] sm:$0xff] }
 0x652   : > { %11769 = vmatpush1.bf16.msra.mxu0 %v14185_v25  ;;  %11800 = vmatprep.mubr.bf16.mxu0 %v16070_v3  ;;  %v14282_v18 = vcombine.high %v1927_v44, %v1931_v26  ;;  %v1791_v60 = vld [vmem:[%s15654_s25 + $0x2098] sm:$0xff]  ;;  %v14281_v11 = vcombine.low %v1927_v44, %v1931_v26 }
 0x653   : > { %v11515_v37 = vpop.f32.mrf.mxu1  ;;  %11760 = vmatmul.mubr.bf16.vlgmr.msra.gmra.mxu1 %v16066_v59  ;;  %v11476_v41 = vpop.f32.mrf.mxu0  ;;  %11770 = vmatprep.subr.bf16.mxu0 %v14178_v30  ;;  %v1795_v4 = vld [vmem:[%s15654_s25 + $0x20b8] sm:$0xff] }
 0x654   : > { %v17446_v34 = vadd.f32 %v11515_v37, %v11474_v55  ;;  %11810 = vmatpush1.bf16.msra.mxu1 %v14313_v62  ;;  %11841 = vmatprep.mubr.bf16.mxu1 %v16075_v43  ;;  %v14161_v43 = vcombine.low %v1807_v47, %v1811_v39  ;;  %v1919_v12 = vld [vmem:[%s15654_s25 + $0x2498] sm:$0xff]  ;;  %v14146_v17 = vcombine.high %v1791_v60, %v1795_v4 }
 0x655   : > { %v11517_v61 = vpop.f32.mrf.mxu1  ;;  %11811 = vmatprep.subr.bf16.mxu1 %v14306_v36  ;;  %v11478_v59 = vpop.f32.mrf.mxu0  ;;  %v1923_v20 = vld [vmem:[%s15654_s25 + $0x24b8] sm:$0xff]  ;;  %v14145_v27 = vcombine.low %v1791_v60, %v1795_v4 }
 0x656   : > { %v17451_v5 = vadd.f32 %v11517_v61, %v11476_v41  ;;  %11771 = vmatpush1.bf16.msra.mxu0 %v14177_v38  ;;  %v14274_v24 = vcombine.high %v1919_v12, %v1923_v20  ;;  %v1783_v48 = vld [vmem:[%s15654_s25 + $0x2058] sm:$0xff]  ;;  %v14273_v21 = vcombine.low %v1919_v12, %v1923_v20 }
 0x657   : > { %v11519_v52 = vpop.f32.mrf.mxu1  ;;  %v11479_v50 = vpop.f32.mrf.mxu0  ;;  %11772 = vmatprep.subr.bf16.mxu0 %v14170_v57  ;;  %v1787_v15 = vld [vmem:[%s15654_s25 + $0x2078] sm:$0xff] }
 0x658   : > { %11812 = vmatpush1.bf16.msra.mxu1 %v14305_v1  ;;  %v1911_v22 = vld [vmem:[%s15654_s25 + $0x2458] sm:$0xff]  ;;  %v14138_v25 = vcombine.high %v1783_v48, %v1787_v15  ;;  %v14137_v55 = vcombine.low %v1783_v48, %v1787_v15 }
 0x659   : > { %v11520_v3 = vpop.f32.mrf.mxu1  ;;  %11813 = vmatprep.subr.bf16.mxu1 %v14298_v51  ;;  %v1915_v19 = vld [vmem:[%s15654_s25 + $0x2478] sm:$0xff] }
 0x65a   : > { %11773 = vmatpush1.bf16.msra.mxu0 %v14169_v14  ;;  %v14266_v62 = vcombine.high %v1911_v22, %v1915_v19  ;;  %v1775_v30 = vld [vmem:[%s15654_s25 + $0x2018] sm:$0xff]  ;;  %v14265_v8 = vcombine.low %v1911_v22, %v1915_v19 }
 0x65b   : > { %11774 = vmatprep.subr.bf16.mxu0 %v14162_v23  ;;  %v1779_v36 = vld [vmem:[%s15654_s25 + $0x2038] sm:$0xff] }
 0x65c   : > { %11814 = vmatpush1.bf16.msra.mxu1 %v14297_v10  ;;  %v1903_v6 = vld [vmem:[%s15654_s25 + $0x2418] sm:$0xff]  ;;  %v14130_v40 = vcombine.high %v1775_v30, %v1779_v36  ;;  %v14129_v61 = vcombine.low %v1775_v30, %v1779_v36 }
 0x65d   : > { %11815 = vmatprep.subr.bf16.mxu1 %v14290_v58  ;;  %v1907_v0 = vld [vmem:[%s15654_s25 + $0x2438] sm:$0xff] }
 0x65e   : > { %11775 = vmatpush1.bf16.msra.mxu0 %v14161_v43  ;;  %v14258_v37 = vcombine.high %v1903_v6, %v1907_v0  ;;  %v1895_v38 = vld [vmem:[%s15654_s25 + $0x23d8] sm:$0xff]  ;;  %v14257_v51 = vcombine.low %v1903_v6, %v1907_v0 }
 0x65f   : > { %11776 = vmatprep.subr.bf16.mxu0 %v14154_v56  ;;  %v1899_v41 = vld [vmem:[%s15654_s25 + $0x23f8] sm:$0xff] }
 0x660   : > { %11816 = vmatpush1.bf16.msra.mxu1 %v14289_v13  ;;  %v2023_v1 = vld [vmem:[%s15654_s25 + $0x27d8] sm:$0xff]  ;;  %v14250_v47 = vcombine.high %v1895_v38, %v1899_v41  ;;  %v14249_v14 = vcombine.low %v1895_v38, %v1899_v41 }
 0x661   : > { %11817 = vmatprep.subr.bf16.mxu1 %v14282_v18  ;;  %v2027_v57 = vld [vmem:[%s15654_s25 + $0x27f8] sm:$0xff] }
 0x662   : > { %11777 = vmatpush1.bf16.msra.mxu0 %v14153_v7  ;;  %v14378_v39 = vcombine.high %v2023_v1, %v2027_v57  ;;  %v1887_v59 = vld [vmem:[%s15654_s25 + $0x2398] sm:$0xff]  ;;  %v14377_v50 = vcombine.low %v2023_v1, %v2027_v57 }
 0x663   : > { %11778 = vmatprep.subr.bf16.mxu0 %v14146_v17  ;;  %v1891_v49 = vld [vmem:[%s15654_s25 + $0x23b8] sm:$0xff] }
 0x664   : > { %11818 = vmatpush1.bf16.msra.mxu1 %v14281_v11  ;;  %v2015_v31 = vld [vmem:[%s15654_s25 + $0x2798] sm:$0xff]  ;;  %v14242_v10 = vcombine.high %v1887_v59, %v1891_v49  ;;  %v14241_v44 = vcombine.low %v1887_v59, %v1891_v49 }
 0x665   : > { %11819 = vmatprep.subr.bf16.mxu1 %v14274_v24  ;;  %v2019_v52 = vld [vmem:[%s15654_s25 + $0x27b8] sm:$0xff] }
 0x666   : > { %11779 = vmatpush1.bf16.msra.mxu0 %v14145_v27  ;;  %v14370_v23 = vcombine.high %v2015_v31, %v2019_v52  ;;  %v1879_v3 = vld [vmem:[%s15654_s25 + $0x2358] sm:$0xff]  ;;  %v14369_v26 = vcombine.low %v2015_v31, %v2019_v52 }
 0x667   : > { %11780 = vmatprep.subr.bf16.mxu0 %v14138_v25  ;;  %v1883_v58 = vld [vmem:[%s15654_s25 + $0x2378] sm:$0xff] }
 0x668   : > { %11820 = vmatpush1.bf16.msra.mxu1 %v14273_v21  ;;  %v2007_v16 = vld [vmem:[%s15654_s25 + $0x2758] sm:$0xff]  ;;  %v14234_v43 = vcombine.high %v1879_v3, %v1883_v58  ;;  %v14233_v12 = vcombine.low %v1879_v3, %v1883_v58 }
 0x669   : > { %11821 = vmatprep.subr.bf16.mxu1 %v14266_v62  ;;  %v2011_v63 = vld [vmem:[%s15654_s25 + $0x2778] sm:$0xff] }
 0x66a   : > { %11781 = vmatpush1.bf16.msra.mxu0 %v14137_v55  ;;  %v14362_v13 = vcombine.high %v2007_v16, %v2011_v63  ;;  %v1871_v56 = vld [vmem:[%s15654_s25 + $0x2318] sm:$0xff]  ;;  %v14361_v20 = vcombine.low %v2007_v16, %v2011_v63 }
 0x66b   : > { %11782 = vmatprep.subr.bf16.mxu0 %v14130_v40  ;;  %v1875_v18 = vld [vmem:[%s15654_s25 + $0x2338] sm:$0xff] }
 0x66c   : > { %11822 = vmatpush1.bf16.msra.mxu1 %v14265_v8  ;;  %v1999_v60 = vld [vmem:[%s15654_s25 + $0x2718] sm:$0xff]  ;;  %v14226_v7 = vcombine.high %v1871_v56, %v1875_v18  ;;  %v14225_v22 = vcombine.low %v1871_v56, %v1875_v18 }
 0x66d   : > { %11823 = vmatprep.subr.bf16.mxu1 %v14258_v37  ;;  %v2003_v4 = vld [vmem:[%s15654_s25 + $0x2738] sm:$0xff] }
 0x66e   : > { %11783 = vmatpush1.bf16.msra.mxu0 %v14129_v61  ;;  %v14354_v11 = vcombine.high %v1999_v60, %v2003_v4  ;;  %v1863_v17 = vld [vmem:[%s15654_s25 + $0x22d8] sm:$0xff]  ;;  %v14353_v19 = vcombine.low %v1999_v60, %v2003_v4 }
 0x66f   : > { %11784 = vmatprep.subr.bf16.mxu0 %v14250_v47  ;;  %v1867_v24 = vld [vmem:[%s15654_s25 + $0x22f8] sm:$0xff] }
 0x670   : > { %11824 = vmatpush1.bf16.msra.mxu1 %v14257_v51  ;;  %v1991_v48 = vld [vmem:[%s15654_s25 + $0x26d8] sm:$0xff]  ;;  %v14218_v27 = vcombine.high %v1863_v17, %v1867_v24  ;;  %v14217_v6 = vcombine.low %v1863_v17, %v1867_v24 }
 0x671   : > { %11825 = vmatprep.subr.bf16.mxu1 %v14378_v39  ;;  %v1995_v15 = vld [vmem:[%s15654_s25 + $0x26f8] sm:$0xff] }
 0x672   : > { %11785 = vmatpush2.bf16.msra.mxu0 %v14249_v14  ;;  %v14346_v21 = vcombine.high %v1991_v48, %v1995_v15  ;;  %v1855_v25 = vld [vmem:[%s15654_s25 + $0x2298] sm:$0xff]  ;;  %v14345_v0 = vcombine.low %v1991_v48, %v1995_v15 }
 0x673   : > { %11786 = vmatprep.subr.bf16.mxu0 %v14242_v10  ;;  %v1859_v62 = vld [vmem:[%s15654_s25 + $0x22b8] sm:$0xff] }
 0x674   : > { %11826 = vmatpush2.bf16.msra.mxu1 %v14377_v50  ;;  %v1983_v30 = vld [vmem:[%s15654_s25 + $0x2698] sm:$0xff]  ;;  %v14210_v55 = vcombine.high %v1855_v25, %v1859_v62  ;;  %v14209_v1 = vcombine.low %v1855_v25, %v1859_v62 }
 0x675   : > { %11827 = vmatprep.subr.bf16.mxu1 %v14370_v23  ;;  %v1987_v36 = vld [vmem:[%s15654_s25 + $0x26b8] sm:$0xff] }
 0x676   : > { %11787 = vmatpush2.bf16.msra.mxu0 %v14241_v44  ;;  %v14338_v8 = vcombine.high %v1983_v30, %v1987_v36  ;;  %v1847_v40 = vld [vmem:[%s15654_s25 + $0x2258] sm:$0xff]  ;;  %v14337_v57 = vcombine.low %v1983_v30, %v1987_v36 }
 0x677   : > { %11788 = vmatprep.subr.bf16.mxu0 %v14234_v43  ;;  %v1851_v37 = vld [vmem:[%s15654_s25 + $0x2278] sm:$0xff] }
 0x678   : > { %11828 = vmatpush2.bf16.msra.mxu1 %v14369_v26  ;;  %v1975_v38 = vld [vmem:[%s15654_s25 + $0x2658] sm:$0xff]  ;;  %v14202_v61 = vcombine.high %v1847_v40, %v1851_v37  ;;  %v14201_v31 = vcombine.low %v1847_v40, %v1851_v37 }
 0x679   : > { %11829 = vmatprep.subr.bf16.mxu1 %v14362_v13  ;;  %v1979_v41 = vld [vmem:[%s15654_s25 + $0x2678] sm:$0xff] }
 0x67a   : > { %11789 = vmatpush2.bf16.msra.mxu0 %v14233_v12  ;;  %v14330_v51 = vcombine.high %v1975_v38, %v1979_v41  ;;  %v1839_v47 = vld [vmem:[%s15654_s25 + $0x2218] sm:$0xff]  ;;  %v14329_v52 = vcombine.low %v1975_v38, %v1979_v41 }
 0x67b   : > { %11790 = vmatprep.subr.bf16.mxu0 %v14226_v7  ;;  %v1843_v39 = vld [vmem:[%s15654_s25 + $0x2238] sm:$0xff] }
 0x67c   : > { %11830 = vmatpush2.bf16.msra.mxu1 %v14361_v20  ;;  %v1967_v59 = vld [vmem:[%s15654_s25 + $0x2618] sm:$0xff]  ;;  %v14194_v14 = vcombine.high %v1839_v47, %v1843_v39  ;;  %v14193_v16 = vcombine.low %v1839_v47, %v1843_v39 }
 0x67d   : > { %11831 = vmatprep.subr.bf16.mxu1 %v14354_v11  ;;  %v1971_v49 = vld [vmem:[%s15654_s25 + $0x2638] sm:$0xff] }
 0x67e   : > { %11791 = vmatpush2.bf16.msra.mxu0 %v14225_v22  ;;  %v14322_v50 = vcombine.high %v1967_v59, %v1971_v49  ;;  %v2087_v10 = vld [vmem:[%s15654_s25 + $0x29d8] sm:$0xff]  ;;  %v14321_v63 = vcombine.low %v1967_v59, %v1971_v49 }
 0x67f   : > { %11792 = vmatprep.subr.bf16.mxu0 %v14218_v27  ;;  %v2091_v23 = vld [vmem:[%s15654_s25 + $0x29f8] sm:$0xff] }
 0x680   : > { %11832 = vmatpush2.bf16.msra.mxu1 %v14353_v19  ;;  %v2215_v3 = vld [vmem:[%s15654_s25 + $0x2dd8] sm:$0xff]  ;;  %v14442_v44 = vcombine.high %v2087_v10, %v2091_v23  ;;  %v14441_v60 = vcombine.low %v2087_v10, %v2091_v23 }
 0x681   : > { %11833 = vmatprep.subr.bf16.mxu1 %v14346_v21  ;;  %v2219_v58 = vld [vmem:[%s15654_s25 + $0x2df8] sm:$0xff] }
 0x682   : > { %11793 = vmatpush2.bf16.msra.mxu0 %v14217_v6  ;;  %v14570_v26 = vcombine.high %v2215_v3, %v2219_v58  ;;  %v2079_v43 = vld [vmem:[%s15654_s25 + $0x2998] sm:$0xff]  ;;  %v14569_v4 = vcombine.low %v2215_v3, %v2219_v58 }
 0x683   : > { %11794 = vmatprep.subr.bf16.mxu0 %v14210_v55  ;;  %v2083_v13 = vld [vmem:[%s15654_s25 + $0x29b8] sm:$0xff] }
 0x684   : > { %11834 = vmatpush2.bf16.msra.mxu1 %v14345_v0  ;;  %v2207_v56 = vld [vmem:[%s15654_s25 + $0x2d98] sm:$0xff]  ;;  %v14434_v12 = vcombine.high %v2079_v43, %v2083_v13  ;;  %v14433_v19 = vcombine.low %v2079_v43, %v2083_v13 }
 0x685   : > { %11835 = vmatprep.subr.bf16.mxu1 %v14338_v8  ;;  %v2211_v18 = vld [vmem:[%s15654_s25 + $0x2db8] sm:$0xff] }
 0x686   : > { %11795 = vmatpush2.bf16.msra.mxu0 %v14209_v1  ;;  %v14562_v20 = vcombine.high %v2207_v56, %v2211_v18  ;;  %v2071_v7 = vld [vmem:[%s15654_s25 + $0x2958] sm:$0xff]  ;;  %v14561_v21 = vcombine.low %v2207_v56, %v2211_v18 }
 0x687   : > { %11796 = vmatprep.subr.bf16.mxu0 %v14202_v61  ;;  %v2075_v11 = vld [vmem:[%s15654_s25 + $0x2978] sm:$0xff] }
 0x688   : > { %11836 = vmatpush2.bf16.msra.mxu1 %v14337_v57  ;;  %v2199_v24 = vld [vmem:[%s15654_s25 + $0x2d58] sm:$0xff]  ;;  %v14426_v25 = vcombine.high %v2071_v7, %v2075_v11 }
 0x689   : > { %11837 = vmatprep.subr.bf16.mxu1 %v14330_v51  ;;  %v2203_v48 = vld [vmem:[%s15654_s25 + $0x2d78] sm:$0xff] }
 0x68a   : > { %11797 = vmatpush2.bf16.msra.mxu0 %v14201_v31  ;;  %v2063_v36 = vld [vmem:[%s15654_s25 + $0x2918] sm:$0xff]  ;;  %v14553_v38 = vcombine.low %v2199_v24, %v2203_v48 }
 0x68b   : > { %11798 = vmatprep.subr.bf16.mxu0 %v14194_v14  ;;  %v2067_v6 = vld [vmem:[%s15654_s25 + $0x2938] sm:$0xff] }
 0x68c   : > { %11838 = vmatpush2.bf16.msra.mxu1 %v14329_v52  ;;  %v2191_v0 = vld [vmem:[%s15654_s25 + $0x2d18] sm:$0xff]  ;;  %v14418_v41 = vcombine.high %v2063_v36, %v2067_v6  ;;  %v14417_v47 = vcombine.low %v2063_v36, %v2067_v6 }
 0x68d   : > { %11839 = vmatprep.subr.bf16.mxu1 %v14322_v50  ;;  %v2195_v55 = vld [vmem:[%s15654_s25 + $0x2d38] sm:$0xff] }
 0x68e   : > { %11799 = vmatpush2.bf16.msra.mxu0 %v14193_v16  ;;  %v14546_v1 = vcombine.high %v2191_v0, %v2195_v55  ;;  %v2055_v57 = vld [vmem:[%s15654_s25 + $0x28d8] sm:$0xff]  ;;  %v14545_v39 = vcombine.low %v2191_v0, %v2195_v55 }
 0x68f   : > { %11850 = vmatprep.subr.bf16.mxu0 %v14442_v44  ;;  %v2183_v61 = vld [vmem:[%s15654_s25 + $0x2cd8] sm:$0xff] }
 0x690   : > { %11840 = vmatpush2.bf16.msra.mxu1 %v14321_v63  ;;  %v2187_v51 = vld [vmem:[%s15654_s25 + $0x2cf8] sm:$0xff] }
 0x691   : > { %11891 = vmatprep.subr.bf16.mxu1 %v14570_v26  ;;  %v11556_v17 = vpop.f32.mrf.mxu0  ;;  %11801 = vmatmul.mubr.bf16.vlgmr.msra.gmra.mxu0 %v16153_v29  ;;  %v14538_v49 = vcombine.high %v2183_v61, %v2187_v51  ;;  %v2047_v31 = vld [vmem:[%s15654_s25 + $0x2898] sm:$0xff]  ;;  %v14537_v23 = vcombine.low %v2183_v61, %v2187_v51 }
 0x692   : > { %v11557_v15 = vadd.f32 %v11556_v17, %v17446_v34  ;;  %11851 = vmatpush1.bf16.msra.mxu0 %v14441_v60  ;;  %v14554_v34 = vcombine.high %v2199_v24, %v2203_v48  ;;  %11882 = vmatprep.mubr.bf16.mxu0 %v16165_v46  ;;  %v2051_v52 = vld [vmem:[%s15654_s25 + $0x28b8] sm:$0xff] }
 0x693   : > { %v11597_v22 = vpop.f32.mrf.mxu1  ;;  %11842 = vmatmul.mubr.bf16.vlgmr.msra.gmra.mxu1 %v16161_v33  ;;  %v11558_v27 = vpop.f32.mrf.mxu0  ;;  %11852 = vmatprep.subr.bf16.mxu0 %v14434_v12  ;;  %v2175_v14 = vld [vmem:[%s15654_s25 + $0x2c98] sm:$0xff]  ;;  %v14402_v3 = vcombine.high %v2047_v31, %v2051_v52  ;;  %v14401_v43 = vcombine.low %v2047_v31, %v2051_v52 }
 0x694   : > { %11892 = vmatpush1.bf16.msra.mxu1 %v14569_v4  ;;  %v17519_v62 = vadd.f32 %v11597_v22, %v11557_v15  ;;  %v11559_v29 = vadd.f32 %v11558_v27, %v17451_v5  ;;  %11923 = vmatprep.mubr.bf16.mxu1 %v16170_v53  ;;  %v14425_v5 = vcombine.low %v2071_v7, %v2075_v11  ;;  %v2059_v53 = vld [vmem:[%s15654_s25 + $0x28f8] sm:$0xff] }
 0x695   : > { %v11599_v30 = vpop.f32.mrf.mxu1  ;;  %11893 = vmatprep.subr.bf16.mxu1 %v14562_v20  ;;  %v11560_v33 = vpop.f32.mrf.mxu0  ;;  %v14410_v59 = vcombine.high %v2055_v57, %v2059_v53  ;;  %v2179_v50 = vld [vmem:[%s15654_s25 + $0x2cb8] sm:$0xff]  ;;  %v14409_v10 = vcombine.low %v2055_v57, %v2059_v53 }
 0x696   : > { %v17528_v8 = vadd.f32 %v11599_v30, %v11559_v29  ;;  %11853 = vmatpush1.bf16.msra.mxu0 %v14433_v19  ;;  %v14530_v58 = vcombine.high %v2175_v14, %v2179_v50  ;;  %v2039_v16 = vld [vmem:[%s15654_s25 + $0x2858] sm:$0xff]  ;;  %v14529_v13 = vcombine.low %v2175_v14, %v2179_v50 }
 0x697   : > { %v11601_v40 = vpop.f32.mrf.mxu1  ;;  %v11561_v37 = vpop.f32.mrf.mxu0  ;;  %11854 = vmatprep.subr.bf16.mxu0 %v14426_v25  ;;  %v2043_v63 = vld [vmem:[%s15654_s25 + $0x2878] sm:$0xff] }
 0x698   : > { %11894 = vmatpush1.bf16.msra.mxu1 %v14561_v21  ;;  %v2167_v44 = vld [vmem:[%s15654_s25 + $0x2c58] sm:$0xff]  ;;  %v14394_v56 = vcombine.high %v2039_v16, %v2043_v63  ;;  %v14393_v7 = vcombine.low %v2039_v16, %v2043_v63 }
 0x699   : > { %v11602_v46 = vpop.f32.mrf.mxu1  ;;  %11895 = vmatprep.subr.bf16.mxu1 %v14554_v34  ;;  %v2171_v26 = vld [vmem:[%s15654_s25 + $0x2c78] sm:$0xff] }
 0x69a   : > { %11855 = vmatpush1.bf16.msra.mxu0 %v14425_v5  ;;  %v14522_v18 = vcombine.high %v2167_v44, %v2171_v26  ;;  %v2031_v60 = vld [vmem:[%s15654_s25 + $0x2818] sm:$0xff]  ;;  %v14521_v11 = vcombine.low %v2167_v44, %v2171_v26 }
 0x69b   : > { %11856 = vmatprep.subr.bf16.mxu0 %v14418_v41  ;;  %v2035_v4 = vld [vmem:[%s15654_s25 + $0x2838] sm:$0xff] }
 0x69c   : > { %11896 = vmatpush1.bf16.msra.mxu1 %v14553_v38  ;;  %v2159_v12 = vld [vmem:[%s15654_s25 + $0x2c18] sm:$0xff]  ;;  %v14386_v17 = vcombine.high %v2031_v60, %v2035_v4  ;;  %v14385_v27 = vcombine.low %v2031_v60, %v2035_v4 }
 0x69d   : > { %11897 = vmatprep.subr.bf16.mxu1 %v14546_v1  ;;  %v2163_v20 = vld [vmem:[%s15654_s25 + $0x2c38] sm:$0xff] }
 0x69e   : > { %11857 = vmatpush1.bf16.msra.mxu0 %v14417_v47  ;;  %v14514_v24 = vcombine.high %v2159_v12, %v2163_v20  ;;  %v2151_v48 = vld [vmem:[%s15654_s25 + $0x2bd8] sm:$0xff]  ;;  %v14513_v21 = vcombine.low %v2159_v12, %v2163_v20 }
 0x69f   : > { %11858 = vmatprep.subr.bf16.mxu0 %v14410_v59  ;;  %v2155_v15 = vld [vmem:[%s15654_s25 + $0x2bf8] sm:$0xff] }
 0x6a0   : > { %11898 = vmatpush1.bf16.msra.mxu1 %v14545_v39  ;;  %v2279_v22 = vld [vmem:[%s15654_s25 + $0x2fd8] sm:$0xff]  ;;  %v14506_v25 = vcombine.high %v2151_v48, %v2155_v15  ;;  %v14505_v33 = vcombine.low %v2151_v48, %v2155_v15 }
 0x6a1   : > { %11899 = vmatprep.subr.bf16.mxu1 %v14538_v49  ;;  %v2283_v19 = vld [vmem:[%s15654_s25 + $0x2ff8] sm:$0xff] }
 0x6a2   : > { %11859 = vmatpush1.bf16.msra.mxu0 %v14409_v10  ;;  %v14634_v29 = vcombine.high %v2279_v22, %v2283_v19  ;;  %v2143_v30 = vld [vmem:[%s15654_s25 + $0x2b98] sm:$0xff]  ;;  %v14633_v0 = vcombine.low %v2279_v22, %v2283_v19 }
 0x6a3   : > { %11860 = vmatprep.subr.bf16.mxu0 %v14402_v3  ;;  %v2147_v34 = vld [vmem:[%s15654_s25 + $0x2bb8] sm:$0xff] }
 0x6a4   : > { %11900 = vmatpush1.bf16.msra.mxu1 %v14537_v23  ;;  %v2271_v36 = vld [vmem:[%s15654_s25 + $0x2f98] sm:$0xff]  ;;  %v14498_v55 = vcombine.high %v2143_v30, %v2147_v34  ;;  %v14497_v46 = vcombine.low %v2143_v30, %v2147_v34 }
 0x6a5   : > { %11901 = vmatprep.subr.bf16.mxu1 %v14530_v58  ;;  %v2275_v6 = vld [vmem:[%s15654_s25 + $0x2fb8] sm:$0xff] }
 0x6a6   : > { %11861 = vmatpush1.bf16.msra.mxu0 %v14401_v43  ;;  %v14626_v40 = vcombine.high %v2271_v36, %v2275_v6  ;;  %v2135_v5 = vld [vmem:[%s15654_s25 + $0x2b58] sm:$0xff]  ;;  %v14625_v1 = vcombine.low %v2271_v36, %v2275_v6 }
 0x6a7   : > { %11862 = vmatprep.subr.bf16.mxu0 %v14394_v56  ;;  %v2139_v37 = vld [vmem:[%s15654_s25 + $0x2b78] sm:$0xff] }
 0x6a8   : > { %11902 = vmatpush1.bf16.msra.mxu1 %v14529_v13  ;;  %v2263_v38 = vld [vmem:[%s15654_s25 + $0x2f58] sm:$0xff]  ;;  %v14490_v57 = vcombine.high %v2135_v5, %v2139_v37  ;;  %v14489_v59 = vcombine.low %v2135_v5, %v2139_v37 }
 0x6a9   : > { %11903 = vmatprep.subr.bf16.mxu1 %v14522_v18  ;;  %v2267_v41 = vld [vmem:[%s15654_s25 + $0x2f78] sm:$0xff] }
 0x6aa   : > { %11863 = vmatpush1.bf16.msra.mxu0 %v14393_v7  ;;  %v14618_v53 = vcombine.high %v2263_v38, %v2267_v41  ;;  %v2127_v61 = vld [vmem:[%s15654_s25 + $0x2b18] sm:$0xff]  ;;  %v14617_v49 = vcombine.low %v2263_v38, %v2267_v41 }
 0x6ab   : > { %11864 = vmatprep.subr.bf16.mxu0 %v14386_v17  ;;  %v2131_v51 = vld [vmem:[%s15654_s25 + $0x2b38] sm:$0xff] }
 0x6ac   : > { %11904 = vmatpush1.bf16.msra.mxu1 %v14521_v11  ;;  %v2255_v47 = vld [vmem:[%s15654_s25 + $0x2f18] sm:$0xff]  ;;  %v14482_v31 = vcombine.high %v2127_v61, %v2131_v51  ;;  %v14481_v3 = vcombine.low %v2127_v61, %v2131_v51 }
 0x6ad   : > { %11905 = vmatprep.subr.bf16.mxu1 %v14514_v24  ;;  %v2259_v39 = vld [vmem:[%s15654_s25 + $0x2f38] sm:$0xff] }
 0x6ae   : > { %11865 = vmatpush1.bf16.msra.mxu0 %v14385_v27  ;;  %v14610_v52 = vcombine.high %v2255_v47, %v2259_v39  ;;  %v2119_v14 = vld [vmem:[%s15654_s25 + $0x2ad8] sm:$0xff]  ;;  %v14609_v58 = vcombine.low %v2255_v47, %v2259_v39 }
 0x6af   : > { %11866 = vmatprep.subr.bf16.mxu0 %v14506_v25  ;;  %v2123_v50 = vld [vmem:[%s15654_s25 + $0x2af8] sm:$0xff] }
 0x6b0   : > { %11906 = vmatpush1.bf16.msra.mxu1 %v14513_v21  ;;  %v2247_v10 = vld [vmem:[%s15654_s25 + $0x2ed8] sm:$0xff]  ;;  %v14474_v16 = vcombine.high %v2119_v14, %v2123_v50  ;;  %v14473_v56 = vcombine.low %v2119_v14, %v2123_v50 }
 0x6b1   : > { %11907 = vmatprep.subr.bf16.mxu1 %v14634_v29  ;;  %v2251_v23 = vld [vmem:[%s15654_s25 + $0x2ef8] sm:$0xff] }
 0x6b2   : > { %11867 = vmatpush2.bf16.msra.mxu0 %v14505_v33  ;;  %v14602_v63 = vcombine.high %v2247_v10, %v2251_v23  ;;  %v2111_v44 = vld [vmem:[%s15654_s25 + $0x2a98] sm:$0xff]  ;;  %v14601_v18 = vcombine.low %v2247_v10, %v2251_v23 }
 0x6b3   : > { %11868 = vmatprep.subr.bf16.mxu0 %v14498_v55  ;;  %v2115_v26 = vld [vmem:[%s15654_s25 + $0x2ab8] sm:$0xff] }
 0x6b4   : > { %11908 = vmatpush2.bf16.msra.mxu1 %v14633_v0  ;;  %v2239_v43 = vld [vmem:[%s15654_s25 + $0x2e98] sm:$0xff]  ;;  %v14466_v60 = vcombine.high %v2111_v44, %v2115_v26  ;;  %v14465_v17 = vcombine.low %v2111_v44, %v2115_v26 }
 0x6b5   : > { %11909 = vmatprep.subr.bf16.mxu1 %v14626_v40  ;;  %v2243_v13 = vld [vmem:[%s15654_s25 + $0x2eb8] sm:$0xff] }
 0x6b6   : > { %11869 = vmatpush2.bf16.msra.mxu0 %v14497_v46  ;;  %v14594_v4 = vcombine.high %v2239_v43, %v2243_v13  ;;  %v2103_v12 = vld [vmem:[%s15654_s25 + $0x2a58] sm:$0xff]  ;;  %v14593_v24 = vcombine.low %v2239_v43, %v2243_v13 }
 0x6b7   : > { %11870 = vmatprep.subr.bf16.mxu0 %v14490_v57  ;;  %v2107_v20 = vld [vmem:[%s15654_s25 + $0x2a78] sm:$0xff] }
 0x6b8   : > { %11910 = vmatpush2.bf16.msra.mxu1 %v14625_v1  ;;  %v2231_v7 = vld [vmem:[%s15654_s25 + $0x2e58] sm:$0xff]  ;;  %v14458_v48 = vcombine.high %v2103_v12, %v2107_v20  ;;  %v14457_v25 = vcombine.low %v2103_v12, %v2107_v20 }
 0x6b9   : > { %11911 = vmatprep.subr.bf16.mxu1 %v14618_v53  ;;  %v2235_v11 = vld [vmem:[%s15654_s25 + $0x2e78] sm:$0xff] }
 0x6ba   : > { %11871 = vmatpush2.bf16.msra.mxu0 %v14489_v59  ;;  %v14586_v15 = vcombine.high %v2231_v7, %v2235_v11  ;;  %v2095_v22 = vld [vmem:[%s15654_s25 + $0x2a18] sm:$0xff]  ;;  %v14585_v29 = vcombine.low %v2231_v7, %v2235_v11 }
 0x6bb   : > { %11872 = vmatprep.subr.bf16.mxu0 %v14482_v31  ;;  %v2099_v19 = vld [vmem:[%s15654_s25 + $0x2a38] sm:$0xff] }
 0x6bc   : > { %11912 = vmatpush2.bf16.msra.mxu1 %v14617_v49  ;;  %v2223_v27 = vld [vmem:[%s15654_s25 + $0x2e18] sm:$0xff]  ;;  %v14450_v30 = vcombine.high %v2095_v22, %v2099_v19  ;;  %v14449_v36 = vcombine.low %v2095_v22, %v2099_v19  ;;  %v11965_v19 = vrot.slane %v11957_v2, %v15711_v54 }
 0x6bd   : > { %11913 = vmatprep.subr.bf16.mxu1 %v14610_v52  ;;  %v2227_v21 = vld [vmem:[%s15654_s25 + $0x2e38] sm:$0xff] }
 0x6be   : > { %11873 = vmatpush2.bf16.msra.mxu0 %v14481_v3  ;;  %v14578_v34 = vcombine.high %v2223_v27, %v2227_v21  ;;  %v14577_v6 = vcombine.low %v2223_v27, %v2227_v21  ;;  %v585_v21 = vld [vmem:[#allocation2 + $0x8] sm:$0xff] }
 0x6bf   : > { %11874 = vmatprep.subr.bf16.mxu0 %v14474_v16 }
 0x6c0   : > { %11914 = vmatpush2.bf16.msra.mxu1 %v14609_v58 }
 0x6c1   : > { %11915 = vmatprep.subr.bf16.mxu1 %v14602_v63 }
 0x6c2   : > { %11875 = vmatpush2.bf16.msra.mxu0 %v14473_v56 }
 0x6c3   : > { %11876 = vmatprep.subr.bf16.mxu0 %v14466_v60 }
 0x6c4   : > { %11916 = vmatpush2.bf16.msra.mxu1 %v14601_v18 }
 0x6c5   : > { %11917 = vmatprep.subr.bf16.mxu1 %v14594_v4 }
 0x6c6   : > { %11877 = vmatpush2.bf16.msra.mxu0 %v14465_v17 }
 0x6c7   : > { %11878 = vmatprep.subr.bf16.mxu0 %v14458_v48 }
 0x6c8   : > { %11918 = vmatpush2.bf16.msra.mxu1 %v14593_v24 }
 0x6c9   : > { %11919 = vmatprep.subr.bf16.mxu1 %v14586_v15 }
 0x6ca   : > { %11879 = vmatpush2.bf16.msra.mxu0 %v14457_v25 }
 0x6cb   : > { %11880 = vmatprep.subr.bf16.mxu0 %v14450_v30 }
 0x6cc   : > { %11920 = vmatpush2.bf16.msra.mxu1 %v14585_v29 }
 0x6cd   : > { %11921 = vmatprep.subr.bf16.mxu1 %v14578_v34 }
 0x6ce   : > { %11881 = vmatpush2.bf16.msra.mxu0 %v14449_v36 }
 0x6d0   : > { %11922 = vmatpush2.bf16.msra.mxu1 %v14577_v6 }
 0x6d1   : > { %v11638_v33 = vpop.f32.mrf.mxu0  ;;  %11883 = vmatmul.mubr.bf16.vlgmr.msra.gmra.mxu0 %v16241_v28 }
 0x6d2   : > { %v11639_v0 = vadd.f32 %v11638_v33, %v17519_v62 }
 0x6d3   : > { %v11679_v55 = vpop.f32.mrf.mxu1  ;;  %11924 = vmatmul.mubr.bf16.vlgmr.msra.gmra.mxu1 %v16247_v32  ;;  %v11640_v40 = vpop.f32.mrf.mxu0 }
 0x6d4   : > { %v11680_v5 = vadd.f32 %v11679_v55, %v11639_v0  ;;  %v11641_v37 = vadd.f32 %v11640_v40, %v17528_v8 }
 0x6d5   : > { %v11681_v38 = vpop.f32.mrf.mxu1  ;;  %v11642_v41 = vpop.f32.mrf.mxu0 }
 0x6d6   : > { %v11682_v46 = vadd.f32 %v11681_v38, %v11641_v37 }
 0x6d7   : > { %v11683_v1 = vpop.f32.mrf.mxu1  ;;  %v11643_v57 = vpop.f32.mrf.mxu0 }
 0x6d9   : > { %v11684_v53 = vpop.f32.mrf.mxu1 }
 0x711   : > { %v11720_v61 = vpop.f32.mrf.mxu0 }
 0x712   : > { %v11721_v51 = vadd.f32 %v11720_v61, %v11680_v5 }
 0x713   : > { %v11761_v47 = vpop.f32.mrf.mxu1  ;;  %v11722_v39 = vpop.f32.mrf.mxu0 }
 0x714   : > { %v11762_v28 = vadd.f32 %v11761_v47, %v11721_v51  ;;  %v11723_v59 = vadd.f32 %v11722_v39, %v11682_v46 }
 0x715   : > { %v11763_v62 = vpop.f32.mrf.mxu1  ;;  %v11724_v49 = vpop.f32.mrf.mxu0 }
 0x716   : > { %v11764_v31 = vadd.f32 %v11763_v62, %v11723_v59 }
 0x717   : > { %v11765_v32 = vpop.f32.mrf.mxu1  ;;  %v11725_v52 = vpop.f32.mrf.mxu0 }
 0x719   : > { %v11766_v14 = vpop.f32.mrf.mxu1 }
 0x751   : > { %v11802_v50 = vpop.f32.mrf.mxu0 }
 0x752   : > { %v11803_v44 = vadd.f32 %v11802_v50, %v11762_v28 }
 0x753   : > { %v11843_v8 = vpop.f32.mrf.mxu1  ;;  %v11804_v10 = vpop.f32.mrf.mxu0 }
 0x754   : > { %v11805_v26 = vadd.f32 %v11804_v10, %v11764_v31  ;;  %v11844_v43 = vadd.f32 %v11843_v8, %v11803_v44 }
 0x755   : > { %v11845_v23 = vpop.f32.mrf.mxu1  ;;  %v11806_v3 = vpop.f32.mrf.mxu0 }
 0x756   : > { %v11846_v56 = vadd.f32 %v11845_v23, %v11805_v26 }
 0x757   : > { %v11847_v58 = vpop.f32.mrf.mxu1  ;;  %v11807_v16 = vpop.f32.mrf.mxu0 }
 0x759   : > { %v11848_v63 = vpop.f32.mrf.mxu1 }
 0x791   : > { %v11884_v13 = vpop.f32.mrf.mxu0 }
 0x792   : > { %v11885_v18 = vadd.f32 %v11884_v13, %v11844_v43 }
 0x793   : > { %v11925_v60 = vpop.f32.mrf.mxu1  ;;  %v11886_v4 = vpop.f32.mrf.mxu0 }
 0x794   : > { %v11887_v12 = vadd.f32 %v11886_v4, %v11846_v56  ;;  %v11926_v11 = vadd.f32 %v11925_v60, %v11885_v18 }
 0x795   : > { %v11927_v20 = vpop.f32.mrf.mxu1  ;;  %v11888_v7 = vpop.f32.mrf.mxu0 }
 0x796   : > { %v11928_v17 = vadd.f32 %v11927_v20, %v11887_v12 }
 0x797   : > { %v11929_v24 = vpop.f32.mrf.mxu1  ;;  %v11889_v48 = vpop.f32.mrf.mxu0 }
 0x798   : > { %v11958_v15 = vcombine.low %v11926_v11, %v11928_v17 }
 0x799   : > { %v11930_v22 = vpop.f32.mrf.mxu1 }
 0x79a   : > { %v11972_v27 = vrot.slane %v11958_v15, %v15711_v54 }
 0x79c   : > { %v11973_v25 = vcombine.low %v11965_v19, %v11972_v27  ;;  %11983 = sbr.rel (%p14635_p4) target bundleno = 3091 (0xc13), region = 116 }
 0x79e   : > { %v11977_v29 = vadd.f32 %v11973_v25, %v585_v21 }
 0x7a0   : > { %11979 = vst [vmem:[#allocation2 + $0x8] sm:$0xff] %v11977_v29 }
 0x7a1   : > { %v11986_v30 = vld [vmem:[#allocation7] sm:$0xff]  ;;  %v17589_v34 = vsub.s32 0, %v15704_v45  ;;  %v17592_v36 = vsub.s32 1, %v15704_v45  ;;  %v17595_v6 = vsub.s32 2, %v15704_v45  ;;  %v17598_v9 = vsub.s32 3, %v15704_v45  ;;  %v11984_v59 = vld [vmem:[#allocation2] sm:$0xff] }
 0x7a2   : > { %v17601_v42 = vsub.s32 4, %v15704_v45  ;;  %v17604_v2 = vsub.s32 5, %v15704_v45  ;;  %v17607_v33 = vsub.s32 6, %v15704_v45  ;;  %v17613_v5 = vsub.s32 7, %v15704_v45  ;;  %v12374_v29 = vld [vmem:[#allocation11 + $0xf8] sm:$0xff] }
 0x7a3   : > { %v11991_v0 = vrot.slane %v11986_v30, %v17589_v34  ;;  %v11995_v55 = vrot.slane %v11986_v30, %v17592_v36  ;;  %v11999_v40 = vrot.slane %v11986_v30, %v17595_v6  ;;  %v12003_v37 = vrot.slane %v11986_v30, %v17598_v9  ;;  %14647 = vmatprep.subr.mxu0 %v12374_v29 }
 0x7a4   : > { %v12007_v38 = vrot.slane %v11986_v30, %v17601_v42  ;;  %v12011_v41 = vrot.slane %v11986_v30, %v17604_v2  ;;  %v12015_v46 = vrot.slane %v11986_v30, %v17607_v33  ;;  %v12019_v1 = vrot.slane %v11986_v30, %v17613_v5  ;;  %v12406_v30 = vld [vmem:[#allocation11 + $0x1f8] sm:$0xff] }
 0x7a5   : > { %v12020_v57 = vcombine.low %v11991_v0, %v11995_v55  ;;  %v12021_v53 = vcombine.low %v11999_v40, %v12003_v37  ;;  %vm12125_vm2 = vcmask 1041408   ;;  %v12358_v0 = vld [vmem:[#allocation11 + $0x78] sm:$0xff]  ;;  %14682 = vmatprep.subr.mxu1 %v12406_v30  ;;  %v12373_v40 = vld [vmem:[#allocation11 + $0xf0] sm:$0xff]  ;;  %vm15402_vm6 = vmmov 0  }
 0x7a6   : > { %v12037_v61 = vcombine.low %v12007_v38, %v12011_v41  ;;  %v12038_v47 = vcombine.low %v12015_v46, %v12019_v1  ;;  %v12390_v55 = vld [vmem:[#allocation11 + $0x178] sm:$0xff]  ;;  %v12405_v37 = vld [vmem:[#allocation11 + $0x1f0] sm:$0xff]  ;;  %14648 = vmatpush3.msra.mxu0 %v12358_v0  ;;  %v12372_v46 = vld [vmem:[#allocation11 + $0xe8] sm:$0xff] }
 0x7a7   : > { %v12028_v51 = vrot.slane %v12020_v57, %v15711_v54  ;;  %v12035_v39 = vrot.slane %v12021_v53, %v15711_v54  ;;  %v11985_v49 = vld [vmem:[#allocation2 + $0x8] sm:$0xff]  ;;  %14683 = vmatpush3.msra.mxu1 %v12390_v55  ;;  %v12357_v38 = vld [vmem:[#allocation11 + $0x70] sm:$0xff]  ;;  %14649 = vmatprep.subr.mxu0 %v12373_v40  ;;  %v12404_v1 = vld [vmem:[#allocation11 + $0x1e8] sm:$0xff] }
 0x7a8   : > { %v12045_v28 = vrot.slane %v12037_v61, %v15711_v54  ;;  %v12052_v62 = vrot.slane %v12038_v47, %v15711_v54  ;;  %v12389_v41 = vld [vmem:[#allocation11 + $0x170] sm:$0xff]  ;;  %14684 = vmatprep.subr.mxu1 %v12405_v37  ;;  %v12356_v57 = vld [vmem:[#allocation11 + $0x68] sm:$0xff]  ;;  %14650 = vmatpush3.msra.mxu0 %v12357_v38  ;;  %v12371_v61 = vld [vmem:[#allocation11 + $0xe0] sm:$0xff] }
 0x7a9   : > { %v12036_v31 = vcombine.low %v12028_v51, %v12035_v39  ;;  %v12388_v53 = vld [vmem:[#allocation11 + $0x168] sm:$0xff]  ;;  %14685 = vmatpush3.msra.mxu1 %v12389_v41  ;;  %v12403_v51 = vld [vmem:[#allocation11 + $0x1e0] sm:$0xff]  ;;  %14651 = vmatprep.subr.mxu0 %v12372_v46  ;;  %v12370_v37 = vld [vmem:[#allocation11 + $0xd8] sm:$0xff] }
 0x7aa   : > { %v12053_v32 = vcombine.low %v12045_v28, %v12052_v62  ;;  %14686 = vmatprep.subr.mxu1 %v12404_v1  ;;  %v12355_v47 = vld [vmem:[#allocation11 + $0x60] sm:$0xff]  ;;  %14652 = vmatpush3.msra.mxu0 %v12356_v57  ;;  %v15400_v28 = vmov 269488144   ;;  %v12402_v38 = vld [vmem:[#allocation11 + $0x1d8] sm:$0xff]  ;;  %v12369_v1 = vld [vmem:[#allocation11 + $0xd0] sm:$0xff] }
 0x7ab   : > { %v12056_v52 = vadd.f32 %v12036_v31, %v11984_v59  ;;  %v12387_v39 = vld [vmem:[#allocation11 + $0x160] sm:$0xff]  ;;  %14687 = vmatpush3.msra.mxu1 %v12388_v53  ;;  %14653 = vmatprep.subr.mxu0 %v12371_v61  ;;  %v12146_v59 = vunpack.c.l.s4 %v15400_v28  ;;  %v12354_v41 = vld [vmem:[#allocation11 + $0x58] sm:$0xff]  ;;  %v12401_v57 = vld [vmem:[#allocation11 + $0x1d0] sm:$0xff] }
 0x7ac   : > { %v12057_v14 = vadd.f32 %v12053_v32, %v11985_v49  ;;  %14688 = vmatprep.subr.mxu1 %v12403_v51  ;;  %14654 = vmatpush3.msra.mxu0 %v12355_v47  ;;  %v12386_v46 = vld [vmem:[#allocation11 + $0x158] sm:$0xff]  ;;  %v12353_v53 = vld [vmem:[#allocation11 + $0x50] sm:$0xff]  ;;  %v12368_v51 = vld [vmem:[#allocation11 + $0xc8] sm:$0xff] }
 0x7ad   : > { %vm12058_vm0 = vcmp.gt.f32.partialorder %v12056_v52, 0.0  ;;  %v12060_v50 = vmul.f32 0.05, %v12056_v52  ;;  %14689 = vmatpush3.msra.mxu1 %v12387_v39  ;;  %v12147_v62 = vunpack.c.0.s8 %v12146_v59  ;;  %14655 = vmatprep.subr.mxu0 %v12370_v37  ;;  %v12385_v61 = vld [vmem:[#allocation11 + $0x150] sm:$0xff]  ;;  %v12400_v47 = vld [vmem:[#allocation11 + $0x1c8] sm:$0xff]  ;;  %v12367_v59 = vld [vmem:[#allocation11 + $0xc0] sm:$0xff] }
 0x7ae   : > { %vm12059_vm1 = vcmp.gt.f32.partialorder %v12057_v14, 0.0  ;;  %v12061_v8 = vmul.f32 0.05, %v12057_v14  ;;  %14690 = vmatprep.subr.mxu1 %v12402_v38  ;;  %14656 = vmatpush3.msra.mxu0 %v12354_v41  ;;  %v12352_v39 = vld [vmem:[#allocation11 + $0x48] sm:$0xff]  ;;  %v12375_v37 = vld [vmem:[#allocation11 + $0x100] sm:$0xff]  ;;  %v12438_v38 = vld [vmem:[#allocation11 + $0x2f8] sm:$0xff] }
 0x7af   : > { %v17624_v10 = vsel %vm12058_vm0, %v12056_v52, %v12060_v50  ;;  %v12150_v49 = vsub.s32 %v12147_v62, %v15704_v45  ;;  %14691 = vmatpush3.msra.mxu1 %v12386_v46  ;;  %14657 = vmatprep.subr.mxu0 %v12369_v1  ;;  %v12384_v28 = vld [vmem:[#allocation11 + $0x148] sm:$0xff]  ;;  %v12399_v62 = vld [vmem:[#allocation11 + $0x1c0] sm:$0xff]  ;;  %v12470_v41 = vld [vmem:[#allocation11 + $0x3f8] sm:$0xff] }
 0x7b0   : > { %v17626_v23 = vsel %vm12059_vm1, %v12057_v14, %v12061_v8  ;;  %v12083_v3 = vcombine.high %v17624_v10, %v17624_v10  ;;  %v12090_v58 = vrot.slane %v17624_v10, %v15711_v54  ;;  %14692 = vmatprep.subr.mxu1 %v12401_v57  ;;  %14658 = vmatpush3.msra.mxu0 %v12353_v53  ;;  %v17705_v53 = vld [vmem:[#allocation8] sm:$0xff] }
 0x7b1   : > { %v12100_v16 = vcombine.high %v17626_v23, %v17626_v23  ;;  %v12107_v26 = vrot.slane %v17626_v23, %v15711_v54  ;;  %14693 = vmatpush3.msra.mxu1 %v12385_v61  ;;  %14659 = vmatprep.subr.mxu0 %v12368_v51  ;;  %v17707_v61 = vld [vmem:[#allocation10] sm:$0xff]  ;;  %v12252_v51 = vrot.slane %v17705_v53, %v17592_v36 }
 0x7b2   : > { %v12097_v63 = vrot.slane %v12083_v3, %v15711_v54  ;;  %v12098_v44 = vcombine.high %v12090_v58, %v12090_v58  ;;  %v12126_v43 = vsel %vm12125_vm2, %v12090_v58, 0.0  ;;  %14694 = vmatprep.subr.mxu1 %v12400_v47  ;;  %14660 = vmatpush3.msra.mxu0 %v12352_v39  ;;  %v12260_v47 = vrot.slane %v17705_v53, %v17598_v9 }
 0x7b3   : > { %v12114_v4 = vrot.slane %v12100_v16, %v15711_v54  ;;  %v12115_v12 = vcombine.high %v12107_v26, %v12107_v26  ;;  %v12133_v11 = vsel %vm12125_vm2, %v12107_v26, 0.0  ;;  %v17653_v16 = vand.u32 127, %v602_v35  ;;  %14695 = vmatpush3.msra.mxu1 %v12384_v28  ;;  %14661 = vmatprep.subr.mxu0 %v12367_v59 }
 0x7b4   : > { %v12099_v13 = vcombine.high %v12097_v63, %v12097_v63  ;;  %v12127_v56 = vsel %vm12125_vm2, %v12098_v44, 0.0  ;;  %v12129_v18 = vsel %vm12125_vm2, %v12097_v63, 0.0  ;;  %14696 = vmatprep.subr.mxu1 %v12399_v62  ;;  %v12248_v39 = vrot.slane %v17705_v53, %v17589_v34 }
 0x7b5   : > { %v12128_v60 = vadd.f32 %v12127_v56, %v12126_v43  ;;  %v12116_v24 = vcombine.high %v12114_v4, %v12114_v4  ;;  %v12135_v48 = vsel %vm12125_vm2, %v12115_v12, 0.0  ;;  %v12137_v22 = vsel %vm12125_vm2, %v12114_v4, 0.0 }
 0x7b6   : > { %v12131_v20 = vsel %vm12125_vm2, %v12099_v13, 0.0  ;;  %v12072_v13 = vadd.s32 896, %v17653_v16  ;;  %v12256_v28 = vrot.slane %v17705_v53, %v17595_v6  ;;  %v12268_v59 = vrot.slane %v17705_v53, %v17604_v2 }
 0x7b7   : > { %v12130_v7 = vadd.f32 %v12129_v18, %v12128_v60  ;;  %v12139_v27 = vsel %vm12125_vm2, %v12116_v24, 0.0  ;;  %v12276_v62 = vrot.slane %v17705_v53, %v17613_v5  ;;  %vm12761_vm5 = vcmp.lt.s32.totalorder %v17653_v16, 100  ;;  %v12798_v16 = vld [vmem:[#allocation17 + $0x30] sm:$0xff] }
 0x7b8   : > { %vm12080_vm3 = vcmp.lt.s32.totalorder %v12072_v13, 1000  ;;  %v12396_v13 = vld [vmem:[#allocation11 + $0x1a8] sm:$0xff] }
 0x7b9   : > { %v12132_v17 = vadd.f32 %v12131_v20, %v12130_v7 }
 0x7bb   : > { %v12134_v15 = vadd.f32 %v12133_v11, %v12132_v17 }
 0x7bd   : > { %v12136_v19 = vadd.f32 %v12135_v48, %v12134_v15 }
 0x7bf   : > { %v12138_v21 = vadd.f32 %v12137_v22, %v12136_v19 }
 0x7c1   : > { %v12140_v25 = vadd.f32 %v12139_v27, %v12138_v21 }
 0x7c3   : > { %12141 = vadd.xlane.f32.xlu0 %v12140_v25 }
 0x84c   : > { %v12142_v31 = vpop.xlane.xlu0 %12141 }
 0x84d   : > { %v12143_v32 = vmul.f32 0.001, %v12142_v31  ;;  %v12383_v31 = vld [vmem:[#allocation11 + $0x140] sm:$0xff] }
 0x84e   : > { %14697 = vmatpush3.msra.mxu1 %v12383_v31  ;;  %v12302_v31 = vrot.slane %v17707_v61, %v17592_v36 }
 0x84f   : > { %v12151_v52 = vrot.slane %v12143_v32, %v12150_v49  ;;  %v12351_v49 = vld [vmem:[#allocation11 + $0x40] sm:$0xff]  ;;  %v12366_v32 = vld [vmem:[#allocation11 + $0xb8] sm:$0xff] }
 0x850   : > { %14662 = vmatpush3.msra.mxu0 %v12351_v49 }
 0x851   : > { %v12153_v14 = vsub.f32 %v17624_v10, %v12151_v52  ;;  %v12154_v50 = vsub.f32 %v17626_v23, %v12151_v52  ;;  %v12398_v52 = vld [vmem:[#allocation11 + $0x1b8] sm:$0xff]  ;;  %14663 = vmatprep.subr.mxu0 %v12366_v32  ;;  %v12310_v32 = vrot.slane %v17707_v61, %v17598_v9 }
 0x852   : > { %14698 = vmatprep.subr.mxu1 %v12398_v52  ;;  %v12298_v52 = vrot.slane %v17707_v61, %v17589_v34 }
 0x853   : > { %v12157_v8 = vcombine.high %v12153_v14, %v12153_v14  ;;  %v17650_v3 = vrot.slane %v12153_v14, %v15711_v54  ;;  %v12174_v58 = vcombine.high %v12154_v50, %v12154_v50  ;;  %v17663_v44 = vrot.slane %v12154_v50, %v15711_v54  ;;  %v12350_v14 = vld [vmem:[#allocation11 + $0x38] sm:$0xff] }
 0x854   : > { %v12382_v50 = vld [vmem:[#allocation11 + $0x138] sm:$0xff]  ;;  %14664 = vmatpush3.msra.mxu0 %v12350_v14  ;;  %v12306_v14 = vrot.slane %v17707_v61, %v17595_v6 }
 0x855   : > { %v17656_v63 = vrot.slane %v12157_v8, %v15711_v54  ;;  %v17660_v45 = vcombine.high %v17650_v3, %v17650_v3  ;;  %v12207_v10 = vmul.f32 %v17650_v3, %v17650_v3  ;;  %v17668_v23 = vrot.slane %v12174_v58, %v15711_v54  ;;  %v12365_v8 = vld [vmem:[#allocation11 + $0xb0] sm:$0xff]  ;;  %14699 = vmatpush3.msra.mxu1 %v12382_v50 }
 0x856   : > { %v17682_v18 = vcombine.high %v17663_v44, %v17663_v44  ;;  %v12211_v20 = vmul.f32 %v17663_v44, %v17663_v44  ;;  %v12397_v58 = vld [vmem:[#allocation11 + $0x1b0] sm:$0xff]  ;;  %14665 = vmatprep.subr.mxu0 %v12365_v8 }
 0x857   : > { %v17672_v35 = vcombine.high %v17656_v63, %v17656_v63  ;;  %v12208_v26 = vmul.f32 %v17660_v45, %v17660_v45  ;;  %v12209_v43 = vmul.f32 %v17656_v63, %v17656_v63  ;;  %v12215_v56 = vsel %vm12125_vm2, %v12207_v10, 0.0  ;;  %v12349_v10 = vld [vmem:[#allocation11 + $0x30] sm:$0xff]  ;;  %14700 = vmatprep.subr.mxu1 %v12397_v58 }
 0x858   : > { %v12190_v4 = vcombine.high %v17668_v23, %v17668_v23  ;;  %v12212_v17 = vmul.f32 %v17682_v18, %v17682_v18  ;;  %v12213_v22 = vmul.f32 %v17668_v23, %v17668_v23  ;;  %v12222_v19 = vsel %vm12125_vm2, %v12211_v20, 0.0  ;;  %14666 = vmatpush3.msra.mxu0 %v12349_v10  ;;  %v12379_v20 = vld [vmem:[#allocation11 + $0x120] sm:$0xff] }
 0x859   : > { %v12210_v54 = vmul.f32 %v17672_v35, %v17672_v35  ;;  %v12216_v60 = vsel %vm12125_vm2, %v12208_v26, 0.0  ;;  %v12218_v7 = vsel %vm12125_vm2, %v12209_v43, 0.0  ;;  %v12381_v26 = vld [vmem:[#allocation11 + $0x130] sm:$0xff]  ;;  %v12364_v43 = vld [vmem:[#allocation11 + $0xa8] sm:$0xff] }
 0x85a   : > { %v12217_v12 = vadd.f32 %v12216_v60, %v12215_v56  ;;  %v17695_v48 = vsel %vm12080_vm3, %v12190_v4, 0.0  ;;  %v12224_v25 = vsel %vm12125_vm2, %v12212_v17, 0.0  ;;  %v12226_v30 = vsel %vm12125_vm2, %v12213_v22, 0.0  ;;  %v12348_v56 = vld [vmem:[#allocation11 + $0x28] sm:$0xff]  ;;  %14701 = vmatpush3.msra.mxu1 %v12381_v26  ;;  %v12363_v60 = vld [vmem:[#allocation11 + $0xa0] sm:$0xff]  ;;  %14667 = vmatprep.subr.mxu0 %v12364_v43  ;;  %v12346_v17 = vld [vmem:[#allocation11 + $0x18] sm:$0xff] }
 0x85b   : > { %v12220_v24 = vsel %vm12125_vm2, %v12210_v54, 0.0  ;;  %v12214_v21 = vmul.f32 %v17695_v48, %v17695_v48  ;;  %v12380_v54 = vld [vmem:[#allocation11 + $0x128] sm:$0xff]  ;;  %v12395_v4 = vld [vmem:[#allocation11 + $0x1a0] sm:$0xff]  ;;  %14702 = vmatprep.subr.mxu1 %v12396_v13  ;;  %14668 = vmatpush3.msra.mxu0 %v12348_v56  ;;  %v12393_v22 = vld [vmem:[#allocation11 + $0x190] sm:$0xff] }
 0x85c   : > { %v12219_v11 = vadd.f32 %v12218_v7, %v12217_v12  ;;  %v12347_v12 = vld [vmem:[#allocation11 + $0x20] sm:$0xff]  ;;  %14703 = vmatpush3.msra.mxu1 %v12380_v54  ;;  %v12362_v7 = vld [vmem:[#allocation11 + $0x98] sm:$0xff]  ;;  %14669 = vmatprep.subr.mxu0 %v12363_v60 }
 0x85d   : > { %v12228_v55 = vsel %vm12125_vm2, %v12214_v21, 0.0  ;;  %14704 = vmatprep.subr.mxu1 %v12395_v4  ;;  %14670 = vmatpush3.msra.mxu0 %v12347_v12  ;;  %v12360_v21 = vld [vmem:[#allocation11 + $0x88] sm:$0xff]  ;;  %v12454_v4 = vld [vmem:[#allocation11 + $0x378] sm:$0xff] }
 0x85e   : > { %v12221_v15 = vadd.f32 %v12220_v24, %v12219_v11  ;;  %v12394_v11 = vld [vmem:[#allocation11 + $0x198] sm:$0xff]  ;;  %14705 = vmatpush3.msra.mxu1 %v12379_v20  ;;  %14671 = vmatprep.subr.mxu0 %v12362_v7  ;;  %v12469_v20 = vld [vmem:[#allocation11 + $0x3f0] sm:$0xff] }
 0x85f   : > { %v12378_v24 = vld [vmem:[#allocation11 + $0x118] sm:$0xff]  ;;  %14706 = vmatprep.subr.mxu1 %v12394_v11  ;;  %14672 = vmatpush3.msra.mxu0 %v12346_v17  ;;  %v12421_v7 = vld [vmem:[#allocation11 + $0x270] sm:$0xff]  ;;  %v12468_v17 = vld [vmem:[#allocation11 + $0x3e8] sm:$0xff] }
 0x860   : > { %v12223_v27 = vadd.f32 %v12222_v19, %v12221_v15  ;;  %v12361_v15 = vld [vmem:[#allocation11 + $0x90] sm:$0xff]  ;;  %14707 = vmatpush3.msra.mxu1 %v12378_v24  ;;  %v12420_v24 = vld [vmem:[#allocation11 + $0x268] sm:$0xff] }
 0x861   : > { %v12345_v19 = vld [vmem:[#allocation11 + $0x10] sm:$0xff]  ;;  %14673 = vmatprep.subr.mxu0 %v12361_v15  ;;  %14708 = vmatprep.subr.mxu1 %v12393_v22  ;;  %v12452_v15 = vld [vmem:[#allocation11 + $0x368] sm:$0xff]  ;;  %v12435_v22 = vld [vmem:[#allocation11 + $0x2e0] sm:$0xff] }
 0x862   : > { %v12225_v29 = vadd.f32 %v12224_v25, %v12223_v27  ;;  %v12377_v27 = vld [vmem:[#allocation11 + $0x110] sm:$0xff]  ;;  %v12392_v25 = vld [vmem:[#allocation11 + $0x188] sm:$0xff]  ;;  %14674 = vmatpush3.msra.mxu0 %v12345_v19  ;;  %v12467_v19 = vld [vmem:[#allocation11 + $0x3e0] sm:$0xff] }
 0x863   : > { %14709 = vmatpush3.msra.mxu1 %v12377_v27  ;;  %14675 = vmatprep.subr.mxu0 %v12360_v21  ;;  %v12453_v11 = vld [vmem:[#allocation11 + $0x370] sm:$0xff]  ;;  %v12419_v27 = vld [vmem:[#allocation11 + $0x260] sm:$0xff] }
 0x864   : > { %v12227_v0 = vadd.f32 %v12226_v30, %v12225_v29  ;;  %v12344_v29 = vld [vmem:[#allocation11 + $0x8] sm:$0xff]  ;;  %14710 = vmatprep.subr.mxu1 %v12392_v25  ;;  %v12451_v21 = vld [vmem:[#allocation11 + $0x360] sm:$0xff]  ;;  %v12434_v25 = vld [vmem:[#allocation11 + $0x2d8] sm:$0xff] }
 0x865   : > { %v12376_v30 = vld [vmem:[#allocation11 + $0x108] sm:$0xff]  ;;  %14676 = vmatpush3.msra.mxu0 %v12344_v29  ;;  %v12466_v29 = vld [vmem:[#allocation11 + $0x3d8] sm:$0xff] }
 0x866   : > { %v12229_v40 = vadd.f32 %v12228_v55, %v12227_v0  ;;  %v12359_v0 = vld [vmem:[#allocation11 + $0x80] sm:$0xff]  ;;  %14711 = vmatpush3.msra.mxu1 %v12376_v30  ;;  %v12418_v30 = vld [vmem:[#allocation11 + $0x258] sm:$0xff] }
 0x867   : > { %v12391_v55 = vld [vmem:[#allocation11 + $0x180] sm:$0xff]  ;;  %14677 = vmatprep.subr.mxu0 %v12359_v0  ;;  %v12450_v0 = vld [vmem:[#allocation11 + $0x358] sm:$0xff] }
 0x868   : > { %12230 = vadd.xlane.f32.xlu0 %v12229_v40  ;;  %v12343_v40 = vld [vmem:[#allocation11] sm:$0xff]  ;;  %14712 = vmatprep.subr.mxu1 %v12391_v55  ;;  %v12433_v55 = vld [vmem:[#allocation11 + $0x2d0] sm:$0xff] }
 0x869   : > { %14678 = vmatpush3.msra.mxu0 %v12343_v40  ;;  %14713 = vmatpush3.msra.mxu1 %v12375_v37  ;;  %v12465_v40 = vld [vmem:[#allocation11 + $0x3d0] sm:$0xff] }
 0x86a   : > { %14717 = vmatprep.subr.mxu0 %v12438_v38  ;;  %14752 = vmatprep.subr.mxu1 %v12470_v41  ;;  %v12417_v37 = vld [vmem:[#allocation11 + $0x250] sm:$0xff]  ;;  %v12432_v41 = vld [vmem:[#allocation11 + $0x2c8] sm:$0xff] }
 0x86b   : > { %v12449_v38 = vld [vmem:[#allocation11 + $0x350] sm:$0xff] }
 0x8f1   : > { %v12231_v46 = vpop.xlane.xlu0 %12230 }
 0x8f2   : > { %v12232_v1 = vmul.f32 0.001, %v12231_v46  ;;  %v12464_v46 = vld [vmem:[#allocation11 + $0x3c8] sm:$0xff] }
 0x8f4   : > { %v12233_v57 = vadd.f32 1e-05, %v12232_v1  ;;  %v12416_v1 = vld [vmem:[#allocation11 + $0x248] sm:$0xff] }
 0x8f6   : > { %15009 = vrsqrt.f32 %v12233_v57  ;;  %v12448_v57 = vld [vmem:[#allocation11 + $0x348] sm:$0xff] }
 0x903   : > { %v17721_v49 = vpop.eup %15009 }
 0x904   : > { %v12236_v50 = vmul.f32 %v17721_v49, %v17660_v45  ;;  %v12238_v8 = vmul.f32 %v17721_v49, %v17672_v35  ;;  %v12235_v58 = vmul.f32 %v17721_v49, %v17650_v3  ;;  %v12237_v36 = vmul.f32 %v17721_v49, %v17656_v63 }
 0x905   : > { %v12240_v9 = vmul.f32 %v17721_v49, %v17682_v18  ;;  %v12242_v34 = vmul.f32 %v17721_v49, %v17695_v48  ;;  %v12318_v35 = vrot.slane %v17707_v61, %v17604_v2  ;;  %v12326_v3 = vrot.slane %v17707_v61, %v17613_v5  ;;  %v12422_v18 = vld [vmem:[#allocation11 + $0x278] sm:$0xff]  ;;  %v12437_v48 = vld [vmem:[#allocation11 + $0x2f0] sm:$0xff]  ;;  %v12436_v5 = vld [vmem:[#allocation11 + $0x2e8] sm:$0xff] }
 0x906   : > { %v12286_v10 = vmul.f32 %v12252_v51, %v12236_v50  ;;  %v12288_v6 = vmul.f32 %v12260_v47, %v12238_v8  ;;  %v12285_v26 = vmul.f32 %v12248_v39, %v12235_v58  ;;  %v12287_v43 = vmul.f32 %v12256_v28, %v12237_v36  ;;  %v12431_v51 = vld [vmem:[#allocation11 + $0x2c0] sm:$0xff]  ;;  %v12413_v50 = vld [vmem:[#allocation11 + $0x230] sm:$0xff]  ;;  %v12428_v58 = vld [vmem:[#allocation11 + $0x2a8] sm:$0xff] }
 0x907   : > { %v12290_v45 = vmul.f32 %v12268_v59, %v12240_v9  ;;  %v12292_v13 = vmul.f32 %v12276_v62, %v12242_v34  ;;  %v12463_v47 = vld [vmem:[#allocation11 + $0x3c0] sm:$0xff]  ;;  %v12430_v59 = vld [vmem:[#allocation11 + $0x2b8] sm:$0xff]  ;;  %v12445_v8 = vld [vmem:[#allocation11 + $0x330] sm:$0xff] }
 0x908   : > { %v12336_v56 = vadd.f32 %v12302_v31, %v12286_v10  ;;  %v12338_v63 = vadd.f32 %v12310_v32, %v12288_v6  ;;  %v12335_v54 = vadd.f32 %v12298_v52, %v12285_v26  ;;  %v12337_v60 = vadd.f32 %v12306_v14, %v12287_v43  ;;  %v12415_v39 = vld [vmem:[#allocation11 + $0x240] sm:$0xff]  ;;  %v12462_v62 = vld [vmem:[#allocation11 + $0x3b8] sm:$0xff]  ;;  %v12429_v52 = vld [vmem:[#allocation11 + $0x2b0] sm:$0xff] }
 0x909   : > { %v12340_v12 = vadd.f32 %v12318_v35, %v12290_v45  ;;  %v12342_v2 = vadd.f32 %v12326_v3, %v12292_v13  ;;  %v12447_v28 = vld [vmem:[#allocation11 + $0x340] sm:$0xff]  ;;  %v12414_v31 = vld [vmem:[#allocation11 + $0x238] sm:$0xff]  ;;  %v12461_v14 = vld [vmem:[#allocation11 + $0x3b0] sm:$0xff]  ;;  %v12264_v13 = vrot.slane %v17705_v53, %v17601_v42 }
 0x90a   : > { %12542 = vmatprep.mubr.f32.mxu0 %v12336_v56  ;;  %12612 = vmatprep.mubr.f32.mxu1 %v12338_v63  ;;  %v12446_v32 = vld [vmem:[#allocation11 + $0x338] sm:$0xff]  ;;  %v12460_v36 = vld [vmem:[#allocation11 + $0x3a8] sm:$0xff]  ;;  %v12427_v10 = vld [vmem:[#allocation11 + $0x2a0] sm:$0xff]  ;;  %v12239_v63 = vmul.f32 %v17721_v49, %v17663_v44  ;;  %v12314_v44 = vrot.slane %v17707_v61, %v17601_v42 }
 0x90b   : > { %12543 = vmatmul.mubr.f32.vlgmr.msra.gmra.mxu0 %v12335_v54  ;;  %12613 = vmatmul.mubr.f32.vlgmr.msra.gmra.mxu1 %v12337_v60  ;;  %v12412_v9 = vld [vmem:[#allocation11 + $0x228] sm:$0xff]  ;;  %v12459_v6 = vld [vmem:[#allocation11 + $0x3a0] sm:$0xff]  ;;  %v12426_v45 = vld [vmem:[#allocation11 + $0x298] sm:$0xff]  ;;  %v12241_v54 = vmul.f32 %v17721_v49, %v17668_v23  ;;  %v12272_v60 = vrot.slane %v17705_v53, %v17607_v33 }
 0x90c   : > { %14718 = vmatpush3.msra.mxu0 %v12422_v18  ;;  %14753 = vmatpush3.msra.mxu1 %v12454_v4  ;;  %v12444_v34 = vld [vmem:[#allocation11 + $0x328] sm:$0xff]  ;;  %v12411_v26 = vld [vmem:[#allocation11 + $0x220] sm:$0xff]  ;;  %v12458_v35 = vld [vmem:[#allocation11 + $0x398] sm:$0xff]  ;;  %v12289_v53 = vmul.f32 %v12264_v13, %v12239_v63 }
 0x90d   : > { %14719 = vmatprep.subr.mxu0 %v12437_v48  ;;  %12682 = vmatprep.mubr.f32.mxu0 %v12340_v12  ;;  %v12443_v43 = vld [vmem:[#allocation11 + $0x320] sm:$0xff]  ;;  %v12410_v3 = vld [vmem:[#allocation11 + $0x218] sm:$0xff]  ;;  %v12425_v18 = vld [vmem:[#allocation11 + $0x290] sm:$0xff] }
 0x90e   : > { %14754 = vmatprep.subr.mxu1 %v12469_v20  ;;  %12752 = vmatprep.mubr.f32.mxu1 %v12342_v2  ;;  %v12442_v56 = vld [vmem:[#allocation11 + $0x318] sm:$0xff]  ;;  %v12457_v4 = vld [vmem:[#allocation11 + $0x390] sm:$0xff]  ;;  %v12424_v20 = vld [vmem:[#allocation11 + $0x288] sm:$0xff]  ;;  %v12339_v42 = vadd.f32 %v12314_v44, %v12289_v53 }
 0x90f   : > { %14720 = vmatpush3.msra.mxu0 %v12421_v7  ;;  %14755 = vmatpush3.msra.mxu1 %v12453_v11  ;;  %v12409_v48 = vld [vmem:[#allocation11 + $0x210] sm:$0xff]  ;;  %v12456_v2 = vld [vmem:[#allocation11 + $0x388] sm:$0xff]  ;;  %v12291_v7 = vmul.f32 %v12272_v60, %v12241_v54  ;;  %v12322_v11 = vrot.slane %v17707_v61, %v17607_v33  ;;  %v14639_v44 = vld [vmem:[#allocation19] ss:$0 sm:$0xff] }
 0x910   : > { %14721 = vmatprep.subr.mxu0 %v12436_v5  ;;  %14756 = vmatprep.subr.mxu1 %v12468_v17  ;;  %v12441_v12 = vld [vmem:[#allocation11 + $0x310] sm:$0xff]  ;;  %v12408_v23 = vld [vmem:[#allocation11 + $0x208] sm:$0xff]  ;;  %v12423_v5 = vld [vmem:[#allocation11 + $0x280] sm:$0xff] }
 0x911   : > { %14722 = vmatpush3.msra.mxu0 %v12420_v24  ;;  %14757 = vmatpush3.msra.mxu1 %v12452_v15  ;;  %v12440_v49 = vld [vmem:[#allocation11 + $0x308] sm:$0xff]  ;;  %v12455_v17 = vld [vmem:[#allocation11 + $0x380] sm:$0xff]  ;;  %v12794_v13 = vld [vmem:[#allocation17 + $0x10] sm:$0xff] }
 0x912   : > { %14723 = vmatprep.subr.mxu0 %v12435_v22  ;;  %14758 = vmatprep.subr.mxu1 %v12467_v19  ;;  %v12407_v24 = vld [vmem:[#allocation11 + $0x200] sm:$0xff]  ;;  %v12341_v22 = vadd.f32 %v12322_v11, %v12291_v7 }
 0x913   : > { %14724 = vmatpush3.msra.mxu0 %v12419_v27  ;;  %14759 = vmatpush3.msra.mxu1 %v12451_v21  ;;  %v12439_v15 = vld [vmem:[#allocation11 + $0x300] sm:$0xff] }
 0x914   : > { %14725 = vmatprep.subr.mxu0 %v12434_v25  ;;  %14760 = vmatprep.subr.mxu1 %v12466_v29  ;;  %v14636_v21 = vld [vmem:[#allocation13] ss:$0 sm:$0xff] }
 0x915   : > { %14726 = vmatpush3.msra.mxu0 %v12418_v30  ;;  %14761 = vmatpush3.msra.mxu1 %v12450_v0 }
 0x916   : > { %14727 = vmatprep.subr.mxu0 %v12433_v55  ;;  %14762 = vmatprep.subr.mxu1 %v12465_v40 }
 0x917   : > { %14728 = vmatpush3.msra.mxu0 %v12417_v37  ;;  %14763 = vmatpush3.msra.mxu1 %v12449_v38 }
 0x918   : > { %14729 = vmatprep.subr.mxu0 %v12432_v41  ;;  %14764 = vmatprep.subr.mxu1 %v12464_v46 }
 0x919   : > { %14730 = vmatpush3.msra.mxu0 %v12416_v1  ;;  %14765 = vmatpush3.msra.mxu1 %v12448_v57 }
 0x91a   : > { %14731 = vmatprep.subr.mxu0 %v12431_v51  ;;  %14766 = vmatprep.subr.mxu1 %v12463_v47 }
 0x91b   : > { %14732 = vmatpush3.msra.mxu0 %v12415_v39  ;;  %14767 = vmatpush3.msra.mxu1 %v12447_v28  ;;  %v12807_v28 = vld [vmem:[#allocation17 + $0x78] sm:$0xff] }
 0x91c   : > { %14733 = vmatprep.subr.mxu0 %v12430_v59  ;;  %14768 = vmatprep.subr.mxu1 %v12462_v62  ;;  %v15401_v59 = vmov 0.0   ;;  %v12806_v62 = vld [vmem:[#allocation17 + $0x70] sm:$0xff] }
 0x91d   : > { %14734 = vmatpush3.msra.mxu0 %v12414_v31  ;;  %14769 = vmatpush3.msra.mxu1 %v12446_v32  ;;  %v12805_v31 = vld [vmem:[#allocation17 + $0x68] sm:$0xff]  ;;  %v12804_v32 = vld [vmem:[#allocation17 + $0x60] sm:$0xff] }
 0x91e   : > { %14735 = vmatprep.subr.mxu0 %v12429_v52  ;;  %14770 = vmatprep.subr.mxu1 %v12461_v14 }
 0x91f   : > { %14736 = vmatpush3.msra.mxu0 %v12413_v50  ;;  %14771 = vmatpush3.msra.mxu1 %v12445_v8 }
 0x920   : > { %14737 = vmatprep.subr.mxu0 %v12428_v58  ;;  %14772 = vmatprep.subr.mxu1 %v12460_v36 }
 0x921   : > { %14738 = vmatpush3.msra.mxu0 %v12412_v9  ;;  %14773 = vmatpush3.msra.mxu1 %v12444_v34  ;;  %v12803_v9 = vld [vmem:[#allocation17 + $0x58] sm:$0xff]  ;;  %v12802_v34 = vld [vmem:[#allocation17 + $0x50] sm:$0xff] }
 0x922   : > { %14739 = vmatprep.subr.mxu0 %v12427_v10  ;;  %14774 = vmatprep.subr.mxu1 %v12459_v6  ;;  %v12801_v10 = vld [vmem:[#allocation17 + $0x48] sm:$0xff]  ;;  %v12800_v6 = vld [vmem:[#allocation17 + $0x40] sm:$0xff] }
 0x923   : > { %14740 = vmatpush3.msra.mxu0 %v12411_v26  ;;  %14775 = vmatpush3.msra.mxu1 %v12443_v43  ;;  %v12799_v26 = vld [vmem:[#allocation17 + $0x38] sm:$0xff]  ;;  %v12797_v43 = vld [vmem:[#allocation17 + $0x28] sm:$0xff] }
 0x924   : > { %14741 = vmatprep.subr.mxu0 %v12426_v45  ;;  %14776 = vmatprep.subr.mxu1 %v12458_v35  ;;  %v12796_v45 = vld [vmem:[#allocation17 + $0x20] sm:$0xff]  ;;  %v12795_v35 = vld [vmem:[#allocation17 + $0x18] sm:$0xff] }
 0x925   : > { %14742 = vmatpush3.msra.mxu0 %v12410_v3  ;;  %14777 = vmatpush3.msra.mxu1 %v12442_v56  ;;  %v12793_v3 = vld [vmem:[#allocation17 + $0x8] sm:$0xff]  ;;  %v12792_v56 = vld [vmem:[#allocation17] sm:$0xff] }
 0x926   : > { %14743 = vmatprep.subr.mxu0 %v12425_v18  ;;  %14778 = vmatprep.subr.mxu1 %v12457_v4  ;;  %v14637_v4 = vld [vmem:[#allocation14] ss:$0 sm:$0xff] }
 0x927   : > { %14744 = vmatpush3.msra.mxu0 %v12409_v48  ;;  %14779 = vmatpush3.msra.mxu1 %v12441_v12  ;;  %v14638_v12 = vld [vmem:[#allocation16] ss:$0 sm:$0xff] }
 0x928   : > { %14745 = vmatprep.subr.mxu0 %v12424_v20  ;;  %14780 = vmatprep.subr.mxu1 %v12456_v2 }
 0x929   : > { %14746 = vmatpush3.msra.mxu0 %v12408_v23  ;;  %14781 = vmatpush3.msra.mxu1 %v12440_v49 }
 0x92a   : > { %14747 = vmatprep.subr.mxu0 %v12423_v5  ;;  %14782 = vmatprep.subr.mxu1 %v12455_v17 }
 0x92b   : > { %14748 = vmatpush3.msra.mxu0 %v12407_v24  ;;  %14783 = vmatpush3.msra.mxu1 %v12439_v15 }
 0x92c   : > { %12683 = vmatmul.mubr.f32.vlgmr.msra.gmra.mxu0 %v12339_v42  ;;  %12753 = vmatmul.mubr.f32.vlgmr.msra.gmra.mxu1 %v12341_v22 }
 0x92d   : > { %14804 = vmatprep.subr.mxu0 %v15401_v59  ;;  %14836 = vmatprep.mubr.msk.f32.mxu0 %vm15402_vm6, %v15401_v59 }
 0x92e   : > { %14805 = vmatpush3.msra.mxu0 %v12807_v28 }
 0x92f   : > { %14806 = vmatprep.subr.mxu0 %v15401_v59 }
 0x930   : > { %14807 = vmatpush3.msra.mxu0 %v12806_v62 }
 0x931   : > { %14808 = vmatprep.subr.mxu0 %v15401_v59 }
 0x932   : > { %14809 = vmatpush3.msra.mxu0 %v12805_v31 }
 0x933   : > { %14810 = vmatprep.subr.mxu0 %v15401_v59 }
 0x934   : > { %14811 = vmatpush3.msra.mxu0 %v12804_v32 }
 0x935   : > { %14812 = vmatprep.subr.mxu0 %v15401_v59 }
 0x936   : > { %14813 = vmatpush3.msra.mxu0 %v12803_v9 }
 0x937   : > { %14814 = vmatprep.subr.mxu0 %v15401_v59 }
 0x938   : > { %14815 = vmatpush3.msra.mxu0 %v12802_v34 }
 0x939   : > { %14816 = vmatprep.subr.mxu0 %v15401_v59 }
 0x93a   : > { %14817 = vmatpush3.msra.mxu0 %v12801_v10 }
 0x93b   : > { %14818 = vmatprep.subr.mxu0 %v15401_v59 }
 0x93c   : > { %14819 = vmatpush3.msra.mxu0 %v12800_v6 }
 0x93d   : > { %14820 = vmatprep.subr.mxu0 %v15401_v59 }
 0x93e   : > { %14821 = vmatpush3.msra.mxu0 %v12799_v26 }
 0x93f   : > { %14822 = vmatprep.subr.mxu0 %v15401_v59 }
 0x940   : > { %14823 = vmatpush3.msra.mxu0 %v12798_v16 }
 0x941   : > { %14824 = vmatprep.subr.mxu0 %v15401_v59 }
 0x942   : > { %14825 = vmatpush3.msra.mxu0 %v12797_v43 }
 0x943   : > { %14826 = vmatprep.subr.mxu0 %v15401_v59 }
 0x944   : > { %14827 = vmatpush3.msra.mxu0 %v12796_v45 }
 0x945   : > { %14828 = vmatprep.subr.mxu0 %v15401_v59 }
 0x946   : > { %14829 = vmatpush3.msra.mxu0 %v12795_v35 }
 0x947   : > { %14830 = vmatprep.subr.mxu0 %v15401_v59 }
 0x948   : > { %14831 = vmatpush3.msra.mxu0 %v12794_v13 }
 0x949   : > { %14832 = vmatprep.subr.mxu0 %v15401_v59 }
 0x94a   : > { %14833 = vmatpush3.msra.mxu0 %v12793_v3 }
 0x94b   : > { %14834 = vmatprep.subr.mxu0 %v15401_v59 }
 0x94c   : > { %14835 = vmatpush3.msra.mxu0 %v12792_v56 }
 0x9cb   : > { %v14679_v19 = vpop.f32.mrf.mxu0  ;;  %v14714_v61 = vpop.f32.mrf.mxu1 }
 0x9cd   : > { %v14680_v33 = vpop.f32.mrf.mxu0  ;;  %v14715_v25 = vpop.f32.mrf.mxu1 }
 0x9ce   : > { %v14681_v27 = vadd.f32 %v14680_v33, %v14679_v19  ;;  %v14716_v55 = vadd.f32 %v14715_v25, %v14714_v61 }
 0x9d0   : > { %v12545_v29 = vadd.f32 %v14681_v27, %v14636_v21 }
 0x9d2   : > { %v12615_v38 = vadd.f32 %v14716_v55, %v12545_v29 }
 0x9ec   : > { %v14749_v30 = vpop.f32.mrf.mxu0  ;;  %v14784_v0 = vpop.f32.mrf.mxu1 }
 0x9ee   : > { %v14750_v40 = vpop.f32.mrf.mxu0  ;;  %v14785_v37 = vpop.f32.mrf.mxu1 }
 0x9ef   : > { %v14751_v41 = vadd.f32 %v14750_v40, %v14749_v30  ;;  %v14786_v1 = vadd.f32 %v14785_v37, %v14784_v0 }
 0x9f1   : > { %v12685_v46 = vadd.f32 %v14751_v41, %v12615_v38 }
 0x9f3   : > { %v12755_v57 = vadd.f32 %v14786_v1, %v12685_v46 }
 0x9f5   : > { %vm12758_vm4 = vcmp.gt.f32.partialorder %v12755_v57, 0.0  ;;  %v12759_v51 = vmul.f32 0.05, %v12755_v57 }
 0x9f7   : > { %v12760_v47 = vsel %vm12758_vm4, %v12755_v57, %v12759_v51 }
 0x9f8   : > { %v12762_v39 = vsel %vm12125_vm2, %v12760_v47, 0.0 }
 0x9f9   : > { %12763 = vadd.xlane.f32.xlu1 %v12762_v39 }
 0xa82   : > { %v12764_v52 = vpop.xlane.xlu1 %12763 }
 0xa83   : > { %v12765_v14 = vmul.f32 0.01, %v12764_v52 }
 0xa85   : > { %v12766_v50 = vsub.f32 %v12760_v47, %v12765_v14 }
 0xa87   : > { %v12767_v8 = vsel %vm12761_vm5, %v12766_v50, 0.0 }
 0xa88   : > { %v12768_v58 = vmul.f32 %v12767_v8, %v12767_v8 }
 0xa8a   : > { %v12769_v36 = vsel %vm12125_vm2, %v12768_v58, 0.0 }
 0xa8b   : > { %12770 = vadd.xlane.f32.xlu1 %v12769_v36 }
 0xb14   : > { %v12771_v63 = vpop.xlane.xlu1 %12770 }
 0xb15   : > { %v12772_v54 = vmul.f32 0.01, %v12771_v63 }
 0xb17   : > { %v12773_v60 = vadd.f32 1e-05, %v12772_v54 }
 0xb19   : > { %15011 = vrsqrt.f32 %v12773_v60 }
 0xb26   : > { %v15012_v18 = vpop.eup %15011 }
 0xb27   : > { %v12775_v48 = vmul.f32 %v15012_v18, %v12767_v8 }
 0xb29   : > { %v12783_v20 = vmul.f32 %v14637_v4, %v12775_v48 }
 0xb2b   : > { %v12791_v2 = vadd.f32 %v14638_v12, %v12783_v20 }
 0xb2d   : > { %14837 = vmatmul.mubr.f32.vlgmr.msra.gmra.mxu0 %v12791_v2 }
 0xbed   : > { %v12881_v23 = vpop.f32.mrf.mxu0 }
 0xbee   : > { %v12882_v49 = vadd.f32 %v14639_v44, %v12881_v23 }
 0xbef   : > { %v14838_v53 = vpop.f32.mrf.mxu0 }
 0xbf0   : > { %v12885_v7 = vsub.f32 0.0, %v12882_v49 }
 0xbf2   : > { %v12886_v11 = vmul.f32 1.442695, %v12885_v7 }
 0xbf4   : > { %15013 = vpow2.f32 %v12886_v11 }
 0xc01   : > { %v15014_v5 = vpop.eup %15013 }
 0xc02   : > { %v12888_v17 = vadd.f32 1.0, %v15014_v5 }
 0xc04   : > { %15015 = vrcp.f32 %v12888_v17 }
 0xc11   : > { %v15016_v24 = vpop.eup %15015 }
 0xc12   : > { %12891 = vst [vmem:[%s17794_s11] sm:$0x3] %v15016_v24 }
 0xc13 PF: > { %s31_s22 = sadd.s32 1, %s15381_s22   ;;  %s17823_s17 = smov %s15365_s18 }
 0xc14   : > { %p28_p10 = scmp.ge.s32.totalorder %s31_s22, 6   ;;  %s17824_s18 = smov %s15369_s19 }
 0xc15   : > { %s17825_s19 = smov %s15617_s2  ;;  %s17826_s20 = smov %s15377_s21 }
 0xc16   : > { %s17827_s21 = smov %s17829_s14  ;;  %30 = sbr.rel (!%p28_p10) target bundleno = 18 (0x12), region = 161 }
 0xc1b   :  { %12911 = vsyncpa [#allocation4], 1 }
 0xc1c   :  { %12913 = vsyncpa [#allocation4 + $0x1], 1 }
 0xc1d   :  { %12914 = vsyncpa [#allocation6], 1 }
 0xc1e   :  { %12916 = vsyncpa [#allocation6 + $0x1], 1 }
 0xc1f   :  { %12917 = vsyncpa [#allocation9], 1 }
 0xc20   :  { %12918 = vsyncpa [#allocation12], 1 }
 0xc21   :  { %12919 = vsyncpa [#allocation15], 1 }
 0xc22   :  { %12920 = vsyncpa [#allocation18], 1 }

</bundles_post_ra>
